<compile_context>
chip_gen: v5e
topology: v5e:2x2
jax: 0.10.0
libtpu: 0.0.40
codegen_flags: <defaults>
</compile_context>

<pallas_src>
import numpy as np
import jax
import jax.numpy as jnp
from jax import lax
from jax.experimental import pallas as pl
from jax.experimental.pallas import tpu as pltpu

# ---- ModelConfig defaults ----
ENC_CH = [14, 8]
K = 3
LIN = [75, 25]
T = 120                 # input_frames
NUM_FEATURES = 14
META = 6                # metadata_len
JOINTS = 12
DIMS = 2
CIN = JOINTS * DIMS     # 24
C1, C2 = ENC_CH         # 14, 8
P1, P2 = LIN            # 75, 25
H = NUM_FEATURES
FLAT = C2 * T           # 960

# ---- kernel tiling constants ----
S = 128                 # per-sample lane span: [1 pad | 120 frames | 7 pad]
MAX_TB_ENC = 128        # encoder batch tile (samples -> lanes)
MAX_TB_PRED = 256       # predictor batch tile (samples -> MXU rows)
NP1 = 1152              # H*P1 = 1050 padded to lane multiple
NP2 = 384               # H*P2 = 350 padded
NPO = 128               # H = 14 padded (lane-dense output stores)


def _round_up(x, m):
    return ((x + m - 1) // m) * m


# --------------------------- encoder kernel ---------------------------------
def encoder_kernel(x_ref, cw1_ref, cb1_ref, cw2_ref, cb2_ref, enc_ref):
    # x_ref: (CIN, L) channel-major; lane l = b*128 + u, u=0 and u>120 are zero.
    x = x_ref[...]
    L = x.shape[1]
    lane = lax.broadcasted_iota(jnp.int32, (1, L), 1)
    u = jnp.bitwise_and(lane, S - 1)                 # position inside sample
    valid = jnp.logical_and(u >= 1, u <= T)          # real frames only

    # ---- conv1 ('same') via lane rolls (XLU) + MXU matmuls, then ReLU.
    x_m1 = pltpu.roll(x, 1, 1)                       # lane u <- u-1  (x[t-1])
    x_p1 = pltpu.roll(x, L - 1, 1)                   # lane u <- u+1  (x[t+1])
    acc1 = (jnp.dot(cw1_ref[0], x_m1, preferred_element_type=jnp.float32)
            + jnp.dot(cw1_ref[1], x, preferred_element_type=jnp.float32)
            + jnp.dot(cw1_ref[2], x_p1, preferred_element_type=jnp.float32))
    h1 = jnp.where(valid, jnp.maximum(acc1 + cb1_ref[...], 0.0), 0.0)

    # ---- conv2 ('same') + ReLU; pad lanes masked to exact zeros so the
    # predictor can consume all 1024 lanes per sample (zero weight rows there).
    h1_m1 = pltpu.roll(h1, 1, 1)
    h1_p1 = pltpu.roll(h1, L - 1, 1)
    acc2 = (jnp.dot(cw2_ref[0], h1_m1, preferred_element_type=jnp.float32)
            + jnp.dot(cw2_ref[1], h1, preferred_element_type=jnp.float32)
            + jnp.dot(cw2_ref[2], h1_p1, preferred_element_type=jnp.float32))
    enc_ref[...] = jnp.where(valid, jnp.maximum(acc2 + cb2_ref[...], 0.0), 0.0)


# -------------------------- predictor kernel --------------------------------
def predictor_kernel(enc_ref, meta_ref, w1e_ref, w1m_ref, b1_ref,
                     w2_ref, b2_ref, w3_ref, b3_ref, out_ref):
    # enc_ref: (C2, TB, S) -- per-channel (TB, S) tiles, batch on sublanes.
    # Layer 1 = sum over channels of dense (TB,128)x(128,NP1) matmuls + meta.
    z1 = (jnp.dot(meta_ref[...], w1m_ref[...], preferred_element_type=jnp.float32)
          + b1_ref[...])
    for c in range(C2):
        z1 = z1 + jnp.dot(enc_ref[c], w1e_ref[c],
                          preferred_element_type=jnp.float32)
    z1 = jnp.maximum(z1, 0.0)                                   # (TB, NP1)
    z2 = jnp.maximum(
        jnp.dot(z1, w2_ref[...], preferred_element_type=jnp.float32)
        + b2_ref[...], 0.0)                                     # (TB, NP2)
    out_ref[...] = (jnp.dot(z2, w3_ref[...], preferred_element_type=jnp.float32)
                    + b3_ref[...])                              # (TB, NPO)


# ------------------------------- wrapper -------------------------------------
def pose2gait_forward(loc, meta, params):
    (cw1k, cb1c, cw2k, cb2c, w1e, w1m, b1a, w2b, b2a, w3b, b3a) = params
    B = loc.shape[0]
    tb_enc = min(MAX_TB_ENC, _round_up(B, 8))     # small-batch path: no 128x pad
    tb_pred = min(MAX_TB_PRED, _round_up(B, 8))
    B_pad = _round_up(B, max(tb_enc, tb_pred))
    n_enc = B_pad // tb_enc
    n_pred = B_pad // tb_pred
    L = tb_enc * S

    # ---- channel-major, lane-flattened encoder input (remaining XLA glue) ----
    x = loc.reshape(B, T, CIN)
    x = jnp.transpose(x, (2, 0, 1))                              # (CIN, B, T)
    x = jnp.pad(x, ((0, 0), (0, B_pad - B), (1, S - 1 - T)))     # (CIN, B_pad, S)
    x_cf = x.reshape(CIN, B_pad * S)

    meta_p = jnp.pad(meta, ((0, B_pad - B), (0, 0)))             # (B_pad, META)

    def const_spec(a):
        nd = a.ndim
        return pl.BlockSpec(a.shape, lambda i, _nd=nd: (0,) * _nd)

    enc_f = pl.pallas_call(
        encoder_kernel,
        out_shape=jax.ShapeDtypeStruct((C2, B_pad * S), jnp.float32),
        grid_spec=pltpu.PrefetchScalarGridSpec(
            num_scalar_prefetch=0,
            grid=(n_enc,),
            in_specs=[
                pl.BlockSpec((CIN, L), lambda i: (0, i)),
                const_spec(cw1k), const_spec(cb1c),
                const_spec(cw2k), const_spec(cb2c),
            ],
            out_specs=pl.BlockSpec((C2, L), lambda i: (0, i)),
        ),
        compiler_params=pltpu.CompilerParams(
            dimension_semantics=("parallel",),
            vmem_limit_bytes=48 * 1024 * 1024),
    )(x_cf, cw1k, cb1c, cw2k, cb2c)

    # Metadata-only reshape (row-major split of the last dim -> no data copy):
    # the predictor's BlockSpec then DMAs per-channel (TB, S) tiles directly,
    # so there is no activation pivot through HBM anymore.
    enc_3d = enc_f.reshape(C2, B_pad, S)

    out_p = pl.pallas_call(
        predictor_kernel,
        out_shape=jax.ShapeDtypeStruct((B_pad, NPO), jnp.float32),
        grid_spec=pltpu.PrefetchScalarGridSpec(
            num_scalar_prefetch=0,
            grid=(n_pred,),
            in_specs=[
                pl.BlockSpec((C2, tb_pred, S), lambda i: (0, i, 0)),
                pl.BlockSpec((tb_pred, META), lambda i: (i, 0)),
                const_spec(w1e), const_spec(w1m), const_spec(b1a),
                const_spec(w2b), const_spec(b2a),
                const_spec(w3b), const_spec(b3a),
            ],
            out_specs=pl.BlockSpec((tb_pred, NPO), lambda i: (i, 0)),
        ),
        compiler_params=pltpu.CompilerParams(
            dimension_semantics=("parallel",),
            vmem_limit_bytes=48 * 1024 * 1024),
    )(enc_3d, meta_p, w1e, w1m, b1a, w2b, b2a, w3b, b3a)

    return out_p[:B, :H]


# ---------- deterministic parameter construction (PyTorch layouts) ----------
def init_torch_params(key):
    ks = jax.random.split(key, 4 + 6 * H)

    def w(k, shape, fan_in):
        return (jax.random.normal(k, shape, dtype=jnp.float32)
                / np.float32(np.sqrt(fan_in)))

    cw1 = w(ks[0], (C1, CIN, K), CIN * K)       # Conv1d weight (Cout, Cin, K)
    cb1 = w(ks[1], (C1,), CIN * K)
    cw2 = w(ks[2], (C2, C1, K), C1 * K)
    cb2 = w(ks[3], (C2,), C1 * K)

    heads = []
    idx = 4
    in1 = FLAT + META
    for _ in range(H):
        W1 = w(ks[idx + 0], (P1, in1), in1); b1 = w(ks[idx + 1], (P1,), in1)
        W2 = w(ks[idx + 2], (P2, P1), P1);   b2 = w(ks[idx + 3], (P2,), P1)
        W3 = w(ks[idx + 4], (1, P2), P2);    b3 = w(ks[idx + 5], (1,), P2)
        heads.append((W1, b1, W2, b2, W3, b3))
        idx += 6
    return cw1, cb1, cw2, cb2, heads


def pack_params(torch_params):
    cw1, cb1, cw2, cb2, heads = torch_params
    cw1k = jnp.transpose(cw1, (2, 0, 1))        # (K, C1, CIN)
    cw2k = jnp.transpose(cw2, (2, 0, 1))        # (K, C2, C1)
    cb1c = cb1.reshape(C1, 1)
    cb2c = cb2.reshape(C2, 1)

    # Fused + lane-padded predictor bank.  Layer-1 encoder weights are laid out
    # per conv channel over the 128-lane per-sample span (lane u = frame u-1),
    # with zero rows on pad lanes; the PyTorch flatten order (C, T) is baked in.
    W1E = np.zeros((C2, S, NP1), np.float32)
    W1M = np.zeros((META, NP1), np.float32)
    B1 = np.zeros((1, NP1), np.float32)
    W2B = np.zeros((NP1, NP2), np.float32)
    B2 = np.zeros((1, NP2), np.float32)
    W3B = np.zeros((NP2, NPO), np.float32)
    B3 = np.zeros((1, NPO), np.float32)
    for h, (W1, b1, W2, b2, W3, b3) in enumerate(heads):
        W1 = np.asarray(W1); W2 = np.asarray(W2); W3 = np.asarray(W3)
        w_enc = W1[:, :FLAT].T.reshape(C2, T, P1)          # [c2, t, p1]
        W1E[:, 1:T + 1, h * P1:(h + 1) * P1] = w_enc
        W1M[:, h * P1:(h + 1) * P1] = W1[:, FLAT:].T
        B1[0, h * P1:(h + 1) * P1] = np.asarray(b1)
        W2B[h * P1:(h + 1) * P1, h * P2:(h + 1) * P2] = W2.T
        B2[0, h * P2:(h + 1) * P2] = np.asarray(b2)
        W3B[h * P2:(h + 1) * P2, h] = W3[0]
        B3[0, h] = np.asarray(b3)[0]
    return (cw1k, cb1c, cw2k, cb2c,
            jnp.asarray(W1E), jnp.asarray(W1M), jnp.asarray(B1),
            jnp.asarray(W2B), jnp.asarray(B2),
            jnp.asarray(W3B), jnp.asarray(B3))


# ---------- pure-JAX reference (mirrors the PyTorch forward) ----------
def reference_forward(loc, meta, torch_params):
    B = loc.shape[0]
    cw1, cb1, cw2, cb2, heads = torch_params
    x = loc.reshape(B, T, CIN).transpose(0, 2, 1)             # (B, CIN, T)
    hp = lax.Precision.HIGHEST
    h = lax.conv_general_dilated(x, cw1, (1,), 'SAME',
                                 dimension_numbers=('NCH', 'OIH', 'NCH'),
                                 precision=hp)
    h = jnp.maximum(h + cb1[None, :, None], 0.0)
    h = lax.conv_general_dilated(h, cw2, (1,), 'SAME',
                                 dimension_numbers=('NCH', 'OIH', 'NCH'),
                                 precision=hp)
    h = jnp.maximum(h + cb2[None, :, None], 0.0)              # (B, C2, T)
    flat = h.reshape(B, -1)
    wm = jnp.concatenate([flat, meta], axis=1)                # (B, 966)
    outs = []
    for (W1, b1, W2, b2, W3, b3) in heads:
        z = jnp.maximum(jnp.matmul(wm, W1.T, precision=hp) + b1, 0.0)
        z = jnp.maximum(jnp.matmul(z, W2.T, precision=hp) + b2, 0.0)
        z = jnp.matmul(z, W3.T, precision=hp) + b3
        outs.append(z)
    return jnp.stack(outs, axis=1)[..., 0]                    # (B, H)


if __name__ == "__main__":
    key = jax.random.PRNGKey(0)
    kp, kx, km = jax.random.split(key, 3)

    torch_params = init_torch_params(kp)
    pallas_params = pack_params(torch_params)

    B = 2
    loc = jax.random.normal(kx, (B, T, JOINTS, DIMS), dtype=jnp.float32)
    meta = jax.random.normal(km, (B, META), dtype=jnp.float32)

    fwd = jax.jit(pose2gait_forward)
    out = jax.block_until_ready(fwd(loc, meta, pallas_params))
    assert out.shape == (B, NUM_FEATURES)

    ref = reference_forward(loc, meta, torch_params)
    np.testing.assert_allclose(np.asarray(out), np.asarray(ref),
                               rtol=5e-3, atol=5e-3)
    print("KERNEL_OK")
</pallas_src>

<mosaic_0001>
module attributes {stable_mosaic.version = 11 : i64} {
  func.func @encoder_kernel(%arg0: i32, %arg1: memref<24x1024xf32, #tpu.memory_space<vmem>>, %arg2: memref<3x14x24xf32, #tpu.memory_space<vmem>>, %arg3: memref<14x1xf32, #tpu.memory_space<vmem>>, %arg4: memref<3x8x14xf32, #tpu.memory_space<vmem>>, %arg5: memref<8x1xf32, #tpu.memory_space<vmem>>, %arg6: memref<8x1024xf32, #tpu.memory_space<vmem>>) attributes {dimension_semantics = [#tpu.dimension_semantics<parallel>], iteration_bounds = array<i64: 1>, scalar_prefetch = 0 : i64, scratch_operands = 0 : i64, tpu.core_type = #tpu.core_type<tc>, window_params = [{transform_indices = @transform_0, window_bounds = array<i64: 24, 1024>}, {pipeline_mode = #tpu.pipeline_mode<synchronous>, transform_indices = @transform_1, window_bounds = array<i64: 3, 14, 24>}, {pipeline_mode = #tpu.pipeline_mode<synchronous>, transform_indices = @transform_2, window_bounds = array<i64: 14, 1>}, {pipeline_mode = #tpu.pipeline_mode<synchronous>, transform_indices = @transform_3, window_bounds = array<i64: 3, 8, 14>}, {pipeline_mode = #tpu.pipeline_mode<synchronous>, transform_indices = @transform_4, window_bounds = array<i64: 8, 1>}, {transform_indices = @transform_5, window_bounds = array<i64: 8, 1024>}]} {
    %c0 = arith.constant 0 : index
    %c0_0 = arith.constant 0 : index
    %0 = vector.load %arg1[%c0, %c0_0] : memref<24x1024xf32, #tpu.memory_space<vmem>>, vector<24x1024xf32>
    %1 = tpu.iota {dimensions = array<i32: 1>} : vector<1x1024xi32>
    %c127_i32 = arith.constant 127 : i32
    %2 = vector.broadcast %c127_i32 : i32 to vector<1x1024xi32>
    %3 = arith.andi %1, %2 : vector<1x1024xi32>
    %c1_i32 = arith.constant 1 : i32
    %4 = vector.broadcast %c1_i32 : i32 to vector<1x1024xi32>
    %5 = arith.cmpi sge, %3, %4 : vector<1x1024xi32>
    %c120_i32 = arith.constant 120 : i32
    %6 = vector.broadcast %c120_i32 : i32 to vector<1x1024xi32>
    %7 = arith.cmpi sle, %3, %6 : vector<1x1024xi32>
    %8 = arith.andi %5, %7 : vector<1x1024xi1>
    %c1_i32_1 = arith.constant 1 : i32
    %9 = tpu.dynamic_rotate %0 by %c1_i32_1 dim 1 : vector<24x1024xf32>, i32 -> vector<24x1024xf32>
    %c1023_i32 = arith.constant 1023 : i32
    %10 = tpu.dynamic_rotate %0 by %c1023_i32 dim 1 : vector<24x1024xf32>, i32 -> vector<24x1024xf32>
    %c0_2 = arith.constant 0 : index
    %c0_3 = arith.constant 0 : index
    %c0_4 = arith.constant 0 : index
    %11 = vector.load %arg2[%c0_2, %c0_3, %c0_4] : memref<3x14x24xf32, #tpu.memory_space<vmem>>, vector<1x14x24xf32>
    %12 = vector.shape_cast %11 : vector<1x14x24xf32> to vector<14x24xf32>
    %cst = arith.constant dense<0.000000e+00> : vector<14x1024xf32>
    %13 = tpu.matmul %12, %9, %cst {dimension_numbers = #tpu.dot_dimension_numbers<[1], [0], [0], [1], [0, 0, 1, 1], [], []>} : vector<14x24xf32>, vector<24x1024xf32>, vector<14x1024xf32> -> vector<14x1024xf32>
    %c1 = arith.constant 1 : index
    %c0_5 = arith.constant 0 : index
    %c0_6 = arith.constant 0 : index
    %14 = vector.load %arg2[%c1, %c0_5, %c0_6] : memref<3x14x24xf32, #tpu.memory_space<vmem>>, vector<1x14x24xf32>
    %15 = vector.shape_cast %14 : vector<1x14x24xf32> to vector<14x24xf32>
    %cst_7 = arith.constant dense<0.000000e+00> : vector<14x1024xf32>
    %16 = tpu.matmul %15, %0, %cst_7 {dimension_numbers = #tpu.dot_dimension_numbers<[1], [0], [0], [1], [0, 0, 1, 1], [], []>} : vector<14x24xf32>, vector<24x1024xf32>, vector<14x1024xf32> -> vector<14x1024xf32>
    %17 = arith.addf %13, %16 : vector<14x1024xf32>
    %c2 = arith.constant 2 : index
    %c0_8 = arith.constant 0 : index
    %c0_9 = arith.constant 0 : index
    %18 = vector.load %arg2[%c2, %c0_8, %c0_9] : memref<3x14x24xf32, #tpu.memory_space<vmem>>, vector<1x14x24xf32>
    %19 = vector.shape_cast %18 : vector<1x14x24xf32> to vector<14x24xf32>
    %cst_10 = arith.constant dense<0.000000e+00> : vector<14x1024xf32>
    %20 = tpu.matmul %19, %10, %cst_10 {dimension_numbers = #tpu.dot_dimension_numbers<[1], [0], [0], [1], [0, 0, 1, 1], [], []>} : vector<14x24xf32>, vector<24x1024xf32>, vector<14x1024xf32> -> vector<14x1024xf32>
    %21 = arith.addf %17, %20 : vector<14x1024xf32>
    %c0_11 = arith.constant 0 : index
    %c0_12 = arith.constant 0 : index
    %22 = vector.load %arg3[%c0_11, %c0_12] : memref<14x1xf32, #tpu.memory_space<vmem>>, vector<14x1xf32>
    %23 = vector.broadcast %22 : vector<14x1xf32> to vector<14x1024xf32>
    %24 = arith.addf %21, %23 : vector<14x1024xf32>
    %cst_13 = arith.constant 0.000000e+00 : f32
    %25 = vector.broadcast %cst_13 : f32 to vector<14x1024xf32>
    %26 = arith.maximumf %24, %25 : vector<14x1024xf32>
    %cst_14 = arith.constant 0.000000e+00 : f32
    %27 = vector.shape_cast %8 : vector<1x1024xi1> to vector<1x1024xi1>
    %28 = vector.broadcast %27 : vector<1x1024xi1> to vector<14x1024xi1>
    %29 = vector.broadcast %cst_14 : f32 to vector<14x1024xf32>
    %30 = arith.select %28, %26, %29 : vector<14x1024xi1>, vector<14x1024xf32>
    %c1_i32_15 = arith.constant 1 : i32
    %31 = tpu.dynamic_rotate %30 by %c1_i32_15 dim 1 : vector<14x1024xf32>, i32 -> vector<14x1024xf32>
    %c1023_i32_16 = arith.constant 1023 : i32
    %32 = tpu.dynamic_rotate %30 by %c1023_i32_16 dim 1 : vector<14x1024xf32>, i32 -> vector<14x1024xf32>
    %c0_17 = arith.constant 0 : index
    %c0_18 = arith.constant 0 : index
    %c0_19 = arith.constant 0 : index
    %33 = vector.load %arg4[%c0_17, %c0_18, %c0_19] : memref<3x8x14xf32, #tpu.memory_space<vmem>>, vector<1x8x14xf32>
    %34 = vector.shape_cast %33 : vector<1x8x14xf32> to vector<8x14xf32>
    %cst_20 = arith.constant dense<0.000000e+00> : vector<8x1024xf32>
    %35 = tpu.matmul %34, %31, %cst_20 {dimension_numbers = #tpu.dot_dimension_numbers<[1], [0], [0], [1], [0, 0, 1, 1], [], []>} : vector<8x14xf32>, vector<14x1024xf32>, vector<8x1024xf32> -> vector<8x1024xf32>
    %c1_21 = arith.constant 1 : index
    %c0_22 = arith.constant 0 : index
    %c0_23 = arith.constant 0 : index
    %36 = vector.load %arg4[%c1_21, %c0_22, %c0_23] : memref<3x8x14xf32, #tpu.memory_space<vmem>>, vector<1x8x14xf32>
    %37 = vector.shape_cast %36 : vector<1x8x14xf32> to vector<8x14xf32>
    %cst_24 = arith.constant dense<0.000000e+00> : vector<8x1024xf32>
    %38 = tpu.matmul %37, %30, %cst_24 {dimension_numbers = #tpu.dot_dimension_numbers<[1], [0], [0], [1], [0, 0, 1, 1], [], []>} : vector<8x14xf32>, vector<14x1024xf32>, vector<8x1024xf32> -> vector<8x1024xf32>
    %39 = arith.addf %35, %38 : vector<8x1024xf32>
    %c2_25 = arith.constant 2 : index
    %c0_26 = arith.constant 0 : index
    %c0_27 = arith.constant 0 : index
    %40 = vector.load %arg4[%c2_25, %c0_26, %c0_27] : memref<3x8x14xf32, #tpu.memory_space<vmem>>, vector<1x8x14xf32>
    %41 = vector.shape_cast %40 : vector<1x8x14xf32> to vector<8x14xf32>
    %cst_28 = arith.constant dense<0.000000e+00> : vector<8x1024xf32>
    %42 = tpu.matmul %41, %32, %cst_28 {dimension_numbers = #tpu.dot_dimension_numbers<[1], [0], [0], [1], [0, 0, 1, 1], [], []>} : vector<8x14xf32>, vector<14x1024xf32>, vector<8x1024xf32> -> vector<8x1024xf32>
    %43 = arith.addf %39, %42 : vector<8x1024xf32>
    %c0_29 = arith.constant 0 : index
    %c0_30 = arith.constant 0 : index
    %44 = vector.load %arg5[%c0_29, %c0_30] : memref<8x1xf32, #tpu.memory_space<vmem>>, vector<8x1xf32>
    %45 = vector.broadcast %44 : vector<8x1xf32> to vector<8x1024xf32>
    %46 = arith.addf %43, %45 : vector<8x1024xf32>
    %cst_31 = arith.constant 0.000000e+00 : f32
    %47 = vector.broadcast %cst_31 : f32 to vector<8x1024xf32>
    %48 = arith.maximumf %46, %47 : vector<8x1024xf32>
    %cst_32 = arith.constant 0.000000e+00 : f32
    %49 = vector.shape_cast %8 : vector<1x1024xi1> to vector<1x1024xi1>
    %50 = vector.broadcast %49 : vector<1x1024xi1> to vector<8x1024xi1>
    %51 = vector.broadcast %cst_32 : f32 to vector<8x1024xf32>
    %52 = arith.select %50, %48, %51 : vector<8x1024xi1>, vector<8x1024xf32>
    %c0_33 = arith.constant 0 : index
    %c0_34 = arith.constant 0 : index
    %53 = vector.load %arg6[%c0_33, %c0_34] : memref<8x1024xf32, #tpu.memory_space<vmem>>, vector<8x1024xf32>
    tpu.vector_store %arg6[%c0_33, %c0_34], %52 {strides = array<i32>} : memref<8x1024xf32, #tpu.memory_space<vmem>>, vector<8x1024xf32>,
    return
  }
  func.func @transform_0(%arg0: i32) -> (i32, i32) {
    %c0_i32 = arith.constant 0 : i32
    %c0_i32_0 = arith.constant 0 : i32
    return %c0_i32, %arg0 : i32, i32
  }
  func.func @transform_1(%arg0: i32) -> (i32, i32, i32) {
    %c0_i32 = arith.constant 0 : i32
    %c0_i32_0 = arith.constant 0 : i32
    %c0_i32_1 = arith.constant 0 : i32
    %c0_i32_2 = arith.constant 0 : i32
    return %c0_i32, %c0_i32_0, %c0_i32_1 : i32, i32, i32
  }
  func.func @transform_2(%arg0: i32) -> (i32, i32) {
    %c0_i32 = arith.constant 0 : i32
    %c0_i32_0 = arith.constant 0 : i32
    %c0_i32_1 = arith.constant 0 : i32
    return %c0_i32, %c0_i32_0 : i32, i32
  }
  func.func @transform_3(%arg0: i32) -> (i32, i32, i32) {
    %c0_i32 = arith.constant 0 : i32
    %c0_i32_0 = arith.constant 0 : i32
    %c0_i32_1 = arith.constant 0 : i32
    %c0_i32_2 = arith.constant 0 : i32
    return %c0_i32, %c0_i32_0, %c0_i32_1 : i32, i32, i32
  }
  func.func @transform_4(%arg0: i32) -> (i32, i32) {
    %c0_i32 = arith.constant 0 : i32
    %c0_i32_0 = arith.constant 0 : i32
    %c0_i32_1 = arith.constant 0 : i32
    return %c0_i32, %c0_i32_0 : i32, i32
  }
  func.func @transform_5(%arg0: i32) -> (i32, i32) {
    %c0_i32 = arith.constant 0 : i32
    %c0_i32_0 = arith.constant 0 : i32
    return %c0_i32, %arg0 : i32, i32
  }
}

module attributes {stable_mosaic.version = 11 : i64} {
  func.func @predictor_kernel(%arg0: i32, %arg1: memref<8x8x128xf32, #tpu.memory_space<vmem>>, %arg2: memref<8x6xf32, #tpu.memory_space<vmem>>, %arg3: memref<8x128x1152xf32, #tpu.memory_space<vmem>>, %arg4: memref<6x1152xf32, #tpu.memory_space<vmem>>, %arg5: memref<1x1152xf32, #tpu.memory_space<vmem>>, %arg6: memref<1152x384xf32, #tpu.memory_space<vmem>>, %arg7: memref<1x384xf32, #tpu.memory_space<vmem>>, %arg8: memref<384x128xf32, #tpu.memory_space<vmem>>, %arg9: memref<1x128xf32, #tpu.memory_space<vmem>>, %arg10: memref<8x128xf32, #tpu.memory_space<vmem>>) attributes {dimension_semantics = [#tpu.dimension_semantics<parallel>], iteration_bounds = array<i64: 1>, scalar_prefetch = 0 : i64, scratch_operands = 0 : i64, tpu.core_type = #tpu.core_type<tc>, window_params = [{transform_indices = @transform_0, window_bounds = array<i64: 8, 8, 128>}, {transform_indices = @transform_1, window_bounds = array<i64: 8, 6>}, {pipeline_mode = #tpu.pipeline_mode<synchronous>, transform_indices = @transform_2, window_bounds = array<i64: 8, 128, 1152>}, {pipeline_mode = #tpu.pipeline_mode<synchronous>, transform_indices = @transform_3, window_bounds = array<i64: 6, 1152>}, {pipeline_mode = #tpu.pipeline_mode<synchronous>, transform_indices = @transform_4, window_bounds = array<i64: 1, 1152>}, {pipeline_mode = #tpu.pipeline_mode<synchronous>, transform_indices = @transform_5, window_bounds = array<i64: 1152, 384>}, {pipeline_mode = #tpu.pipeline_mode<synchronous>, transform_indices = @transform_6, window_bounds = array<i64: 1, 384>}, {pipeline_mode = #tpu.pipeline_mode<synchronous>, transform_indices = @transform_7, window_bounds = array<i64: 384, 128>}, {pipeline_mode = #tpu.pipeline_mode<synchronous>, transform_indices = @transform_8, window_bounds = array<i64: 1, 128>}, {transform_indices = @transform_9, window_bounds = array<i64: 8, 128>}]} {
    %c0 = arith.constant 0 : index
    %c0_0 = arith.constant 0 : index
    %0 = vector.load %arg2[%c0, %c0_0] : memref<8x6xf32, #tpu.memory_space<vmem>>, vector<8x6xf32>
    %c0_1 = arith.constant 0 : index
    %c0_2 = arith.constant 0 : index
    %1 = vector.load %arg4[%c0_1, %c0_2] : memref<6x1152xf32, #tpu.memory_space<vmem>>, vector<6x1152xf32>
    %cst = arith.constant dense<0.000000e+00> : vector<8x1152xf32>
    %2 = tpu.matmul %0, %1, %cst {dimension_numbers = #tpu.dot_dimension_numbers<[1], [0], [0], [1], [0, 0, 1, 1], [], []>} : vector<8x6xf32>, vector<6x1152xf32>, vector<8x1152xf32> -> vector<8x1152xf32>
    %c0_3 = arith.constant 0 : index
    %c0_4 = arith.constant 0 : index
    %3 = vector.load %arg5[%c0_3, %c0_4] : memref<1x1152xf32, #tpu.memory_space<vmem>>, vector<1x1152xf32>
    %4 = vector.broadcast %3 : vector<1x1152xf32> to vector<8x1152xf32>
    %5 = arith.addf %2, %4 : vector<8x1152xf32>
    %c0_5 = arith.constant 0 : index
    %c0_6 = arith.constant 0 : index
    %c0_7 = arith.constant 0 : index
    %6 = vector.load %arg1[%c0_5, %c0_6, %c0_7] : memref<8x8x128xf32, #tpu.memory_space<vmem>>, vector<1x8x128xf32>
    %7 = vector.shape_cast %6 : vector<1x8x128xf32> to vector<8x128xf32>
    %c0_8 = arith.constant 0 : index
    %c0_9 = arith.constant 0 : index
    %c0_10 = arith.constant 0 : index
    %8 = vector.load %arg3[%c0_8, %c0_9, %c0_10] : memref<8x128x1152xf32, #tpu.memory_space<vmem>>, vector<1x128x1152xf32>
    %9 = vector.shape_cast %8 : vector<1x128x1152xf32> to vector<128x1152xf32>
    %cst_11 = arith.constant dense<0.000000e+00> : vector<8x1152xf32>
    %10 = tpu.matmul %7, %9, %cst_11 {dimension_numbers = #tpu.dot_dimension_numbers<[1], [0], [0], [1], [0, 0, 1, 1], [], []>} : vector<8x128xf32>, vector<128x1152xf32>, vector<8x1152xf32> -> vector<8x1152xf32>
    %11 = arith.addf %5, %10 : vector<8x1152xf32>
    %c1 = arith.constant 1 : index
    %c0_12 = arith.constant 0 : index
    %c0_13 = arith.constant 0 : index
    %12 = vector.load %arg1[%c1, %c0_12, %c0_13] : memref<8x8x128xf32, #tpu.memory_space<vmem>>, vector<1x8x128xf32>
    %13 = vector.shape_cast %12 : vector<1x8x128xf32> to vector<8x128xf32>
    %c1_14 = arith.constant 1 : index
    %c0_15 = arith.constant 0 : index
    %c0_16 = arith.constant 0 : index
    %14 = vector.load %arg3[%c1_14, %c0_15, %c0_16] : memref<8x128x1152xf32, #tpu.memory_space<vmem>>, vector<1x128x1152xf32>
    %15 = vector.shape_cast %14 : vector<1x128x1152xf32> to vector<128x1152xf32>
    %cst_17 = arith.constant dense<0.000000e+00> : vector<8x1152xf32>
    %16 = tpu.matmul %13, %15, %cst_17 {dimension_numbers = #tpu.dot_dimension_numbers<[1], [0], [0], [1], [0, 0, 1, 1], [], []>} : vector<8x128xf32>, vector<128x1152xf32>, vector<8x1152xf32> -> vector<8x1152xf32>
    %17 = arith.addf %11, %16 : vector<8x1152xf32>
    %c2 = arith.constant 2 : index
    %c0_18 = arith.constant 0 : index
    %c0_19 = arith.constant 0 : index
    %18 = vector.load %arg1[%c2, %c0_18, %c0_19] : memref<8x8x128xf32, #tpu.memory_space<vmem>>, vector<1x8x128xf32>
    %19 = vector.shape_cast %18 : vector<1x8x128xf32> to vector<8x128xf32>
    %c2_20 = arith.constant 2 : index
    %c0_21 = arith.constant 0 : index
    %c0_22 = arith.constant 0 : index
    %20 = vector.load %arg3[%c2_20, %c0_21, %c0_22] : memref<8x128x1152xf32, #tpu.memory_space<vmem>>, vector<1x128x1152xf32>
    %21 = vector.shape_cast %20 : vector<1x128x1152xf32> to vector<128x1152xf32>
    %cst_23 = arith.constant dense<0.000000e+00> : vector<8x1152xf32>
    %22 = tpu.matmul %19, %21, %cst_23 {dimension_numbers = #tpu.dot_dimension_numbers<[1], [0], [0], [1], [0, 0, 1, 1], [], []>} : vector<8x128xf32>, vector<128x1152xf32>, vector<8x1152xf32> -> vector<8x1152xf32>
    %23 = arith.addf %17, %22 : vector<8x1152xf32>
    %c3 = arith.constant 3 : index
    %c0_24 = arith.constant 0 : index
    %c0_25 = arith.constant 0 : index
    %24 = vector.load %arg1[%c3, %c0_24, %c0_25] : memref<8x8x128xf32, #tpu.memory_space<vmem>>, vector<1x8x128xf32>
    %25 = vector.shape_cast %24 : vector<1x8x128xf32> to vector<8x128xf32>
    %c3_26 = arith.constant 3 : index
    %c0_27 = arith.constant 0 : index
    %c0_28 = arith.constant 0 : index
    %26 = vector.load %arg3[%c3_26, %c0_27, %c0_28] : memref<8x128x1152xf32, #tpu.memory_space<vmem>>, vector<1x128x1152xf32>
    %27 = vector.shape_cast %26 : vector<1x128x1152xf32> to vector<128x1152xf32>
    %cst_29 = arith.constant dense<0.000000e+00> : vector<8x1152xf32>
    %28 = tpu.matmul %25, %27, %cst_29 {dimension_numbers = #tpu.dot_dimension_numbers<[1], [0], [0], [1], [0, 0, 1, 1], [], []>} : vector<8x128xf32>, vector<128x1152xf32>, vector<8x1152xf32> -> vector<8x1152xf32>
    %29 = arith.addf %23, %28 : vector<8x1152xf32>
    %c4 = arith.constant 4 : index
    %c0_30 = arith.constant 0 : index
    %c0_31 = arith.constant 0 : index
    %30 = vector.load %arg1[%c4, %c0_30, %c0_31] : memref<8x8x128xf32, #tpu.memory_space<vmem>>, vector<1x8x128xf32>
    %31 = vector.shape_cast %30 : vector<1x8x128xf32> to vector<8x128xf32>
    %c4_32 = arith.constant 4 : index
    %c0_33 = arith.constant 0 : index
    %c0_34 = arith.constant 0 : index
    %32 = vector.load %arg3[%c4_32, %c0_33, %c0_34] : memref<8x128x1152xf32, #tpu.memory_space<vmem>>, vector<1x128x1152xf32>
    %33 = vector.shape_cast %32 : vector<1x128x1152xf32> to vector<128x1152xf32>
    %cst_35 = arith.constant dense<0.000000e+00> : vector<8x1152xf32>
    %34 = tpu.matmul %31, %33, %cst_35 {dimension_numbers = #tpu.dot_dimension_numbers<[1], [0], [0], [1], [0, 0, 1, 1], [], []>} : vector<8x128xf32>, vector<128x1152xf32>, vector<8x1152xf32> -> vector<8x1152xf32>
    %35 = arith.addf %29, %34 : vector<8x1152xf32>
    %c5 = arith.constant 5 : index
    %c0_36 = arith.constant 0 : index
    %c0_37 = arith.constant 0 : index
    %36 = vector.load %arg1[%c5, %c0_36, %c0_37] : memref<8x8x128xf32, #tpu.memory_space<vmem>>, vector<1x8x128xf32>
    %37 = vector.shape_cast %36 : vector<1x8x128xf32> to vector<8x128xf32>
    %c5_38 = arith.constant 5 : index
    %c0_39 = arith.constant 0 : index
    %c0_40 = arith.constant 0 : index
    %38 = vector.load %arg3[%c5_38, %c0_39, %c0_40] : memref<8x128x1152xf32, #tpu.memory_space<vmem>>, vector<1x128x1152xf32>
    %39 = vector.shape_cast %38 : vector<1x128x1152xf32> to vector<128x1152xf32>
    %cst_41 = arith.constant dense<0.000000e+00> : vector<8x1152xf32>
    %40 = tpu.matmul %37, %39, %cst_41 {dimension_numbers = #tpu.dot_dimension_numbers<[1], [0], [0], [1], [0, 0, 1, 1], [], []>} : vector<8x128xf32>, vector<128x1152xf32>, vector<8x1152xf32> -> vector<8x1152xf32>
    %41 = arith.addf %35, %40 : vector<8x1152xf32>
    %c6 = arith.constant 6 : index
    %c0_42 = arith.constant 0 : index
    %c0_43 = arith.constant 0 : index
    %42 = vector.load %arg1[%c6, %c0_42, %c0_43] : memref<8x8x128xf32, #tpu.memory_space<vmem>>, vector<1x8x128xf32>
    %43 = vector.shape_cast %42 : vector<1x8x128xf32> to vector<8x128xf32>
    %c6_44 = arith.constant 6 : index
    %c0_45 = arith.constant 0 : index
    %c0_46 = arith.constant 0 : index
    %44 = vector.load %arg3[%c6_44, %c0_45, %c0_46] : memref<8x128x1152xf32, #tpu.memory_space<vmem>>, vector<1x128x1152xf32>
    %45 = vector.shape_cast %44 : vector<1x128x1152xf32> to vector<128x1152xf32>
    %cst_47 = arith.constant dense<0.000000e+00> : vector<8x1152xf32>
    %46 = tpu.matmul %43, %45, %cst_47 {dimension_numbers = #tpu.dot_dimension_numbers<[1], [0], [0], [1], [0, 0, 1, 1], [], []>} : vector<8x128xf32>, vector<128x1152xf32>, vector<8x1152xf32> -> vector<8x1152xf32>
    %47 = arith.addf %41, %46 : vector<8x1152xf32>
    %c7 = arith.constant 7 : index
    %c0_48 = arith.constant 0 : index
    %c0_49 = arith.constant 0 : index
    %48 = vector.load %arg1[%c7, %c0_48, %c0_49] : memref<8x8x128xf32, #tpu.memory_space<vmem>>, vector<1x8x128xf32>
    %49 = vector.shape_cast %48 : vector<1x8x128xf32> to vector<8x128xf32>
    %c7_50 = arith.constant 7 : index
    %c0_51 = arith.constant 0 : index
    %c0_52 = arith.constant 0 : index
    %50 = vector.load %arg3[%c7_50, %c0_51, %c0_52] : memref<8x128x1152xf32, #tpu.memory_space<vmem>>, vector<1x128x1152xf32>
    %51 = vector.shape_cast %50 : vector<1x128x1152xf32> to vector<128x1152xf32>
    %cst_53 = arith.constant dense<0.000000e+00> : vector<8x1152xf32>
    %52 = tpu.matmul %49, %51, %cst_53 {dimension_numbers = #tpu.dot_dimension_numbers<[1], [0], [0], [1], [0, 0, 1, 1], [], []>} : vector<8x128xf32>, vector<128x1152xf32>, vector<8x1152xf32> -> vector<8x1152xf32>
    %53 = arith.addf %47, %52 : vector<8x1152xf32>
    %cst_54 = arith.constant 0.000000e+00 : f32
    %54 = vector.broadcast %cst_54 : f32 to vector<8x1152xf32>
    %55 = arith.maximumf %53, %54 : vector<8x1152xf32>
    %c0_55 = arith.constant 0 : index
    %c0_56 = arith.constant 0 : index
    %56 = vector.load %arg6[%c0_55, %c0_56] : memref<1152x384xf32, #tpu.memory_space<vmem>>, vector<1152x384xf32>
    %cst_57 = arith.constant dense<0.000000e+00> : vector<8x384xf32>
    %57 = tpu.matmul %55, %56, %cst_57 {dimension_numbers = #tpu.dot_dimension_numbers<[1], [0], [0], [1], [0, 0, 1, 1], [], []>} : vector<8x1152xf32>, vector<1152x384xf32>, vector<8x384xf32> -> vector<8x384xf32>
    %c0_58 = arith.constant 0 : index
    %c0_59 = arith.constant 0 : index
    %58 = vector.load %arg7[%c0_58, %c0_59] : memref<1x384xf32, #tpu.memory_space<vmem>>, vector<1x384xf32>
    %59 = vector.broadcast %58 : vector<1x384xf32> to vector<8x384xf32>
    %60 = arith.addf %57, %59 : vector<8x384xf32>
    %cst_60 = arith.constant 0.000000e+00 : f32
    %61 = vector.broadcast %cst_60 : f32 to vector<8x384xf32>
    %62 = arith.maximumf %60, %61 : vector<8x384xf32>
    %c0_61 = arith.constant 0 : index
    %c0_62 = arith.constant 0 : index
    %63 = vector.load %arg8[%c0_61, %c0_62] : memref<384x128xf32, #tpu.memory_space<vmem>>, vector<384x128xf32>
    %cst_63 = arith.constant dense<0.000000e+00> : vector<8x128xf32>
    %64 = tpu.matmul %62, %63, %cst_63 {dimension_numbers = #tpu.dot_dimension_numbers<[1], [0], [0], [1], [0, 0, 1, 1], [], []>} : vector<8x384xf32>, vector<384x128xf32>, vector<8x128xf32> -> vector<8x128xf32>
    %c0_64 = arith.constant 0 : index
    %c0_65 = arith.constant 0 : index
    %65 = vector.load %arg9[%c0_64, %c0_65] : memref<1x128xf32, #tpu.memory_space<vmem>>, vector<1x128xf32>
    %66 = vector.broadcast %65 : vector<1x128xf32> to vector<8x128xf32>
    %67 = arith.addf %64, %66 : vector<8x128xf32>
    %c0_66 = arith.constant 0 : index
    %c0_67 = arith.constant 0 : index
    %68 = vector.load %arg10[%c0_66, %c0_67] : memref<8x128xf32, #tpu.memory_space<vmem>>, vector<8x128xf32>
    tpu.vector_store %arg10[%c0_66, %c0_67], %67 {strides = array<i32>} : memref<8x128xf32, #tpu.memory_space<vmem>>, vector<8x128xf32>,
    return
  }
  func.func @transform_0(%arg0: i32) -> (i32, i32, i32) {
    %c0_i32 = arith.constant 0 : i32
    %c0_i32_0 = arith.constant 0 : i32
    %c0_i32_1 = arith.constant 0 : i32
    return %c0_i32, %arg0, %c0_i32_0 : i32, i32, i32
  }
  func.func @transform_1(%arg0: i32) -> (i32, i32) {
    %c0_i32 = arith.constant 0 : i32
    %c0_i32_0 = arith.constant 0 : i32
    return %arg0, %c0_i32 : i32, i32
  }
  func.func @transform_2(%arg0: i32) -> (i32, i32, i32) {
    %c0_i32 = arith.constant 0 : i32
    %c0_i32_0 = arith.constant 0 : i32
    %c0_i32_1 = arith.constant 0 : i32
    %c0_i32_2 = arith.constant 0 : i32
    return %c0_i32, %c0_i32_0, %c0_i32_1 : i32, i32, i32
  }
  func.func @transform_3(%arg0: i32) -> (i32, i32) {
    %c0_i32 = arith.constant 0 : i32
    %c0_i32_0 = arith.constant 0 : i32
    %c0_i32_1 = arith.constant 0 : i32
    return %c0_i32, %c0_i32_0 : i32, i32
  }
  func.func @transform_4(%arg0: i32) -> (i32, i32) {
    %c0_i32 = arith.constant 0 : i32
    %c0_i32_0 = arith.constant 0 : i32
    %c0_i32_1 = arith.constant 0 : i32
    return %c0_i32, %c0_i32_0 : i32, i32
  }
  func.func @transform_5(%arg0: i32) -> (i32, i32) {
    %c0_i32 = arith.constant 0 : i32
    %c0_i32_0 = arith.constant 0 : i32
    %c0_i32_1 = arith.constant 0 : i32
    return %c0_i32, %c0_i32_0 : i32, i32
  }
  func.func @transform_6(%arg0: i32) -> (i32, i32) {
    %c0_i32 = arith.constant 0 : i32
    %c0_i32_0 = arith.constant 0 : i32
    %c0_i32_1 = arith.constant 0 : i32
    return %c0_i32, %c0_i32_0 : i32, i32
  }
  func.func @transform_7(%arg0: i32) -> (i32, i32) {
    %c0_i32 = arith.constant 0 : i32
    %c0_i32_0 = arith.constant 0 : i32
    %c0_i32_1 = arith.constant 0 : i32
    return %c0_i32, %c0_i32_0 : i32, i32
  }
  func.func @transform_8(%arg0: i32) -> (i32, i32) {
    %c0_i32 = arith.constant 0 : i32
    %c0_i32_0 = arith.constant 0 : i32
    %c0_i32_1 = arith.constant 0 : i32
    return %c0_i32, %c0_i32_0 : i32, i32
  }
  func.func @transform_9(%arg0: i32) -> (i32, i32) {
    %c0_i32 = arith.constant 0 : i32
    %c0_i32_0 = arith.constant 0 : i32
    return %arg0, %c0_i32 : i32, i32
  }
}

</mosaic_0001>

<bundles_post_ra>
// kernel: pose2gait_forward.2
= control target key start
LH: loop header
LB: loop body
LE: loop exit
PB: predicated region body
PF: predicated region fallthrough
CT: control target
= control target key end

     0   :  { %10 = vsyncpa [#allocation3], 0  ;;  %s2864_s0 = inlined_call_operand.vmem [shape: f32[24,1024], index: 0, kind: input, shape index: {}]   ;;  %s2865_s1 = inlined_call_operand.hbm [shape: f32[3,14,24], index: 1, kind: input, shape index: {}]   ;;  %s2866_s2 = inlined_call_operand.vmem [shape: f32[14,1], index: 2, kind: input, shape index: {}]   ;;  %s2867_s3 = inlined_call_operand.hbm [shape: f32[3,8,14], index: 3, kind: input, shape index: {}]   ;;  %s2868_s4 = inlined_call_operand.vmem [shape: f32[8,1], index: 4, kind: input, shape index: {}]   ;;  %s2869_s5 = inlined_call_operand.vmem [shape: f32[8,1024], index: 5, kind: output, shape index: {}]  }
   0x1   :  { %s18_s20 = sshll.u32 %s2865_s1, 4  ;;  %s19_s20 = int_to_ptr.hbm [resolvable:$true] %s18_s20 }
   0x2   :  { %11 = vsyncpa [#allocation5], 0  ;;  %s1970_s21 = smov [#allocation2]   ;;  %s33_s25 = sshll.u32 %s2867_s3, 4  ;;  %s34_s25 = int_to_ptr.hbm [resolvable:$true] %s33_s25 }
   0x3   :  { %s20_s22 = sshll.u32 %s1970_s21, 4  ;;  %s1971_s26 = smov 128   ;;  %s21_s22 = int_to_ptr.vmem [resolvable:$true] %s20_s22 }
   0x4   :  { %s1972_s27 = smov 8   ;;  %s1973_s28 = smov [#allocation4]  }
   0x5   :  { %26 = dma.hbm_to_vmem [thread:$0]  %s19_s20, 768, %s21_s22, [#allocation3], %s1971_s26, %s1971_s26, %s1972_s27  }
   0x6   :  { %s35_s29 = sshll.u32 %s1973_s28, 4  ;;  %s36_s29 = int_to_ptr.vmem [resolvable:$true] %s35_s29 }
   0x7   :  { %41 = dma.hbm_to_vmem [thread:$0]  %s34_s25, 384, %s36_s29, [#allocation5], %s1971_s26, %s1971_s26, %s1972_s27  }
   0x8   :  { %1966 = dma.done.wait [#allocation3], 768  }
   0x9   :  { %1967 = vsyncadd [#allocation3], 4294966528 }
   0xa   :  { %1968 = dma.done.wait [#allocation5], 384  }
   0xb   :  { %1969 = vsyncadd [#allocation5], 4294966912  ;;  %v2016_v0 = vld [vmem:[%s2864_s0 + $0x90] sm:$0xff]  ;;  %v2021_v1 = vld [vmem:[%s2864_s0 + $0x98] sm:$0xff]  ;;  %s1974_s17 = smov 1   ;;  %vm268_vm0 = vcmask 195584   ;;  %v76_v50 = vlaneseq }
   0xc   :  { %v2026_v2 = vld [vmem:[%s2864_s0 + $0x48] sm:$0xff]  ;;  %v1761_v3 = vpack.i.bf16 %v2021_v1, %v2016_v0  ;;  %v2033_v4 = vld [vmem:[%s2864_s0 + $0x58] sm:$0xff]  ;;  %v2043_v6 = vld [vmem:[%s2864_s0 + $0x80] sm:$0xff]  ;;  %357 = vmatpush.msra.mxu3 %v2021_v1  ;;  %334 = vmatpush.msra.mxu2 %v2016_v0  ;;  %vm1037_vm14 = vcmask 1045504  }
   0xd   :  { %v2038_v5 = vld [vmem:[%s2864_s0 + $0x8] sm:$0xff]  ;;  %v1771_v7 = vpack.i.bf16 %v2026_v2, %v2033_v4  ;;  %288 = vmatpush.msra.mxu0 %v2043_v6  ;;  %v62_v10 = vld [vmem:[%s2864_s0 + $0x50] sm:$0xff]  ;;  %v2072_v12 = vld [vmem:[%s2864_s0 + $0x18] sm:$0xff]  ;;  %v1826_v37 = vpack.i.bf16 %v2033_v4, %v2016_v0  ;;  %v2180_v51 = vand.u32 127, %v76_v50  ;;  %v1976_v50 = vmov 0  }
   0xe   :  { %v1781_v8 = vpack.i.bf16 %v2043_v6, %v2038_v5  ;;  %v2054_v9 = vld [vmem:[%s2864_s0 + $0x88] sm:$0xff]  ;;  %1762 = vrot.lane.b32.xlu0 %v1761_v3, %s1974_s17  ;;  %v2067_v11 = vld [vmem:[%s2864_s0 + $0x10] sm:$0xff]  ;;  %v2077_v13 = vld [vmem:[%s2864_s0] sm:$0xff]  ;;  %358 = vmatpush.msra.mxu3 %v2033_v4  ;;  %v1846_v41 = vpack.i.bf16 %v2038_v5, %v2026_v2 }
   0xf   :  { %311 = vmatpush.msra.mxu1 %v2054_v9  ;;  %1772 = vrot.lane.b32.xlu1 %v1771_v7, %s1974_s17  ;;  %v2082_v14 = vld [vmem:[%s2864_s0 + $0x40] sm:$0xff]  ;;  %v1766_v15 = vpack.i.bf16 %v62_v10, %v2054_v9  ;;  %v1776_v16 = vpack.i.bf16 %v2072_v12, %v2067_v11  ;;  %v75_v18 = vld [vmem:[%s2864_s0 + $0xb8] sm:$0xff]  ;;  %v73_v19 = vld [vmem:[%s2864_s0 + $0xa8] sm:$0xff]  ;;  %v1841_v40 = vpack.i.bf16 %v2054_v9, %v2067_v11  ;;  %vm165_vm1 = vcmp.lt.s32.totalorder %v2180_v51, 1 }
  0x10   :  { %1782 = vrot.lane.b32.xlu2 %v1781_v8, %s1974_s17  ;;  %335 = vmatpush.msra.mxu2 %v62_v10  ;;  %v1786_v17 = vpack.i.bf16 %v2077_v13, %v2082_v14  ;;  %v74_v20 = vld [vmem:[%s2864_s0 + $0xb0] sm:$0xff]  ;;  %v72_v21 = vld [vmem:[%s2864_s0 + $0xa0] sm:$0xff]  ;;  %v67_v22 = vld [vmem:[%s2864_s0 + $0x78] sm:$0xff]  ;;  %v1851_v42 = vpack.i.bf16 %v2082_v14, %v2043_v6  ;;  %v1856_v43 = vpack.i.bf16 %v2077_v13, %v75_v18  ;;  %vm238_vm2 = vcmp.lt.s32.totalorder %v2180_v51, 127 }
  0x11   :  { %312 = vmatpush.msra.mxu1 %v2026_v2  ;;  %289 = vmatpush.msra.mxu0 %v2082_v14  ;;  %v66_v23 = vld [vmem:[%s2864_s0 + $0x70] sm:$0xff]  ;;  %v65_v24 = vld [vmem:[%s2864_s0 + $0x68] sm:$0xff]  ;;  %v59_v25 = vld [vmem:[%s2864_s0 + $0x38] sm:$0xff]  ;;  %v1791_v29 = vpack.i.bf16 %v74_v20, %v75_v18  ;;  %v1796_v31 = vpack.i.bf16 %v73_v19, %v67_v22  ;;  %v1821_v36 = vpack.i.bf16 %v72_v21, %v2021_v1  ;;  %vm93_vm10 = vcmp.ge.s32.totalorder %v2180_v51, 1 }
  0x12   :  { %359 = vmatpush.msra.mxu3 %v2072_v12  ;;  %336 = vmatpush.msra.mxu2 %v2067_v11  ;;  %v64_v26 = vld [vmem:[%s2864_s0 + $0x60] sm:$0xff]  ;;  %v58_v27 = vld [vmem:[%s2864_s0 + $0x30] sm:$0xff]  ;;  %v57_v28 = vld [vmem:[%s2864_s0 + $0x28] sm:$0xff]  ;;  %v1801_v32 = vpack.i.bf16 %v59_v25, %v66_v23  ;;  %v1861_v44 = vpack.i.bf16 %v67_v22, %v74_v20  ;;  %vm101_vm11 = vcmp.le.s32.totalorder %v2180_v51, 120 }
  0x13   :  { %313 = vmatpush.msra.mxu1 %v2038_v5  ;;  %290 = vmatpush.msra.mxu0 %v2077_v13  ;;  %v56_v30 = vld [vmem:[%s2864_s0 + $0x20] sm:$0xff]  ;;  %v1806_v33 = vpack.i.bf16 %v58_v27, %v65_v24  ;;  %v1811_v34 = vpack.i.bf16 %v72_v21, %v57_v28  ;;  %v1831_v38 = vpack.i.bf16 %v62_v10, %v64_v26  ;;  %s1975_s0 = smov 127   ;;  %v266_v47 = vld [vmem:[#allocation2 + $0x10] sm:$0xff]  ;;  %v267_v48 = vld [vmem:[#allocation2 + $0x18] sm:$0x3f] }
  0x14   :  { %449 = vmatpush.msrb.mxu3 %v75_v18  ;;  %426 = vmatpush.msrb.mxu2 %v74_v20  ;;  %v1816_v35 = vpack.i.bf16 %v56_v30, %v64_v26  ;;  %v1836_v39 = vpack.i.bf16 %v56_v30, %v2072_v12  ;;  %v1871_v45 = vpack.i.bf16 %v73_v19, %v58_v27  ;;  %v2221_v13 = vld [vmem:[#allocation2] sm:$0xff]  ;;  %vm2501_vm15 = vmand %vm93_vm10, %vm101_vm11 }
  0x15   :  { %403 = vmatpush.msrb.mxu1 %v73_v19  ;;  %380 = vmatpush.msrb.mxu0 %v72_v21  ;;  %v1876_v46 = vpack.i.bf16 %v57_v28, %v65_v24 }
  0x16   :  { %1767 = vrot.lane.b32.xlu0 %v1766_v15, %s1974_s17  ;;  %450 = vmatpush.msrb.mxu3 %v67_v22 }
  0x17   :  { %1777 = vrot.lane.b32.xlu1 %v1776_v16, %s1974_s17  ;;  %404 = vmatpush.msrb.mxu1 %v65_v24 }
  0x18   :  { %1787 = vrot.lane.b32.xlu2 %v1786_v17, %s1974_s17  ;;  %427 = vmatpush.msrb.mxu2 %v66_v23 }
  0x19   :  { %451 = vmatpush.msrb.mxu3 %v59_v25  ;;  %381 = vmatpush.msrb.mxu0 %v64_v26 }
  0x1a   :  { %405 = vmatpush.msrb.mxu1 %v57_v28  ;;  %428 = vmatpush.msrb.mxu2 %v58_v27 }
  0x1b   :  { %382 = vmatpush.msrb.mxu0 %v56_v30  ;;  %1656 = vmatmul.msk.f32.vlgmr.msra.gmra.mxu3 %vm268_vm0, %v266_v47  ;;  %v2245_v30 = vld [vmem:[#allocation2 + $0x8] sm:$0x3f] }
  0x1c   :  { %1652 = vmatmul.msk.f32.vlgmr.msra.gmra.mxu1 %vm268_vm0, %v266_v47  ;;  %1654 = vmatmul.msk.f32.vlgmr.msra.gmra.mxu2 %vm268_vm0, %v266_v47 }
  0x1d   :  { %1650 = vmatmul.msk.f32.vlgmr.msra.gmra.mxu0 %vm268_vm0, %v266_v47  ;;  %1882 = vset.pattern.permute.xlu1 %v1976_v50 }
  0x1e   :  { %1792 = vrot.lane.b32.xlu0 %v1791_v29, %s1974_s17 }
  0x1f   :  { %1797 = vrot.lane.b32.xlu1 %v1796_v31, %s1974_s17  ;;  %1881 = vset.pattern.permute.xlu0 %v1976_v50 }
  0x20   :  { %1802 = vrot.lane.b32.xlu2 %v1801_v32, %s1974_s17 }
  0x23   :  { %1657 = vmatmul.msk.f32.gmra.mxu3 %vm268_vm0, %v267_v48 }
  0x24   :  { %1653 = vmatmul.msk.f32.gmra.mxu1 %vm268_vm0, %v267_v48  ;;  %1655 = vmatmul.msk.f32.gmra.mxu2 %vm268_vm0, %v267_v48 }
  0x25   :  { %1651 = vmatmul.msk.f32.gmra.mxu0 %vm268_vm0, %v267_v48 }
  0x26   :  { %1807 = vrot.lane.b32.xlu0 %v1806_v33, %s1974_s17 }
  0x27   :  { %1812 = vrot.lane.b32.xlu1 %v1811_v34, %s1974_s17 }
  0x28   :  { %1817 = vrot.lane.b32.xlu2 %v1816_v35, %s1974_s17 }
  0x2b   :  { %1664 = vmatmul.msk.f32.vlgmr.msrb.gmra.mxu3 %vm268_vm0, %v266_v47 }
  0x2c   :  { %1660 = vmatmul.msk.f32.vlgmr.msrb.gmra.mxu1 %vm268_vm0, %v266_v47  ;;  %1662 = vmatmul.msk.f32.vlgmr.msrb.gmra.mxu2 %vm268_vm0, %v266_v47 }
  0x2d   :  { %1658 = vmatmul.msk.f32.vlgmr.msrb.gmra.mxu0 %vm268_vm0, %v266_v47 }
  0x2e   :  { %1822 = vrot.lane.b32.xlu0 %v1821_v36, %s1975_s0 }
  0x2f   :  { %1827 = vrot.lane.b32.xlu1 %v1826_v37, %s1975_s0 }
  0x30   :  { %1832 = vrot.lane.b32.xlu2 %v1831_v38, %s1975_s0 }
  0x33   :  { %1665 = vmatmul.msk.f32.gmra.mxu3 %vm268_vm0, %v267_v48 }
  0x34   :  { %1661 = vmatmul.msk.f32.gmra.mxu1 %vm268_vm0, %v267_v48  ;;  %1663 = vmatmul.msk.f32.gmra.mxu2 %vm268_vm0, %v267_v48 }
  0x35   :  { %1659 = vmatmul.msk.f32.gmra.mxu0 %vm268_vm0, %v267_v48 }
  0x36   :  { %1837 = vrot.lane.b32.xlu0 %v1836_v39, %s1975_s0 }
  0x37   :  { %1842 = vrot.lane.b32.xlu1 %v1841_v40, %s1975_s0 }
  0x38   :  { %1847 = vrot.lane.b32.xlu2 %v1846_v41, %s1975_s0 }
  0x3e   :  { %1852 = vrot.lane.b32.xlu0 %v1851_v42, %s1975_s0 }
  0x3f   :  { %1857 = vrot.lane.b32.xlu1 %v1856_v43, %s1975_s0 }
  0x40   :  { %1862 = vrot.lane.b32.xlu2 %v1861_v44, %s1975_s0 }
  0x46   :  { %1867 = vrot.lane.b32.xlu0 %v1801_v32, %s1975_s0 }
  0x47   :  { %1872 = vrot.lane.b32.xlu1 %v1871_v45, %s1975_s0 }
  0x48   :  { %1877 = vrot.lane.b32.xlu2 %v1876_v46, %s1975_s0  ;;  %v858_v46 = vld [vmem:[%s2866_s2] sm:$0xff] }
  0x4f   :  { %862 = vperm.xlu1 %1882, %v858_v46  }
  0x6a   :  { %v1783_v49 = vpop.permute.xlu2 %1782 }
  0x6b   :  { %v1785_v58 = vunpack.i.h.bf16 %v1783_v49  ;;  %v1784_v8 = vunpack.i.l.bf16 %v1783_v49 }
  0x72   :  { %v2182_v52 = vpop.permute.xlu2 %1787 }
  0x73   :  { %v1789_v59 = vunpack.i.l.bf16 %v2182_v52  ;;  %v1790_v9 = vunpack.i.h.bf16 %v2182_v52 }
  0x75   :  { %v184_v17 = vsel %vm165_vm1, %v1790_v9, %v1784_v8 }
  0x7a   :  { %v2196_v61 = vpop.permute.xlu2 %1802 }
  0x7b   :  { %v1804_v15 = vunpack.i.l.bf16 %v2196_v61  ;;  %v1805_v23 = vunpack.i.h.bf16 %v2196_v61 }
  0x7d   :  { %v187_v31 = vsel %vm165_vm1, %v1805_v23, %v1790_v9 }
  0x80   :  { %v2184_v53 = vpop.permute.xlu0 %1762 }
  0x81   :  { %v1765_v54 = vunpack.i.h.bf16 %v2184_v53  ;;  %v1764_v55 = vunpack.i.l.bf16 %v2184_v53  ;;  %v2189_v56 = vpop.permute.xlu1 %1772 }
  0x82   :  { %v1775_v62 = vunpack.i.h.bf16 %v2189_v56  ;;  %v1774_v63 = vunpack.i.l.bf16 %v2189_v56  ;;  %v1818_v24 = vpop.permute.xlu2 %1817 }
  0x83   :  { %v180_v57 = vsel %vm165_vm1, %v1764_v55, %v1765_v54  ;;  %v1819_v36 = vunpack.i.l.bf16 %v1818_v24  ;;  %v1820_v42 = vunpack.i.h.bf16 %v1818_v24 }
  0x84   :  { %547 = vmatpush.msra.mxu3 %v180_v57  ;;  %v185_v11 = vsel %vm165_vm1, %v1789_v59, %v1775_v62 }
  0x85   :  { %v176_v47 = vsel %vm165_vm1, %v1774_v63, %v1819_v36 }
  0x88   :  { %v1768_v60 = vpop.permute.xlu0 %1767 }
  0x89   :  { %v1770_v0 = vunpack.i.h.bf16 %v1768_v60  ;;  %v1769_v1 = vunpack.i.l.bf16 %v1768_v60  ;;  %v2200_v2 = vpop.permute.xlu1 %1777 }
  0x8a   :  { %v1780_v3 = vunpack.i.h.bf16 %v2200_v2  ;;  %v1779_v4 = vunpack.i.l.bf16 %v2200_v2  ;;  %v2257_v39 = vpop.permute.xlu2 %1832 }
  0x8b   :  { %v186_v5 = vsel %vm165_vm1, %v1785_v58, %v1769_v1  ;;  %v183_v6 = vsel %vm165_vm1, %v1769_v1, %v1764_v55  ;;  %v179_v7 = vsel %vm165_vm1, %v1770_v0, %v1774_v63  ;;  %v182_v12 = vsel %vm165_vm1, %v1775_v62, %v1770_v0  ;;  %v859_v62 = vld [vmem:[%s2866_s2 + $0x8] sm:$0x3f] }
  0x8c   :  { %501 = vmatpush.msra.mxu1 %v186_v5  ;;  %524 = vmatpush.msra.mxu2 %v183_v6  ;;  %v178_v10 = vsel %vm165_vm1, %v1779_v4, %v1780_v3  ;;  %v181_v14 = vsel %vm165_vm1, %v1784_v8, %v1779_v4  ;;  %v1835_v52 = vunpack.i.h.bf16 %v2257_v39  ;;  %v1834_v53 = vunpack.i.l.bf16 %v2257_v39 }
  0x8d   :  { %548 = vmatpush.msra.mxu3 %v179_v7  ;;  %v175_v55 = vsel %vm165_vm1, %v1780_v3, %v1820_v42  ;;  %867 = vperm.xlu0 %1881, %v859_v62  }
  0x8e   :  { %502 = vmatpush.msra.mxu1 %v185_v11  ;;  %525 = vmatpush.msra.mxu2 %v182_v12 }
  0x8f   :  { %549 = vmatpush.msra.mxu3 %v178_v10 }
  0x90   :  { %1672 = vmatmul.msk.f32.vlgmr.msra.gmra.mxu3 %vm268_vm0, %v2221_v13  ;;  %v1793_v16 = vpop.permute.xlu0 %1792  ;;  %526 = vmatpush.msra.mxu2 %v181_v14 }
  0x91   :  { %v1795_v18 = vunpack.i.h.bf16 %v1793_v16  ;;  %v1794_v19 = vunpack.i.l.bf16 %v1793_v16  ;;  %v1798_v20 = vpop.permute.xlu1 %1797  ;;  %503 = vmatpush.msra.mxu1 %v184_v17  ;;  %1670 = vmatmul.msk.f32.vlgmr.msra.gmra.mxu2 %vm268_vm0, %v2221_v13 }
  0x92   :  { %v1800_v21 = vunpack.i.h.bf16 %v1798_v20  ;;  %v1799_v22 = vunpack.i.l.bf16 %v1798_v20  ;;  %1668 = vmatmul.msk.f32.vlgmr.msra.gmra.mxu1 %vm268_vm0, %v2221_v13  ;;  %v1848_v2 = vpop.permute.xlu2 %1847 }
  0x93   :  { %v189_v25 = vsel %vm165_vm1, %v1794_v19, %v1785_v58  ;;  %v168_v26 = vsel %vm165_vm1, %v1795_v18, %v1794_v19  ;;  %v1849_v3 = vunpack.i.l.bf16 %v1848_v2  ;;  %v1850_v8 = vunpack.i.h.bf16 %v1848_v2 }
  0x94   :  { %478 = vmatpush.msra.mxu0 %v189_v25  ;;  %v171_v27 = vsel %vm165_vm1, %v1800_v21, %v1795_v18  ;;  %639 = vmatpush.msrb.mxu3 %v168_v26  ;;  %v167_v28 = vsel %vm165_vm1, %v1804_v15, %v1799_v22  ;;  %v188_v29 = vsel %vm165_vm1, %v1799_v22, %v1789_v59 }
  0x95   :  { %616 = vmatpush.msrb.mxu2 %v171_v27 }
  0x96   :  { %479 = vmatpush.msra.mxu0 %v188_v29  ;;  %640 = vmatpush.msrb.mxu3 %v167_v28 }
  0x98   :  { %1673 = vmatmul.msk.f32.gmra.mxu3 %vm268_vm0, %v2245_v30  ;;  %v1808_v32 = vpop.permute.xlu0 %1807  ;;  %480 = vmatpush.msra.mxu0 %v187_v31 }
  0x99   :  { %v1810_v33 = vunpack.i.h.bf16 %v1808_v32  ;;  %v1809_v34 = vunpack.i.l.bf16 %v1808_v32  ;;  %v1813_v35 = vpop.permute.xlu1 %1812  ;;  %1666 = vmatmul.msk.f32.vlgmr.msra.gmra.mxu0 %vm268_vm0, %v2221_v13  ;;  %1671 = vmatmul.msk.f32.gmra.mxu2 %vm268_vm0, %v2245_v30  ;;  %v315_v39 = vpop.f32.mrf.mxu1 }
  0x9a   :  { %v1815_v37 = vunpack.i.h.bf16 %v1813_v35  ;;  %v1814_v38 = vunpack.i.l.bf16 %v1813_v35  ;;  %1669 = vmatmul.msk.f32.gmra.mxu1 %vm268_vm0, %v2245_v30  ;;  %v1863_v17 = vpop.permute.xlu2 %1862 }
  0x9b   :  { %v170_v40 = vsel %vm165_vm1, %v1809_v34, %v1804_v15  ;;  %v166_v41 = vsel %vm165_vm1, %v1810_v33, %v1805_v23  ;;  %v173_v48 = vsel %vm165_vm1, %v1819_v36, %v1809_v34  ;;  %v2338_v15 = vld [vmem:[#allocation2 + $0x20] sm:$0xff]  ;;  %v1864_v18 = vunpack.i.l.bf16 %v1863_v17 }
  0x9c   :  { %v177_v43 = vsel %vm165_vm1, %v1765_v54, %v1815_v37  ;;  %v174_v44 = vsel %vm165_vm1, %v1815_v37, %v1800_v21  ;;  %617 = vmatpush.msrb.mxu2 %v170_v40  ;;  %641 = vmatpush.msrb.mxu3 %v166_v41  ;;  %v169_v45 = vsel %vm165_vm1, %v1814_v38, %v1810_v33  ;;  %v1865_v23 = vunpack.i.h.bf16 %v1863_v17 }
  0x9d   :  { %570 = vmatpush.msrb.mxu0 %v177_v43  ;;  %593 = vmatpush.msrb.mxu1 %v174_v44  ;;  %v172_v49 = vsel %vm165_vm1, %v1820_v42, %v1814_v38 }
  0x9e   :  { %618 = vmatpush.msrb.mxu2 %v169_v45 }
  0x9f   :  { %571 = vmatpush.msrb.mxu0 %v176_v47  ;;  %594 = vmatpush.msrb.mxu1 %v173_v48 }
  0xa0   :  { %1680 = vmatmul.msk.f32.vlgmr.msrb.gmra.mxu3 %vm268_vm0, %v2221_v13  ;;  %v2286_v54 = vpop.permute.xlu0 %1822 }
  0xa1   :  { %v1825_v56 = vunpack.i.h.bf16 %v2286_v54  ;;  %v1824_v57 = vunpack.i.l.bf16 %v2286_v54  ;;  %v1828_v58 = vpop.permute.xlu1 %1827  ;;  %572 = vmatpush.msrb.mxu0 %v175_v55  ;;  %595 = vmatpush.msrb.mxu1 %v172_v49  ;;  %v338_v54 = vpop.f32.mrf.mxu2 }
  0xa2   :  { %v1830_v59 = vunpack.i.h.bf16 %v1828_v58  ;;  %v1829_v60 = vunpack.i.l.bf16 %v1828_v58  ;;  %1667 = vmatmul.msk.f32.gmra.mxu0 %vm268_vm0, %v2245_v30  ;;  %1676 = vmatmul.msk.f32.vlgmr.msrb.gmra.mxu1 %vm268_vm0, %v2221_v13  ;;  %v1878_v34 = vpop.permute.xlu2 %1877  ;;  %v292_v55 = vpop.f32.mrf.mxu0 }
  0xa3   :  { %1678 = vmatmul.msk.f32.vlgmr.msrb.gmra.mxu2 %vm268_vm0, %v2221_v13  ;;  %v250_v61 = vsel %vm238_vm2, %v1824_v57, %v1825_v56  ;;  %v1879_v38 = vunpack.i.l.bf16 %v1878_v34  ;;  %v1880_v44 = vunpack.i.h.bf16 %v1878_v34 }
  0xa4   :  { %v253_v63 = vsel %vm238_vm2, %v1829_v60, %v1824_v57  ;;  %740 = vmatpush.msra.mxu3 %v250_v61  ;;  %v252_v0 = vsel %vm238_vm2, %v1835_v52, %v1830_v59  ;;  %v249_v1 = vsel %vm238_vm2, %v1830_v59, %v1834_v53 }
  0xa5   :  { %717 = vmatpush.msra.mxu2 %v253_v63  ;;  %v246_v49 = vsel %vm238_vm2, %v1834_v53, %v1879_v38  ;;  %v361_v53 = vpop.f32.mrf.mxu3 }
  0xa6   :  { %741 = vmatpush.msra.mxu3 %v249_v1 }
  0xa7   :  { %718 = vmatpush.msra.mxu2 %v252_v0 }
  0xa8   :  { %1681 = vmatmul.msk.f32.gmra.mxu3 %vm268_vm0, %v2245_v30  ;;  %v2318_v4 = vpop.permute.xlu0 %1837 }
  0xa9   :  { %v1840_v5 = vunpack.i.h.bf16 %v2318_v4  ;;  %v1839_v6 = vunpack.i.l.bf16 %v2318_v4  ;;  %v1843_v7 = vpop.permute.xlu1 %1842  ;;  %v2406_v58 = vpop.f32.mrf.mxu2 }
  0xaa   :  { %v1845_v9 = vunpack.i.h.bf16 %v1843_v7  ;;  %v1844_v10 = vunpack.i.l.bf16 %v1843_v7  ;;  %1674 = vmatmul.msk.f32.vlgmr.msrb.gmra.mxu0 %vm268_vm0, %v2221_v13  ;;  %1677 = vmatmul.msk.f32.gmra.mxu1 %vm268_vm0, %v2245_v30  ;;  %v255_v13 = vsel %vm238_vm2, %v1849_v3, %v1835_v52  ;;  %v2408_v59 = vpop.f32.mrf.mxu0 }
  0xab   :  { %1679 = vmatmul.msk.f32.gmra.mxu2 %vm268_vm0, %v2245_v30  ;;  %v248_v11 = vsel %vm238_vm2, %v1839_v6, %v1840_v5  ;;  %v245_v52 = vsel %vm238_vm2, %v1840_v5, %v1880_v44 }
  0xac   :  { %v256_v12 = vsel %vm238_vm2, %v1845_v9, %v1829_v60  ;;  %v251_v14 = vsel %vm238_vm2, %v1844_v10, %v1839_v6  ;;  %742 = vmatpush.msra.mxu3 %v248_v11  ;;  %v254_v16 = vsel %vm238_vm2, %v1850_v8, %v1844_v10 }
  0xad   :  { %694 = vmatpush.msra.mxu1 %v256_v12  ;;  %719 = vmatpush.msra.mxu2 %v251_v14  ;;  %v2404_v57 = vpop.f32.mrf.mxu3 }
  0xaf   :  { %695 = vmatpush.msra.mxu1 %v255_v13 }
  0xb0   :  { %1688 = vmatmul.msk.f32.vlgmr.msra.gmra.mxu3 %vm268_vm0, %v2338_v15  ;;  %v1853_v19 = vpop.permute.xlu0 %1852 }
  0xb1   :  { %v1855_v20 = vunpack.i.h.bf16 %v1853_v19  ;;  %v1854_v21 = vunpack.i.l.bf16 %v1853_v19  ;;  %v1858_v22 = vpop.permute.xlu1 %1857  ;;  %696 = vmatpush.msra.mxu1 %v254_v16  ;;  %v2414_v62 = vpop.f32.mrf.mxu2 }
  0xb2   :  { %v1859_v24 = vunpack.i.l.bf16 %v1858_v22  ;;  %1675 = vmatmul.msk.f32.gmra.mxu0 %vm268_vm0, %v2245_v30  ;;  %1684 = vmatmul.msk.f32.vlgmr.msra.gmra.mxu1 %vm268_vm0, %v2338_v15  ;;  %v1860_v25 = vunpack.i.h.bf16 %v1858_v22  ;;  %v651_v30 = vld [vmem:[#allocation2 + $0x28] sm:$0x3f]  ;;  %v2416_v63 = vpop.f32.mrf.mxu0 }
  0xb3   :  { %1686 = vmatmul.msk.f32.vlgmr.msra.gmra.mxu2 %vm268_vm0, %v2338_v15  ;;  %v259_v26 = vsel %vm238_vm2, %v1854_v21, %v1845_v9  ;;  %v258_v29 = vsel %vm238_vm2, %v1855_v20, %v1849_v3  ;;  %v261_v31 = vsel %vm238_vm2, %v1865_v23, %v1855_v20  ;;  %v80_v20 = vadd.s32 384, %v2180_v51 }
  0xb4   :  { %671 = vmatpush.msra.mxu0 %v259_v26  ;;  %v262_v27 = vsel %vm238_vm2, %v1859_v24, %v1854_v21  ;;  %v241_v28 = vsel %vm238_vm2, %v1864_v18, %v1859_v24  ;;  %v257_v32 = vsel %vm238_vm2, %v1860_v25, %v1850_v8  ;;  %v79_v24 = vadd.s32 256, %v2180_v51 }
  0xb5   :  { %832 = vmatpush.msrb.mxu3 %v262_v27  ;;  %809 = vmatpush.msrb.mxu2 %v241_v28  ;;  %v2412_v61 = vpop.f32.mrf.mxu3 }
  0xb6   :  { %672 = vmatpush.msra.mxu0 %v258_v29  ;;  %v88_v29 = vand.u32 127, %v80_v20 }
  0xb7   :  { %833 = vmatpush.msrb.mxu3 %v261_v31  ;;  %v87_v31 = vand.u32 127, %v79_v24 }
  0xb8   :  { %1689 = vmatmul.msk.f32.gmra.mxu3 %vm268_vm0, %v651_v30  ;;  %673 = vmatpush.msra.mxu0 %v257_v32  ;;  %v1868_v33 = vpop.permute.xlu0 %1867  ;;  %vm96_vm5 = vcmp.ge.s32.totalorder %v88_v29, 1  ;;  %vm104_vm6 = vcmp.le.s32.totalorder %v88_v29, 120 }
  0xb9   :  { %v1873_v35 = vpop.permute.xlu1 %1872  ;;  %v1870_v36 = vunpack.i.h.bf16 %v1868_v33  ;;  %v1869_v37 = vunpack.i.l.bf16 %v1868_v33  ;;  %v2422_v2 = vpop.f32.mrf.mxu2  ;;  %vm2459_vm7 = vcmp.ge.s32.totalorder %v87_v31, 1  ;;  %vm103_vm8 = vcmp.le.s32.totalorder %v87_v31, 120  ;;  %vm2477_vm12 = vmand %vm96_vm5, %vm104_vm6 }
  0xba   :  { %v1875_v40 = vunpack.i.h.bf16 %v1873_v35  ;;  %v1874_v41 = vunpack.i.l.bf16 %v1873_v35  ;;  %1682 = vmatmul.msk.f32.vlgmr.msra.gmra.mxu0 %vm268_vm0, %v2338_v15  ;;  %1685 = vmatmul.msk.f32.gmra.mxu1 %vm268_vm0, %v651_v30  ;;  %v2424_v3 = vpop.f32.mrf.mxu0  ;;  %vm2489_vm13 = vmand %vm2459_vm7, %vm103_vm8 }
  0xbb   :  { %1687 = vmatmul.msk.f32.gmra.mxu2 %vm268_vm0, %v651_v30  ;;  %v240_v42 = vsel %vm238_vm2, %v1869_v37, %v1865_v23  ;;  %v260_v43 = vsel %vm238_vm2, %v1870_v36, %v1860_v25  ;;  %v243_v47 = vsel %vm238_vm2, %v1879_v38, %v1869_v37 }
  0xbc   :  { %v247_v45 = vsel %vm238_vm2, %v1825_v56, %v1875_v40  ;;  %v244_v46 = vsel %vm238_vm2, %v1875_v40, %v1864_v18  ;;  %810 = vmatpush.msrb.mxu2 %v240_v42  ;;  %834 = vmatpush.msrb.mxu3 %v260_v43  ;;  %v239_v48 = vsel %vm238_vm2, %v1874_v41, %v1870_v36  ;;  %v318_v56 = vpop.f32.mrf.mxu1  ;;  %v78_v18 = vadd.s32 128, %v2180_v51 }
  0xbd   :  { %763 = vmatpush.msrb.mxu0 %v247_v45  ;;  %786 = vmatpush.msrb.mxu1 %v244_v46  ;;  %v242_v50 = vsel %vm238_vm2, %v1880_v44, %v1874_v41  ;;  %v2420_v1 = vpop.f32.mrf.mxu3 }
  0xbe   :  { %811 = vmatpush.msrb.mxu2 %v239_v48  ;;  %v86_v26 = vand.u32 127, %v78_v18 }
  0xbf   :  { %764 = vmatpush.msrb.mxu0 %v246_v49  ;;  %787 = vmatpush.msrb.mxu1 %v243_v47 }
  0xc0   :  { %1696 = vmatmul.msk.f32.vlgmr.msrb.gmra.mxu3 %vm268_vm0, %v2338_v15  ;;  %vm2445_vm3 = vcmp.ge.s32.totalorder %v86_v26, 1  ;;  %vm2449_vm4 = vcmp.le.s32.totalorder %v86_v26, 120 }
  0xc1   :  { %765 = vmatpush.msrb.mxu0 %v245_v52  ;;  %788 = vmatpush.msrb.mxu1 %v242_v50  ;;  %v2443_v28 = vpop.permute.xlu1 %862  ;;  %vm2467_vm9 = vmand %vm2445_vm3, %vm2449_vm4 }
  0xc2   :  { %1683 = vmatmul.msk.f32.gmra.mxu0 %vm268_vm0, %v651_v30  ;;  %1692 = vmatmul.msk.f32.vlgmr.msrb.gmra.mxu1 %vm268_vm0, %v2338_v15 }
  0xc3   :  { %1694 = vmatmul.msk.f32.vlgmr.msrb.gmra.mxu2 %vm268_vm0, %v2338_v15 }
  0xc4   :  { %v2410_v60 = vpop.f32.mrf.mxu1 }
  0xc8   :  { %1697 = vmatmul.msk.f32.gmra.mxu3 %vm268_vm0, %v651_v30 }
  0xca   :  { %1690 = vmatmul.msk.f32.vlgmr.msrb.gmra.mxu0 %vm268_vm0, %v2338_v15  ;;  %1693 = vmatmul.msk.f32.gmra.mxu1 %vm268_vm0, %v651_v30 }
  0xcb   :  { %1695 = vmatmul.msk.f32.gmra.mxu2 %vm268_vm0, %v651_v30 }
  0xcc   :  { %v2418_v0 = vpop.f32.mrf.mxu1 }
  0xd2   :  { %1691 = vmatmul.msk.f32.gmra.mxu0 %vm268_vm0, %v651_v30 }
  0xff   :  { %v2457_v42 = vpop.permute.xlu0 %867 }
 0x10f   :  { %v505_v4 = vpop.f32.mrf.mxu1 }
 0x110   :  { %v506_v21 = vadd.f32 %v505_v4, %v315_v39 }
 0x113   :  { %v551_v5 = vpop.f32.mrf.mxu3 }
 0x114   :  { %v528_v6 = vpop.f32.mrf.mxu2  ;;  %v552_v27 = vadd.f32 %v551_v5, %v361_v53 }
 0x115   :  { %v529_v32 = vadd.f32 %v528_v6, %v338_v54  ;;  %v82_v54 = vadd.s32 640, %v2180_v51 }
 0x116   :  { %v482_v7 = vpop.f32.mrf.mxu0 }
 0x117   :  { %v508_v8 = vpop.f32.mrf.mxu1  ;;  %v483_v34 = vadd.f32 %v482_v7, %v292_v55 }
 0x118   :  { %v509_v38 = vadd.f32 %v508_v8, %v318_v56 }
 0x11b   :  { %v554_v9 = vpop.f32.mrf.mxu3 }
 0x11c   :  { %v531_v10 = vpop.f32.mrf.mxu2  ;;  %v555_v55 = vadd.f32 %v554_v9, %v2404_v57 }
 0x11d   :  { %v532_v56 = vadd.f32 %v531_v10, %v2406_v58 }
 0x11f   :  { %v485_v11 = vpop.f32.mrf.mxu0  ;;  %v597_v12 = vpop.f32.mrf.mxu1 }
 0x120   :  { %v486_v7 = vadd.f32 %v485_v11, %v2408_v59  ;;  %v598_v8 = vadd.f32 %v597_v12, %v2410_v60  ;;  %v84_v59 = vadd.s32 896, %v2180_v51 }
 0x123   :  { %v2426_v14 = vpop.f32.mrf.mxu3 }
 0x126   :  { %v2428_v13 = vpop.f32.mrf.mxu2 }
 0x127   :  { %v2430_v15 = vpop.f32.mrf.mxu0  ;;  %v2432_v16 = vpop.f32.mrf.mxu1 }
 0x12b   :  { %v2434_v17 = vpop.f32.mrf.mxu3 }
 0x12e   :  { %v2437_v19 = vpop.f32.mrf.mxu2 }
 0x12f   :  { %v2440_v22 = vpop.f32.mrf.mxu0  ;;  %v698_v23 = vpop.f32.mrf.mxu1 }
 0x130   :  { %v843_v25 = vadd.f32 %v698_v23, %v506_v21  ;;  %v90_v21 = vand.u32 127, %v82_v54 }
 0x132   :  { %v871_v37 = vadd.f32 %v2443_v28, %v843_v25  ;;  %vm2559_vm0 = vcmp.ge.s32.totalorder %v90_v21, 1  ;;  %vm2565_vm3 = vcmp.le.s32.totalorder %v90_v21, 120 }
 0x133   :  { %v744_v30 = vpop.f32.mrf.mxu3  ;;  %vm2596_vm6 = vmand %vm2559_vm0, %vm2565_vm3 }
 0x134   :  { %v845_v33 = vadd.f32 %v744_v30, %v552_v27  ;;  %v887_v53 = vmax.f32 %v871_v37, 0.0 }
 0x136   :  { %v2455_v40 = vadd.f32 %v2443_v28, %v845_v33  ;;  %v721_v41 = vpop.f32.mrf.mxu2  ;;  %v2509_v60 = vsel %vm2467_vm9, %v887_v53, 0.0  ;;  %v83_v33 = vadd.s32 768, %v2180_v51 }
 0x137   :  { %v844_v43 = vadd.f32 %v721_v41, %v529_v32  ;;  %v675_v44 = vpop.f32.mrf.mxu0  ;;  %v701_v45 = vpop.f32.mrf.mxu1  ;;  %v644_v41 = vadd.f32 %v2426_v14, %v2412_v61 }
 0x138   :  { %v842_v47 = vadd.f32 %v675_v44, %v483_v34  ;;  %v851_v48 = vadd.f32 %v701_v45, %v509_v38  ;;  %v889_v50 = vmax.f32 %v2455_v40, 0.0  ;;  %v81_v34 = vadd.s32 512, %v2180_v51 }
 0x139   :  { %v2475_v52 = vadd.f32 %v2443_v28, %v844_v43  ;;  %v92_v38 = vand.u32 127, %v84_v59 }
 0x13a   :  { %v2485_v4 = vadd.f32 %v2443_v28, %v842_v47  ;;  %v879_v6 = vadd.f32 %v2457_v42, %v851_v48  ;;  %v2521_v12 = vsel %vm2477_vm12, %v889_v50, 0.0  ;;  %v89_v54 = vand.u32 127, %v81_v34 }
 0x13b   :  { %v888_v18 = vmax.f32 %v2475_v52, 0.0  ;;  %v747_v57 = vpop.f32.mrf.mxu3  ;;  %vm2569_vm4 = vcmp.ge.s32.totalorder %v92_v38, 1  ;;  %vm2573_vm5 = vcmp.le.s32.totalorder %v92_v38, 120  ;;  %v578_v38 = vadd.f32 %v2440_v22, %v2424_v3 }
 0x13c   :  { %v886_v9 = vmax.f32 %v2485_v4, 0.0  ;;  %v853_v10 = vadd.f32 %v747_v57, %v555_v55  ;;  %v895_v20 = vmax.f32 %v879_v6, 0.0  ;;  %v575_v57 = vadd.f32 %v2430_v15, %v2416_v63  ;;  %vm2612_vm7 = vmand %vm2569_vm4, %vm2573_vm5 }
 0x13d   :  { %v2515_v11 = vsel %vm2489_vm13, %v888_v18, 0.0  ;;  %vm2620_vm11 = vcmp.ge.s32.totalorder %v89_v54, 1  ;;  %vm105_vm0 = vcmp.le.s32.totalorder %v89_v54, 120  ;;  %vm1033_vm5 = vcmask 113664  }
 0x13e   :  { %v881_v23 = vadd.f32 %v2457_v42, %v853_v10  ;;  %v724_v24 = vpop.f32.mrf.mxu2  ;;  %v2526_v25 = vsel %vm2467_vm9, %v895_v20, 0.0  ;;  %v1883_v26 = vpack.i.bf16 %v2515_v11, %v2509_v60  ;;  %v2534_v27 = vsel %vm2501_vm15, %v886_v9, 0.0  ;;  %vm2651_vm4 = vmand %vm2620_vm11, %vm105_vm0 }
 0x13f   :  { %v852_v29 = vadd.f32 %v724_v24, %v532_v56  ;;  %v790_v30 = vpop.f32.mrf.mxu1  ;;  %940 = vrot.lane.b32.xlu2 %v2526_v25, %s1974_s17  ;;  %1701 = vmatpush.msk.msra.mxu1 %vm1037_vm14, %v2526_v25  ;;  %v678_v31 = vpop.f32.mrf.mxu0  ;;  %v1888_v32 = vpack.i.bf16 %v2534_v27, %v2521_v12  ;;  %v601_v20 = vadd.f32 %v2432_v16, %v2418_v0 }
 0x140   :  { %v897_v35 = vmax.f32 %v881_v23, 0.0  ;;  %v847_v36 = vadd.f32 %v790_v30, %v598_v8  ;;  %1884 = vrot.lane.b32.xlu0 %v1883_v26, %s1974_s17  ;;  %v850_v37 = vadd.f32 %v678_v31, %v486_v7  ;;  %v621_v8 = vadd.f32 %v2428_v13, %v2414_v62 }
 0x141   :  { %v880_v43 = vadd.f32 %v2457_v42, %v852_v29  ;;  %1702 = vmatpush.msk.msra.mxu1 %vm2467_vm9, %v887_v53  ;;  %1889 = vrot.lane.b32.xlu1 %v1888_v32, %s1974_s17  ;;  %v91_v53 = vand.u32 127, %v83_v33  ;;  %v647_v30 = vadd.f32 %v2434_v17, %v2420_v1 }
 0x142   :  { %v2553_v44 = vsel %vm2477_vm12, %v897_v35, 0.0  ;;  %v2556_v45 = vadd.f32 %v2443_v28, %v847_v36  ;;  %v878_v46 = vadd.f32 %v2457_v42, %v850_v37  ;;  %v624_v37 = vadd.f32 %v2437_v19, %v2422_v2 }
 0x143   :  { %v896_v61 = vmax.f32 %v880_v43, 0.0  ;;  %v836_v14 = vpop.f32.mrf.mxu3  ;;  %1707 = vmatpush.msk.msra.mxu3 %vm1037_vm14, %v2553_v44  ;;  %vm2616_vm8 = vcmp.ge.s32.totalorder %v91_v53, 1  ;;  %vm107_vm10 = vcmp.le.s32.totalorder %v91_v53, 120 }
 0x144   :  { %v894_v55 = vmax.f32 %v878_v46, 0.0  ;;  %v849_v56 = vadd.f32 %v836_v14, %v644_v41  ;;  %v891_v59 = vmax.f32 %v2556_v45, 0.0  ;;  %vm2641_vm3 = vmand %vm2616_vm8, %vm107_vm10 }
 0x145   :  { %v928_v10 = vsel %vm2489_vm13, %v896_v61, 0.0  ;;  %1708 = vmatpush.msk.msra.mxu3 %vm2477_vm12, %v889_v50 }
 0x146   :  { %v877_v21 = vadd.f32 %v2443_v28, %v849_v56  ;;  %v813_v23 = vpop.f32.mrf.mxu2  ;;  %1704 = vmatpush.msk.msra.mxu2 %vm1037_vm14, %v928_v10  ;;  %v2602_v63 = vsel %vm2501_vm15, %v894_v55, 0.0  ;;  %v923_v1 = vsel %vm2596_vm6, %v891_v59, 0.0 }
 0x147   :  { %v848_v0 = vadd.f32 %v813_v23, %v621_v8  ;;  %v793_v13 = vpop.f32.mrf.mxu1  ;;  %v767_v15 = vpop.f32.mrf.mxu0  ;;  %936 = vrot.lane.b32.xlu2 %v2602_v63, %s1974_s17  ;;  %1698 = vmatpush.msk.msra.mxu0 %vm1037_vm14, %v2602_v63 }
 0x148   :  { %v893_v24 = vmax.f32 %v877_v21, 0.0  ;;  %v855_v26 = vadd.f32 %v793_v13, %v601_v20  ;;  %1705 = vmatpush.msk.msra.mxu2 %vm2489_vm13, %v888_v18  ;;  %992 = vrot.lane.b32.xlu0 %v928_v10, %s1975_s0  ;;  %v846_v29 = vadd.f32 %v767_v15, %v575_v57 }
 0x149   :  { %v876_v31 = vadd.f32 %v2443_v28, %v848_v0  ;;  %1699 = vmatpush.msk.msra.mxu0 %vm2501_vm15, %v886_v9  ;;  %944 = vrot.lane.b32.xlu1 %v928_v10, %s1974_s17 }
 0x14a   :  { %v883_v52 = vadd.f32 %v2457_v42, %v855_v26  ;;  %v874_v18 = vadd.f32 %v2443_v28, %v846_v29  ;;  %v925_v17 = vsel %vm2612_vm7, %v893_v24, 0.0 }
 0x14b   :  { %v892_v4 = vmax.f32 %v876_v31, 0.0  ;;  %v839_v9 = vpop.f32.mrf.mxu3  ;;  %v1893_v33 = vpack.i.bf16 %v923_v1, %v925_v17 }
 0x14c   :  { %v899_v28 = vmax.f32 %v883_v52, 0.0  ;;  %v890_v35 = vmax.f32 %v874_v18, 0.0  ;;  %v857_v36 = vadd.f32 %v839_v9, %v647_v30 }
 0x14d   :  { %v924_v41 = vsel %vm2641_vm3, %v892_v4, 0.0 }
 0x14e   :  { %v931_v43 = vsel %vm2596_vm6, %v899_v28, 0.0  ;;  %v885_v45 = vadd.f32 %v2457_v42, %v857_v36  ;;  %v816_v46 = vpop.f32.mrf.mxu2  ;;  %v922_v47 = vsel %vm2651_vm4, %v890_v35, 0.0  ;;  %v1913_v61 = vpack.i.bf16 %v924_v41, %v2509_v60 }
 0x14f   :  { %v856_v14 = vadd.f32 %v816_v46, %v624_v37  ;;  %1713 = vmatpush.msk.msrb.mxu1 %vm1037_vm14, %v931_v43  ;;  %v770_v2 = vpop.f32.mrf.mxu0  ;;  %948 = vrot.lane.b32.xlu2 %v2553_v44, %s1974_s17  ;;  %v1898_v3 = vpack.i.bf16 %v922_v47, %v924_v41  ;;  %v1908_v6 = vpack.i.bf16 %v2534_v27, %v922_v47 }
 0x150   :  { %v901_v19 = vmax.f32 %v885_v45, 0.0  ;;  %1894 = vrot.lane.b32.xlu0 %v1893_v33, %s1974_s17  ;;  %v854_v22 = vadd.f32 %v770_v2, %v578_v38 }
 0x151   :  { %v884_v48 = vadd.f32 %v2457_v42, %v856_v14  ;;  %1714 = vmatpush.msk.msrb.mxu1 %vm2596_vm6, %v891_v59  ;;  %996 = vrot.lane.b32.xlu1 %v2553_v44, %s1975_s0 }
 0x152   :  { %v933_v60 = vsel %vm2612_vm7, %v901_v19, 0.0  ;;  %v882_v53 = vadd.f32 %v2457_v42, %v854_v22  ;;  %v1903_v42 = vpack.i.bf16 %v2521_v12, %v2515_v11  ;;  %v1606_v11 = vld [vmem:[%s2868_s4] sm:$0xff]  ;;  %v1032_v12 = vld [vmem:[#allocation4 + $0x8] sm:$0xff] }
 0x153   :  { %v900_v54 = vmax.f32 %v884_v48, 0.0  ;;  %1719 = vmatpush.msk.msrb.mxu3 %vm1037_vm14, %v933_v60  ;;  %1703 = vmatmul.msk.f32.vlgmr.msra.gmra.mxu1 %vm1033_vm5, %v1032_v12 }
 0x154   :  { %v898_v55 = vmax.f32 %v882_v53, 0.0  ;;  %1706 = vmatmul.msk.f32.vlgmr.msra.gmra.mxu2 %vm1033_vm5, %v1032_v12  ;;  %1709 = vmatmul.msk.f32.vlgmr.msra.gmra.mxu3 %vm1033_vm5, %v1032_v12 }
 0x155   :  { %v932_v56 = vsel %vm2641_vm3, %v900_v54, 0.0  ;;  %1720 = vmatpush.msk.msrb.mxu3 %vm2612_vm7, %v893_v24  ;;  %1700 = vmatmul.msk.f32.vlgmr.msra.gmra.mxu0 %vm1033_vm5, %v1032_v12 }
 0x156   :  { %1716 = vmatpush.msk.msrb.mxu2 %vm1037_vm14, %v932_v56  ;;  %v930_v44 = vsel %vm2651_vm4, %v898_v55, 0.0 }
 0x157   :  { %952 = vrot.lane.b32.xlu2 %v930_v44, %s1974_s17  ;;  %1710 = vmatpush.msk.msrb.mxu0 %vm1037_vm14, %v930_v44 }
 0x158   :  { %1717 = vmatpush.msk.msrb.mxu2 %vm2641_vm3, %v892_v4  ;;  %964 = vrot.lane.b32.xlu0 %v933_v60, %s1974_s17 }
 0x159   :  { %1711 = vmatpush.msk.msrb.mxu0 %vm2651_vm4, %v890_v35  ;;  %1899 = vrot.lane.b32.xlu1 %v1898_v3, %s1974_s17 }
 0x15b   :  { %1715 = vmatmul.msk.f32.vlgmr.msrb.gmra.mxu1 %vm1033_vm5, %v1032_v12 }
 0x15c   :  { %1718 = vmatmul.msk.f32.vlgmr.msrb.gmra.mxu2 %vm1033_vm5, %v1032_v12  ;;  %1721 = vmatmul.msk.f32.vlgmr.msrb.gmra.mxu3 %vm1033_vm5, %v1032_v12 }
 0x15d   :  { %1712 = vmatmul.msk.f32.vlgmr.msrb.gmra.mxu0 %vm1033_vm5, %v1032_v12 }
 0x15f   :  { %1000 = vrot.lane.b32.xlu2 %v930_v44, %s1975_s0 }
 0x160   :  { %1904 = vrot.lane.b32.xlu0 %v1903_v42, %s1975_s0 }
 0x161   :  { %956 = vrot.lane.b32.xlu1 %v931_v43, %s1974_s17 }
 0x167   :  { %960 = vrot.lane.b32.xlu2 %v932_v56, %s1974_s17 }
 0x168   :  { %988 = vrot.lane.b32.xlu0 %v2526_v25, %s1975_s0 }
 0x169   :  { %1909 = vrot.lane.b32.xlu1 %v1908_v6, %s1975_s0 }
 0x16f   :  { %984 = vrot.lane.b32.xlu2 %v2602_v63, %s1975_s0  ;;  %v1030_v63 = vld [vmem:[#allocation4] sm:$0xff] }
 0x170   :  { %1012 = vrot.lane.b32.xlu0 %v933_v60, %s1975_s0 }
 0x171   :  { %1914 = vrot.lane.b32.xlu1 %v1913_v61, %s1975_s0 }
 0x177   :  { %1008 = vrot.lane.b32.xlu2 %v932_v56, %s1975_s0 }
 0x178   :  { %1002 = vrot.lane.b32.xlu0 %v923_v1, %s1975_s0 }
 0x179   :  { %1010 = vrot.lane.b32.xlu1 %v925_v17, %s1975_s0 }
 0x17f   :  { %1004 = vrot.lane.b32.xlu2 %v931_v43, %s1975_s0 }
 0x181   :  { %1609 = vperm.xlu1 %1882, %v1606_v11   ;;  %v1410_v11 = vld [vmem:[#allocation4 + $0x10] sm:$0xff] }
 0x199   :  { %v941_v25 = vpop.permute.xlu2 %940 }
 0x1a1   :  { %v937_v27 = vpop.permute.xlu2 %936 }
 0x1a2   :  { %v979_v7 = vsel %vm165_vm1, %v937_v27, %v941_v25 }
 0x1a3   :  { %1724 = vmatpush.msk.msra.mxu1 %vm1037_vm14, %v979_v7 }
 0x1a9   :  { %v949_v8 = vpop.permute.xlu2 %948 }
 0x1b1   :  { %v953_v10 = vpop.permute.xlu2 %952 }
 0x1b2   :  { %v1885_v57 = vpop.permute.xlu0 %1884  ;;  %v973_v37 = vsel %vm165_vm1, %v949_v8, %v953_v10 }
 0x1b3   :  { %v1890_v20 = vpop.permute.xlu1 %1889  ;;  %v1886_v59 = vunpack.i.l.bf16 %v1885_v57  ;;  %v1887_v0 = vunpack.i.h.bf16 %v1885_v57 }
 0x1b4   :  { %v1892_v21 = vunpack.i.h.bf16 %v1890_v20  ;;  %v1891_v13 = vunpack.i.l.bf16 %v1890_v20 }
 0x1b5   :  { %v976_v29 = vsel %vm165_vm1, %v1886_v59, %v1887_v0 }
 0x1b6   :  { %v978_v23 = vsel %vm165_vm1, %v1892_v21, %v1886_v59  ;;  %v974_v30 = vsel %vm165_vm1, %v1887_v0, %v1891_v13 }
 0x1b7   :  { %1284 = vmatpush.msra.mxu1 %v978_v23 }
 0x1b8   :  { %1725 = vmatmul.msk.f32.vlgmr.msra.gmra.mxu1 %vm1033_vm5, %v1030_v63 }
 0x1b9   :  { %v2734_v26 = vpop.permute.xlu2 %1000 }
 0x1ba   :  { %v993_v15 = vpop.permute.xlu0 %992 }
 0x1bb   :  { %v945_v40 = vpop.permute.xlu1 %944 }
 0x1bc   :  { %v975_v50 = vsel %vm165_vm1, %v945_v40, %v949_v8  ;;  %v977_v24 = vsel %vm165_vm1, %v941_v25, %v945_v40 }
 0x1bd   :  { %1726 = vmatpush.msk.msra.mxu2 %vm1037_vm14, %v977_v24  ;;  %1728 = vmatpush.msk.msra.mxu3 %vm1037_vm14, %v975_v50 }
 0x1bf   :  { %1304 = vmatpush.msra.mxu2 %v976_v29  ;;  %1324 = vmatpush.msra.mxu3 %v974_v30 }
 0x1c0   :  { %1727 = vmatmul.msk.f32.vlgmr.msra.gmra.mxu2 %vm1033_vm5, %v1030_v63  ;;  %1729 = vmatmul.msk.f32.vlgmr.msra.gmra.mxu3 %vm1033_vm5, %v1030_v63 }
 0x1c1   :  { %v961_v18 = vpop.permute.xlu2 %960 }
 0x1c2   :  { %v1895_v31 = vpop.permute.xlu0 %1894 }
 0x1c3   :  { %v997_v52 = vpop.permute.xlu1 %996  ;;  %v1896_v1 = vunpack.i.l.bf16 %v1895_v31  ;;  %v1897_v61 = vunpack.i.h.bf16 %v1895_v31 }
 0x1c4   :  { %v1021_v43 = vsel %vm238_vm2, %v997_v52, %v2734_v26  ;;  %v1023_v60 = vsel %vm238_vm2, %v993_v15, %v997_v52 }
 0x1c5   :  { %v980_v36 = vsel %vm165_vm1, %v1896_v1, %v1892_v21 }
 0x1c9   :  { %v985_v45 = vpop.permute.xlu2 %984 }
 0x1ca   :  { %v965_v17 = vpop.permute.xlu0 %964 }
 0x1cb   :  { %v967_v4 = vsel %vm165_vm1, %v961_v18, %v965_v17  ;;  %v981_v9 = vsel %vm165_vm1, %v965_v17, %v937_v27  ;;  %v1900_v33 = vpop.permute.xlu1 %1899 }
 0x1cc   :  { %1722 = vmatpush.msk.msra.mxu0 %vm1037_vm14, %v981_v9  ;;  %v1902_v28 = vunpack.i.h.bf16 %v1900_v33  ;;  %v1901_v35 = vunpack.i.l.bf16 %v1900_v33  ;;  %1736 = vmatpush.msk.msrb.mxu3 %vm1037_vm14, %v967_v4 }
 0x1ce   :  { %1264 = vmatpush.msra.mxu0 %v980_v36  ;;  %v966_v38 = vsel %vm165_vm1, %v1901_v35, %v1896_v1  ;;  %v972_v41 = vsel %vm165_vm1, %v1891_v13, %v1902_v28  ;;  %v970_v22 = vsel %vm165_vm1, %v1902_v28, %v1897_v61  ;;  %v968_v48 = vsel %vm165_vm1, %v1897_v61, %v1901_v35 }
 0x1cf   :  { %1404 = vmatpush.msrb.mxu3 %v966_v38  ;;  %1723 = vmatmul.msk.f32.vlgmr.msra.gmra.mxu0 %vm1033_vm5, %v1030_v63 }
 0x1d0   :  { %1730 = vmatpush.msk.msrb.mxu0 %vm1037_vm14, %v973_v37  ;;  %1737 = vmatmul.msk.f32.vlgmr.msrb.gmra.mxu3 %vm1033_vm5, %v1030_v63  ;;  %v1099_v52 = vpop.f32.mrf.mxu1 }
 0x1d1   :  { %1744 = vmatpush.msk.msra.mxu3 %vm1037_vm14, %v1021_v43  ;;  %v1009_v55 = vpop.permute.xlu2 %1008 }
 0x1d2   :  { %1344 = vmatpush.msrb.mxu0 %v972_v41  ;;  %v1905_v46 = vpop.permute.xlu0 %1904  ;;  %v1079_v31 = vpop.f32.mrf.mxu0 }
 0x1d3   :  { %v957_v47 = vpop.permute.xlu1 %956  ;;  %v1907_v3 = vunpack.i.h.bf16 %v1905_v46  ;;  %v1906_v19 = vunpack.i.l.bf16 %v1905_v46 }
 0x1d4   :  { %v969_v14 = vsel %vm165_vm1, %v957_v47, %v961_v18  ;;  %v971_v2 = vsel %vm165_vm1, %v953_v10, %v957_v47 }
 0x1d5   :  { %1732 = vmatpush.msk.msrb.mxu1 %vm1037_vm14, %v971_v2  ;;  %1734 = vmatpush.msk.msrb.mxu2 %vm1037_vm14, %v969_v14  ;;  %v1022_v54 = vsel %vm238_vm2, %v1906_v19, %v1907_v3 }
 0x1d7   :  { %1364 = vmatpush.msrb.mxu1 %v970_v22  ;;  %1384 = vmatpush.msrb.mxu2 %v968_v48  ;;  %v1119_v29 = vpop.f32.mrf.mxu2  ;;  %v1139_v30 = vpop.f32.mrf.mxu3 }
 0x1d8   :  { %1735 = vmatmul.msk.f32.vlgmr.msrb.gmra.mxu2 %vm1033_vm5, %v1030_v63  ;;  %1731 = vmatmul.msk.f32.vlgmr.msrb.gmra.mxu0 %vm1033_vm5, %v1030_v63  ;;  %v1179_v4 = vpop.f32.mrf.mxu1 }
 0x1d9   :  { %1742 = vmatpush.msk.msra.mxu2 %vm1037_vm14, %v1023_v60  ;;  %1733 = vmatmul.msk.f32.vlgmr.msrb.gmra.mxu1 %vm1033_vm5, %v1030_v63  ;;  %v1005_v20 = vpop.permute.xlu2 %1004 }
 0x1da   :  { %v989_v53 = vpop.permute.xlu0 %988  ;;  %v1017_v23 = vsel %vm238_vm2, %v1005_v20, %v1009_v55  ;;  %v1019_v63 = vsel %vm238_vm2, %v2734_v26, %v1005_v20  ;;  %v1159_v17 = vpop.f32.mrf.mxu0 }
 0x1db   :  { %v1025_v56 = vsel %vm238_vm2, %v989_v53, %v993_v15  ;;  %v1027_v44 = vsel %vm238_vm2, %v985_v45, %v989_v53  ;;  %1493 = vmatpush.msra.mxu2 %v1022_v54  ;;  %v1910_v42 = vpop.permute.xlu1 %1909 }
 0x1dc   :  { %v1911_v6 = vunpack.i.l.bf16 %v1910_v42  ;;  %1738 = vmatpush.msk.msra.mxu0 %vm1037_vm14, %v1027_v44  ;;  %1740 = vmatpush.msk.msra.mxu1 %vm1037_vm14, %v1025_v56  ;;  %v1912_v57 = vunpack.i.h.bf16 %v1910_v42 }
 0x1de   :  { %v1020_v12 = vsel %vm238_vm2, %v1907_v3, %v1911_v6 }
 0x1df   :  { %1513 = vmatpush.msra.mxu3 %v1020_v12  ;;  %v1199_v18 = vpop.f32.mrf.mxu2  ;;  %v1219_v1 = vpop.f32.mrf.mxu3 }
 0x1e0   :  { %1743 = vmatmul.msk.f32.vlgmr.msra.gmra.mxu2 %vm1033_vm5, %v1410_v11  ;;  %1745 = vmatmul.msk.f32.vlgmr.msra.gmra.mxu3 %vm1033_vm5, %v1410_v11 }
 0x1e2   :  { %v1013_v25 = vpop.permute.xlu0 %1012 }
 0x1e3   :  { %v1015_v27 = vsel %vm238_vm2, %v1009_v55, %v1013_v25  ;;  %v1029_v7 = vsel %vm238_vm2, %v1013_v25, %v985_v45  ;;  %v1915_v8 = vpop.permute.xlu1 %1914 }
 0x1e4   :  { %v1916_v10 = vunpack.i.l.bf16 %v1915_v8  ;;  %1750 = vmatpush.msk.msrb.mxu2 %vm1037_vm14, %v1015_v27  ;;  %1752 = vmatpush.msk.msrb.mxu3 %vm1037_vm14, %v1029_v7  ;;  %v1917_v0 = vunpack.i.h.bf16 %v1915_v8 }
 0x1e6   :  { %v1026_v59 = vsel %vm238_vm2, %v1912_v57, %v1916_v10  ;;  %v1024_v21 = vsel %vm238_vm2, %v1916_v10, %v1906_v19 }
 0x1e7   :  { %1453 = vmatpush.msra.mxu0 %v1026_v59  ;;  %1473 = vmatpush.msra.mxu1 %v1024_v21 }
 0x1e8   :  { %1739 = vmatmul.msk.f32.vlgmr.msra.gmra.mxu0 %vm1033_vm5, %v1410_v11  ;;  %1741 = vmatmul.msk.f32.vlgmr.msra.gmra.mxu1 %vm1033_vm5, %v1410_v11 }
 0x1e9   :  { %1746 = vmatpush.msk.msrb.mxu0 %vm1037_vm14, %v1019_v63  ;;  %1748 = vmatpush.msk.msrb.mxu1 %vm1037_vm14, %v1017_v23 }
 0x1ea   :  { %v1003_v13 = vpop.permute.xlu0 %1002 }
 0x1eb   :  { %v1011_v15 = vpop.permute.xlu1 %1010  ;;  %v1018_v40 = vsel %vm238_vm2, %v1911_v6, %v1003_v13  ;;  %v1016_v50 = vsel %vm238_vm2, %v1003_v13, %v1917_v0 }
 0x1ec   :  { %1533 = vmatpush.msrb.mxu0 %v1018_v40  ;;  %1553 = vmatpush.msrb.mxu1 %v1016_v50  ;;  %v1014_v24 = vsel %vm238_vm2, %v1917_v0, %v1011_v15  ;;  %v1028_v26 = vsel %vm238_vm2, %v1011_v15, %v1912_v57 }
 0x1ed   :  { %1573 = vmatpush.msrb.mxu2 %v1014_v24  ;;  %1593 = vmatpush.msrb.mxu3 %v1028_v26 }
 0x1ee   :  { %1751 = vmatmul.msk.f32.vlgmr.msrb.gmra.mxu2 %vm1033_vm5, %v1410_v11  ;;  %1753 = vmatmul.msk.f32.vlgmr.msrb.gmra.mxu3 %vm1033_vm5, %v1410_v11 }
 0x1f0   :  { %1747 = vmatmul.msk.f32.vlgmr.msrb.gmra.mxu0 %vm1033_vm5, %v1410_v11  ;;  %1749 = vmatmul.msk.f32.vlgmr.msrb.gmra.mxu1 %vm1033_vm5, %v1410_v11 }
 0x1f3   :  { %v1610_v47 = vpop.permute.xlu1 %1609 }
 0x235   :  { %v1286_v28 = vpop.f32.mrf.mxu1 }
 0x236   :  { %v1287_v14 = vadd.f32 %v1286_v28, %v1099_v52 }
 0x243   :  { %v1306_v51 = vpop.f32.mrf.mxu2  ;;  %v1326_v9 = vpop.f32.mrf.mxu3 }
 0x244   :  { %v1307_v41 = vadd.f32 %v1306_v51, %v1119_v29  ;;  %v1327_v43 = vadd.f32 %v1326_v9, %v1139_v30 }
 0x24c   :  { %v1266_v33 = vpop.f32.mrf.mxu0 }
 0x24d   :  { %v1267_v61 = vadd.f32 %v1266_v33, %v1079_v31 }
 0x253   :  { %v1406_v36 = vpop.f32.mrf.mxu3 }
 0x254   :  { %v1407_v21 = vadd.f32 %v1406_v36, %v1219_v1 }
 0x255   :  { %v1346_v37 = vpop.f32.mrf.mxu0 }
 0x256   :  { %v1366_v38 = vpop.f32.mrf.mxu1  ;;  %v1347_v27 = vadd.f32 %v1346_v37, %v1159_v17 }
 0x257   :  { %v1367_v7 = vadd.f32 %v1366_v38, %v1179_v4 }
 0x25b   :  { %v1386_v35 = vpop.f32.mrf.mxu2 }
 0x25c   :  { %v1387_v59 = vadd.f32 %v1386_v35, %v1199_v18 }
 0x263   :  { %v1495_v45 = vpop.f32.mrf.mxu2  ;;  %v1515_v46 = vpop.f32.mrf.mxu3 }
 0x264   :  { %v1600_v2 = vadd.f32 %v1495_v45, %v1307_v41  ;;  %v1601_v3 = vadd.f32 %v1515_v46, %v1327_v43 }
 0x265   :  { %v1455_v19 = vpop.f32.mrf.mxu0  ;;  %v1475_v22 = vpop.f32.mrf.mxu1 }
 0x266   :  { %v1614_v48 = vadd.f32 %v1610_v47, %v1600_v2  ;;  %v1615_v60 = vadd.f32 %v1610_v47, %v1601_v3  ;;  %v1598_v53 = vadd.f32 %v1455_v19, %v1267_v61  ;;  %v1599_v54 = vadd.f32 %v1475_v22, %v1287_v14 }
 0x268   :  { %v1622_v55 = vmax.f32 %v1614_v48, 0.0  ;;  %v1623_v56 = vmax.f32 %v1615_v60, 0.0  ;;  %v1612_v44 = vadd.f32 %v1610_v47, %v1598_v53  ;;  %v1613_v42 = vadd.f32 %v1610_v47, %v1599_v54 }
 0x26a   :  { %v1630_v6 = vsel %vm2489_vm13, %v1622_v55, 0.0  ;;  %v1631_v11 = vsel %vm2477_vm12, %v1623_v56, 0.0  ;;  %v1620_v12 = vmax.f32 %v1612_v44, 0.0  ;;  %v1621_v25 = vmax.f32 %v1613_v42, 0.0 }
 0x26b   :  { %1638 = vst [vmem:[%s2869_s5 + $0x10] sm:$0xff] %v1630_v6 }
 0x26c   :  { %1639 = vst [vmem:[%s2869_s5 + $0x18] sm:$0xff] %v1631_v11  ;;  %v1628_v8 = vsel %vm2501_vm15, %v1620_v12, 0.0  ;;  %v1629_v5 = vsel %vm2467_vm9, %v1621_v25, 0.0 }
 0x26d   :  { %1636 = vst [vmem:[%s2869_s5] sm:$0xff] %v1628_v8  ;;  %v1535_v39 = vpop.f32.mrf.mxu0  ;;  %v1555_v57 = vpop.f32.mrf.mxu1 }
 0x26e   :  { %1637 = vst [vmem:[%s2869_s5 + $0x8] sm:$0xff] %v1629_v5  ;;  %v1602_v10 = vadd.f32 %v1535_v39, %v1347_v27  ;;  %v1603_v20 = vadd.f32 %v1555_v57, %v1367_v7 }
 0x270   :  { %v1616_v23 = vadd.f32 %v1610_v47, %v1602_v10  ;;  %v1617_v58 = vadd.f32 %v1610_v47, %v1603_v20 }
 0x271   :  { %v1575_v63 = vpop.f32.mrf.mxu2  ;;  %v1595_v0 = vpop.f32.mrf.mxu3 }
 0x272   :  { %v1624_v49 = vmax.f32 %v1616_v23, 0.0  ;;  %v1625_v13 = vmax.f32 %v1617_v58, 0.0  ;;  %v1604_v15 = vadd.f32 %v1575_v63, %v1387_v59  ;;  %v1605_v40 = vadd.f32 %v1595_v0, %v1407_v21 }
 0x274   :  { %v1632_v50 = vsel %vm2651_vm4, %v1624_v49, 0.0  ;;  %v1633_v24 = vsel %vm2596_vm6, %v1625_v13, 0.0  ;;  %v1618_v26 = vadd.f32 %v1610_v47, %v1604_v15  ;;  %v1619_v29 = vadd.f32 %v1610_v47, %v1605_v40 }
 0x275   :  { %1640 = vst [vmem:[%s2869_s5 + $0x20] sm:$0xff] %v1632_v50 }
 0x276   :  { %1641 = vst [vmem:[%s2869_s5 + $0x28] sm:$0xff] %v1633_v24  ;;  %v1626_v30 = vmax.f32 %v1618_v26, 0.0  ;;  %v1627_v31 = vmax.f32 %v1619_v29, 0.0 }
 0x278   :  { %v1634_v52 = vsel %vm2641_vm3, %v1626_v30, 0.0  ;;  %v1635_v34 = vsel %vm2612_vm7, %v1627_v31, 0.0 }
 0x279   :  { %1642 = vst [vmem:[%s2869_s5 + $0x30] sm:$0xff] %v1634_v52 }
 0x27a   :  { %1643 = vst [vmem:[%s2869_s5 + $0x38] sm:$0xff] %v1635_v34 }
 0x27b   :  { %1648 = vsyncpa [#allocation3], 1 }
 0x27c   :  { %1649 = vsyncpa [#allocation5], 1 }

// kernel: pose2gait_forward.3
= control target key start
LH: loop header
LB: loop body
LE: loop exit
PB: predicated region body
PF: predicated region fallthrough
CT: control target
= control target key end

     0   :  { %14 = vsyncpa [#allocation3], 0  ;;  %s4884_s0 = inlined_call_operand.vmem [shape: f32[8,8,128], index: 0, kind: input, shape index: {}]   ;;  %s4885_s1 = inlined_call_operand.vmem [shape: f32[8,6], index: 1, kind: input, shape index: {}]   ;;  %s4886_s2 = inlined_call_operand.hbm [shape: f32[8,128,1152], index: 2, kind: input, shape index: {}]   ;;  %s4887_s3 = inlined_call_operand.hbm [shape: f32[6,1152], index: 3, kind: input, shape index: {}]   ;;  %s4888_s4 = inlined_call_operand.hbm [shape: f32[1,1152], index: 4, kind: input, shape index: {}]   ;;  %s4889_s5 = inlined_call_operand.hbm [shape: f32[1152,384], index: 5, kind: input, shape index: {}]   ;;  %s4890_s6 = inlined_call_operand.hbm [shape: f32[1,384], index: 6, kind: input, shape index: {}]   ;;  %s4891_s7 = inlined_call_operand.hbm [shape: f32[384,128], index: 7, kind: input, shape index: {}]   ;;  %s4892_s8 = inlined_call_operand.hbm [shape: f32[1,128], index: 8, kind: input, shape index: {}]   ;;  %s4893_s9 = inlined_call_operand.vmem [shape: f32[8,128], index: 9, kind: output, shape index: {}]  }
   0x1   :  { %15 = vsyncpa [#allocation5], 0 }
   0x2   :  { %16 = vsyncpa [#allocation8], 0  ;;  %s40_s11 = sshll.u32 %s4887_s3, 4  ;;  %s41_s11 = int_to_ptr.hbm [resolvable:$true] %s40_s11 }
   0x3   :  { %17 = vsyncpa [#allocation11], 0  ;;  %s4393_s12 = smov [#allocation4]   ;;  %s61_s16 = sshll.u32 %s4889_s5, 4  ;;  %s62_s16 = int_to_ptr.hbm [resolvable:$true] %s61_s16 }
   0x4   :  { %s42_s13 = sshll.u32 %s4393_s12, 4  ;;  %s4394_s17 = smov [#allocation7]   ;;  %s43_s13 = int_to_ptr.vmem [resolvable:$true] %s42_s13 }
   0x5   :  { %45 = dma.hbm_to_vmem [thread:$0]  %s41_s11, 1152, %s43_s13, [#allocation5]  }
   0x6   :  { %s63_s18 = sshll.u32 %s4394_s17, 4  ;;  %s4395_s19 = smov 384   ;;  %s64_s18 = int_to_ptr.vmem [resolvable:$true] %s63_s18 }
   0x7   :  { %s4396_s20 = smov 24   ;;  %s85_s3 = sshll.u32 %s4891_s7, 4  ;;  %s86_s3 = int_to_ptr.hbm [resolvable:$true] %s85_s3 }
   0x8   :  { %69 = dma.hbm_to_vmem [thread:$0]  %s62_s16, 55296, %s64_s18, [#allocation8], %s4395_s19, %s4395_s19, %s4396_s20  }
   0x9   :  { %s4397_s23 = smov [#allocation10]   ;;  %s26_s5 = sshll.u32 %s4886_s2, 4  ;;  %s27_s5 = int_to_ptr.hbm [resolvable:$true] %s26_s5 }
   0xa   :  { %s87_s24 = sshll.u32 %s4397_s23, 4  ;;  %s4398_s27 = smov 128   ;;  %s88_s24 = int_to_ptr.vmem [resolvable:$true] %s87_s24 }
   0xb   :  { %s4399_s28 = smov 8   ;;  %s4400_s29 = smov [#allocation2]  }
   0xc   :  { %93 = dma.hbm_to_vmem [thread:$0]  %s86_s3, 6144, %s88_s24, [#allocation11], %s4398_s27, %s4398_s27, %s4399_s28  }
   0xd   :  { %s28_s30 = sshll.u32 %s4400_s29, 4  ;;  %s4401_s10 = smov 1152   ;;  %s29_s30 = int_to_ptr.vmem [resolvable:$true] %s28_s30 }
   0xe   :  { %s4402_s11 = smov 72   ;;  %s51_s13 = sshll.u32 %s4888_s4, 4  ;;  %s52_s13 = int_to_ptr.hbm [resolvable:$true] %s51_s13 }
   0xf   :  { %34 = dma.hbm_to_vmem [thread:$0]  %s27_s5, 147456, %s29_s30, [#allocation3], %s4401_s10, %s4401_s10, %s4402_s11  }
  0x10   :  { %s4403_s14 = smov [#allocation6]   ;;  %s75_s17 = sshll.u32 %s4890_s6, 4  ;;  %s76_s17 = int_to_ptr.hbm [resolvable:$true] %s75_s17 }
  0x11   :  { %s53_s15 = sshll.u32 %s4403_s14, 4  ;;  %s4404_s18 = smov [#allocation9]   ;;  %s54_s15 = int_to_ptr.vmem [resolvable:$true] %s53_s15 }
  0x12   :  { %56 = dma.hbm_to_vmem [thread:$0]  %s52_s13, 144, %s54_s15, [#allocation5]  }
  0x13   :  { %s77_s19 = sshll.u32 %s4404_s18, 4  ;;  %s99_s22 = sshll.u32 %s4892_s8, 4  ;;  %s78_s19 = int_to_ptr.vmem [resolvable:$true] %s77_s19  ;;  %s100_s22 = int_to_ptr.hbm [resolvable:$true] %s99_s22 }
  0x14   :  { %80 = dma.hbm_to_vmem [thread:$0]  %s76_s17, 48, %s78_s19, [#allocation8]  }
  0x15   :  { %s4405_s4 = smov [#allocation12]  }
  0x16   :  { %s101_s3 = sshll.u32 %s4405_s4, 4  ;;  %s102_s3 = int_to_ptr.vmem [resolvable:$true] %s101_s3 }
  0x17   :  { %104 = dma.hbm_to_vmem [thread:$0]  %s100_s22, 16, %s102_s3, [#allocation11]  }
  0x18   :  { %4385 = dma.done.wait [#allocation3], 147456  }
  0x19   :  { %4386 = vsyncadd [#allocation3], 4294819840 }
  0x1a   :  { %4387 = dma.done.wait [#allocation5], 1296  }
  0x1b   :  { %4388 = vsyncadd [#allocation5], 4294966000 }
  0x1c   :  { %4389 = dma.done.wait [#allocation8], 55344  }
  0x1d   :  { %4390 = vsyncadd [#allocation8], 4294911952 }
  0x1e   :  { %4391 = dma.done.wait [#allocation11], 6160  }
  0x1f   :  { %4392 = vsyncadd [#allocation11], 4294961136  ;;  %vm169_vm0 = vcmask 1045504   ;;  %vm165_vm1 = vcmask 48128   ;;  %v134_v0 = vld [vmem:[#allocation4] sm:$0x3f] }
  0x20   :  { %v135_v1 = vld [vmem:[#allocation4 + $0x8] sm:$0x3f]  ;;  %v140_v2 = vld [vmem:[#allocation4 + $0x30] sm:$0x3f]  ;;  %4176 = vmatpush.msk.msra.mxu0 %vm169_vm0, %v134_v0  ;;  %v513_v3 = vld [vmem:[#allocation2 + $0x438] sm:$0xff] }
  0x21   :  { %4178 = vmatpush.msk.msra.mxu3 %vm169_vm0, %v135_v1  ;;  %v4482_v4 = vld [vmem:[%s4885_s1] sm:$0xff]  ;;  %4188 = vmatpush.msk.msra.mxu2 %vm169_vm0, %v140_v2  ;;  %v504_v6 = vld [vmem:[#allocation2 + $0x3f0] sm:$0xff]  ;;  %v505_v7 = vld [vmem:[#allocation2 + $0x3f8] sm:$0xff] }
  0x22   :  { %v514_v5 = vld [vmem:[#allocation2 + $0x440] sm:$0xff]  ;;  %522 = vmatpush.msra.mxu1 %v513_v3  ;;  %4177 = vmatmul.msk.f32.vlgmr.msra.gmra.mxu0 %vm165_vm1, %v4482_v4  ;;  %v495_v8 = vld [vmem:[#allocation2 + $0x3a8] sm:$0xff]  ;;  %v136_v9 = vld [vmem:[#allocation4 + $0x10] sm:$0x3f] }
  0x23   :  { %4179 = vmatmul.msk.f32.vlgmr.msra.gmra.mxu3 %vm165_vm1, %v4482_v4  ;;  %542 = vmatpush.msrb.mxu2 %v514_v5  ;;  %v137_v10 = vld [vmem:[#allocation4 + $0x18] sm:$0x3f]  ;;  %v496_v11 = vld [vmem:[#allocation2 + $0x3b0] sm:$0xff]  ;;  %v486_v12 = vld [vmem:[#allocation2 + $0x360] sm:$0xff] }
  0x24   :  { %523 = vmatpush.msra.mxu1 %v504_v6  ;;  %4180 = vmatpush.msk.msrb.mxu0 %vm169_vm0, %v136_v9  ;;  %v487_v13 = vld [vmem:[#allocation2 + $0x368] sm:$0xff]  ;;  %v477_v14 = vld [vmem:[#allocation2 + $0x318] sm:$0xff]  ;;  %v138_v15 = vld [vmem:[#allocation4 + $0x20] sm:$0x3f] }
  0x25   :  { %4182 = vmatpush.msk.msrb.mxu3 %vm169_vm0, %v137_v10  ;;  %543 = vmatpush.msrb.mxu2 %v505_v7  ;;  %v139_v16 = vld [vmem:[#allocation4 + $0x28] sm:$0x3f]  ;;  %v478_v17 = vld [vmem:[#allocation2 + $0x320] sm:$0xff]  ;;  %v468_v18 = vld [vmem:[#allocation2 + $0x2d0] sm:$0xff] }
  0x26   :  { %524 = vmatpush.msra.mxu1 %v495_v8  ;;  %4189 = vmatmul.msk.f32.vlgmr.msra.gmra.mxu2 %vm165_vm1, %v4482_v4  ;;  %v141_v19 = vld [vmem:[#allocation4 + $0x38] sm:$0x3f]  ;;  %v142_v20 = vld [vmem:[#allocation4 + $0x40] sm:$0x3f]  ;;  %v459_v22 = vld [vmem:[#allocation2 + $0x288] sm:$0xff] }
  0x27   :  { %544 = vmatpush.msrb.mxu2 %v496_v11  ;;  %4184 = vmatpush.msk.msra.mxu0 %vm169_vm0, %v138_v15  ;;  %v469_v21 = vld [vmem:[#allocation2 + $0x2d8] sm:$0xff]  ;;  %v460_v23 = vld [vmem:[#allocation2 + $0x290] sm:$0xff]  ;;  %v450_v24 = vld [vmem:[#allocation2 + $0x240] sm:$0xff] }
  0x28   :  { %525 = vmatpush.msra.mxu1 %v486_v12  ;;  %4186 = vmatpush.msk.msra.mxu3 %vm169_vm0, %v139_v16  ;;  %v451_v25 = vld [vmem:[#allocation2 + $0x248] sm:$0xff]  ;;  %v441_v26 = vld [vmem:[#allocation2 + $0x1f8] sm:$0xff]  ;;  %v442_v27 = vld [vmem:[#allocation2 + $0x200] sm:$0xff] }
  0x29   :  { %545 = vmatpush.msrb.mxu2 %v487_v13  ;;  %v515_v28 = vld [vmem:[#allocation2 + $0x448] sm:$0xff]  ;;  %v516_v29 = vld [vmem:[#allocation2 + $0x450] sm:$0xff]  ;;  %v433_v31 = vld [vmem:[#allocation2 + $0x1b8] sm:$0xff] }
  0x2a   :  { %526 = vmatpush.msra.mxu1 %v477_v14  ;;  %4181 = vmatmul.msk.f32.vlgmr.msrb.gmra.mxu0 %vm165_vm1, %v4482_v4  ;;  %v432_v30 = vld [vmem:[#allocation2 + $0x1b0] sm:$0xff]  ;;  %v506_v32 = vld [vmem:[#allocation2 + $0x400] sm:$0xff]  ;;  %v507_v33 = vld [vmem:[#allocation2 + $0x408] sm:$0xff] }
  0x2b   :  { %4183 = vmatmul.msk.f32.vlgmr.msrb.gmra.mxu3 %vm165_vm1, %v4482_v4  ;;  %546 = vmatpush.msrb.mxu2 %v478_v17  ;;  %v423_v34 = vld [vmem:[#allocation2 + $0x168] sm:$0xff]  ;;  %v424_v35 = vld [vmem:[#allocation2 + $0x170] sm:$0xff]  ;;  %v497_v36 = vld [vmem:[#allocation2 + $0x3b8] sm:$0xff] }
  0x2c   :  { %527 = vmatpush.msra.mxu1 %v468_v18  ;;  %4190 = vmatpush.msk.msrb.mxu3 %vm169_vm0, %v141_v19  ;;  %v498_v37 = vld [vmem:[#allocation2 + $0x3c0] sm:$0xff]  ;;  %v415_v39 = vld [vmem:[#allocation2 + $0x128] sm:$0xff]  ;;  %v488_v40 = vld [vmem:[#allocation2 + $0x370] sm:$0xff] }
  0x2d   :  { %4192 = vmatpush.msk.msrb.mxu0 %vm169_vm0, %v142_v20  ;;  %547 = vmatpush.msrb.mxu2 %v469_v21  ;;  %v414_v38 = vld [vmem:[#allocation2 + $0x120] sm:$0xff]  ;;  %v489_v41 = vld [vmem:[#allocation2 + $0x378] sm:$0xff]  ;;  %v479_v44 = vld [vmem:[#allocation2 + $0x328] sm:$0xff] }
  0x2e   :  { %528 = vmatpush.msra.mxu1 %v459_v22  ;;  %v405_v42 = vld [vmem:[#allocation2 + $0xd8] sm:$0xff]  ;;  %v406_v43 = vld [vmem:[#allocation2 + $0xe0] sm:$0xff]  ;;  %v480_v45 = vld [vmem:[#allocation2 + $0x330] sm:$0xff] }
  0x2f   :  { %548 = vmatpush.msrb.mxu2 %v460_v23  ;;  %v396_v46 = vld [vmem:[#allocation2 + $0x90] sm:$0xff]  ;;  %v397_v47 = vld [vmem:[#allocation2 + $0x98] sm:$0xff]  ;;  %v470_v48 = vld [vmem:[#allocation2 + $0x2e0] sm:$0xff] }
  0x30   :  { %529 = vmatpush.msra.mxu1 %v450_v24  ;;  %v471_v49 = vld [vmem:[#allocation2 + $0x2e8] sm:$0xff]  ;;  %v388_v51 = vld [vmem:[#allocation2 + $0x50] sm:$0xff]  ;;  %v461_v52 = vld [vmem:[#allocation2 + $0x298] sm:$0xff] }
  0x31   :  { %549 = vmatpush.msrb.mxu2 %v451_v25  ;;  %v387_v50 = vld [vmem:[#allocation2 + $0x48] sm:$0xff]  ;;  %v462_v53 = vld [vmem:[#allocation2 + $0x2a0] sm:$0xff]  ;;  %v452_v57 = vld [vmem:[#allocation2 + $0x250] sm:$0xff] }
  0x32   :  { %530 = vmatpush.msra.mxu1 %v441_v26  ;;  %4185 = vmatmul.msk.f32.vlgmr.msra.gmra.mxu0 %vm165_vm1, %v4482_v4  ;;  %v378_v54 = vld [vmem:[#allocation2] sm:$0xff]  ;;  %v379_v56 = vld [vmem:[#allocation2 + $0x8] sm:$0xff]  ;;  %v453_v58 = vld [vmem:[#allocation2 + $0x258] sm:$0xff] }
  0x33   :  { %4187 = vmatmul.msk.f32.vlgmr.msra.gmra.mxu3 %vm165_vm1, %v4482_v4  ;;  %550 = vmatpush.msrb.mxu2 %v442_v27  ;;  %v4508_v55 = vld [vmem:[%s4884_s0] sm:$0xff]  ;;  %v517_v59 = vld [vmem:[#allocation2 + $0x458] sm:$0xff]  ;;  %v443_v61 = vld [vmem:[#allocation2 + $0x208] sm:$0xff] }
  0x34   :  { %562 = vmatpush.msra.mxu3 %v515_v28  ;;  %582 = vmatpush.msra.mxu0 %v516_v29  ;;  %v518_v60 = vld [vmem:[#allocation2 + $0x460] sm:$0xff]  ;;  %v444_v62 = vld [vmem:[#allocation2 + $0x210] sm:$0xff]  ;;  %v509_v0 = vld [vmem:[#allocation2 + $0x418] sm:$0xff] }
  0x35   :  { %531 = vmatpush.msra.mxu1 %v432_v30  ;;  %551 = vmatpush.msrb.mxu2 %v433_v31  ;;  %v508_v63 = vld [vmem:[#allocation2 + $0x410] sm:$0xff]  ;;  %v434_v1 = vld [vmem:[#allocation2 + $0x1c0] sm:$0xff]  ;;  %v435_v2 = vld [vmem:[#allocation2 + $0x1c8] sm:$0xff] }
  0x36   :  { %563 = vmatpush.msra.mxu3 %v506_v32  ;;  %583 = vmatpush.msra.mxu0 %v507_v33  ;;  %v499_v3 = vld [vmem:[#allocation2 + $0x3c8] sm:$0xff]  ;;  %v500_v5 = vld [vmem:[#allocation2 + $0x3d0] sm:$0xff]  ;;  %v425_v6 = vld [vmem:[#allocation2 + $0x178] sm:$0xff] }
  0x37   :  { %532 = vmatpush.msra.mxu1 %v423_v34  ;;  %552 = vmatpush.msrb.mxu2 %v424_v35  ;;  %v426_v7 = vld [vmem:[#allocation2 + $0x180] sm:$0xff]  ;;  %v491_v9 = vld [vmem:[#allocation2 + $0x388] sm:$0xff]  ;;  %v416_v10 = vld [vmem:[#allocation2 + $0x130] sm:$0xff] }
  0x38   :  { %564 = vmatpush.msra.mxu3 %v497_v36  ;;  %584 = vmatpush.msra.mxu0 %v498_v37  ;;  %v490_v8 = vld [vmem:[#allocation2 + $0x380] sm:$0xff]  ;;  %v417_v11 = vld [vmem:[#allocation2 + $0x138] sm:$0xff]  ;;  %v407_v14 = vld [vmem:[#allocation2 + $0xe8] sm:$0xff] }
  0x39   :  { %533 = vmatpush.msra.mxu1 %v414_v38  ;;  %553 = vmatpush.msrb.mxu2 %v415_v39  ;;  %v481_v12 = vld [vmem:[#allocation2 + $0x338] sm:$0xff]  ;;  %v482_v13 = vld [vmem:[#allocation2 + $0x340] sm:$0xff]  ;;  %v408_v15 = vld [vmem:[#allocation2 + $0xf0] sm:$0xff] }
  0x3a   :  { %565 = vmatpush.msra.mxu3 %v488_v40  ;;  %585 = vmatpush.msra.mxu0 %v489_v41  ;;  %v472_v16 = vld [vmem:[#allocation2 + $0x2f0] sm:$0xff]  ;;  %v473_v17 = vld [vmem:[#allocation2 + $0x2f8] sm:$0xff]  ;;  %v398_v18 = vld [vmem:[#allocation2 + $0xa0] sm:$0xff] }
  0x3b   :  { %534 = vmatpush.msra.mxu1 %v405_v42  ;;  %554 = vmatpush.msrb.mxu2 %v406_v43  ;;  %v399_v19 = vld [vmem:[#allocation2 + $0xa8] sm:$0xff]  ;;  %v464_v21 = vld [vmem:[#allocation2 + $0x2b0] sm:$0xff]  ;;  %v389_v22 = vld [vmem:[#allocation2 + $0x58] sm:$0xff] }
  0x3c   :  { %566 = vmatpush.msra.mxu3 %v479_v44  ;;  %586 = vmatpush.msra.mxu0 %v480_v45  ;;  %v463_v20 = vld [vmem:[#allocation2 + $0x2a8] sm:$0xff]  ;;  %v390_v23 = vld [vmem:[#allocation2 + $0x60] sm:$0xff]  ;;  %v380_v26 = vld [vmem:[#allocation2 + $0x10] sm:$0xff] }
  0x3d   :  { %535 = vmatpush.msra.mxu1 %v396_v46  ;;  %555 = vmatpush.msrb.mxu2 %v397_v47  ;;  %v454_v24 = vld [vmem:[#allocation2 + $0x260] sm:$0xff]  ;;  %v455_v25 = vld [vmem:[#allocation2 + $0x268] sm:$0xff]  ;;  %v445_v27 = vld [vmem:[#allocation2 + $0x218] sm:$0xff] }
  0x3e   :  { %567 = vmatpush.msra.mxu3 %v470_v48  ;;  %587 = vmatpush.msra.mxu0 %v471_v49  ;;  %v446_v28 = vld [vmem:[#allocation2 + $0x220] sm:$0xff]  ;;  %v519_v29 = vld [vmem:[#allocation2 + $0x468] sm:$0xff]  ;;  %v520_v30 = vld [vmem:[#allocation2 + $0x470] sm:$0xff] }
  0x3f   :  { %536 = vmatpush.msra.mxu1 %v387_v50  ;;  %556 = vmatpush.msrb.mxu2 %v388_v51  ;;  %v436_v31 = vld [vmem:[#allocation2 + $0x1d0] sm:$0xff]  ;;  %v437_v32 = vld [vmem:[#allocation2 + $0x1d8] sm:$0xff]  ;;  %v510_v33 = vld [vmem:[#allocation2 + $0x420] sm:$0xff] }
  0x40   :  { %568 = vmatpush.msra.mxu3 %v461_v52  ;;  %588 = vmatpush.msra.mxu0 %v462_v53  ;;  %v511_v34 = vld [vmem:[#allocation2 + $0x428] sm:$0xff]  ;;  %v428_v36 = vld [vmem:[#allocation2 + $0x190] sm:$0xff]  ;;  %v501_v37 = vld [vmem:[#allocation2 + $0x3d8] sm:$0xff] }
  0x41   :  { %537 = vmatpush.msra.mxu1 %v378_v54  ;;  %557 = vmatpush.msrb.mxu2 %v379_v56  ;;  %v427_v35 = vld [vmem:[#allocation2 + $0x188] sm:$0xff]  ;;  %v502_v38 = vld [vmem:[#allocation2 + $0x3e0] sm:$0xff]  ;;  %v492_v41 = vld [vmem:[#allocation2 + $0x390] sm:$0xff] }
  0x42   :  { %538 = vmatmul.f32.vlgmr.msra.gmra.mxu1 %v4508_v55  ;;  %569 = vmatpush.msra.mxu3 %v452_v57  ;;  %v418_v39 = vld [vmem:[#allocation2 + $0x140] sm:$0xff]  ;;  %v419_v40 = vld [vmem:[#allocation2 + $0x148] sm:$0xff]  ;;  %v493_v42 = vld [vmem:[#allocation2 + $0x398] sm:$0xff] }
  0x43   :  { %589 = vmatpush.msra.mxu0 %v453_v58  ;;  %602 = vmatpush.msrb.mxu1 %v517_v59  ;;  %v409_v43 = vld [vmem:[#allocation2 + $0xf8] sm:$0xff]  ;;  %v410_v44 = vld [vmem:[#allocation2 + $0x100] sm:$0xff]  ;;  %v483_v45 = vld [vmem:[#allocation2 + $0x348] sm:$0xff] }
  0x44   :  { %558 = vmatmul.f32.vlgmr.msrb.gmra.mxu2 %v4508_v55  ;;  %570 = vmatpush.msra.mxu3 %v443_v61  ;;  %v484_v46 = vld [vmem:[#allocation2 + $0x350] sm:$0xff]  ;;  %v401_v48 = vld [vmem:[#allocation2 + $0xb8] sm:$0xff]  ;;  %v474_v49 = vld [vmem:[#allocation2 + $0x300] sm:$0xff] }
  0x45   :  { %622 = vmatpush.msra.mxu2 %v518_v60  ;;  %590 = vmatpush.msra.mxu0 %v444_v62  ;;  %v400_v47 = vld [vmem:[#allocation2 + $0xb0] sm:$0xff]  ;;  %v475_v50 = vld [vmem:[#allocation2 + $0x308] sm:$0xff]  ;;  %v465_v53 = vld [vmem:[#allocation2 + $0x2b8] sm:$0xff] }
  0x46   :  { %603 = vmatpush.msrb.mxu1 %v508_v63  ;;  %571 = vmatpush.msra.mxu3 %v434_v1  ;;  %v391_v51 = vld [vmem:[#allocation2 + $0x68] sm:$0xff]  ;;  %v392_v52 = vld [vmem:[#allocation2 + $0x70] sm:$0xff]  ;;  %v466_v54 = vld [vmem:[#allocation2 + $0x2c0] sm:$0xff] }
  0x47   :  { %623 = vmatpush.msra.mxu2 %v509_v0  ;;  %591 = vmatpush.msra.mxu0 %v435_v2  ;;  %v382_v56 = vld [vmem:[#allocation2 + $0x20] sm:$0xff]  ;;  %v383_v57 = vld [vmem:[#allocation2 + $0x28] sm:$0xff]  ;;  %v456_v58 = vld [vmem:[#allocation2 + $0x270] sm:$0xff] }
  0x48   :  { %604 = vmatpush.msrb.mxu1 %v499_v3  ;;  %572 = vmatpush.msra.mxu3 %v425_v6  ;;  %v457_v59 = vld [vmem:[#allocation2 + $0x278] sm:$0xff]  ;;  %v447_v62 = vld [vmem:[#allocation2 + $0x228] sm:$0xff]  ;;  %v448_v63 = vld [vmem:[#allocation2 + $0x230] sm:$0xff] }
  0x49   :  { %624 = vmatpush.msra.mxu2 %v500_v5  ;;  %592 = vmatpush.msra.mxu0 %v426_v7  ;;  %v521_v60 = vld [vmem:[#allocation2 + $0x478] sm:$0xff]  ;;  %v512_v0 = vld [vmem:[#allocation2 + $0x430] sm:$0xff]  ;;  %v438_v2 = vld [vmem:[#allocation2 + $0x1e0] sm:$0xff] }
  0x4a   :  { %605 = vmatpush.msrb.mxu1 %v490_v8  ;;  %573 = vmatpush.msra.mxu3 %v416_v10  ;;  %v849_v61 = vld [vmem:[#allocation2 + $0x8b8] sm:$0xff]  ;;  %v840_v1 = vld [vmem:[#allocation2 + $0x870] sm:$0xff]  ;;  %v439_v3 = vld [vmem:[#allocation2 + $0x1e8] sm:$0xff] }
  0x4b   :  { %625 = vmatpush.msra.mxu2 %v491_v9  ;;  %593 = vmatpush.msra.mxu0 %v417_v11  ;;  %v503_v5 = vld [vmem:[#allocation2 + $0x3e8] sm:$0xff]  ;;  %v429_v7 = vld [vmem:[#allocation2 + $0x198] sm:$0xff]  ;;  %v430_v8 = vld [vmem:[#allocation2 + $0x1a0] sm:$0xff] }
  0x4c   :  { %606 = vmatpush.msrb.mxu1 %v481_v12  ;;  %4191 = vmatmul.msk.f32.vlgmr.msrb.gmra.mxu3 %vm165_vm1, %v4482_v4  ;;  %v831_v6 = vld [vmem:[#allocation2 + $0x828] sm:$0xff]  ;;  %v494_v9 = vld [vmem:[#allocation2 + $0x3a0] sm:$0xff]  ;;  %v420_v11 = vld [vmem:[#allocation2 + $0x150] sm:$0xff] }
  0x4d   :  { %4193 = vmatmul.msk.f32.vlgmr.msrb.gmra.mxu0 %vm165_vm1, %v4482_v4  ;;  %626 = vmatpush.msra.mxu2 %v482_v13  ;;  %v381_v4 = vld [vmem:[#allocation2 + $0x18] sm:$0xff]  ;;  %v822_v10 = vld [vmem:[#allocation2 + $0x7e0] sm:$0xff] }
  0x4e   :  { %574 = vmatpush.msra.mxu3 %v407_v14  ;;  %594 = vmatpush.msra.mxu0 %v408_v15  ;;  %v421_v12 = vld [vmem:[#allocation2 + $0x158] sm:$0xff]  ;;  %v411_v15 = vld [vmem:[#allocation2 + $0x108] sm:$0xff] }
  0x4f   :  { %607 = vmatpush.msrb.mxu1 %v472_v16  ;;  %627 = vmatpush.msra.mxu2 %v473_v17  ;;  %v485_v13 = vld [vmem:[#allocation2 + $0x358] sm:$0xff]  ;;  %v412_v16 = vld [vmem:[#allocation2 + $0x110] sm:$0xff] }
  0x50   :  { %575 = vmatpush.msra.mxu3 %v398_v18  ;;  %595 = vmatpush.msra.mxu0 %v399_v19  ;;  %v813_v14 = vld [vmem:[#allocation2 + $0x798] sm:$0xff]  ;;  %v476_v17 = vld [vmem:[#allocation2 + $0x310] sm:$0xff]  ;;  %v402_v19 = vld [vmem:[#allocation2 + $0xc0] sm:$0xff] }
  0x51   :  { %608 = vmatpush.msrb.mxu1 %v463_v20  ;;  %628 = vmatpush.msra.mxu2 %v464_v21  ;;  %v804_v18 = vld [vmem:[#allocation2 + $0x750] sm:$0xff]  ;;  %v403_v20 = vld [vmem:[#allocation2 + $0xc8] sm:$0xff] }
  0x52   :  { %576 = vmatpush.msra.mxu3 %v389_v22  ;;  %596 = vmatpush.msra.mxu0 %v390_v23  ;;  %v467_v21 = vld [vmem:[#allocation2 + $0x2c8] sm:$0xff]  ;;  %v393_v23 = vld [vmem:[#allocation2 + $0x78] sm:$0xff] }
  0x53   :  { %609 = vmatpush.msrb.mxu1 %v454_v24  ;;  %629 = vmatpush.msra.mxu2 %v455_v25  ;;  %v795_v22 = vld [vmem:[#allocation2 + $0x708] sm:$0xff]  ;;  %v394_v24 = vld [vmem:[#allocation2 + $0x80] sm:$0xff] }
  0x54   :  { %577 = vmatpush.msra.mxu3 %v380_v26  ;;  %597 = vmatpush.msra.mxu0 %v381_v4  ;;  %v458_v25 = vld [vmem:[#allocation2 + $0x280] sm:$0xff]  ;;  %v384_v4 = vld [vmem:[#allocation2 + $0x30] sm:$0xff] }
  0x55   :  { %610 = vmatpush.msrb.mxu1 %v445_v27  ;;  %578 = vmatmul.f32.vlgmr.msra.gmra.mxu3 %v4508_v55  ;;  %v786_v26 = vld [vmem:[#allocation2 + $0x6c0] sm:$0xff]  ;;  %v385_v27 = vld [vmem:[#allocation2 + $0x38] sm:$0xff] }
  0x56   :  { %598 = vmatmul.f32.vlgmr.msra.gmra.mxu0 %v4508_v55  ;;  %630 = vmatpush.msra.mxu2 %v446_v28  ;;  %v449_v28 = vld [vmem:[#allocation2 + $0x238] sm:$0xff] }
  0x57   :  { %642 = vmatpush.msrb.mxu3 %v519_v29  ;;  %662 = vmatpush.msrb.mxu0 %v520_v30  ;;  %v777_v29 = vld [vmem:[#allocation2 + $0x678] sm:$0xff]  ;;  %v850_v30 = vld [vmem:[#allocation2 + $0x8c0] sm:$0xff] }
  0x58   :  { %611 = vmatpush.msrb.mxu1 %v436_v31  ;;  %631 = vmatpush.msra.mxu2 %v437_v32  ;;  %v851_v31 = vld [vmem:[#allocation2 + $0x8c8] sm:$0xff]  ;;  %v440_v32 = vld [vmem:[#allocation2 + $0x1f0] sm:$0xff] }
  0x59   :  { %643 = vmatpush.msrb.mxu3 %v510_v33  ;;  %663 = vmatpush.msrb.mxu0 %v511_v34  ;;  %v768_v33 = vld [vmem:[#allocation2 + $0x630] sm:$0xff]  ;;  %v841_v34 = vld [vmem:[#allocation2 + $0x878] sm:$0xff] }
  0x5a   :  { %612 = vmatpush.msrb.mxu1 %v427_v35  ;;  %632 = vmatpush.msra.mxu2 %v428_v36  ;;  %v842_v35 = vld [vmem:[#allocation2 + $0x880] sm:$0xff]  ;;  %v431_v36 = vld [vmem:[#allocation2 + $0x1a8] sm:$0xff] }
  0x5b   :  { %644 = vmatpush.msrb.mxu3 %v501_v37  ;;  %664 = vmatpush.msrb.mxu0 %v502_v38  ;;  %v759_v37 = vld [vmem:[#allocation2 + $0x5e8] sm:$0xff]  ;;  %v832_v38 = vld [vmem:[#allocation2 + $0x830] sm:$0xff] }
  0x5c   :  { %613 = vmatpush.msrb.mxu1 %v418_v39  ;;  %633 = vmatpush.msra.mxu2 %v419_v40  ;;  %v833_v39 = vld [vmem:[#allocation2 + $0x838] sm:$0xff]  ;;  %v422_v40 = vld [vmem:[#allocation2 + $0x160] sm:$0xff] }
  0x5d   :  { %645 = vmatpush.msrb.mxu3 %v492_v41  ;;  %665 = vmatpush.msrb.mxu0 %v493_v42  ;;  %v750_v41 = vld [vmem:[#allocation2 + $0x5a0] sm:$0xff]  ;;  %v823_v42 = vld [vmem:[#allocation2 + $0x7e8] sm:$0xff] }
  0x5e   :  { %614 = vmatpush.msrb.mxu1 %v409_v43  ;;  %634 = vmatpush.msra.mxu2 %v410_v44  ;;  %v824_v43 = vld [vmem:[#allocation2 + $0x7f0] sm:$0xff]  ;;  %v413_v44 = vld [vmem:[#allocation2 + $0x118] sm:$0xff] }
  0x5f   :  { %646 = vmatpush.msrb.mxu3 %v483_v45  ;;  %666 = vmatpush.msrb.mxu0 %v484_v46  ;;  %v741_v45 = vld [vmem:[#allocation2 + $0x558] sm:$0xff]  ;;  %v814_v46 = vld [vmem:[#allocation2 + $0x7a0] sm:$0xff] }
  0x60   :  { %615 = vmatpush.msrb.mxu1 %v400_v47  ;;  %635 = vmatpush.msra.mxu2 %v401_v48  ;;  %v815_v47 = vld [vmem:[#allocation2 + $0x7a8] sm:$0xff]  ;;  %v404_v48 = vld [vmem:[#allocation2 + $0xd0] sm:$0xff] }
  0x61   :  { %647 = vmatpush.msrb.mxu3 %v474_v49  ;;  %667 = vmatpush.msrb.mxu0 %v475_v50  ;;  %v732_v49 = vld [vmem:[#allocation2 + $0x510] sm:$0xff]  ;;  %v805_v50 = vld [vmem:[#allocation2 + $0x758] sm:$0xff] }
  0x62   :  { %616 = vmatpush.msrb.mxu1 %v391_v51  ;;  %636 = vmatpush.msra.mxu2 %v392_v52  ;;  %v806_v51 = vld [vmem:[#allocation2 + $0x760] sm:$0xff]  ;;  %v395_v52 = vld [vmem:[#allocation2 + $0x88] sm:$0xff] }
  0x63   :  { %648 = vmatpush.msrb.mxu3 %v465_v53  ;;  %668 = vmatpush.msrb.mxu0 %v466_v54  ;;  %v723_v53 = vld [vmem:[#allocation2 + $0x4c8] sm:$0xff]  ;;  %v796_v54 = vld [vmem:[#allocation2 + $0x710] sm:$0xff] }
  0x64   :  { %617 = vmatpush.msrb.mxu1 %v382_v56  ;;  %637 = vmatpush.msra.mxu2 %v383_v57  ;;  %v797_v56 = vld [vmem:[#allocation2 + $0x718] sm:$0xff]  ;;  %v386_v57 = vld [vmem:[#allocation2 + $0x40] sm:$0xff] }
  0x65   :  { %618 = vmatmul.f32.vlgmr.msrb.gmra.mxu1 %v4508_v55  ;;  %649 = vmatpush.msrb.mxu3 %v456_v58  ;;  %v714_v58 = vld [vmem:[#allocation2 + $0x480] sm:$0xff] }
  0x66   :  { %669 = vmatpush.msrb.mxu0 %v457_v59  ;;  %682 = vmatpush.msra.mxu1 %v521_v60  ;;  %v787_v59 = vld [vmem:[#allocation2 + $0x6c8] sm:$0xff]  ;;  %v788_v60 = vld [vmem:[#allocation2 + $0x6d0] sm:$0xff] }
  0x67   :  { %638 = vmatmul.f32.vlgmr.msra.gmra.mxu2 %v4508_v55  ;;  %650 = vmatpush.msrb.mxu3 %v447_v62  ;;  %v4525_v62 = vld [vmem:[%s4884_s0 + $0x8] sm:$0xff] }
  0x68   :  { %858 = vmatpush.msrb.mxu2 %v849_v61  ;;  %670 = vmatpush.msrb.mxu0 %v448_v63  ;;  %v852_v61 = vld [vmem:[#allocation2 + $0x8d0] sm:$0xff]  ;;  %v853_v63 = vld [vmem:[#allocation2 + $0x8d8] sm:$0xff] }
  0x69   :  { %683 = vmatpush.msra.mxu1 %v512_v0  ;;  %651 = vmatpush.msrb.mxu3 %v438_v2  ;;  %v778_v0 = vld [vmem:[#allocation2 + $0x680] sm:$0xff]  ;;  %v843_v2 = vld [vmem:[#allocation2 + $0x888] sm:$0xff] }
  0x6a   :  { %859 = vmatpush.msrb.mxu2 %v840_v1  ;;  %671 = vmatpush.msrb.mxu0 %v439_v3  ;;  %v779_v1 = vld [vmem:[#allocation2 + $0x688] sm:$0xff]  ;;  %v844_v3 = vld [vmem:[#allocation2 + $0x890] sm:$0xff] }
  0x6b   :  { %684 = vmatpush.msra.mxu1 %v503_v5  ;;  %652 = vmatpush.msrb.mxu3 %v429_v7  ;;  %v769_v5 = vld [vmem:[#allocation2 + $0x638] sm:$0xff]  ;;  %v834_v7 = vld [vmem:[#allocation2 + $0x840] sm:$0xff] }
  0x6c   :  { %860 = vmatpush.msrb.mxu2 %v831_v6  ;;  %672 = vmatpush.msrb.mxu0 %v430_v8  ;;  %v770_v6 = vld [vmem:[#allocation2 + $0x640] sm:$0xff]  ;;  %v835_v8 = vld [vmem:[#allocation2 + $0x848] sm:$0xff] }
  0x6d   :  { %685 = vmatpush.msra.mxu1 %v494_v9  ;;  %653 = vmatpush.msrb.mxu3 %v420_v11  ;;  %v761_v9 = vld [vmem:[#allocation2 + $0x5f8] sm:$0xff]  ;;  %v826_v11 = vld [vmem:[#allocation2 + $0x800] sm:$0xff] }
  0x6e   :  { %861 = vmatpush.msrb.mxu2 %v822_v10  ;;  %673 = vmatpush.msrb.mxu0 %v421_v12  ;;  %v825_v10 = vld [vmem:[#allocation2 + $0x7f8] sm:$0xff]  ;;  %v751_v12 = vld [vmem:[#allocation2 + $0x5a8] sm:$0xff] }
  0x6f   :  { %686 = vmatpush.msra.mxu1 %v485_v13  ;;  %654 = vmatpush.msrb.mxu3 %v411_v15  ;;  %v752_v13 = vld [vmem:[#allocation2 + $0x5b0] sm:$0xff]  ;;  %v817_v15 = vld [vmem:[#allocation2 + $0x7b8] sm:$0xff] }
  0x70   :  { %862 = vmatpush.msrb.mxu2 %v813_v14  ;;  %674 = vmatpush.msrb.mxu0 %v412_v16  ;;  %v816_v14 = vld [vmem:[#allocation2 + $0x7b0] sm:$0xff]  ;;  %v742_v16 = vld [vmem:[#allocation2 + $0x560] sm:$0xff] }
  0x71   :  { %687 = vmatpush.msra.mxu1 %v476_v17  ;;  %655 = vmatpush.msrb.mxu3 %v402_v19  ;;  %v743_v17 = vld [vmem:[#allocation2 + $0x568] sm:$0xff]  ;;  %v808_v19 = vld [vmem:[#allocation2 + $0x770] sm:$0xff] }
  0x72   :  { %863 = vmatpush.msrb.mxu2 %v804_v18  ;;  %675 = vmatpush.msrb.mxu0 %v403_v20  ;;  %v807_v18 = vld [vmem:[#allocation2 + $0x768] sm:$0xff]  ;;  %v733_v20 = vld [vmem:[#allocation2 + $0x518] sm:$0xff] }
  0x73   :  { %688 = vmatpush.msra.mxu1 %v467_v21  ;;  %656 = vmatpush.msrb.mxu3 %v393_v23  ;;  %v734_v21 = vld [vmem:[#allocation2 + $0x520] sm:$0xff]  ;;  %v799_v23 = vld [vmem:[#allocation2 + $0x728] sm:$0xff] }
  0x74   :  { %864 = vmatpush.msrb.mxu2 %v795_v22  ;;  %676 = vmatpush.msrb.mxu0 %v394_v24  ;;  %v798_v22 = vld [vmem:[#allocation2 + $0x720] sm:$0xff]  ;;  %v724_v24 = vld [vmem:[#allocation2 + $0x4d0] sm:$0xff] }
  0x75   :  { %689 = vmatpush.msra.mxu1 %v458_v25  ;;  %657 = vmatpush.msrb.mxu3 %v384_v4  ;;  %v725_v25 = vld [vmem:[#allocation2 + $0x4d8] sm:$0xff]  ;;  %v790_v4 = vld [vmem:[#allocation2 + $0x6e0] sm:$0xff] }
  0x76   :  { %865 = vmatpush.msrb.mxu2 %v786_v26  ;;  %677 = vmatpush.msrb.mxu0 %v385_v27  ;;  %v789_v26 = vld [vmem:[#allocation2 + $0x6d8] sm:$0xff]  ;;  %v715_v27 = vld [vmem:[#allocation2 + $0x488] sm:$0xff] }
  0x77   :  { %690 = vmatpush.msra.mxu1 %v449_v28  ;;  %658 = vmatmul.f32.vlgmr.msrb.gmra.mxu3 %v4508_v55  ;;  %v716_v28 = vld [vmem:[#allocation2 + $0x490] sm:$0xff] }
  0x78   :  { %678 = vmatmul.f32.vlgmr.msrb.gmra.mxu0 %v4508_v55  ;;  %866 = vmatpush.msrb.mxu2 %v777_v29  ;;  %v780_v29 = vld [vmem:[#allocation2 + $0x690] sm:$0xff] }
  0x79   :  { %878 = vmatpush.msra.mxu3 %v850_v30  ;;  %898 = vmatpush.msra.mxu0 %v851_v31  ;;  %v781_v30 = vld [vmem:[#allocation2 + $0x698] sm:$0xff]  ;;  %v854_v31 = vld [vmem:[#allocation2 + $0x8e0] sm:$0xff] }
  0x7a   :  { %691 = vmatpush.msra.mxu1 %v440_v32  ;;  %867 = vmatpush.msrb.mxu2 %v768_v33  ;;  %v855_v32 = vld [vmem:[#allocation2 + $0x8e8] sm:$0xff] }
  0x7b   :  { %879 = vmatpush.msra.mxu3 %v841_v34  ;;  %899 = vmatpush.msra.mxu0 %v842_v35  ;;  %v771_v33 = vld [vmem:[#allocation2 + $0x648] sm:$0xff]  ;;  %v772_v34 = vld [vmem:[#allocation2 + $0x650] sm:$0xff]  ;;  %v845_v35 = vld [vmem:[#allocation2 + $0x898] sm:$0xff] }
  0x7c   :  { %692 = vmatpush.msra.mxu1 %v431_v36  ;;  %868 = vmatpush.msrb.mxu2 %v759_v37  ;;  %v846_v36 = vld [vmem:[#allocation2 + $0x8a0] sm:$0xff] }
  0x7d   :  { %880 = vmatpush.msra.mxu3 %v832_v38  ;;  %900 = vmatpush.msra.mxu0 %v833_v39  ;;  %v762_v37 = vld [vmem:[#allocation2 + $0x600] sm:$0xff]  ;;  %v763_v38 = vld [vmem:[#allocation2 + $0x608] sm:$0xff]  ;;  %v836_v39 = vld [vmem:[#allocation2 + $0x850] sm:$0xff] }
  0x7e   :  { %693 = vmatpush.msra.mxu1 %v422_v40  ;;  %869 = vmatpush.msrb.mxu2 %v750_v41  ;;  %v837_v40 = vld [vmem:[#allocation2 + $0x858] sm:$0xff] }
  0x7f   :  { %881 = vmatpush.msra.mxu3 %v823_v42  ;;  %901 = vmatpush.msra.mxu0 %v824_v43  ;;  %v753_v41 = vld [vmem:[#allocation2 + $0x5b8] sm:$0xff]  ;;  %v754_v42 = vld [vmem:[#allocation2 + $0x5c0] sm:$0xff]  ;;  %v827_v43 = vld [vmem:[#allocation2 + $0x808] sm:$0xff] }
  0x80   :  { %694 = vmatpush.msra.mxu1 %v413_v44  ;;  %870 = vmatpush.msrb.mxu2 %v741_v45  ;;  %v828_v44 = vld [vmem:[#allocation2 + $0x810] sm:$0xff] }
  0x81   :  { %882 = vmatpush.msra.mxu3 %v814_v46  ;;  %902 = vmatpush.msra.mxu0 %v815_v47  ;;  %v744_v45 = vld [vmem:[#allocation2 + $0x570] sm:$0xff]  ;;  %v745_v46 = vld [vmem:[#allocation2 + $0x578] sm:$0xff]  ;;  %v818_v47 = vld [vmem:[#allocation2 + $0x7c0] sm:$0xff] }
  0x82   :  { %695 = vmatpush.msra.mxu1 %v404_v48  ;;  %871 = vmatpush.msrb.mxu2 %v732_v49  ;;  %v819_v48 = vld [vmem:[#allocation2 + $0x7c8] sm:$0xff] }
  0x83   :  { %883 = vmatpush.msra.mxu3 %v805_v50  ;;  %903 = vmatpush.msra.mxu0 %v806_v51  ;;  %v735_v49 = vld [vmem:[#allocation2 + $0x528] sm:$0xff]  ;;  %v736_v50 = vld [vmem:[#allocation2 + $0x530] sm:$0xff]  ;;  %v809_v51 = vld [vmem:[#allocation2 + $0x778] sm:$0xff] }
  0x84   :  { %696 = vmatpush.msra.mxu1 %v395_v52  ;;  %872 = vmatpush.msrb.mxu2 %v723_v53  ;;  %v810_v52 = vld [vmem:[#allocation2 + $0x780] sm:$0xff] }
  0x85   :  { %884 = vmatpush.msra.mxu3 %v796_v54  ;;  %904 = vmatpush.msra.mxu0 %v797_v56  ;;  %v726_v53 = vld [vmem:[#allocation2 + $0x4e0] sm:$0xff]  ;;  %v727_v54 = vld [vmem:[#allocation2 + $0x4e8] sm:$0xff]  ;;  %v800_v56 = vld [vmem:[#allocation2 + $0x730] sm:$0xff] }
  0x86   :  { %697 = vmatpush.msra.mxu1 %v386_v57  ;;  %873 = vmatpush.msrb.mxu2 %v714_v58  ;;  %v801_v57 = vld [vmem:[#allocation2 + $0x738] sm:$0xff] }
  0x87   :  { %698 = vmatmul.f32.vlgmr.msra.gmra.mxu1 %v4508_v55  ;;  %885 = vmatpush.msra.mxu3 %v787_v59  ;;  %v760_v55 = vld [vmem:[#allocation2 + $0x5f0] sm:$0xff]  ;;  %v717_v58 = vld [vmem:[#allocation2 + $0x498] sm:$0xff]  ;;  %v718_v59 = vld [vmem:[#allocation2 + $0x4a0] sm:$0xff] }
  0x88   :  { %905 = vmatpush.msra.mxu0 %v788_v60  ;;  %918 = vmatpush.msrb.mxu1 %v852_v61  ;;  %v791_v60 = vld [vmem:[#allocation2 + $0x6e8] sm:$0xff]  ;;  %v792_v61 = vld [vmem:[#allocation2 + $0x6f0] sm:$0xff] }
  0x89   :  { %874 = vmatmul.f32.vlgmr.msrb.gmra.mxu2 %v4525_v62  ;;  %886 = vmatpush.msra.mxu3 %v778_v0  ;;  %v857_v0 = vld [vmem:[#allocation2 + $0x8f8] sm:$0xff] }
  0x8a   :  { %938 = vmatpush.msra.mxu2 %v853_v63  ;;  %906 = vmatpush.msra.mxu0 %v779_v1  ;;  %v856_v63 = vld [vmem:[#allocation2 + $0x8f0] sm:$0xff]  ;;  %v782_v1 = vld [vmem:[#allocation2 + $0x6a0] sm:$0xff] }
  0x8b   :  { %919 = vmatpush.msrb.mxu1 %v843_v2  ;;  %887 = vmatpush.msra.mxu3 %v769_v5  ;;  %v783_v2 = vld [vmem:[#allocation2 + $0x6a8] sm:$0xff]  ;;  %v848_v5 = vld [vmem:[#allocation2 + $0x8b0] sm:$0xff] }
  0x8c   :  { %939 = vmatpush.msra.mxu2 %v844_v3  ;;  %907 = vmatpush.msra.mxu0 %v770_v6  ;;  %v847_v3 = vld [vmem:[#allocation2 + $0x8a8] sm:$0xff]  ;;  %v773_v6 = vld [vmem:[#allocation2 + $0x658] sm:$0xff] }
  0x8d   :  { %920 = vmatpush.msrb.mxu1 %v834_v7  ;;  %888 = vmatpush.msra.mxu3 %v760_v55  ;;  %v774_v7 = vld [vmem:[#allocation2 + $0x660] sm:$0xff]  ;;  %v839_v55 = vld [vmem:[#allocation2 + $0x868] sm:$0xff] }
  0x8e   :  { %940 = vmatpush.msra.mxu2 %v835_v8  ;;  %908 = vmatpush.msra.mxu0 %v761_v9  ;;  %v838_v8 = vld [vmem:[#allocation2 + $0x860] sm:$0xff]  ;;  %v764_v9 = vld [vmem:[#allocation2 + $0x610] sm:$0xff] }
  0x8f   :  { %921 = vmatpush.msrb.mxu1 %v825_v10  ;;  %889 = vmatpush.msra.mxu3 %v751_v12  ;;  %v765_v10 = vld [vmem:[#allocation2 + $0x618] sm:$0xff]  ;;  %v830_v12 = vld [vmem:[#allocation2 + $0x820] sm:$0xff] }
  0x90   :  { %941 = vmatpush.msra.mxu2 %v826_v11  ;;  %909 = vmatpush.msra.mxu0 %v752_v13  ;;  %v829_v11 = vld [vmem:[#allocation2 + $0x818] sm:$0xff]  ;;  %v755_v13 = vld [vmem:[#allocation2 + $0x5c8] sm:$0xff] }
  0x91   :  { %922 = vmatpush.msrb.mxu1 %v816_v14  ;;  %890 = vmatpush.msra.mxu3 %v742_v16  ;;  %v756_v14 = vld [vmem:[#allocation2 + $0x5d0] sm:$0xff]  ;;  %v821_v16 = vld [vmem:[#allocation2 + $0x7d8] sm:$0xff] }
  0x92   :  { %942 = vmatpush.msra.mxu2 %v817_v15  ;;  %910 = vmatpush.msra.mxu0 %v743_v17  ;;  %v820_v15 = vld [vmem:[#allocation2 + $0x7d0] sm:$0xff]  ;;  %v746_v17 = vld [vmem:[#allocation2 + $0x580] sm:$0xff] }
  0x93   :  { %923 = vmatpush.msrb.mxu1 %v807_v18  ;;  %891 = vmatpush.msra.mxu3 %v733_v20  ;;  %v747_v18 = vld [vmem:[#allocation2 + $0x588] sm:$0xff]  ;;  %v812_v20 = vld [vmem:[#allocation2 + $0x790] sm:$0xff] }
  0x94   :  { %943 = vmatpush.msra.mxu2 %v808_v19  ;;  %911 = vmatpush.msra.mxu0 %v734_v21  ;;  %v811_v19 = vld [vmem:[#allocation2 + $0x788] sm:$0xff]  ;;  %v737_v21 = vld [vmem:[#allocation2 + $0x538] sm:$0xff] }
  0x95   :  { %924 = vmatpush.msrb.mxu1 %v798_v22  ;;  %892 = vmatpush.msra.mxu3 %v724_v24  ;;  %v738_v22 = vld [vmem:[#allocation2 + $0x540] sm:$0xff]  ;;  %v803_v24 = vld [vmem:[#allocation2 + $0x748] sm:$0xff] }
  0x96   :  { %944 = vmatpush.msra.mxu2 %v799_v23  ;;  %912 = vmatpush.msra.mxu0 %v725_v25  ;;  %v802_v23 = vld [vmem:[#allocation2 + $0x740] sm:$0xff]  ;;  %v728_v25 = vld [vmem:[#allocation2 + $0x4f0] sm:$0xff] }
  0x97   :  { %925 = vmatpush.msrb.mxu1 %v789_v26  ;;  %893 = vmatpush.msra.mxu3 %v715_v27  ;;  %v729_v26 = vld [vmem:[#allocation2 + $0x4f8] sm:$0xff]  ;;  %v794_v27 = vld [vmem:[#allocation2 + $0x700] sm:$0xff] }
  0x98   :  { %945 = vmatpush.msra.mxu2 %v790_v4  ;;  %913 = vmatpush.msra.mxu0 %v716_v28  ;;  %v793_v4 = vld [vmem:[#allocation2 + $0x6f8] sm:$0xff]  ;;  %v719_v28 = vld [vmem:[#allocation2 + $0x4a8] sm:$0xff] }
  0x99   :  { %926 = vmatpush.msrb.mxu1 %v780_v29  ;;  %894 = vmatmul.f32.vlgmr.msra.gmra.mxu3 %v4525_v62  ;;  %v720_v29 = vld [vmem:[#allocation2 + $0x4b0] sm:$0xff] }
  0x9a   :  { %914 = vmatmul.f32.vlgmr.msra.gmra.mxu0 %v4525_v62  ;;  %946 = vmatpush.msra.mxu2 %v781_v30  ;;  %v784_v30 = vld [vmem:[#allocation2 + $0x6b0] sm:$0xff] }
  0x9b   :  { %958 = vmatpush.msrb.mxu3 %v854_v31  ;;  %978 = vmatpush.msrb.mxu0 %v855_v32  ;;  %v785_v31 = vld [vmem:[#allocation2 + $0x6b8] sm:$0xff] }
  0x9c   :  { %927 = vmatpush.msrb.mxu1 %v771_v33  ;;  %947 = vmatpush.msra.mxu2 %v772_v34  ;;  %v1185_v32 = vld [vmem:[#allocation2 + $0xd38] sm:$0xff]  ;;  %v1186_v33 = vld [vmem:[#allocation2 + $0xd40] sm:$0xff]  ;;  %v775_v34 = vld [vmem:[#allocation2 + $0x668] sm:$0xff] }
  0x9d   :  { %959 = vmatpush.msrb.mxu3 %v845_v35  ;;  %979 = vmatpush.msrb.mxu0 %v846_v36  ;;  %v776_v35 = vld [vmem:[#allocation2 + $0x670] sm:$0xff] }
  0x9e   :  { %928 = vmatpush.msrb.mxu1 %v762_v37  ;;  %948 = vmatpush.msra.mxu2 %v763_v38  ;;  %v1176_v36 = vld [vmem:[#allocation2 + $0xcf0] sm:$0xff]  ;;  %v1177_v37 = vld [vmem:[#allocation2 + $0xcf8] sm:$0xff]  ;;  %v766_v38 = vld [vmem:[#allocation2 + $0x620] sm:$0xff] }
  0x9f   :  { %960 = vmatpush.msrb.mxu3 %v836_v39  ;;  %980 = vmatpush.msrb.mxu0 %v837_v40  ;;  %v767_v39 = vld [vmem:[#allocation2 + $0x628] sm:$0xff] }
  0xa0   :  { %929 = vmatpush.msrb.mxu1 %v753_v41  ;;  %949 = vmatpush.msra.mxu2 %v754_v42  ;;  %v1167_v40 = vld [vmem:[#allocation2 + $0xca8] sm:$0xff]  ;;  %v1168_v41 = vld [vmem:[#allocation2 + $0xcb0] sm:$0xff]  ;;  %v757_v42 = vld [vmem:[#allocation2 + $0x5d8] sm:$0xff] }
  0xa1   :  { %961 = vmatpush.msrb.mxu3 %v827_v43  ;;  %981 = vmatpush.msrb.mxu0 %v828_v44  ;;  %v758_v43 = vld [vmem:[#allocation2 + $0x5e0] sm:$0xff] }
  0xa2   :  { %930 = vmatpush.msrb.mxu1 %v744_v45  ;;  %950 = vmatpush.msra.mxu2 %v745_v46  ;;  %v1158_v44 = vld [vmem:[#allocation2 + $0xc60] sm:$0xff]  ;;  %v1159_v45 = vld [vmem:[#allocation2 + $0xc68] sm:$0xff]  ;;  %v748_v46 = vld [vmem:[#allocation2 + $0x590] sm:$0xff] }
  0xa3   :  { %962 = vmatpush.msrb.mxu3 %v818_v47  ;;  %982 = vmatpush.msrb.mxu0 %v819_v48  ;;  %v749_v47 = vld [vmem:[#allocation2 + $0x598] sm:$0xff] }
  0xa4   :  { %931 = vmatpush.msrb.mxu1 %v735_v49  ;;  %951 = vmatpush.msra.mxu2 %v736_v50  ;;  %v1149_v48 = vld [vmem:[#allocation2 + $0xc18] sm:$0xff]  ;;  %v1150_v49 = vld [vmem:[#allocation2 + $0xc20] sm:$0xff]  ;;  %v739_v50 = vld [vmem:[#allocation2 + $0x548] sm:$0xff] }
  0xa5   :  { %963 = vmatpush.msrb.mxu3 %v809_v51  ;;  %983 = vmatpush.msrb.mxu0 %v810_v52  ;;  %v740_v51 = vld [vmem:[#allocation2 + $0x550] sm:$0xff] }
  0xa6   :  { %932 = vmatpush.msrb.mxu1 %v726_v53  ;;  %952 = vmatpush.msra.mxu2 %v727_v54  ;;  %v1140_v52 = vld [vmem:[#allocation2 + $0xbd0] sm:$0xff]  ;;  %v4535_v53 = vpop.f32.mrf.mxu0  ;;  %v1141_v54 = vld [vmem:[#allocation2 + $0xbd8] sm:$0xff] }
  0xa7   :  { %964 = vmatpush.msrb.mxu3 %v800_v56  ;;  %984 = vmatpush.msrb.mxu0 %v801_v57  ;;  %v730_v56 = vld [vmem:[#allocation2 + $0x500] sm:$0xff]  ;;  %v731_v57 = vld [vmem:[#allocation2 + $0x508] sm:$0xff] }
  0xa8   :  { %933 = vmatpush.msrb.mxu1 %v717_v58  ;;  %953 = vmatpush.msra.mxu2 %v718_v59  ;;  %v1131_v58 = vld [vmem:[#allocation2 + $0xb88] sm:$0xff]  ;;  %v1132_v59 = vld [vmem:[#allocation2 + $0xb90] sm:$0xff] }
  0xa9   :  { %934 = vmatmul.f32.vlgmr.msrb.gmra.mxu1 %v4525_v62  ;;  %965 = vmatpush.msrb.mxu3 %v791_v60  ;;  %v721_v60 = vld [vmem:[#allocation2 + $0x4b8] sm:$0xff] }
  0xaa   :  { %985 = vmatpush.msrb.mxu0 %v792_v61  ;;  %998 = vmatpush.msra.mxu1 %v856_v63  ;;  %v722_v61 = vld [vmem:[#allocation2 + $0x4c0] sm:$0xff] }
  0xab   :  { %954 = vmatmul.f32.vlgmr.msra.gmra.mxu2 %v4525_v62  ;;  %966 = vmatpush.msrb.mxu3 %v782_v1  ;;  %v1122_v63 = vld [vmem:[#allocation2 + $0xb40] sm:$0xff]  ;;  %v1187_v1 = vld [vmem:[#allocation2 + $0xd48] sm:$0xff] }
  0xac   :  { %1018 = vmatpush.msrb.mxu2 %v857_v0  ;;  %986 = vmatpush.msrb.mxu0 %v783_v2  ;;  %v1123_v0 = vld [vmem:[#allocation2 + $0xb48] sm:$0xff]  ;;  %v1188_v2 = vld [vmem:[#allocation2 + $0xd50] sm:$0xff] }
  0xad   :  { %999 = vmatpush.msra.mxu1 %v847_v3  ;;  %967 = vmatpush.msrb.mxu3 %v773_v6  ;;  %v1113_v3 = vld [vmem:[#allocation2 + $0xaf8] sm:$0xff]  ;;  %v1178_v6 = vld [vmem:[#allocation2 + $0xd00] sm:$0xff] }
  0xae   :  { %1019 = vmatpush.msrb.mxu2 %v848_v5  ;;  %987 = vmatpush.msrb.mxu0 %v774_v7  ;;  %v1114_v5 = vld [vmem:[#allocation2 + $0xb00] sm:$0xff]  ;;  %v1179_v7 = vld [vmem:[#allocation2 + $0xd08] sm:$0xff] }
  0xaf   :  { %1000 = vmatpush.msra.mxu1 %v838_v8  ;;  %968 = vmatpush.msrb.mxu3 %v764_v9  ;;  %v1104_v8 = vld [vmem:[#allocation2 + $0xab0] sm:$0xff]  ;;  %v1169_v9 = vld [vmem:[#allocation2 + $0xcb8] sm:$0xff] }
  0xb0   :  { %1020 = vmatpush.msrb.mxu2 %v839_v55  ;;  %988 = vmatpush.msrb.mxu0 %v765_v10  ;;  %v1105_v55 = vld [vmem:[#allocation2 + $0xab8] sm:$0xff]  ;;  %v4539_v10 = vpop.f32.mrf.mxu0 }
  0xb1   :  { %1001 = vmatpush.msra.mxu1 %v829_v11  ;;  %969 = vmatpush.msrb.mxu3 %v755_v13  ;;  %v1170_v11 = vld [vmem:[#allocation2 + $0xcc0] sm:$0xff]  ;;  %v1096_v13 = vld [vmem:[#allocation2 + $0xa70] sm:$0xff] }
  0xb2   :  { %1021 = vmatpush.msrb.mxu2 %v830_v12  ;;  %989 = vmatpush.msrb.mxu0 %v756_v14  ;;  %v1095_v12 = vld [vmem:[#allocation2 + $0xa68] sm:$0xff]  ;;  %v1160_v14 = vld [vmem:[#allocation2 + $0xc70] sm:$0xff] }
  0xb3   :  { %1002 = vmatpush.msra.mxu1 %v820_v15  ;;  %970 = vmatpush.msrb.mxu3 %v746_v17  ;;  %v1161_v15 = vld [vmem:[#allocation2 + $0xc78] sm:$0xff]  ;;  %v1151_v17 = vld [vmem:[#allocation2 + $0xc28] sm:$0xff] }
  0xb4   :  { %1022 = vmatpush.msrb.mxu2 %v821_v16  ;;  %990 = vmatpush.msrb.mxu0 %v747_v18  ;;  %v1087_v16 = vld [vmem:[#allocation2 + $0xa28] sm:$0xff]  ;;  %v1152_v18 = vld [vmem:[#allocation2 + $0xc30] sm:$0xff] }
  0xb5   :  { %1003 = vmatpush.msra.mxu1 %v811_v19  ;;  %971 = vmatpush.msrb.mxu3 %v737_v21  ;;  %v1077_v19 = vld [vmem:[#allocation2 + $0x9d8] sm:$0xff]  ;;  %v1142_v21 = vld [vmem:[#allocation2 + $0xbe0] sm:$0xff] }
  0xb6   :  { %1023 = vmatpush.msrb.mxu2 %v812_v20  ;;  %991 = vmatpush.msrb.mxu0 %v738_v22  ;;  %v1078_v20 = vld [vmem:[#allocation2 + $0x9e0] sm:$0xff]  ;;  %v4541_v22 = vpop.f32.mrf.mxu3 }
  0xb7   :  { %1004 = vmatpush.msra.mxu1 %v802_v23  ;;  %972 = vmatpush.msrb.mxu3 %v728_v25  ;;  %v1143_v23 = vld [vmem:[#allocation2 + $0xbe8] sm:$0xff]  ;;  %v1069_v25 = vld [vmem:[#allocation2 + $0x998] sm:$0xff] }
  0xb8   :  { %1024 = vmatpush.msrb.mxu2 %v803_v24  ;;  %992 = vmatpush.msrb.mxu0 %v729_v26  ;;  %v1068_v24 = vld [vmem:[#allocation2 + $0x990] sm:$0xff]  ;;  %v1133_v26 = vld [vmem:[#allocation2 + $0xb98] sm:$0xff] }
  0xb9   :  { %1005 = vmatpush.msra.mxu1 %v793_v4  ;;  %973 = vmatpush.msrb.mxu3 %v719_v28  ;;  %v1134_v4 = vld [vmem:[#allocation2 + $0xba0] sm:$0xff]  ;;  %v1060_v28 = vld [vmem:[#allocation2 + $0x950] sm:$0xff] }
  0xba   :  { %1025 = vmatpush.msrb.mxu2 %v794_v27  ;;  %993 = vmatpush.msrb.mxu0 %v720_v29  ;;  %v1059_v27 = vld [vmem:[#allocation2 + $0x948] sm:$0xff]  ;;  %v1124_v29 = vld [vmem:[#allocation2 + $0xb50] sm:$0xff] }
  0xbb   :  { %1006 = vmatpush.msra.mxu1 %v784_v30  ;;  %974 = vmatmul.f32.vlgmr.msrb.gmra.mxu3 %v4525_v62  ;;  %v4543_v30 = vpop.f32.mrf.mxu0 }
  0xbc   :  { %994 = vmatmul.f32.vlgmr.msrb.gmra.mxu0 %v4525_v62  ;;  %1026 = vmatpush.msrb.mxu2 %v785_v31  ;;  %v1125_v31 = vld [vmem:[#allocation2 + $0xb58] sm:$0xff] }
  0xbd   :  { %1194 = vmatpush.msra.mxu3 %v1185_v32  ;;  %1214 = vmatpush.msra.mxu0 %v1186_v33  ;;  %v1050_v32 = vld [vmem:[#allocation2 + $0x900] sm:$0xff]  ;;  %v1051_v33 = vld [vmem:[#allocation2 + $0x908] sm:$0xff] }
  0xbe   :  { %1007 = vmatpush.msra.mxu1 %v775_v34  ;;  %1027 = vmatpush.msrb.mxu2 %v776_v35  ;;  %v1115_v34 = vld [vmem:[#allocation2 + $0xb08] sm:$0xff]  ;;  %v4548_v35 = vld [vmem:[%s4884_s0 + $0x10] sm:$0xff] }
  0xbf   :  { %1195 = vmatpush.msra.mxu3 %v1176_v36  ;;  %1215 = vmatpush.msra.mxu0 %v1177_v37  ;;  %v1116_v36 = vld [vmem:[#allocation2 + $0xb10] sm:$0xff]  ;;  %v1189_v37 = vld [vmem:[#allocation2 + $0xd58] sm:$0xff] }
  0xc0   :  { %1008 = vmatpush.msra.mxu1 %v766_v38  ;;  %1028 = vmatpush.msrb.mxu2 %v767_v39  ;;  %v1190_v38 = vld [vmem:[#allocation2 + $0xd60] sm:$0xff] }
  0xc1   :  { %1196 = vmatpush.msra.mxu3 %v1167_v40  ;;  %1216 = vmatpush.msra.mxu0 %v1168_v41  ;;  %v1106_v39 = vld [vmem:[#allocation2 + $0xac0] sm:$0xff]  ;;  %v1107_v40 = vld [vmem:[#allocation2 + $0xac8] sm:$0xff]  ;;  %v1180_v41 = vld [vmem:[#allocation2 + $0xd10] sm:$0xff] }
  0xc2   :  { %1009 = vmatpush.msra.mxu1 %v757_v42  ;;  %1029 = vmatpush.msrb.mxu2 %v758_v43  ;;  %v4552_v42 = vpop.f32.mrf.mxu3  ;;  %v1181_v43 = vld [vmem:[#allocation2 + $0xd18] sm:$0xff] }
  0xc3   :  { %1197 = vmatpush.msra.mxu3 %v1158_v44  ;;  %1217 = vmatpush.msra.mxu0 %v1159_v45  ;;  %v1097_v44 = vld [vmem:[#allocation2 + $0xa78] sm:$0xff]  ;;  %v1098_v45 = vld [vmem:[#allocation2 + $0xa80] sm:$0xff] }
  0xc4   :  { %1010 = vmatpush.msra.mxu1 %v748_v46  ;;  %1030 = vmatpush.msrb.mxu2 %v749_v47  ;;  %v1171_v46 = vld [vmem:[#allocation2 + $0xcc8] sm:$0xff]  ;;  %v1172_v47 = vld [vmem:[#allocation2 + $0xcd0] sm:$0xff] }
  0xc5   :  { %1198 = vmatpush.msra.mxu3 %v1149_v48  ;;  %1218 = vmatpush.msra.mxu0 %v1150_v49  ;;  %v1088_v48 = vld [vmem:[#allocation2 + $0xa30] sm:$0xff]  ;;  %v1089_v49 = vld [vmem:[#allocation2 + $0xa38] sm:$0xff] }
  0xc6   :  { %1011 = vmatpush.msra.mxu1 %v739_v50  ;;  %1031 = vmatpush.msrb.mxu2 %v740_v51  ;;  %v1162_v50 = vld [vmem:[#allocation2 + $0xc80] sm:$0xff] }
  0xc7   :  { %1199 = vmatpush.msra.mxu3 %v1140_v52  ;;  %1219 = vmatpush.msra.mxu0 %v1141_v54  ;;  %v1163_v52 = vld [vmem:[#allocation2 + $0xc88] sm:$0xff] }
  0xc8   :  { %1012 = vmatpush.msra.mxu1 %v730_v56  ;;  %1032 = vmatpush.msrb.mxu2 %v731_v57  ;;  %v1079_v54 = vld [vmem:[#allocation2 + $0x9e8] sm:$0xff]  ;;  %v1080_v56 = vld [vmem:[#allocation2 + $0x9f0] sm:$0xff]  ;;  %v1153_v57 = vld [vmem:[#allocation2 + $0xc38] sm:$0xff] }
  0xc9   :  { %1200 = vmatpush.msra.mxu3 %v1131_v58  ;;  %1220 = vmatpush.msra.mxu0 %v1132_v59  ;;  %v1154_v58 = vld [vmem:[#allocation2 + $0xc40] sm:$0xff] }
  0xca   :  { %1013 = vmatpush.msra.mxu1 %v721_v60  ;;  %1033 = vmatpush.msrb.mxu2 %v722_v61  ;;  %v4554_v51 = vpop.f32.mrf.mxu0  ;;  %v1070_v59 = vld [vmem:[#allocation2 + $0x9a0] sm:$0xff]  ;;  %v1071_v60 = vld [vmem:[#allocation2 + $0x9a8] sm:$0xff]  ;;  %v1144_v61 = vld [vmem:[#allocation2 + $0xbf0] sm:$0xff] }
  0xcb   :  { %1014 = vmatmul.f32.vlgmr.msra.gmra.mxu1 %v4525_v62  ;;  %1201 = vmatpush.msra.mxu3 %v1122_v63  ;;  %v1145_v63 = vld [vmem:[#allocation2 + $0xbf8] sm:$0xff] }
  0xcc   :  { %1221 = vmatpush.msra.mxu0 %v1123_v0  ;;  %1234 = vmatpush.msrb.mxu1 %v1187_v1  ;;  %v1061_v0 = vld [vmem:[#allocation2 + $0x958] sm:$0xff]  ;;  %v1062_v1 = vld [vmem:[#allocation2 + $0x960] sm:$0xff] }
  0xcd   :  { %1034 = vmatmul.f32.vlgmr.msrb.gmra.mxu2 %v4525_v62  ;;  %1202 = vmatpush.msra.mxu3 %v1113_v3  ;;  %v1086_v62 = vld [vmem:[#allocation2 + $0xa20] sm:$0xff]  ;;  %v4556_v3 = vpop.f32.mrf.mxu3 }
  0xce   :  { %1254 = vmatpush.msra.mxu2 %v1188_v2  ;;  %1222 = vmatpush.msra.mxu0 %v1114_v5  ;;  %v1135_v2 = vld [vmem:[#allocation2 + $0xba8] sm:$0xff]  ;;  %v1136_v5 = vld [vmem:[#allocation2 + $0xbb0] sm:$0xff] }
  0xcf   :  { %1235 = vmatpush.msrb.mxu1 %v1178_v6  ;;  %1203 = vmatpush.msra.mxu3 %v1104_v8  ;;  %v1052_v6 = vld [vmem:[#allocation2 + $0x910] sm:$0xff]  ;;  %v1126_v8 = vld [vmem:[#allocation2 + $0xb60] sm:$0xff] }
  0xd0   :  { %1255 = vmatpush.msra.mxu2 %v1179_v7  ;;  %1223 = vmatpush.msra.mxu0 %v1105_v55  ;;  %v1053_v7 = vld [vmem:[#allocation2 + $0x918] sm:$0xff]  ;;  %v1127_v55 = vld [vmem:[#allocation2 + $0xb68] sm:$0xff] }
  0xd1   :  { %1236 = vmatpush.msrb.mxu1 %v1169_v9  ;;  %1204 = vmatpush.msra.mxu3 %v1095_v12  ;;  %v1191_v9 = vld [vmem:[#allocation2 + $0xd68] sm:$0xff]  ;;  %v1192_v12 = vld [vmem:[#allocation2 + $0xd70] sm:$0xff] }
  0xd2   :  { %1256 = vmatpush.msra.mxu2 %v1170_v11  ;;  %1224 = vmatpush.msra.mxu0 %v1096_v13  ;;  %v1117_v13 = vld [vmem:[#allocation2 + $0xb18] sm:$0xff] }
  0xd3   :  { %1237 = vmatpush.msrb.mxu1 %v1160_v14  ;;  %1205 = vmatpush.msra.mxu3 %v1086_v62  ;;  %v4558_v11 = vpop.f32.mrf.mxu0  ;;  %v1118_v14 = vld [vmem:[#allocation2 + $0xb20] sm:$0xff]  ;;  %v4561_v62 = vld [vmem:[#allocation6] sm:$0xff] }
  0xd4   :  { %1257 = vmatpush.msra.mxu2 %v1161_v15  ;;  %1225 = vmatpush.msra.mxu0 %v1087_v16  ;;  %v1182_v15 = vld [vmem:[#allocation2 + $0xd20] sm:$0xff]  ;;  %v1183_v16 = vld [vmem:[#allocation2 + $0xd28] sm:$0xff] }
  0xd5   :  { %1238 = vmatpush.msrb.mxu1 %v1151_v17  ;;  %1206 = vmatpush.msra.mxu3 %v1077_v19  ;;  %v1108_v17 = vld [vmem:[#allocation2 + $0xad0] sm:$0xff]  ;;  %v1109_v19 = vld [vmem:[#allocation2 + $0xad8] sm:$0xff] }
  0xd6   :  { %1258 = vmatpush.msra.mxu2 %v1152_v18  ;;  %1226 = vmatpush.msra.mxu0 %v1078_v20  ;;  %v154_v18 = vperm.slane %v4561_v62, 7  ;;  %v1173_v20 = vld [vmem:[#allocation2 + $0xcd8] sm:$0xff] }
  0xd7   :  { %1239 = vmatpush.msrb.mxu1 %v1142_v21  ;;  %1207 = vmatpush.msra.mxu3 %v1068_v24  ;;  %v1174_v21 = vld [vmem:[#allocation2 + $0xce0] sm:$0xff]  ;;  %v1100_v24 = vld [vmem:[#allocation2 + $0xa90] sm:$0xff] }
  0xd8   :  { %1259 = vmatpush.msra.mxu2 %v1143_v23  ;;  %1227 = vmatpush.msra.mxu0 %v1069_v25  ;;  %v1099_v23 = vld [vmem:[#allocation2 + $0xa88] sm:$0xff]  ;;  %v1164_v25 = vld [vmem:[#allocation2 + $0xc90] sm:$0xff] }
  0xd9   :  { %1240 = vmatpush.msrb.mxu1 %v1133_v26  ;;  %1208 = vmatpush.msra.mxu3 %v1059_v27  ;;  %v354_v26 = vpop.f32.mrf.mxu3  ;;  %v1090_v27 = vld [vmem:[#allocation2 + $0xa40] sm:$0xff] }
  0xda   :  { %1260 = vmatpush.msra.mxu2 %v1134_v4  ;;  %1228 = vmatpush.msra.mxu0 %v1060_v28  ;;  %v1165_v4 = vld [vmem:[#allocation2 + $0xc98] sm:$0xff]  ;;  %v355_v28 = vadd.f32 %v354_v26, %v154_v18  ;;  %v1458_v26 = vld [vmem:[#allocation2 + $0xfc0] sm:$0xff] }
  0xdb   :  { %1241 = vmatpush.msrb.mxu1 %v1124_v29  ;;  %1209 = vmatpush.msra.mxu3 %v1050_v32  ;;  %v1091_v29 = vld [vmem:[#allocation2 + $0xa48] sm:$0xff]  ;;  %v1156_v32 = vld [vmem:[#allocation2 + $0xc50] sm:$0xff]  ;;  %v1065_v18 = vld [vmem:[#allocation2 + $0x978] sm:$0xff] }
  0xdc   :  { %1261 = vmatpush.msra.mxu2 %v1125_v31  ;;  %1229 = vmatpush.msra.mxu0 %v1051_v33  ;;  %v1155_v31 = vld [vmem:[#allocation2 + $0xc48] sm:$0xff]  ;;  %v1081_v33 = vld [vmem:[#allocation2 + $0x9f8] sm:$0xff] }
  0xdd   :  { %1242 = vmatpush.msrb.mxu1 %v1115_v34  ;;  %1210 = vmatmul.f32.vlgmr.msra.gmra.mxu3 %v4548_v35 }
  0xde   :  { %1230 = vmatmul.f32.vlgmr.msra.gmra.mxu0 %v4548_v35  ;;  %1262 = vmatpush.msra.mxu2 %v1116_v36  ;;  %v1082_v36 = vld [vmem:[#allocation2 + $0xa00] sm:$0xff] }
  0xdf   :  { %1274 = vmatpush.msrb.mxu3 %v1189_v37  ;;  %1294 = vmatpush.msrb.mxu0 %v1190_v38  ;;  %v1146_v37 = vld [vmem:[#allocation2 + $0xc00] sm:$0xff] }
  0xe0   :  { %1243 = vmatpush.msrb.mxu1 %v1106_v39  ;;  %1263 = vmatpush.msra.mxu2 %v1107_v40  ;;  %v1147_v39 = vld [vmem:[#allocation2 + $0xc08] sm:$0xff]  ;;  %v1072_v40 = vld [vmem:[#allocation2 + $0x9b0] sm:$0xff] }
  0xe1   :  { %1275 = vmatpush.msrb.mxu3 %v1180_v41  ;;  %1295 = vmatpush.msrb.mxu0 %v1181_v43  ;;  %v1073_v41 = vld [vmem:[#allocation2 + $0x9b8] sm:$0xff] }
  0xe2   :  { %1244 = vmatpush.msrb.mxu1 %v1097_v44  ;;  %1264 = vmatpush.msra.mxu2 %v1098_v45  ;;  %v1137_v43 = vld [vmem:[#allocation2 + $0xbb8] sm:$0xff]  ;;  %v1138_v44 = vld [vmem:[#allocation2 + $0xbc0] sm:$0xff]  ;;  %v1063_v45 = vld [vmem:[#allocation2 + $0x968] sm:$0xff] }
  0xe3   :  { %1276 = vmatpush.msrb.mxu3 %v1171_v46  ;;  %1296 = vmatpush.msrb.mxu0 %v1172_v47  ;;  %v1064_v46 = vld [vmem:[#allocation2 + $0x970] sm:$0xff] }
  0xe4   :  { %1245 = vmatpush.msrb.mxu1 %v1088_v48  ;;  %1265 = vmatpush.msra.mxu2 %v1089_v49  ;;  %v1128_v47 = vld [vmem:[#allocation2 + $0xb70] sm:$0xff]  ;;  %v1129_v48 = vld [vmem:[#allocation2 + $0xb78] sm:$0xff]  ;;  %v1054_v49 = vld [vmem:[#allocation2 + $0x920] sm:$0xff] }
  0xe5   :  { %1277 = vmatpush.msrb.mxu3 %v1162_v50  ;;  %1297 = vmatpush.msrb.mxu0 %v1163_v52  ;;  %v1055_v50 = vld [vmem:[#allocation2 + $0x928] sm:$0xff] }
  0xe6   :  { %1246 = vmatpush.msrb.mxu1 %v1079_v54  ;;  %1266 = vmatpush.msra.mxu2 %v1080_v56  ;;  %v1119_v52 = vld [vmem:[#allocation2 + $0xb28] sm:$0xff]  ;;  %v1120_v54 = vld [vmem:[#allocation2 + $0xb30] sm:$0xff]  ;;  %v1193_v56 = vld [vmem:[#allocation2 + $0xd78] sm:$0xff] }
  0xe7   :  { %1278 = vmatpush.msrb.mxu3 %v1153_v57  ;;  %1298 = vmatpush.msrb.mxu0 %v1154_v58  ;;  %v1521_v57 = vld [vmem:[#allocation2 + $0x11b8] sm:$0xff]  ;;  %v1110_v58 = vld [vmem:[#allocation2 + $0xae0] sm:$0xff] }
  0xe8   :  { %1247 = vmatpush.msrb.mxu1 %v1070_v59  ;;  %1267 = vmatpush.msra.mxu2 %v1071_v60  ;;  %v1111_v59 = vld [vmem:[#allocation2 + $0xae8] sm:$0xff]  ;;  %v1184_v60 = vld [vmem:[#allocation2 + $0xd30] sm:$0xff] }
  0xe9   :  { %1279 = vmatpush.msrb.mxu3 %v1144_v61  ;;  %1299 = vmatpush.msrb.mxu0 %v1145_v63  ;;  %v1512_v61 = vld [vmem:[#allocation2 + $0x1170] sm:$0xff]  ;;  %v1101_v63 = vld [vmem:[#allocation2 + $0xa98] sm:$0xff] }
  0xea   :  { %1248 = vmatpush.msrb.mxu1 %v1061_v0  ;;  %1268 = vmatpush.msra.mxu2 %v1062_v1  ;;  %v1102_v0 = vld [vmem:[#allocation2 + $0xaa0] sm:$0xff]  ;;  %v1175_v1 = vld [vmem:[#allocation2 + $0xce8] sm:$0xff] }
  0xeb   :  { %1280 = vmatpush.msrb.mxu3 %v1135_v2  ;;  %1300 = vmatpush.msrb.mxu0 %v1136_v5  ;;  %v1503_v2 = vld [vmem:[#allocation2 + $0x1128] sm:$0xff]  ;;  %v1092_v5 = vld [vmem:[#allocation2 + $0xa50] sm:$0xff] }
  0xec   :  { %1249 = vmatpush.msrb.mxu1 %v1052_v6  ;;  %1269 = vmatpush.msra.mxu2 %v1053_v7  ;;  %v1093_v6 = vld [vmem:[#allocation2 + $0xa58] sm:$0xff]  ;;  %v1166_v7 = vld [vmem:[#allocation2 + $0xca0] sm:$0xff] }
  0xed   :  { %1250 = vmatmul.f32.vlgmr.msrb.gmra.mxu1 %v4548_v35  ;;  %1281 = vmatpush.msrb.mxu3 %v1126_v8  ;;  %v1494_v8 = vld [vmem:[#allocation2 + $0x10e0] sm:$0xff] }
  0xee   :  { %1301 = vmatpush.msrb.mxu0 %v1127_v55  ;;  %1314 = vmatpush.msra.mxu1 %v1191_v9  ;;  %v1083_v55 = vld [vmem:[#allocation2 + $0xa08] sm:$0xff]  ;;  %v1084_v9 = vld [vmem:[#allocation2 + $0xa10] sm:$0xff] }
  0xef   :  { %1270 = vmatmul.f32.vlgmr.msra.gmra.mxu2 %v4548_v35  ;;  %1282 = vmatpush.msrb.mxu3 %v1117_v13  ;;  %v1485_v13 = vld [vmem:[#allocation2 + $0x1098] sm:$0xff] }
  0xf0   :  { %1334 = vmatpush.msrb.mxu2 %v1192_v12  ;;  %1302 = vmatpush.msrb.mxu0 %v1118_v14  ;;  %v1157_v12 = vld [vmem:[#allocation2 + $0xc58] sm:$0xff]  ;;  %v1074_v14 = vld [vmem:[#allocation2 + $0x9c0] sm:$0xff] }
  0xf1   :  { %1315 = vmatpush.msra.mxu1 %v1182_v15  ;;  %1283 = vmatpush.msrb.mxu3 %v1108_v17  ;;  %v1075_v15 = vld [vmem:[#allocation2 + $0x9c8] sm:$0xff]  ;;  %v1476_v17 = vld [vmem:[#allocation2 + $0x1050] sm:$0xff] }
  0xf2   :  { %1335 = vmatpush.msrb.mxu2 %v1183_v16  ;;  %1303 = vmatpush.msrb.mxu0 %v1109_v19  ;;  %v1148_v16 = vld [vmem:[#allocation2 + $0xc10] sm:$0xff]  ;;  %v1066_v19 = vld [vmem:[#allocation2 + $0x980] sm:$0xff] }
  0xf3   :  { %1316 = vmatpush.msra.mxu1 %v1173_v20  ;;  %1284 = vmatpush.msrb.mxu3 %v1099_v23  ;;  %v1139_v20 = vld [vmem:[#allocation2 + $0xbc8] sm:$0xff]  ;;  %v1056_v23 = vld [vmem:[#allocation2 + $0x930] sm:$0xff] }
  0xf4   :  { %1336 = vmatpush.msrb.mxu2 %v1174_v21  ;;  %1304 = vmatpush.msrb.mxu0 %v1100_v24  ;;  %v1467_v21 = vld [vmem:[#allocation2 + $0x1008] sm:$0xff]  ;;  %v1057_v24 = vld [vmem:[#allocation2 + $0x938] sm:$0xff] }
  0xf5   :  { %1317 = vmatpush.msra.mxu1 %v1164_v25  ;;  %v679_v34 = vpop.f32.mrf.mxu0  ;;  %1285 = vmatpush.msrb.mxu3 %v1090_v27  ;;  %v1130_v25 = vld [vmem:[#allocation2 + $0xb80] sm:$0xff]  ;;  %v1523_v27 = vld [vmem:[#allocation2 + $0x11c8] sm:$0xff] }
  0xf6   :  { %1337 = vmatpush.msrb.mxu2 %v1165_v4  ;;  %v4565_v38 = vadd.f32 %v679_v34, %v355_v28  ;;  %1305 = vmatpush.msrb.mxu0 %v1091_v29  ;;  %v1522_v4 = vld [vmem:[#allocation2 + $0x11c0] sm:$0xff]  ;;  %v1121_v28 = vld [vmem:[#allocation2 + $0xb38] sm:$0xff]  ;;  %v1440_v34 = vld [vmem:[#allocation2 + $0xf30] sm:$0xff] }
  0xf7   :  { %1318 = vmatpush.msra.mxu1 %v1155_v31  ;;  %1286 = vmatpush.msrb.mxu3 %v1081_v33  ;;  %v1449_v29 = vld [vmem:[#allocation2 + $0xf78] sm:$0xff]  ;;  %v1112_v33 = vld [vmem:[#allocation2 + $0xaf0] sm:$0xff] }
  0xf8   :  { %1338 = vmatpush.msrb.mxu2 %v1156_v32  ;;  %1306 = vmatpush.msrb.mxu0 %v1082_v36  ;;  %v1513_v31 = vld [vmem:[#allocation2 + $0x1178] sm:$0xff]  ;;  %v1514_v32 = vld [vmem:[#allocation2 + $0x1180] sm:$0xff]  ;;  %v1504_v36 = vld [vmem:[#allocation2 + $0x1130] sm:$0xff] }
  0xf9   :  { %1319 = vmatpush.msra.mxu1 %v1146_v37  ;;  %1287 = vmatpush.msrb.mxu3 %v1072_v40  ;;  %v1505_v37 = vld [vmem:[#allocation2 + $0x1138] sm:$0xff]  ;;  %v1431_v40 = vld [vmem:[#allocation2 + $0xee8] sm:$0xff] }
  0xfa   :  { %1339 = vmatpush.msrb.mxu2 %v1147_v39  ;;  %1307 = vmatpush.msrb.mxu0 %v1073_v41  ;;  %v1103_v39 = vld [vmem:[#allocation2 + $0xaa8] sm:$0xff] }
  0xfb   :  { %1320 = vmatpush.msra.mxu1 %v1137_v43  ;;  %1288 = vmatpush.msrb.mxu3 %v1063_v45  ;;  %v1495_v41 = vld [vmem:[#allocation2 + $0x10e8] sm:$0xff]  ;;  %v1496_v43 = vld [vmem:[#allocation2 + $0x10f0] sm:$0xff]  ;;  %v1422_v45 = vld [vmem:[#allocation2 + $0xea0] sm:$0xff] }
  0xfc   :  { %1340 = vmatpush.msrb.mxu2 %v1138_v44  ;;  %1308 = vmatpush.msrb.mxu0 %v1064_v46  ;;  %v1094_v44 = vld [vmem:[#allocation2 + $0xa60] sm:$0xff] }
  0xfd   :  { %1321 = vmatpush.msra.mxu1 %v1128_v47  ;;  %1289 = vmatpush.msrb.mxu3 %v1054_v49  ;;  %v1486_v46 = vld [vmem:[#allocation2 + $0x10a0] sm:$0xff]  ;;  %v1487_v47 = vld [vmem:[#allocation2 + $0x10a8] sm:$0xff]  ;;  %v1413_v49 = vld [vmem:[#allocation2 + $0xe58] sm:$0xff] }
  0xfe   :  { %1341 = vmatpush.msrb.mxu2 %v1129_v48  ;;  %1309 = vmatpush.msrb.mxu0 %v1055_v50  ;;  %v1085_v48 = vld [vmem:[#allocation2 + $0xa18] sm:$0xff] }
  0xff   :  { %1322 = vmatpush.msra.mxu1 %v1119_v52  ;;  %1290 = vmatmul.f32.vlgmr.msrb.gmra.mxu3 %v4548_v35  ;;  %v1477_v50 = vld [vmem:[#allocation2 + $0x1058] sm:$0xff]  ;;  %v1478_v52 = vld [vmem:[#allocation2 + $0x1060] sm:$0xff] }
 0x100   :  { %1310 = vmatmul.f32.vlgmr.msrb.gmra.mxu0 %v4548_v35  ;;  %1342 = vmatpush.msrb.mxu2 %v1120_v54  ;;  %v1076_v54 = vld [vmem:[#allocation2 + $0x9d0] sm:$0xff] }
 0x101   :  { %1354 = vmatpush.msra.mxu3 %v1193_v56  ;;  %1530 = vmatpush.msra.mxu0 %v1521_v57  ;;  %v1404_v56 = vld [vmem:[#allocation2 + $0xe10] sm:$0xff] }
 0x102   :  { %1323 = vmatpush.msra.mxu1 %v1110_v58  ;;  %1343 = vmatpush.msrb.mxu2 %v1111_v59  ;;  %v1468_v57 = vld [vmem:[#allocation2 + $0x1010] sm:$0xff]  ;;  %v1469_v58 = vld [vmem:[#allocation2 + $0x1018] sm:$0xff]  ;;  %v1067_v59 = vld [vmem:[#allocation2 + $0x988] sm:$0xff] }
 0x103   :  { %1355 = vmatpush.msra.mxu3 %v1184_v60  ;;  %1531 = vmatpush.msra.mxu0 %v1512_v61  ;;  %v1395_v60 = vld [vmem:[#allocation2 + $0xdc8] sm:$0xff] }
 0x104   :  { %1324 = vmatpush.msra.mxu1 %v1101_v63  ;;  %1344 = vmatpush.msrb.mxu2 %v1102_v0  ;;  %v1459_v61 = vld [vmem:[#allocation2 + $0xfc8] sm:$0xff]  ;;  %v1460_v63 = vld [vmem:[#allocation2 + $0xfd0] sm:$0xff]  ;;  %v1058_v0 = vld [vmem:[#allocation2 + $0x940] sm:$0xff] }
 0x105   :  { %1356 = vmatpush.msra.mxu3 %v1175_v1  ;;  %1532 = vmatpush.msra.mxu0 %v1503_v2  ;;  %v1386_v1 = vld [vmem:[#allocation2 + $0xd80] sm:$0xff] }
 0x106   :  { %1325 = vmatpush.msra.mxu1 %v1092_v5  ;;  %1345 = vmatpush.msrb.mxu2 %v1093_v6  ;;  %v1450_v2 = vld [vmem:[#allocation2 + $0xf80] sm:$0xff]  ;;  %v4574_v5 = vld [vmem:[%s4884_s0 + $0x18] sm:$0xff]  ;;  %v1451_v6 = vld [vmem:[#allocation2 + $0xf88] sm:$0xff] }
 0x107   :  { %1357 = vmatpush.msra.mxu3 %v1166_v7  ;;  %1533 = vmatpush.msra.mxu0 %v1494_v8  ;;  %v1524_v7 = vld [vmem:[#allocation2 + $0x11d0] sm:$0xff]  ;;  %v1525_v8 = vld [vmem:[#allocation2 + $0x11d8] sm:$0xff] }
 0x108   :  { %1326 = vmatpush.msra.mxu1 %v1083_v55  ;;  %1346 = vmatpush.msrb.mxu2 %v1084_v9  ;;  %v1441_v55 = vld [vmem:[#allocation2 + $0xf38] sm:$0xff]  ;;  %v1442_v9 = vld [vmem:[#allocation2 + $0xf40] sm:$0xff] }
 0x109   :  { %1358 = vmatpush.msra.mxu3 %v1157_v12  ;;  %1534 = vmatpush.msra.mxu0 %v1485_v13  ;;  %v1515_v12 = vld [vmem:[#allocation2 + $0x1188] sm:$0xff]  ;;  %v1516_v13 = vld [vmem:[#allocation2 + $0x1190] sm:$0xff] }
 0x10a   :  { %1327 = vmatpush.msra.mxu1 %v1074_v14  ;;  %1347 = vmatpush.msrb.mxu2 %v1075_v15  ;;  %v1432_v14 = vld [vmem:[#allocation2 + $0xef0] sm:$0xff]  ;;  %v1433_v15 = vld [vmem:[#allocation2 + $0xef8] sm:$0xff] }
 0x10b   :  { %1359 = vmatpush.msra.mxu3 %v1148_v16  ;;  %1535 = vmatpush.msra.mxu0 %v1476_v17  ;;  %v1506_v16 = vld [vmem:[#allocation2 + $0x1140] sm:$0xff]  ;;  %v1507_v17 = vld [vmem:[#allocation2 + $0x1148] sm:$0xff] }
 0x10c   :  { %1328 = vmatpush.msra.mxu1 %v1065_v18  ;;  %1348 = vmatpush.msrb.mxu2 %v1066_v19  ;;  %v1423_v18 = vld [vmem:[#allocation2 + $0xea8] sm:$0xff]  ;;  %v4578_v19 = vpop.f32.mrf.mxu2 }
 0x10d   :  { %1360 = vmatpush.msra.mxu3 %v1139_v20  ;;  %1536 = vmatpush.msra.mxu0 %v1467_v21  ;;  %v1497_v20 = vld [vmem:[#allocation2 + $0x10f8] sm:$0xff]  ;;  %v1498_v21 = vld [vmem:[#allocation2 + $0x1100] sm:$0xff] }
 0x10e   :  { %1329 = vmatpush.msra.mxu1 %v1056_v23  ;;  %1349 = vmatpush.msrb.mxu2 %v1057_v24  ;;  %v1414_v23 = vld [vmem:[#allocation2 + $0xe60] sm:$0xff]  ;;  %v4580_v24 = vpop.f32.mrf.mxu1 }
 0x10f   :  { %1330 = vmatmul.f32.vlgmr.msra.gmra.mxu1 %v4548_v35  ;;  %1361 = vmatpush.msra.mxu3 %v1130_v25  ;;  %v1415_v25 = vld [vmem:[#allocation2 + $0xe68] sm:$0xff] }
 0x110   :  { %1537 = vmatpush.msra.mxu0 %v1458_v26  ;;  %1550 = vmatpush.msrb.mxu1 %v1522_v4  ;;  %v1488_v26 = vld [vmem:[#allocation2 + $0x10b0] sm:$0xff]  ;;  %v1489_v4 = vld [vmem:[#allocation2 + $0x10b8] sm:$0xff] }
 0x111   :  { %1350 = vmatmul.f32.vlgmr.msrb.gmra.mxu2 %v4548_v35  ;;  %1362 = vmatpush.msra.mxu3 %v1121_v28  ;;  %v1406_v28 = vld [vmem:[#allocation2 + $0xe20] sm:$0xff] }
 0x112   :  { %1570 = vmatpush.msra.mxu2 %v1523_v27  ;;  %1538 = vmatpush.msra.mxu0 %v1449_v29  ;;  %v1405_v27 = vld [vmem:[#allocation2 + $0xe18] sm:$0xff]  ;;  %v1479_v29 = vld [vmem:[#allocation2 + $0x1068] sm:$0xff] }
 0x113   :  { %1551 = vmatpush.msrb.mxu1 %v1513_v31  ;;  %1363 = vmatpush.msra.mxu3 %v1112_v33  ;;  %v1480_v31 = vld [vmem:[#allocation2 + $0x1070] sm:$0xff]  ;;  %v1397_v33 = vld [vmem:[#allocation2 + $0xdd8] sm:$0xff] }
 0x114   :  { %1571 = vmatpush.msra.mxu2 %v1514_v32  ;;  %1539 = vmatpush.msra.mxu0 %v1440_v34  ;;  %v1396_v32 = vld [vmem:[#allocation2 + $0xdd0] sm:$0xff]  ;;  %v1470_v34 = vld [vmem:[#allocation2 + $0x1020] sm:$0xff] }
 0x115   :  { %1552 = vmatpush.msrb.mxu1 %v1504_v36  ;;  %1364 = vmatpush.msra.mxu3 %v1103_v39  ;;  %v4582_v36 = vpop.f32.mrf.mxu3  ;;  %v1387_v39 = vld [vmem:[#allocation2 + $0xd88] sm:$0xff] }
 0x116   :  { %1572 = vmatpush.msra.mxu2 %v1505_v37  ;;  %1540 = vmatpush.msra.mxu0 %v1431_v40  ;;  %v1471_v37 = vld [vmem:[#allocation2 + $0x1028] sm:$0xff]  ;;  %v1388_v40 = vld [vmem:[#allocation2 + $0xd90] sm:$0xff] }
 0x117   :  { %1553 = vmatpush.msrb.mxu1 %v1495_v41  ;;  %1365 = vmatpush.msra.mxu3 %v1094_v44  ;;  %v1461_v41 = vld [vmem:[#allocation2 + $0xfd8] sm:$0xff]  ;;  %v4584_v44 = vpop.f32.mrf.mxu2 }
 0x118   :  { %1573 = vmatpush.msra.mxu2 %v1496_v43  ;;  %1541 = vmatpush.msra.mxu0 %v1422_v45  ;;  %v1462_v43 = vld [vmem:[#allocation2 + $0xfe0] sm:$0xff]  ;;  %v4586_v45 = vpop.f32.mrf.mxu1 }
 0x119   :  { %1554 = vmatpush.msrb.mxu1 %v1486_v46  ;;  %1366 = vmatpush.msra.mxu3 %v1085_v48  ;;  %v1526_v46 = vld [vmem:[#allocation2 + $0x11e0] sm:$0xff]  ;;  %v1527_v48 = vld [vmem:[#allocation2 + $0x11e8] sm:$0xff] }
 0x11a   :  { %1574 = vmatpush.msra.mxu2 %v1487_v47  ;;  %1542 = vmatpush.msra.mxu0 %v1413_v49  ;;  %v4588_v47 = vpop.f32.mrf.mxu0  ;;  %v1452_v49 = vld [vmem:[#allocation2 + $0xf90] sm:$0xff] }
 0x11b   :  { %1555 = vmatpush.msrb.mxu1 %v1477_v50  ;;  %1367 = vmatpush.msra.mxu3 %v1076_v54  ;;  %v153_v50 = vperm.slane %v4561_v62, 6  ;;  %v1517_v54 = vld [vmem:[#allocation2 + $0x1198] sm:$0xff] }
 0x11c   :  { %1575 = vmatpush.msra.mxu2 %v1478_v52  ;;  %1543 = vmatpush.msra.mxu0 %v1404_v56  ;;  %v1453_v52 = vld [vmem:[#allocation2 + $0xf98] sm:$0xff]  ;;  %v1518_v56 = vld [vmem:[#allocation2 + $0x11a0] sm:$0xff] }
 0x11d   :  { %1556 = vmatpush.msrb.mxu1 %v1468_v57  ;;  %1368 = vmatpush.msra.mxu3 %v1067_v59  ;;  %v1443_v57 = vld [vmem:[#allocation2 + $0xf48] sm:$0xff]  ;;  %v1508_v59 = vld [vmem:[#allocation2 + $0x1150] sm:$0xff] }
 0x11e   :  { %1576 = vmatpush.msra.mxu2 %v1469_v58  ;;  %1544 = vmatpush.msra.mxu0 %v1395_v60  ;;  %v1444_v58 = vld [vmem:[#allocation2 + $0xf50] sm:$0xff]  ;;  %v659_v60 = vpop.f32.mrf.mxu3 }
 0x11f   :  { %1557 = vmatpush.msrb.mxu1 %v1459_v61  ;;  %1369 = vmatpush.msra.mxu3 %v1058_v0  ;;  %v1509_v61 = vld [vmem:[#allocation2 + $0x1158] sm:$0xff]  ;;  %v335_v0 = vadd.f32 %v4578_v19, %v153_v50 }
 0x120   :  { %1577 = vmatpush.msra.mxu2 %v1460_v63  ;;  %1545 = vmatpush.msra.mxu0 %v1386_v1  ;;  %v1434_v63 = vld [vmem:[#allocation2 + $0xf00] sm:$0xff]  ;;  %v1435_v1 = vld [vmem:[#allocation2 + $0xf08] sm:$0xff]  ;;  %v1437_v50 = vld [vmem:[#allocation2 + $0xf18] sm:$0xff] }
 0x121   :  { %1558 = vmatpush.msrb.mxu1 %v1450_v2  ;;  %1370 = vmatmul.f32.vlgmr.msra.gmra.mxu3 %v4548_v35  ;;  %v1424_v35 = vld [vmem:[#allocation2 + $0xeb0] sm:$0xff]  ;;  %v1499_v2 = vld [vmem:[#allocation2 + $0x1108] sm:$0xff] }
 0x122   :  { %1546 = vmatmul.f32.vlgmr.msra.gmra.mxu0 %v4574_v5  ;;  %1578 = vmatpush.msra.mxu2 %v1451_v6  ;;  %v1500_v6 = vld [vmem:[#allocation2 + $0x1110] sm:$0xff] }
 0x123   :  { %1590 = vmatpush.msrb.mxu3 %v1524_v7  ;;  %1610 = vmatpush.msrb.mxu0 %v1525_v8  ;;  %v1425_v7 = vld [vmem:[#allocation2 + $0xeb8] sm:$0xff]  ;;  %v4594_v8 = vpop.f32.mrf.mxu2 }
 0x124   :  { %1559 = vmatpush.msrb.mxu1 %v1441_v55  ;;  %1579 = vmatpush.msra.mxu2 %v1442_v9  ;;  %v708_v55 = vadd.f32 %v659_v60, %v335_v0  ;;  %v4596_v9 = vpop.f32.mrf.mxu1  ;;  %v1418_v0 = vld [vmem:[#allocation2 + $0xe80] sm:$0xff] }
 0x125   :  { %1591 = vmatpush.msrb.mxu3 %v1515_v12  ;;  %1611 = vmatpush.msrb.mxu0 %v1516_v13  ;;  %v1426_v12 = vld [vmem:[#allocation2 + $0xec0] sm:$0xff] }
 0x126   :  { %1560 = vmatpush.msrb.mxu1 %v1432_v14  ;;  %1580 = vmatpush.msra.mxu2 %v1433_v15  ;;  %v1490_v13 = vld [vmem:[#allocation2 + $0x10c0] sm:$0xff]  ;;  %v1491_v14 = vld [vmem:[#allocation2 + $0x10c8] sm:$0xff]  ;;  %v1416_v15 = vld [vmem:[#allocation2 + $0xe70] sm:$0xff] }
 0x127   :  { %1592 = vmatpush.msrb.mxu3 %v1506_v16  ;;  %1612 = vmatpush.msrb.mxu0 %v1507_v17  ;;  %v1417_v17 = vld [vmem:[#allocation2 + $0xe78] sm:$0xff] }
 0x128   :  { %1561 = vmatpush.msrb.mxu1 %v1423_v18  ;;  %1581 = vmatpush.msra.mxu2 %v1424_v35  ;;  %v1481_v18 = vld [vmem:[#allocation2 + $0x1078] sm:$0xff]  ;;  %v1482_v35 = vld [vmem:[#allocation2 + $0x1080] sm:$0xff] }
 0x129   :  { %1593 = vmatpush.msrb.mxu3 %v1497_v20  ;;  %1613 = vmatpush.msrb.mxu0 %v1498_v21  ;;  %v1407_v20 = vld [vmem:[#allocation2 + $0xe28] sm:$0xff]  ;;  %v1408_v21 = vld [vmem:[#allocation2 + $0xe30] sm:$0xff] }
 0x12a   :  { %1562 = vmatpush.msrb.mxu1 %v1414_v23  ;;  %1582 = vmatpush.msra.mxu2 %v1415_v25  ;;  %v1472_v23 = vld [vmem:[#allocation2 + $0x1030] sm:$0xff]  ;;  %v1473_v25 = vld [vmem:[#allocation2 + $0x1038] sm:$0xff] }
 0x12b   :  { %1594 = vmatpush.msrb.mxu3 %v1488_v26  ;;  %1614 = vmatpush.msrb.mxu0 %v1489_v4  ;;  %v1398_v26 = vld [vmem:[#allocation2 + $0xde0] sm:$0xff]  ;;  %v1399_v4 = vld [vmem:[#allocation2 + $0xde8] sm:$0xff] }
 0x12c   :  { %1563 = vmatpush.msrb.mxu1 %v1405_v27  ;;  %1583 = vmatpush.msra.mxu2 %v1406_v28  ;;  %v1463_v27 = vld [vmem:[#allocation2 + $0xfe8] sm:$0xff]  ;;  %v1464_v28 = vld [vmem:[#allocation2 + $0xff0] sm:$0xff] }
 0x12d   :  { %1595 = vmatpush.msrb.mxu3 %v1479_v29  ;;  %1615 = vmatpush.msrb.mxu0 %v1480_v31  ;;  %v1389_v29 = vld [vmem:[#allocation2 + $0xd98] sm:$0xff]  ;;  %v4600_v31 = vpop.f32.mrf.mxu2 }
 0x12e   :  { %1564 = vmatpush.msrb.mxu1 %v1396_v32  ;;  %1584 = vmatpush.msra.mxu2 %v1397_v33  ;;  %v4602_v32 = vpop.f32.mrf.mxu1  ;;  %v1390_v33 = vld [vmem:[#allocation2 + $0xda0] sm:$0xff] }
 0x12f   :  { %1596 = vmatpush.msrb.mxu3 %v1470_v34  ;;  %1616 = vmatpush.msrb.mxu0 %v1471_v37  ;;  %v1454_v34 = vld [vmem:[#allocation2 + $0xfa0] sm:$0xff]  ;;  %v1455_v37 = vld [vmem:[#allocation2 + $0xfa8] sm:$0xff] }
 0x130   :  { %1565 = vmatpush.msrb.mxu1 %v1387_v39  ;;  %1585 = vmatpush.msra.mxu2 %v1388_v40  ;;  %v1528_v39 = vld [vmem:[#allocation2 + $0x11f0] sm:$0xff]  ;;  %v1529_v40 = vld [vmem:[#allocation2 + $0x11f8] sm:$0xff] }
 0x131   :  { %1566 = vmatmul.f32.vlgmr.msrb.gmra.mxu1 %v4574_v5  ;;  %1597 = vmatpush.msrb.mxu3 %v1461_v41  ;;  %v1445_v41 = vld [vmem:[#allocation2 + $0xf58] sm:$0xff] }
 0x132   :  { %1617 = vmatpush.msrb.mxu0 %v1462_v43  ;;  %1630 = vmatpush.msra.mxu1 %v1526_v46  ;;  %v1446_v43 = vld [vmem:[#allocation2 + $0xf60] sm:$0xff]  ;;  %v1519_v46 = vld [vmem:[#allocation2 + $0x11a8] sm:$0xff] }
 0x133   :  { %1586 = vmatmul.f32.vlgmr.msra.gmra.mxu2 %v4574_v5  ;;  %1598 = vmatpush.msrb.mxu3 %v1452_v49  ;;  %v1436_v49 = vld [vmem:[#allocation2 + $0xf10] sm:$0xff] }
 0x134   :  { %1650 = vmatpush.msrb.mxu2 %v1527_v48  ;;  %1618 = vmatpush.msrb.mxu0 %v1453_v52  ;;  %v1520_v48 = vld [vmem:[#allocation2 + $0x11b0] sm:$0xff]  ;;  %v1510_v52 = vld [vmem:[#allocation2 + $0x1160] sm:$0xff] }
 0x135   :  { %1631 = vmatpush.msra.mxu1 %v1517_v54  ;;  %1599 = vmatpush.msrb.mxu3 %v1443_v57  ;;  %v1511_v54 = vld [vmem:[#allocation2 + $0x1168] sm:$0xff]  ;;  %v4606_v57 = vpop.f32.mrf.mxu2 }
 0x136   :  { %1651 = vmatpush.msrb.mxu2 %v1518_v56  ;;  %1619 = vmatpush.msrb.mxu0 %v1444_v58  ;;  %v1427_v56 = vld [vmem:[#allocation2 + $0xec8] sm:$0xff]  ;;  %v1428_v58 = vld [vmem:[#allocation2 + $0xed0] sm:$0xff] }
 0x137   :  { %1632 = vmatpush.msra.mxu1 %v1508_v59  ;;  %1600 = vmatpush.msrb.mxu3 %v1434_v63  ;;  %v1501_v59 = vld [vmem:[#allocation2 + $0x1118] sm:$0xff]  ;;  %v1502_v63 = vld [vmem:[#allocation2 + $0x1120] sm:$0xff] }
 0x138   :  { %1652 = vmatpush.msrb.mxu2 %v1509_v61  ;;  %1620 = vmatpush.msrb.mxu0 %v1435_v1  ;;  %v4214_v61 = vld [vmem:[#allocation6 + $0x8] ss:$0 sm:$0xff] }
 0x139   :  { %1633 = vmatpush.msra.mxu1 %v1499_v2  ;;  %v995_v16 = vpop.f32.mrf.mxu0  ;;  %1601 = vmatpush.msrb.mxu3 %v1425_v7  ;;  %v1419_v2 = vld [vmem:[#allocation2 + $0xe88] sm:$0xff]  ;;  %v1493_v7 = vld [vmem:[#allocation2 + $0x10d8] sm:$0xff] }
 0x13a   :  { %1653 = vmatpush.msrb.mxu2 %v1500_v6  ;;  %v4598_v19 = vadd.f32 %v995_v16, %v708_v55  ;;  %1621 = vmatpush.msrb.mxu0 %v1426_v12  ;;  %v1492_v6 = vld [vmem:[#allocation2 + $0x10d0] sm:$0xff]  ;;  %v1409_v55 = vld [vmem:[#allocation2 + $0xe38] sm:$0xff]  ;;  %v1410_v12 = vld [vmem:[#allocation2 + $0xe40] sm:$0xff] }
 0x13b   :  { %1634 = vmatpush.msra.mxu1 %v1490_v13  ;;  %1602 = vmatpush.msrb.mxu3 %v1416_v15  ;;  %v1483_v13 = vld [vmem:[#allocation2 + $0x1088] sm:$0xff]  ;;  %v1484_v15 = vld [vmem:[#allocation2 + $0x1090] sm:$0xff] }
 0x13c   :  { %1654 = vmatpush.msrb.mxu2 %v1491_v14  ;;  %1622 = vmatpush.msrb.mxu0 %v1417_v17  ;;  %v375_v14 = vadd.f32 %v4214_v61, %v4554_v51  ;;  %v1400_v16 = vld [vmem:[#allocation2 + $0xdf0] sm:$0xff]  ;;  %v1474_v17 = vld [vmem:[#allocation2 + $0x1040] sm:$0xff]  ;;  %v1465_v51 = vld [vmem:[#allocation2 + $0xff8] sm:$0xff] }
 0x13d   :  { %1635 = vmatpush.msra.mxu1 %v1481_v18  ;;  %1603 = vmatpush.msrb.mxu3 %v1407_v20  ;;  %v1391_v20 = vld [vmem:[#allocation2 + $0xda8] sm:$0xff]  ;;  %v1821_v61 = vld [vmem:[#allocation2 + $0x1518] sm:$0xff] }
 0x13e   :  { %1655 = vmatpush.msrb.mxu2 %v1482_v35  ;;  %1623 = vmatpush.msrb.mxu0 %v1408_v21  ;;  %v710_v18 = vadd.f32 %v4596_v9, %v375_v14  ;;  %v1475_v35 = vld [vmem:[#allocation2 + $0x1048] sm:$0xff]  ;;  %v1392_v21 = vld [vmem:[#allocation2 + $0xdb0] sm:$0xff]  ;;  %v1857_v9 = vld [vmem:[#allocation2 + $0x1638] sm:$0xff] }
 0x13f   :  { %1636 = vmatpush.msra.mxu1 %v1472_v23  ;;  %1604 = vmatpush.msrb.mxu3 %v1398_v26  ;;  %v1466_v26 = vld [vmem:[#allocation2 + $0x1000] sm:$0xff] }
 0x140   :  { %1656 = vmatpush.msrb.mxu2 %v1473_v25  ;;  %1624 = vmatpush.msrb.mxu0 %v1399_v4  ;;  %v895_v25 = vpop.f32.mrf.mxu3 }
 0x141   :  { %1637 = vmatpush.msra.mxu1 %v1463_v27  ;;  %1605 = vmatpush.msrb.mxu3 %v1389_v29  ;;  %v148_v27 = vperm.slane %v4561_v62, 1  ;;  %v1456_v29 = vld [vmem:[#allocation2 + $0xfb0] sm:$0xff] }
 0x142   :  { %1657 = vmatpush.msrb.mxu2 %v1464_v28  ;;  %1625 = vmatpush.msrb.mxu0 %v1390_v33  ;;  %v1858_v28 = vld [vmem:[#allocation2 + $0x1640] sm:$0xff]  ;;  %v1457_v33 = vld [vmem:[#allocation2 + $0xfb8] sm:$0xff] }
 0x143   :  { %1638 = vmatpush.msra.mxu1 %v1454_v34  ;;  %1606 = vmatmul.f32.vlgmr.msrb.gmra.mxu3 %v4574_v5  ;;  %v1848_v34 = vld [vmem:[#allocation2 + $0x15f0] sm:$0xff] }
 0x144   :  { %1626 = vmatmul.f32.vlgmr.msrb.gmra.mxu0 %v4574_v5  ;;  %1658 = vmatpush.msrb.mxu2 %v1455_v37  ;;  %v1849_v37 = vld [vmem:[#allocation2 + $0x15f8] sm:$0xff] }
 0x145   :  { %1670 = vmatpush.msra.mxu3 %v1528_v39  ;;  %1690 = vmatpush.msra.mxu0 %v1529_v40  ;;  %v1447_v39 = vld [vmem:[#allocation2 + $0xf68] sm:$0xff]  ;;  %v235_v40 = vadd.f32 %v4541_v22, %v148_v27 }
 0x146   :  { %1639 = vmatpush.msra.mxu1 %v1445_v41  ;;  %1659 = vmatpush.msrb.mxu2 %v1446_v43  ;;  %v1448_v41 = vld [vmem:[#allocation2 + $0xf70] sm:$0xff]  ;;  %v1839_v43 = vld [vmem:[#allocation2 + $0x15a8] sm:$0xff] }
 0x147   :  { %1671 = vmatpush.msra.mxu3 %v1519_v46  ;;  %1691 = vmatpush.msra.mxu0 %v1520_v48  ;;  %v1840_v46 = vld [vmem:[#allocation2 + $0x15b0] sm:$0xff]  ;;  %v1438_v48 = vld [vmem:[#allocation2 + $0xf20] sm:$0xff]  ;;  %v1831_v22 = vld [vmem:[#allocation2 + $0x1568] sm:$0xff] }
 0x148   :  { %1640 = vmatpush.msra.mxu1 %v1436_v49  ;;  %v1015_v60 = vpop.f32.mrf.mxu1  ;;  %1660 = vmatpush.msrb.mxu2 %v1437_v50  ;;  %v147_v49 = vperm.slane %v4561_v62, 0  ;;  %v703_v50 = vadd.f32 %v4584_v44, %v235_v40  ;;  %v1859_v27 = vld [vmem:[#allocation2 + $0x1648] sm:$0xff]  ;;  %v1768_v40 = vld [vmem:[#allocation2 + $0x1370] sm:$0xff] }
 0x149   :  { %1672 = vmatpush.msra.mxu3 %v1510_v52  ;;  %v4609_v1 = vadd.f32 %v1015_v60, %v4565_v38  ;;  %1692 = vmatpush.msra.mxu0 %v1511_v54  ;;  %v1401_v38 = vld [vmem:[#allocation2 + $0xdf8] sm:$0xff]  ;;  %v1439_v52 = vld [vmem:[#allocation2 + $0xf28] sm:$0xff]  ;;  %v1830_v54 = vld [vmem:[#allocation2 + $0x1560] sm:$0xff] }
 0x14a   :  { %1641 = vmatpush.msra.mxu1 %v1427_v56  ;;  %1661 = vmatpush.msrb.mxu2 %v1428_v58  ;;  %v4621_v56 = vpop.f32.mrf.mxu3  ;;  %v1429_v58 = vld [vmem:[#allocation2 + $0xed8] sm:$0xff]  ;;  %v1430_v60 = vld [vmem:[#allocation2 + $0xee0] sm:$0xff] }
 0x14b   :  { %1673 = vmatpush.msra.mxu3 %v1501_v59  ;;  %1693 = vmatpush.msra.mxu0 %v1502_v63  ;;  %v1039_v59 = vadd.f32 %v895_v25, %v703_v50  ;;  %v1822_v63 = vld [vmem:[#allocation2 + $0x1520] sm:$0xff] }
 0x14c   :  { %1642 = vmatpush.msra.mxu1 %v1418_v0  ;;  %1662 = vmatpush.msrb.mxu2 %v1419_v2  ;;  %v1420_v0 = vld [vmem:[#allocation2 + $0xe90] sm:$0xff]  ;;  %v215_v2 = vadd.f32 %v4535_v53, %v147_v49  ;;  %v1402_v53 = vld [vmem:[#allocation2 + $0xe00] sm:$0xff] }
 0x14d   :  { %1674 = vmatpush.msra.mxu3 %v1492_v6  ;;  %1694 = vmatpush.msra.mxu0 %v1493_v7  ;;  %v1421_v6 = vld [vmem:[#allocation2 + $0xe98] sm:$0xff]  ;;  %v1812_v7 = vld [vmem:[#allocation2 + $0x14d0] sm:$0xff]  ;;  %v1394_v25 = vld [vmem:[#allocation2 + $0xdc0] sm:$0xff] }
 0x14e   :  { %1643 = vmatpush.msra.mxu1 %v1409_v55  ;;  %1663 = vmatpush.msrb.mxu2 %v1410_v12  ;;  %v1813_v12 = vld [vmem:[#allocation2 + $0x14d8] sm:$0xff]  ;;  %v702_v14 = vadd.f32 %v4580_v24, %v215_v2  ;;  %v1832_v49 = vld [vmem:[#allocation2 + $0x1570] sm:$0xff]  ;;  %v1815_v2 = vld [vmem:[#allocation2 + $0x14e8] sm:$0xff] }
 0x14f   :  { %1675 = vmatpush.msra.mxu3 %v1483_v13  ;;  %1695 = vmatpush.msra.mxu0 %v1484_v15  ;;  %v1411_v13 = vld [vmem:[#allocation2 + $0xe48] sm:$0xff]  ;;  %v1412_v15 = vld [vmem:[#allocation2 + $0xe50] sm:$0xff]  ;;  %v1393_v24 = vld [vmem:[#allocation2 + $0xdb8] sm:$0xff] }
 0x150   :  { %1644 = vmatpush.msra.mxu1 %v1400_v16  ;;  %v1035_v23 = vpop.f32.mrf.mxu2  ;;  %1664 = vmatpush.msrb.mxu2 %v1401_v38  ;;  %v1803_v16 = vld [vmem:[#allocation2 + $0x1488] sm:$0xff]  ;;  %v1804_v38 = vld [vmem:[#allocation2 + $0x1490] sm:$0xff] }
 0x151   :  { %1676 = vmatpush.msra.mxu3 %v1474_v17  ;;  %v4613_v4 = vadd.f32 %v1035_v23, %v710_v18  ;;  %1696 = vmatpush.msra.mxu0 %v1475_v35  ;;  %v1038_v17 = vadd.f32 %v4600_v31, %v702_v14  ;;  %v1403_v18 = vld [vmem:[#allocation2 + $0xe08] sm:$0xff]  ;;  %v1794_v35 = vld [vmem:[#allocation2 + $0x1440] sm:$0xff] }
 0x152   :  { %1645 = vmatpush.msra.mxu1 %v1391_v20  ;;  %1665 = vmatpush.msrb.mxu2 %v1392_v21  ;;  %v149_v20 = vperm.slane %v4561_v62, 2  ;;  %v1795_v21 = vld [vmem:[#allocation2 + $0x1448] sm:$0xff]  ;;  %v1786_v31 = vld [vmem:[#allocation2 + $0x1400] sm:$0xff]  ;;  %v1860_v62 = vld [vmem:[#allocation2 + $0x1650] sm:$0xff] }
 0x153   :  { %1646 = vmatmul.f32.vlgmr.msra.gmra.mxu1 %v4574_v5  ;;  %1677 = vmatpush.msra.mxu3 %v1465_v51  ;;  %v1785_v51 = vld [vmem:[#allocation2 + $0x13f8] sm:$0xff]  ;;  %v1722_v14 = vld [vmem:[#allocation2 + $0x1200] sm:$0xff] }
 0x154   :  { %1697 = vmatpush.msra.mxu0 %v1466_v26  ;;  %1866 = vmatpush.msrb.mxu1 %v1857_v9  ;;  %v255_v9 = vadd.f32 %v4539_v10, %v149_v20  ;;  %v1841_v10 = vld [vmem:[#allocation2 + $0x15b8] sm:$0xff]  ;;  %v1787_v20 = vld [vmem:[#allocation2 + $0x1408] sm:$0xff] }
 0x155   :  { %1666 = vmatmul.f32.vlgmr.msrb.gmra.mxu2 %v4574_v5  ;;  %1678 = vmatpush.msra.mxu3 %v1456_v29  ;;  %v1777_v29 = vld [vmem:[#allocation2 + $0x13b8] sm:$0xff] }
 0x156   :  { %1886 = vmatpush.msra.mxu2 %v1858_v28  ;;  %1698 = vmatpush.msra.mxu0 %v1457_v33  ;;  %v1776_v28 = vld [vmem:[#allocation2 + $0x13b0] sm:$0xff]  ;;  %v1850_v33 = vld [vmem:[#allocation2 + $0x1600] sm:$0xff] }
 0x157   :  { %1867 = vmatpush.msrb.mxu1 %v1848_v34  ;;  %1679 = vmatpush.msra.mxu3 %v1447_v39  ;;  %v704_v34 = vadd.f32 %v4582_v36, %v255_v9  ;;  %v1767_v39 = vld [vmem:[#allocation2 + $0x1368] sm:$0xff]  ;;  %v1844_v9 = vld [vmem:[#allocation2 + $0x15d0] sm:$0xff] }
 0x158   :  { %1887 = vmatpush.msra.mxu2 %v1849_v37  ;;  %1699 = vmatpush.msra.mxu0 %v1448_v41  ;;  %v1851_v37 = vld [vmem:[#allocation2 + $0x1608] sm:$0xff] }
 0x159   :  { %1868 = vmatpush.msrb.mxu1 %v1839_v43  ;;  %1680 = vmatpush.msra.mxu3 %v1438_v48  ;;  %v4635_v41 = vld [vmem:[#allocation6] sm:$0xff]  ;;  %v1758_v48 = vld [vmem:[#allocation2 + $0x1320] sm:$0xff] }
 0x15a   :  { %1888 = vmatpush.msra.mxu2 %v1840_v46  ;;  %1700 = vmatpush.msra.mxu0 %v1439_v52  ;;  %v150_v43 = vperm.slane %v4635_v41, 3  ;;  %v1040_v46 = vadd.f32 %v4588_v47, %v704_v34  ;;  %v1759_v36 = vld [vmem:[#allocation2 + $0x1328] sm:$0xff]  ;;  %v1833_v52 = vld [vmem:[#allocation2 + $0x1578] sm:$0xff]  ;;  %v1834_v34 = vld [vmem:[#allocation2 + $0x1580] sm:$0xff] }
 0x15b   :  { %1869 = vmatpush.msrb.mxu1 %v1830_v54  ;;  %v1231_v44 = vpop.f32.mrf.mxu0  ;;  %1681 = vmatpush.msra.mxu3 %v1429_v58  ;;  %v1749_v54 = vld [vmem:[#allocation2 + $0x12d8] sm:$0xff]  ;;  %v1750_v58 = vld [vmem:[#allocation2 + $0x12e0] sm:$0xff] }
 0x15c   :  { %1889 = vmatpush.msra.mxu2 %v1831_v22  ;;  %v4624_v55 = vadd.f32 %v1231_v44, %v1039_v59  ;;  %1701 = vmatpush.msra.mxu0 %v1430_v60  ;;  %v1823_v59 = vld [vmem:[#allocation2 + $0x1528] sm:$0xff]  ;;  %v275_v47 = vadd.f32 %v4552_v42, %v150_v43  ;;  %v1824_v60 = vld [vmem:[#allocation2 + $0x1530] sm:$0xff]  ;;  %v1826_v43 = vld [vmem:[#allocation2 + $0x1540] sm:$0xff] }
 0x15d   :  { %1870 = vmatpush.msrb.mxu1 %v1821_v61  ;;  %1682 = vmatpush.msra.mxu3 %v1420_v0  ;;  %v1740_v61 = vld [vmem:[#allocation2 + $0x1290] sm:$0xff]  ;;  %v1814_v0 = vld [vmem:[#allocation2 + $0x14e0] sm:$0xff] }
 0x15e   :  { %1890 = vmatpush.msra.mxu2 %v1822_v63  ;;  %1702 = vmatpush.msra.mxu0 %v1421_v6  ;;  %v1741_v63 = vld [vmem:[#allocation2 + $0x1298] sm:$0xff]  ;;  %v705_v44 = vadd.f32 %v4558_v11, %v275_v47  ;;  %v1731_v6 = vld [vmem:[#allocation2 + $0x1248] sm:$0xff]  ;;  %v4647_v11 = vld [vmem:[%s4884_s0 + $0x20] sm:$0xff] }
 0x15f   :  { %1871 = vmatpush.msrb.mxu1 %v1812_v7  ;;  %1683 = vmatpush.msra.mxu3 %v1411_v13  ;;  %v1732_v7 = vld [vmem:[#allocation2 + $0x1250] sm:$0xff]  ;;  %v1806_v13 = vld [vmem:[#allocation2 + $0x14a0] sm:$0xff] }
 0x160   :  { %1891 = vmatpush.msra.mxu2 %v1813_v12  ;;  %1703 = vmatpush.msra.mxu0 %v1412_v15  ;;  %v1211_v23 = vpop.f32.mrf.mxu3  ;;  %v1805_v12 = vld [vmem:[#allocation2 + $0x1498] sm:$0xff]  ;;  %v1041_v42 = vadd.f32 %v4602_v32, %v705_v44  ;;  %v1723_v15 = vld [vmem:[#allocation2 + $0x1208] sm:$0xff]  ;;  %v152_v32 = vperm.slane %v4635_v41, 5  ;;  %v1734_v47 = vld [vmem:[#allocation2 + $0x1260] sm:$0xff] }
 0x161   :  { %1872 = vmatpush.msrb.mxu1 %v1803_v16  ;;  %1684 = vmatpush.msra.mxu3 %v1402_v53  ;;  %v4629_v26 = vadd.f32 %v1211_v23, %v1038_v17  ;;  %v1797_v53 = vld [vmem:[#allocation2 + $0x1458] sm:$0xff] }
 0x162   :  { %1892 = vmatpush.msra.mxu2 %v1804_v38  ;;  %1704 = vmatpush.msra.mxu0 %v1403_v18  ;;  %v1796_v38 = vld [vmem:[#allocation2 + $0x1450] sm:$0xff]  ;;  %v1861_v18 = vld [vmem:[#allocation2 + $0x1658] sm:$0xff] }
 0x163   :  { %1873 = vmatpush.msrb.mxu1 %v1794_v35  ;;  %1685 = vmatpush.msra.mxu3 %v1393_v24  ;;  %v1862_v35 = vld [vmem:[#allocation2 + $0x1660] sm:$0xff]  ;;  %v1852_v24 = vld [vmem:[#allocation2 + $0x1610] sm:$0xff]  ;;  %v1853_v23 = vld [vmem:[#allocation2 + $0x1618] sm:$0xff] }
 0x164   :  { %1893 = vmatpush.msra.mxu2 %v1795_v21  ;;  %1705 = vmatpush.msra.mxu0 %v1394_v25  ;;  %v1788_v21 = vld [vmem:[#allocation2 + $0x1410] sm:$0xff]  ;;  %v1778_v25 = vld [vmem:[#allocation2 + $0x13c0] sm:$0xff]  ;;  %v1789_v44 = vld [vmem:[#allocation2 + $0x1418] sm:$0xff] }
 0x165   :  { %1874 = vmatpush.msrb.mxu1 %v1785_v51  ;;  %1686 = vmatmul.f32.vlgmr.msra.gmra.mxu3 %v4574_v5  ;;  %v315_v51 = vadd.f32 %v4556_v3, %v152_v32  ;;  %v1760_v3 = vld [vmem:[#allocation2 + $0x1330] sm:$0xff]  ;;  %v1762_v32 = vld [vmem:[#allocation2 + $0x1340] sm:$0xff] }
 0x166   :  { %1706 = vmatmul.f32.vlgmr.msra.gmra.mxu0 %v4574_v5  ;;  %1894 = vmatpush.msra.mxu2 %v1786_v31  ;;  %v1842_v5 = vld [vmem:[#allocation2 + $0x15c0] sm:$0xff]  ;;  %v1779_v31 = vld [vmem:[#allocation2 + $0x13c8] sm:$0xff] }
 0x167   :  { %1906 = vmatpush.msrb.mxu3 %v1859_v27  ;;  %1926 = vmatpush.msrb.mxu0 %v1860_v62  ;;  %v1843_v27 = vld [vmem:[#allocation2 + $0x15c8] sm:$0xff]  ;;  %v1769_v62 = vld [vmem:[#allocation2 + $0x1378] sm:$0xff] }
 0x168   :  { %1875 = vmatpush.msrb.mxu1 %v1776_v28  ;;  %1895 = vmatpush.msra.mxu2 %v1777_v29  ;;  %v151_v28 = vperm.slane %v4635_v41, 4  ;;  %v707_v29 = vadd.f32 %v4594_v8, %v315_v51  ;;  %v1751_v41 = vld [vmem:[#allocation2 + $0x12e8] sm:$0xff] }
 0x169   :  { %1907 = vmatpush.msrb.mxu3 %v1850_v33  ;;  %1927 = vmatpush.msrb.mxu0 %v1851_v37  ;;  %v1770_v33 = vld [vmem:[#allocation2 + $0x1380] sm:$0xff]  ;;  %v1835_v37 = vld [vmem:[#allocation2 + $0x1588] sm:$0xff] }
 0x16a   :  { %1876 = vmatpush.msrb.mxu1 %v1767_v39  ;;  %v1251_v50 = vpop.f32.mrf.mxu1  ;;  %1896 = vmatpush.msra.mxu2 %v1768_v40  ;;  %v1043_v39 = vadd.f32 %v4621_v56, %v707_v29  ;;  %v1761_v40 = vld [vmem:[#allocation2 + $0x1338] sm:$0xff]  ;;  %v295_v8 = vadd.f32 %v4543_v30, %v151_v28  ;;  %v1827_v51 = vld [vmem:[#allocation2 + $0x1548] sm:$0xff] }
 0x16b   :  { %1908 = vmatpush.msrb.mxu3 %v1841_v10  ;;  %v4639_v22 = vadd.f32 %v1251_v50, %v1040_v46  ;;  %1928 = vmatpush.msrb.mxu0 %v1842_v5  ;;  %v1825_v10 = vld [vmem:[#allocation2 + $0x1538] sm:$0xff]  ;;  %v1752_v5 = vld [vmem:[#allocation2 + $0x12f0] sm:$0xff]  ;;  %v1819_v28 = vld [vmem:[#allocation2 + $0x1508] sm:$0xff] }
 0x16c   :  { %1877 = vmatpush.msrb.mxu1 %v1758_v48  ;;  %1897 = vmatpush.msra.mxu2 %v1759_v36  ;;  %v1816_v48 = vld [vmem:[#allocation2 + $0x14f0] sm:$0xff]  ;;  %v1817_v56 = vld [vmem:[#allocation2 + $0x14f8] sm:$0xff]  ;;  %v706_v50 = vadd.f32 %v4586_v45, %v295_v8  ;;  %v1735_v29 = vld [vmem:[#allocation2 + $0x1268] sm:$0xff] }
 0x16d   :  { %1909 = vmatpush.msrb.mxu3 %v1832_v49  ;;  %1929 = vmatpush.msrb.mxu0 %v1833_v52  ;;  %v1742_v49 = vld [vmem:[#allocation2 + $0x12a0] sm:$0xff]  ;;  %v1743_v52 = vld [vmem:[#allocation2 + $0x12a8] sm:$0xff]  ;;  %v1733_v30 = vld [vmem:[#allocation2 + $0x1258] sm:$0xff] }
 0x16e   :  { %1878 = vmatpush.msrb.mxu1 %v1749_v54  ;;  %1898 = vmatpush.msra.mxu2 %v1750_v58  ;;  %v1807_v54 = vld [vmem:[#allocation2 + $0x14a8] sm:$0xff]  ;;  %v1808_v58 = vld [vmem:[#allocation2 + $0x14b0] sm:$0xff]  ;;  %v1725_v45 = vld [vmem:[#allocation2 + $0x1218] sm:$0xff] }
 0x16f   :  { %1910 = vmatpush.msrb.mxu3 %v1823_v59  ;;  %1930 = vmatpush.msrb.mxu0 %v1824_v60  ;;  %v1042_v59 = vadd.f32 %v4606_v57, %v706_v50  ;;  %v1798_v60 = vld [vmem:[#allocation2 + $0x1460] sm:$0xff]  ;;  %v1791_v8 = vld [vmem:[#allocation2 + $0x1428] sm:$0xff] }
 0x170   :  { %1879 = vmatpush.msrb.mxu1 %v1740_v61  ;;  %1899 = vmatpush.msra.mxu2 %v1741_v63  ;;  %v1799_v61 = vld [vmem:[#allocation2 + $0x1468] sm:$0xff]  ;;  %v1724_v63 = vld [vmem:[#allocation2 + $0x1210] sm:$0xff]  ;;  %v1790_v57 = vld [vmem:[#allocation2 + $0x1420] sm:$0xff] }
 0x171   :  { %1911 = vmatpush.msrb.mxu3 %v1814_v0  ;;  %1931 = vmatpush.msrb.mxu0 %v1815_v2  ;;  %v1847_v50 = vld [vmem:[#allocation2 + $0x15e8] sm:$0xff] }
 0x172   :  { %1880 = vmatpush.msrb.mxu1 %v1731_v6  ;;  %v1271_v16 = vpop.f32.mrf.mxu2  ;;  %1900 = vmatpush.msra.mxu2 %v1732_v7  ;;  %v1863_v6 = vld [vmem:[#allocation2 + $0x1668] sm:$0xff]  ;;  %v1864_v7 = vld [vmem:[#allocation2 + $0x1670] sm:$0xff] }
 0x173   :  { %1912 = vmatpush.msrb.mxu3 %v1805_v12  ;;  %v4649_v17 = vadd.f32 %v1271_v16, %v1041_v42  ;;  %1932 = vmatpush.msrb.mxu0 %v1806_v13  ;;  %v1780_v12 = vld [vmem:[#allocation2 + $0x13d0] sm:$0xff]  ;;  %v1781_v42 = vld [vmem:[#allocation2 + $0x13d8] sm:$0xff]  ;;  %v1854_v13 = vld [vmem:[#allocation2 + $0x1620] sm:$0xff] }
 0x174   :  { %1881 = vmatpush.msrb.mxu1 %v1722_v14  ;;  %1901 = vmatpush.msra.mxu2 %v1723_v15  ;;  %v1855_v14 = vld [vmem:[#allocation2 + $0x1628] sm:$0xff]  ;;  %v1772_v16 = vld [vmem:[#allocation2 + $0x1390] sm:$0xff] }
 0x175   :  { %1882 = vmatmul.f32.vlgmr.msrb.gmra.mxu1 %v4647_v11  ;;  %1913 = vmatpush.msrb.mxu3 %v1796_v38  ;;  %v1771_v15 = vld [vmem:[#allocation2 + $0x1388] sm:$0xff]  ;;  %v1845_v38 = vld [vmem:[#allocation2 + $0x15d8] sm:$0xff] }
 0x176   :  { %1933 = vmatpush.msrb.mxu0 %v1797_v53  ;;  %1946 = vmatpush.msra.mxu1 %v1861_v18  ;;  %v1846_v53 = vld [vmem:[#allocation2 + $0x15e0] sm:$0xff]  ;;  %v1763_v18 = vld [vmem:[#allocation2 + $0x1348] sm:$0xff] }
 0x177   :  { %1902 = vmatmul.f32.vlgmr.msra.gmra.mxu2 %v4647_v11  ;;  %1914 = vmatpush.msrb.mxu3 %v1787_v20 }
 0x178   :  { %1966 = vmatpush.msrb.mxu2 %v1862_v35  ;;  %1934 = vmatpush.msrb.mxu0 %v1788_v21  ;;  %v1836_v35 = vld [vmem:[#allocation2 + $0x1590] sm:$0xff]  ;;  %v1837_v21 = vld [vmem:[#allocation2 + $0x1598] sm:$0xff] }
 0x179   :  { %1947 = vmatpush.msra.mxu1 %v1852_v24  ;;  %1915 = vmatpush.msrb.mxu3 %v1778_v25  ;;  %v1753_v24 = vld [vmem:[#allocation2 + $0x12f8] sm:$0xff]  ;;  %v1754_v25 = vld [vmem:[#allocation2 + $0x1300] sm:$0xff] }
 0x17a   :  { %1967 = vmatpush.msrb.mxu2 %v1853_v23  ;;  %1935 = vmatpush.msrb.mxu0 %v1779_v31  ;;  %v1828_v31 = vld [vmem:[#allocation2 + $0x1550] sm:$0xff] }
 0x17b   :  { %1948 = vmatpush.msra.mxu1 %v1843_v27  ;;  %1916 = vmatpush.msrb.mxu3 %v1769_v62  ;;  %v1744_v27 = vld [vmem:[#allocation2 + $0x12b0] sm:$0xff]  ;;  %v1818_v62 = vld [vmem:[#allocation2 + $0x1500] sm:$0xff] }
 0x17c   :  { %1968 = vmatpush.msrb.mxu2 %v1844_v9  ;;  %1936 = vmatpush.msrb.mxu0 %v1770_v33  ;;  %v1745_v9 = vld [vmem:[#allocation2 + $0x12b8] sm:$0xff] }
 0x17d   :  { %1949 = vmatpush.msra.mxu1 %v1834_v34  ;;  %v1311_v46 = vpop.f32.mrf.mxu0  ;;  %1917 = vmatpush.msrb.mxu3 %v1760_v3  ;;  %v1809_v33 = vld [vmem:[#allocation2 + $0x14b8] sm:$0xff]  ;;  %v1810_v34 = vld [vmem:[#allocation2 + $0x14c0] sm:$0xff]  ;;  %v1727_v3 = vld [vmem:[#allocation2 + $0x1228] sm:$0xff] }
 0x17e   :  { %1969 = vmatpush.msrb.mxu2 %v1835_v37  ;;  %v4659_v36 = vadd.f32 %v1311_v46, %v1043_v39  ;;  %1937 = vmatpush.msrb.mxu0 %v1761_v40  ;;  %v1726_v37 = vld [vmem:[#allocation2 + $0x1220] sm:$0xff]  ;;  %v1800_v40 = vld [vmem:[#allocation2 + $0x1470] sm:$0xff]  ;;  %v2193_v46 = vld [vmem:[#allocation2 + $0x1ab8] sm:$0xff] }
 0x17f   :  { %1950 = vmatpush.msra.mxu1 %v1825_v10  ;;  %1918 = vmatpush.msrb.mxu3 %v1751_v41  ;;  %v1801_v10 = vld [vmem:[#allocation2 + $0x1478] sm:$0xff] }
 0x180   :  { %1970 = vmatpush.msrb.mxu2 %v1826_v43  ;;  %1938 = vmatpush.msrb.mxu0 %v1752_v5  ;;  %v1865_v41 = vld [vmem:[#allocation2 + $0x1678] sm:$0xff]  ;;  %v1792_v5 = vld [vmem:[#allocation2 + $0x1430] sm:$0xff] }
 0x181   :  { %1951 = vmatpush.msra.mxu1 %v1816_v48  ;;  %1919 = vmatpush.msrb.mxu3 %v1742_v49  ;;  %v1856_v48 = vld [vmem:[#allocation2 + $0x1630] sm:$0xff]  ;;  %v1782_v49 = vld [vmem:[#allocation2 + $0x13e0] sm:$0xff] }
 0x182   :  { %1971 = vmatpush.msrb.mxu2 %v1817_v56  ;;  %1939 = vmatpush.msrb.mxu0 %v1743_v52  ;;  %v1291_v0 = vpop.f32.mrf.mxu3  ;;  %v2184_v56 = vld [vmem:[#allocation2 + $0x1a70] sm:$0xff]  ;;  %v2175_v52 = vld [vmem:[#allocation2 + $0x1a28] sm:$0xff] }
 0x183   :  { %1952 = vmatpush.msra.mxu1 %v1807_v54  ;;  %1920 = vmatpush.msrb.mxu3 %v1733_v30  ;;  %v4663_v2 = vadd.f32 %v1291_v0, %v1042_v59  ;;  %v1773_v54 = vld [vmem:[#allocation2 + $0x1398] sm:$0xff]  ;;  %v1838_v30 = vld [vmem:[#allocation2 + $0x15a0] sm:$0xff]  ;;  %v1755_v0 = vld [vmem:[#allocation2 + $0x1308] sm:$0xff] }
 0x184   :  { %1972 = vmatpush.msrb.mxu2 %v1808_v58  ;;  %1940 = vmatpush.msrb.mxu0 %v1734_v47  ;;  %v1774_v58 = vld [vmem:[#allocation2 + $0x13a0] sm:$0xff]  ;;  %v1764_v47 = vld [vmem:[#allocation2 + $0x1350] sm:$0xff] }
 0x185   :  { %1953 = vmatpush.msra.mxu1 %v1798_v60  ;;  %1921 = vmatpush.msrb.mxu3 %v1724_v63  ;;  %v2166_v59 = vld [vmem:[#allocation2 + $0x19e0] sm:$0xff]  ;;  %v1765_v60 = vld [vmem:[#allocation2 + $0x1358] sm:$0xff] }
 0x186   :  { %1973 = vmatpush.msrb.mxu2 %v1799_v61  ;;  %1941 = vmatpush.msrb.mxu0 %v1725_v45  ;;  %v1829_v61 = vld [vmem:[#allocation2 + $0x1558] sm:$0xff] }
 0x187   :  { %1954 = vmatpush.msra.mxu1 %v1789_v44  ;;  %1922 = vmatmul.f32.vlgmr.msrb.gmra.mxu3 %v4647_v11  ;;  %v2157_v63 = vld [vmem:[#allocation2 + $0x1998] sm:$0xff]  ;;  %v1756_v44 = vld [vmem:[#allocation2 + $0x1310] sm:$0xff] }
 0x188   :  { %1942 = vmatmul.f32.vlgmr.msrb.gmra.mxu0 %v4647_v11  ;;  %1974 = vmatpush.msrb.mxu2 %v1790_v57  ;;  %v1820_v57 = vld [vmem:[#allocation2 + $0x1510] sm:$0xff] }
 0x189   :  { %1986 = vmatpush.msra.mxu3 %v1863_v6  ;;  %2006 = vmatpush.msra.mxu0 %v1864_v7  ;;  %v2148_v7 = vld [vmem:[#allocation2 + $0x1950] sm:$0xff] }
 0x18a   :  { %1955 = vmatpush.msra.mxu1 %v1780_v12  ;;  %1975 = vmatpush.msrb.mxu2 %v1781_v42  ;;  %v1746_v12 = vld [vmem:[#allocation2 + $0x12c0] sm:$0xff]  ;;  %v1747_v42 = vld [vmem:[#allocation2 + $0x12c8] sm:$0xff] }
 0x18b   :  { %1987 = vmatpush.msra.mxu3 %v1854_v13  ;;  %2007 = vmatpush.msra.mxu0 %v1855_v14  ;;  %v1811_v13 = vld [vmem:[#allocation2 + $0x14c8] sm:$0xff] }
 0x18c   :  { %1956 = vmatpush.msra.mxu1 %v1771_v15  ;;  %v1331_v20 = vpop.f32.mrf.mxu1  ;;  %1976 = vmatpush.msrb.mxu2 %v1772_v16  ;;  %v2139_v14 = vld [vmem:[#allocation2 + $0x1908] sm:$0xff]  ;;  %v1737_v15 = vld [vmem:[#allocation2 + $0x1278] sm:$0xff]  ;;  %v1738_v16 = vld [vmem:[#allocation2 + $0x1280] sm:$0xff] }
 0x18d   :  { %1988 = vmatpush.msra.mxu3 %v1845_v38  ;;  %v4668_v23 = vadd.f32 %v1331_v20, %v4598_v19  ;;  %2008 = vmatpush.msra.mxu0 %v1846_v53  ;;  %v1736_v19 = vld [vmem:[#allocation2 + $0x1270] sm:$0xff]  ;;  %v1802_v38 = vld [vmem:[#allocation2 + $0x1480] sm:$0xff] }
 0x18e   :  { %1957 = vmatpush.msra.mxu1 %v1762_v32  ;;  %1977 = vmatpush.msrb.mxu2 %v1763_v18  ;;  %v1728_v53 = vld [vmem:[#allocation2 + $0x1230] sm:$0xff]  ;;  %v1729_v18 = vld [vmem:[#allocation2 + $0x1238] sm:$0xff] }
 0x18f   :  { %1989 = vmatpush.msra.mxu3 %v1836_v35  ;;  %2009 = vmatpush.msra.mxu0 %v1837_v21  ;;  %v1793_v35 = vld [vmem:[#allocation2 + $0x1438] sm:$0xff] }
 0x190   :  { %1958 = vmatpush.msra.mxu1 %v1753_v24  ;;  %1978 = vmatpush.msrb.mxu2 %v1754_v25  ;;  %v2121_v21 = vld [vmem:[#allocation2 + $0x1878] sm:$0xff]  ;;  %v2194_v24 = vld [vmem:[#allocation2 + $0x1ac0] sm:$0xff]  ;;  %v2195_v25 = vld [vmem:[#allocation2 + $0x1ac8] sm:$0xff] }
 0x191   :  { %1990 = vmatpush.msra.mxu3 %v1827_v51  ;;  %2010 = vmatpush.msra.mxu0 %v1828_v31  ;;  %v1784_v51 = vld [vmem:[#allocation2 + $0x13f0] sm:$0xff] }
 0x192   :  { %1959 = vmatpush.msra.mxu1 %v1744_v27  ;;  %1979 = vmatpush.msrb.mxu2 %v1745_v9  ;;  %v2112_v31 = vld [vmem:[#allocation2 + $0x1830] sm:$0xff]  ;;  %v2185_v27 = vld [vmem:[#allocation2 + $0x1a78] sm:$0xff]  ;;  %v1775_v9 = vld [vmem:[#allocation2 + $0x13a8] sm:$0xff] }
 0x193   :  { %1991 = vmatpush.msra.mxu3 %v1818_v62  ;;  %2011 = vmatpush.msra.mxu0 %v1819_v28  ;;  %v2103_v62 = vld [vmem:[#allocation2 + $0x17e8] sm:$0xff]  ;;  %v2176_v28 = vld [vmem:[#allocation2 + $0x1a30] sm:$0xff] }
 0x194   :  { %1960 = vmatpush.msra.mxu1 %v1735_v29  ;;  %v1351_v39 = vpop.f32.mrf.mxu2  ;;  %1980 = vmatpush.msrb.mxu2 %v1736_v19  ;;  %v2177_v29 = vld [vmem:[#allocation2 + $0x1a38] sm:$0xff]  ;;  %v1766_v19 = vld [vmem:[#allocation2 + $0x1360] sm:$0xff] }
 0x195   :  { %1992 = vmatpush.msra.mxu3 %v1809_v33  ;;  %v4671_v43 = vadd.f32 %v1351_v39, %v4609_v1  ;;  %2012 = vmatpush.msra.mxu0 %v1810_v34  ;;  %v1783_v1 = vld [vmem:[#allocation2 + $0x13e8] sm:$0xff]  ;;  %v2094_v33 = vld [vmem:[#allocation2 + $0x17a0] sm:$0xff]  ;;  %v1757_v39 = vld [vmem:[#allocation2 + $0x1318] sm:$0xff] }
 0x196   :  { %1961 = vmatpush.msra.mxu1 %v1726_v37  ;;  %1981 = vmatpush.msrb.mxu2 %v1727_v3  ;;  %v2167_v34 = vld [vmem:[#allocation2 + $0x19e8] sm:$0xff]  ;;  %v2168_v3 = vld [vmem:[#allocation2 + $0x19f0] sm:$0xff] }
 0x197   :  { %1962 = vmatmul.f32.vlgmr.msra.gmra.mxu1 %v4647_v11  ;;  %1993 = vmatpush.msra.mxu3 %v1800_v40 }
 0x198   :  { %2013 = vmatpush.msra.mxu0 %v1801_v10  ;;  %2026 = vmatpush.msrb.mxu1 %v1865_v41  ;;  %v2085_v10 = vld [vmem:[#allocation2 + $0x1758] sm:$0xff]  ;;  %v2158_v41 = vld [vmem:[#allocation2 + $0x19a0] sm:$0xff] }
 0x199   :  { %1982 = vmatmul.f32.vlgmr.msrb.gmra.mxu2 %v4647_v11  ;;  %1994 = vmatpush.msra.mxu3 %v1791_v8  ;;  %v1748_v8 = vld [vmem:[#allocation2 + $0x12d0] sm:$0xff] }
 0x19a   :  { %2202 = vmatpush.msra.mxu2 %v2193_v46  ;;  %2014 = vmatpush.msra.mxu0 %v1792_v5  ;;  %v2159_v46 = vld [vmem:[#allocation2 + $0x19a8] sm:$0xff]  ;;  %v2076_v5 = vld [vmem:[#allocation2 + $0x1710] sm:$0xff] }
 0x19b   :  { %2027 = vmatpush.msrb.mxu1 %v1856_v48  ;;  %1995 = vmatpush.msra.mxu3 %v1782_v49  ;;  %v2149_v48 = vld [vmem:[#allocation2 + $0x1958] sm:$0xff]  ;;  %v1739_v49 = vld [vmem:[#allocation2 + $0x1288] sm:$0xff] }
 0x19c   :  { %2203 = vmatpush.msra.mxu2 %v2184_v56  ;;  %2015 = vmatpush.msra.mxu0 %v1783_v1  ;;  %v2150_v56 = vld [vmem:[#allocation2 + $0x1960] sm:$0xff]  ;;  %v2140_v1 = vld [vmem:[#allocation2 + $0x1910] sm:$0xff] }
 0x19d   :  { %2028 = vmatpush.msrb.mxu1 %v1847_v50  ;;  %1996 = vmatpush.msra.mxu3 %v1773_v54  ;;  %v2141_v50 = vld [vmem:[#allocation2 + $0x1918] sm:$0xff]  ;;  %v2058_v54 = vld [vmem:[#allocation2 + $0x1680] sm:$0xff] }
 0x19e   :  { %2204 = vmatpush.msra.mxu2 %v2175_v52  ;;  %2016 = vmatpush.msra.mxu0 %v1774_v58  ;;  %v1730_v52 = vld [vmem:[#allocation2 + $0x1240] sm:$0xff] }
 0x19f   :  { %2029 = vmatpush.msrb.mxu1 %v1838_v30  ;;  %v1547_v45 = vpop.f32.mrf.mxu0  ;;  %1997 = vmatpush.msra.mxu3 %v1764_v47  ;;  %v2131_v30 = vld [vmem:[#allocation2 + $0x18c8] sm:$0xff] }
 0x1a0   :  { %2205 = vmatpush.msra.mxu2 %v2166_v59  ;;  %v4676_v6 = vadd.f32 %v1547_v45, %v4629_v26  ;;  %2017 = vmatpush.msra.mxu0 %v1765_v60  ;;  %v2130_v26 = vld [vmem:[#allocation2 + $0x18c0] sm:$0xff]  ;;  %v2132_v59 = vld [vmem:[#allocation2 + $0x18d0] sm:$0xff]  ;;  %v2123_v45 = vld [vmem:[#allocation2 + $0x1888] sm:$0xff] }
 0x1a1   :  { %2030 = vmatpush.msrb.mxu1 %v1829_v61  ;;  %1998 = vmatpush.msra.mxu3 %v1755_v0  ;;  %v2196_v60 = vld [vmem:[#allocation2 + $0x1ad0] sm:$0xff]  ;;  %v4692_v61 = vld [vmem:[%s4884_s0 + $0x28] sm:$0xff]  ;;  %v2122_v0 = vld [vmem:[#allocation2 + $0x1880] sm:$0xff] }
 0x1a2   :  { %2206 = vmatpush.msra.mxu2 %v2157_v63  ;;  %2018 = vmatpush.msra.mxu0 %v1756_v44  ;;  %v2197_v63 = vld [vmem:[#allocation2 + $0x1ad8] sm:$0xff]  ;;  %v2187_v44 = vld [vmem:[#allocation2 + $0x1a88] sm:$0xff] }
 0x1a3   :  { %2031 = vmatpush.msrb.mxu1 %v1820_v57  ;;  %1999 = vmatpush.msra.mxu3 %v1746_v12  ;;  %v2113_v57 = vld [vmem:[#allocation2 + $0x1838] sm:$0xff]  ;;  %v2178_v12 = vld [vmem:[#allocation2 + $0x1a40] sm:$0xff] }
 0x1a4   :  { %2207 = vmatpush.msra.mxu2 %v2148_v7  ;;  %2019 = vmatpush.msra.mxu0 %v1747_v42  ;;  %v1371_v32 = vpop.f32.mrf.mxu3  ;;  %v2114_v7 = vld [vmem:[#allocation2 + $0x1840] sm:$0xff]  ;;  %v2179_v42 = vld [vmem:[#allocation2 + $0x1a48] sm:$0xff] }
 0x1a5   :  { %2032 = vmatpush.msrb.mxu1 %v1811_v13  ;;  %2000 = vmatpush.msra.mxu3 %v1737_v15  ;;  %v4679_v20 = vadd.f32 %v1371_v32, %v4613_v4  ;;  %v2186_v4 = vld [vmem:[#allocation2 + $0x1a80] sm:$0xff]  ;;  %v2105_v13 = vld [vmem:[#allocation2 + $0x17f8] sm:$0xff] }
 0x1a6   :  { %2208 = vmatpush.msra.mxu2 %v2139_v14  ;;  %2020 = vmatpush.msra.mxu0 %v1738_v16  ;;  %v2169_v14 = vld [vmem:[#allocation2 + $0x19f8] sm:$0xff]  ;;  %v2170_v15 = vld [vmem:[#allocation2 + $0x1a00] sm:$0xff]  ;;  %v2095_v16 = vld [vmem:[#allocation2 + $0x17a8] sm:$0xff] }
 0x1a7   :  { %2033 = vmatpush.msrb.mxu1 %v1802_v38  ;;  %2001 = vmatpush.msra.mxu3 %v1728_v53  ;;  %v2096_v38 = vld [vmem:[#allocation2 + $0x17b0] sm:$0xff]  ;;  %v2161_v53 = vld [vmem:[#allocation2 + $0x19b8] sm:$0xff]  ;;  %v2086_v32 = vld [vmem:[#allocation2 + $0x1760] sm:$0xff] }
 0x1a8   :  { %2209 = vmatpush.msra.mxu2 %v2130_v26  ;;  %2021 = vmatpush.msra.mxu0 %v1729_v18  ;;  %v2160_v26 = vld [vmem:[#allocation2 + $0x19b0] sm:$0xff] }
 0x1a9   :  { %2034 = vmatpush.msrb.mxu1 %v1793_v35  ;;  %2002 = vmatmul.f32.vlgmr.msra.gmra.mxu3 %v4647_v11  ;;  %v2087_v35 = vld [vmem:[#allocation2 + $0x1768] sm:$0xff] }
 0x1aa   :  { %2022 = vmatmul.f32.vlgmr.msra.gmra.mxu0 %v4647_v11  ;;  %2210 = vmatpush.msra.mxu2 %v2121_v21  ;;  %v2151_v21 = vld [vmem:[#allocation2 + $0x1968] sm:$0xff] }
 0x1ab   :  { %2222 = vmatpush.msrb.mxu3 %v2194_v24  ;;  %2242 = vmatpush.msrb.mxu0 %v2195_v25  ;;  %v2152_v25 = vld [vmem:[#allocation2 + $0x1970] sm:$0xff] }
 0x1ac   :  { %2035 = vmatpush.msrb.mxu1 %v1784_v51  ;;  %2211 = vmatpush.msra.mxu2 %v2112_v31  ;;  %v2077_v51 = vld [vmem:[#allocation2 + $0x1718] sm:$0xff]  ;;  %v2078_v31 = vld [vmem:[#allocation2 + $0x1720] sm:$0xff] }
 0x1ad   :  { %2223 = vmatpush.msrb.mxu3 %v2185_v27  ;;  %2243 = vmatpush.msrb.mxu0 %v2186_v4  ;;  %v2142_v27 = vld [vmem:[#allocation2 + $0x1920] sm:$0xff]  ;;  %v2143_v4 = vld [vmem:[#allocation2 + $0x1928] sm:$0xff] }
 0x1ae   :  { %2036 = vmatpush.msrb.mxu1 %v1775_v9  ;;  %v1567_v37 = vpop.f32.mrf.mxu1  ;;  %2212 = vmatpush.msra.mxu2 %v2103_v62  ;;  %v2068_v9 = vld [vmem:[#allocation2 + $0x16d0] sm:$0xff]  ;;  %v2069_v62 = vld [vmem:[#allocation2 + $0x16d8] sm:$0xff] }
 0x1af   :  { %2224 = vmatpush.msrb.mxu3 %v2176_v28  ;;  %v4684_v40 = vadd.f32 %v1567_v37, %v4624_v55  ;;  %2244 = vmatpush.msrb.mxu0 %v2177_v29  ;;  %v2067_v55 = vld [vmem:[#allocation2 + $0x16c8] sm:$0xff]  ;;  %v2133_v28 = vld [vmem:[#allocation2 + $0x18d8] sm:$0xff] }
 0x1b0   :  { %2037 = vmatpush.msrb.mxu1 %v1766_v19  ;;  %2213 = vmatpush.msra.mxu2 %v2094_v33  ;;  %v2059_v29 = vld [vmem:[#allocation2 + $0x1688] sm:$0xff]  ;;  %v2060_v33 = vld [vmem:[#allocation2 + $0x1690] sm:$0xff] }
 0x1b1   :  { %2225 = vmatpush.msrb.mxu3 %v2167_v34  ;;  %2245 = vmatpush.msrb.mxu0 %v2168_v3  ;;  %v2124_v34 = vld [vmem:[#allocation2 + $0x1890] sm:$0xff]  ;;  %v2125_v3 = vld [vmem:[#allocation2 + $0x1898] sm:$0xff] }
 0x1b2   :  { %2038 = vmatpush.msrb.mxu1 %v1757_v39  ;;  %2214 = vmatpush.msra.mxu2 %v2085_v10  ;;  %v2198_v39 = vld [vmem:[#allocation2 + $0x1ae0] sm:$0xff]  ;;  %v2199_v10 = vld [vmem:[#allocation2 + $0x1ae8] sm:$0xff] }
 0x1b3   :  { %2226 = vmatpush.msrb.mxu3 %v2158_v41  ;;  %2246 = vmatpush.msrb.mxu0 %v2159_v46  ;;  %v2115_v41 = vld [vmem:[#allocation2 + $0x1848] sm:$0xff]  ;;  %v2116_v46 = vld [vmem:[#allocation2 + $0x1850] sm:$0xff] }
 0x1b4   :  { %2039 = vmatpush.msrb.mxu1 %v1748_v8  ;;  %2215 = vmatpush.msra.mxu2 %v2076_v5  ;;  %v2189_v8 = vld [vmem:[#allocation2 + $0x1a98] sm:$0xff]  ;;  %v2106_v5 = vld [vmem:[#allocation2 + $0x1800] sm:$0xff] }
 0x1b5   :  { %2227 = vmatpush.msrb.mxu3 %v2149_v48  ;;  %2247 = vmatpush.msrb.mxu0 %v2150_v56  ;;  %v2107_v48 = vld [vmem:[#allocation2 + $0x1808] sm:$0xff]  ;;  %v2180_v56 = vld [vmem:[#allocation2 + $0x1a50] sm:$0xff] }
 0x1b6   :  { %2040 = vmatpush.msrb.mxu1 %v1739_v49  ;;  %v1587_v58 = vpop.f32.mrf.mxu2  ;;  %2216 = vmatpush.msra.mxu2 %v2067_v55  ;;  %v2181_v49 = vld [vmem:[#allocation2 + $0x1a58] sm:$0xff] }
 0x1b7   :  { %2228 = vmatpush.msrb.mxu3 %v2140_v1  ;;  %v4687_v47 = vadd.f32 %v1587_v58, %v4639_v22  ;;  %2248 = vmatpush.msrb.mxu0 %v2141_v50  ;;  %v2188_v22 = vld [vmem:[#allocation2 + $0x1a90] sm:$0xff]  ;;  %v2097_v55 = vld [vmem:[#allocation2 + $0x17b8] sm:$0xff]  ;;  %v2098_v1 = vld [vmem:[#allocation2 + $0x17c0] sm:$0xff] }
 0x1b8   :  { %2041 = vmatpush.msrb.mxu1 %v1730_v52  ;;  %2217 = vmatpush.msra.mxu2 %v2058_v54  ;;  %v2171_v50 = vld [vmem:[#allocation2 + $0x1a08] sm:$0xff]  ;;  %v2172_v54 = vld [vmem:[#allocation2 + $0x1a10] sm:$0xff] }
 0x1b9   :  { %2042 = vmatmul.f32.vlgmr.msrb.gmra.mxu1 %v4647_v11  ;;  %2229 = vmatpush.msrb.mxu3 %v2131_v30  ;;  %v2104_v11 = vld [vmem:[#allocation2 + $0x17f0] sm:$0xff] }
 0x1ba   :  { %2249 = vmatpush.msrb.mxu0 %v2132_v59  ;;  %2262 = vmatpush.msra.mxu1 %v2196_v60  ;;  %v2088_v58 = vld [vmem:[#allocation2 + $0x1770] sm:$0xff]  ;;  %v2089_v59 = vld [vmem:[#allocation2 + $0x1778] sm:$0xff]  ;;  %v2162_v60 = vld [vmem:[#allocation2 + $0x19c0] sm:$0xff] }
 0x1bb   :  { %2218 = vmatmul.f32.vlgmr.msra.gmra.mxu2 %v4692_v61  ;;  %2230 = vmatpush.msrb.mxu3 %v2122_v0  ;;  %v2079_v0 = vld [vmem:[#allocation2 + $0x1728] sm:$0xff] }
 0x1bc   :  { %2282 = vmatpush.msrb.mxu2 %v2197_v63  ;;  %2250 = vmatpush.msrb.mxu0 %v2123_v45  ;;  %v2163_v63 = vld [vmem:[#allocation2 + $0x19c8] sm:$0xff]  ;;  %v2080_v45 = vld [vmem:[#allocation2 + $0x1730] sm:$0xff] }
 0x1bd   :  { %2263 = vmatpush.msra.mxu1 %v2187_v44  ;;  %2231 = vmatpush.msrb.mxu3 %v2113_v57  ;;  %v2153_v44 = vld [vmem:[#allocation2 + $0x1978] sm:$0xff]  ;;  %v2070_v57 = vld [vmem:[#allocation2 + $0x16e0] sm:$0xff] }
 0x1be   :  { %2283 = vmatpush.msrb.mxu2 %v2188_v22  ;;  %2251 = vmatpush.msrb.mxu0 %v2114_v7  ;;  %v2154_v22 = vld [vmem:[#allocation2 + $0x1980] sm:$0xff]  ;;  %v2144_v7 = vld [vmem:[#allocation2 + $0x1930] sm:$0xff] }
 0x1bf   :  { %2264 = vmatpush.msra.mxu1 %v2178_v12  ;;  %2232 = vmatpush.msrb.mxu3 %v2104_v11  ;;  %v2145_v12 = vld [vmem:[#allocation2 + $0x1938] sm:$0xff]  ;;  %v2062_v11 = vld [vmem:[#allocation2 + $0x16a0] sm:$0xff] }
 0x1c0   :  { %2284 = vmatpush.msrb.mxu2 %v2179_v42  ;;  %2252 = vmatpush.msrb.mxu0 %v2105_v13  ;;  %v2061_v42 = vld [vmem:[#allocation2 + $0x1698] sm:$0xff] }
 0x1c1   :  { %2265 = vmatpush.msra.mxu1 %v2169_v14  ;;  %v1627_v18 = vpop.f32.mrf.mxu0  ;;  %2233 = vmatpush.msrb.mxu3 %v2095_v16  ;;  %v2135_v14 = vld [vmem:[#allocation2 + $0x18e8] sm:$0xff] }
 0x1c2   :  { %2285 = vmatpush.msrb.mxu2 %v2170_v15  ;;  %v4697_v24 = vadd.f32 %v1627_v18, %v4663_v2  ;;  %2253 = vmatpush.msrb.mxu0 %v2096_v38  ;;  %v2134_v2 = vld [vmem:[#allocation2 + $0x18e0] sm:$0xff]  ;;  %v2136_v15 = vld [vmem:[#allocation2 + $0x18f0] sm:$0xff]  ;;  %v2191_v18 = vld [vmem:[#allocation2 + $0x1aa8] sm:$0xff] }
 0x1c3   :  { %2266 = vmatpush.msra.mxu1 %v2160_v26  ;;  %2234 = vmatpush.msrb.mxu3 %v2086_v32  ;;  %v2200_v38 = vld [vmem:[#allocation2 + $0x1af0] sm:$0xff]  ;;  %v2201_v26 = vld [vmem:[#allocation2 + $0x1af8] sm:$0xff]  ;;  %v2127_v32 = vld [vmem:[#allocation2 + $0x18a8] sm:$0xff] }
 0x1c4   :  { %2286 = vmatpush.msrb.mxu2 %v2161_v53  ;;  %2254 = vmatpush.msrb.mxu0 %v2087_v35  ;;  %v2126_v53 = vld [vmem:[#allocation2 + $0x18a0] sm:$0xff]  ;;  %v2192_v35 = vld [vmem:[#allocation2 + $0x1ab0] sm:$0xff] }
 0x1c5   :  { %2267 = vmatpush.msra.mxu1 %v2151_v21  ;;  %2235 = vmatpush.msrb.mxu3 %v2077_v51  ;;  %v2117_v21 = vld [vmem:[#allocation2 + $0x1858] sm:$0xff]  ;;  %v2183_v51 = vld [vmem:[#allocation2 + $0x1a68] sm:$0xff] }
 0x1c6   :  { %2287 = vmatpush.msrb.mxu2 %v2152_v25  ;;  %2255 = vmatpush.msrb.mxu0 %v2078_v31  ;;  %v1607_v19 = vpop.f32.mrf.mxu3  ;;  %v2182_v25 = vld [vmem:[#allocation2 + $0x1a60] sm:$0xff]  ;;  %v2108_v31 = vld [vmem:[#allocation2 + $0x1810] sm:$0xff] }
 0x1c7   :  { %2268 = vmatpush.msra.mxu1 %v2142_v27  ;;  %2236 = vmatpush.msrb.mxu3 %v2068_v9  ;;  %v4700_v37 = vadd.f32 %v1607_v19, %v4649_v17  ;;  %v2190_v17 = vld [vmem:[#allocation2 + $0x1aa0] sm:$0xff]  ;;  %v2109_v27 = vld [vmem:[#allocation2 + $0x1818] sm:$0xff] }
 0x1c8   :  { %2288 = vmatpush.msrb.mxu2 %v2143_v4  ;;  %2256 = vmatpush.msrb.mxu0 %v2069_v62  ;;  %v2173_v4 = vld [vmem:[#allocation2 + $0x1a18] sm:$0xff]  ;;  %v2174_v9 = vld [vmem:[#allocation2 + $0x1a20] sm:$0xff]  ;;  %v2099_v62 = vld [vmem:[#allocation2 + $0x17c8] sm:$0xff] }
 0x1c9   :  { %2269 = vmatpush.msra.mxu1 %v2133_v28  ;;  %2237 = vmatpush.msrb.mxu3 %v2059_v29  ;;  %v2100_v28 = vld [vmem:[#allocation2 + $0x17d0] sm:$0xff]  ;;  %v2165_v29 = vld [vmem:[#allocation2 + $0x19d8] sm:$0xff]  ;;  %v2090_v19 = vld [vmem:[#allocation2 + $0x1780] sm:$0xff] }
 0x1ca   :  { %2289 = vmatpush.msrb.mxu2 %v2134_v2  ;;  %2257 = vmatpush.msrb.mxu0 %v2060_v33  ;;  %v2164_v2 = vld [vmem:[#allocation2 + $0x19d0] sm:$0xff] }
 0x1cb   :  { %2270 = vmatpush.msra.mxu1 %v2124_v34  ;;  %2238 = vmatmul.f32.vlgmr.msrb.gmra.mxu3 %v4692_v61  ;;  %v2091_v34 = vld [vmem:[#allocation2 + $0x1788] sm:$0xff] }
 0x1cc   :  { %2258 = vmatmul.f32.vlgmr.msrb.gmra.mxu0 %v4692_v61  ;;  %2290 = vmatpush.msrb.mxu2 %v2125_v3  ;;  %v2155_v3 = vld [vmem:[#allocation2 + $0x1988] sm:$0xff] }
 0x1cd   :  { %2302 = vmatpush.msra.mxu3 %v2198_v39  ;;  %2322 = vmatpush.msra.mxu0 %v2199_v10  ;;  %v2156_v10 = vld [vmem:[#allocation2 + $0x1990] sm:$0xff] }
 0x1ce   :  { %2271 = vmatpush.msra.mxu1 %v2115_v41  ;;  %2291 = vmatpush.msrb.mxu2 %v2116_v46  ;;  %v2081_v41 = vld [vmem:[#allocation2 + $0x1738] sm:$0xff]  ;;  %v2082_v46 = vld [vmem:[#allocation2 + $0x1740] sm:$0xff] }
 0x1cf   :  { %2303 = vmatpush.msra.mxu3 %v2189_v8  ;;  %2323 = vmatpush.msra.mxu0 %v2190_v17  ;;  %v2146_v8 = vld [vmem:[#allocation2 + $0x1940] sm:$0xff]  ;;  %v2147_v17 = vld [vmem:[#allocation2 + $0x1948] sm:$0xff] }
 0x1d0   :  { %2272 = vmatpush.msra.mxu1 %v2106_v5  ;;  %v1647_v52 = vpop.f32.mrf.mxu1  ;;  %2292 = vmatpush.msrb.mxu2 %v2107_v48  ;;  %v2072_v5 = vld [vmem:[#allocation2 + $0x16f0] sm:$0xff]  ;;  %v2073_v48 = vld [vmem:[#allocation2 + $0x16f8] sm:$0xff] }
 0x1d1   :  { %2304 = vmatpush.msra.mxu3 %v2180_v56  ;;  %v4705_v30 = vadd.f32 %v1647_v52, %v4659_v36  ;;  %2324 = vmatpush.msra.mxu0 %v2181_v49  ;;  %v2071_v36 = vld [vmem:[#allocation2 + $0x16e8] sm:$0xff]  ;;  %v2137_v56 = vld [vmem:[#allocation2 + $0x18f8] sm:$0xff] }
 0x1d2   :  { %2273 = vmatpush.msra.mxu1 %v2097_v55  ;;  %2293 = vmatpush.msrb.mxu2 %v2098_v1  ;;  %v2063_v49 = vld [vmem:[#allocation2 + $0x16a8] sm:$0xff]  ;;  %v2064_v1 = vld [vmem:[#allocation2 + $0x16b0] sm:$0xff] }
 0x1d3   :  { %2305 = vmatpush.msra.mxu3 %v2171_v50  ;;  %2325 = vmatpush.msra.mxu0 %v2172_v54  ;;  %v2128_v50 = vld [vmem:[#allocation2 + $0x18b0] sm:$0xff]  ;;  %v2129_v54 = vld [vmem:[#allocation2 + $0x18b8] sm:$0xff] }
 0x1d4   :  { %2274 = vmatpush.msra.mxu1 %v2088_v58  ;;  %2294 = vmatpush.msrb.mxu2 %v2089_v59  ;;  %v2529_v58 = vld [vmem:[#allocation2 + $0x1f38] sm:$0xff]  ;;  %v2530_v59 = vld [vmem:[#allocation2 + $0x1f40] sm:$0xff] }
 0x1d5   :  { %2306 = vmatpush.msra.mxu3 %v2162_v60  ;;  %2326 = vmatpush.msra.mxu0 %v2163_v63  ;;  %v2119_v60 = vld [vmem:[#allocation2 + $0x1868] sm:$0xff]  ;;  %v2120_v63 = vld [vmem:[#allocation2 + $0x1870] sm:$0xff] }
 0x1d6   :  { %2275 = vmatpush.msra.mxu1 %v2079_v0  ;;  %2295 = vmatpush.msrb.mxu2 %v2080_v45  ;;  %v2520_v0 = vld [vmem:[#allocation2 + $0x1ef0] sm:$0xff]  ;;  %v2110_v45 = vld [vmem:[#allocation2 + $0x1820] sm:$0xff] }
 0x1d7   :  { %2307 = vmatpush.msra.mxu3 %v2153_v44  ;;  %2327 = vmatpush.msra.mxu0 %v2154_v22  ;;  %v2111_v44 = vld [vmem:[#allocation2 + $0x1828] sm:$0xff] }
 0x1d8   :  { %2276 = vmatpush.msra.mxu1 %v2070_v57  ;;  %v1667_v13 = vpop.f32.mrf.mxu2  ;;  %2296 = vmatpush.msrb.mxu2 %v2071_v36  ;;  %v2511_v22 = vld [vmem:[#allocation2 + $0x1ea8] sm:$0xff]  ;;  %v2512_v57 = vld [vmem:[#allocation2 + $0x1eb0] sm:$0xff]  ;;  %v2101_v36 = vld [vmem:[#allocation2 + $0x17d8] sm:$0xff] }
 0x1d9   :  { %2308 = vmatpush.msra.mxu3 %v2144_v7  ;;  %v4708_v16 = vadd.f32 %v1667_v13, %v4668_v23  ;;  %2328 = vmatpush.msra.mxu0 %v2145_v12  ;;  %v2118_v23 = vld [vmem:[#allocation2 + $0x1860] sm:$0xff]  ;;  %v2093_v13 = vld [vmem:[#allocation2 + $0x1798] sm:$0xff] }
 0x1da   :  { %2277 = vmatpush.msra.mxu1 %v2061_v42  ;;  %2297 = vmatpush.msrb.mxu2 %v2062_v11  ;;  %v2102_v7 = vld [vmem:[#allocation2 + $0x17e0] sm:$0xff]  ;;  %v2503_v42 = vld [vmem:[#allocation2 + $0x1e68] sm:$0xff]  ;;  %v2092_v11 = vld [vmem:[#allocation2 + $0x1790] sm:$0xff] }
 0x1db   :  { %2278 = vmatmul.f32.vlgmr.msra.gmra.mxu1 %v4692_v61  ;;  %2309 = vmatpush.msra.mxu3 %v2135_v14  ;;  %v2502_v12 = vld [vmem:[#allocation2 + $0x1e60] sm:$0xff]  ;;  %v2493_v14 = vld [vmem:[#allocation2 + $0x1e18] sm:$0xff] }
 0x1dc   :  { %2329 = vmatpush.msra.mxu0 %v2136_v15  ;;  %2342 = vmatpush.msrb.mxu1 %v2200_v38  ;;  %v2494_v15 = vld [vmem:[#allocation2 + $0x1e20] sm:$0xff]  ;;  %v2083_v38 = vld [vmem:[#allocation2 + $0x1748] sm:$0xff] }
 0x1dd   :  { %2298 = vmatmul.f32.vlgmr.msrb.gmra.mxu2 %v4692_v61  ;;  %2310 = vmatpush.msra.mxu3 %v2126_v53  ;;  %v2484_v53 = vld [vmem:[#allocation2 + $0x1dd0] sm:$0xff] }
 0x1de   :  { %2362 = vmatpush.msra.mxu2 %v2201_v26  ;;  %2330 = vmatpush.msra.mxu0 %v2127_v32  ;;  %v2084_v26 = vld [vmem:[#allocation2 + $0x1750] sm:$0xff]  ;;  %v2485_v32 = vld [vmem:[#allocation2 + $0x1dd8] sm:$0xff] }
 0x1df   :  { %2343 = vmatpush.msrb.mxu1 %v2191_v18  ;;  %2311 = vmatpush.msra.mxu3 %v2117_v21  ;;  %v2074_v18 = vld [vmem:[#allocation2 + $0x1700] sm:$0xff]  ;;  %v2475_v21 = vld [vmem:[#allocation2 + $0x1d88] sm:$0xff] }
 0x1e0   :  { %2363 = vmatpush.msra.mxu2 %v2192_v35  ;;  %2331 = vmatpush.msra.mxu0 %v2118_v23  ;;  %v2075_v35 = vld [vmem:[#allocation2 + $0x1708] sm:$0xff]  ;;  %v2476_v23 = vld [vmem:[#allocation2 + $0x1d90] sm:$0xff] }
 0x1e1   :  { %2344 = vmatpush.msrb.mxu1 %v2182_v25  ;;  %2312 = vmatpush.msra.mxu3 %v2108_v31  ;;  %v2065_v25 = vld [vmem:[#allocation2 + $0x16b8] sm:$0xff]  ;;  %v2466_v31 = vld [vmem:[#allocation2 + $0x1d40] sm:$0xff] }
 0x1e2   :  { %2364 = vmatpush.msra.mxu2 %v2183_v51  ;;  %2332 = vmatpush.msra.mxu0 %v2109_v27  ;;  %v2066_v51 = vld [vmem:[#allocation2 + $0x16c0] sm:$0xff]  ;;  %v2467_v27 = vld [vmem:[#allocation2 + $0x1d48] sm:$0xff] }
 0x1e3   :  { %2345 = vmatpush.msrb.mxu1 %v2173_v4  ;;  %v1707_v33 = vpop.f32.mrf.mxu0  ;;  %2313 = vmatpush.msra.mxu3 %v2099_v62  ;;  %v2531_v4 = vld [vmem:[#allocation2 + $0x1f48] sm:$0xff]  ;;  %v2457_v62 = vld [vmem:[#allocation2 + $0x1cf8] sm:$0xff] }
 0x1e4   :  { %2365 = vmatpush.msra.mxu2 %v2174_v9  ;;  %v4713_v39 = vadd.f32 %v1707_v33, %v4679_v20  ;;  %2333 = vmatpush.msra.mxu0 %v2100_v28  ;;  %v2138_v20 = vld [vmem:[#allocation2 + $0x1900] sm:$0xff]  ;;  %v2532_v9 = vld [vmem:[#allocation2 + $0x1f50] sm:$0xff]  ;;  %v2449_v33 = vld [vmem:[#allocation2 + $0x1cb8] sm:$0xff] }
 0x1e5   :  { %2346 = vmatpush.msrb.mxu1 %v2164_v2  ;;  %2314 = vmatpush.msra.mxu3 %v2090_v19  ;;  %v2458_v28 = vld [vmem:[#allocation2 + $0x1d00] sm:$0xff]  ;;  %v2448_v19 = vld [vmem:[#allocation2 + $0x1cb0] sm:$0xff] }
 0x1e6   :  { %2366 = vmatpush.msra.mxu2 %v2165_v29  ;;  %2334 = vmatpush.msra.mxu0 %v2091_v34  ;;  %v2522_v2 = vld [vmem:[#allocation2 + $0x1f00] sm:$0xff]  ;;  %v2523_v29 = vld [vmem:[#allocation2 + $0x1f08] sm:$0xff]  ;;  %v2513_v34 = vld [vmem:[#allocation2 + $0x1eb8] sm:$0xff] }
 0x1e7   :  { %2347 = vmatpush.msrb.mxu1 %v2155_v3  ;;  %2315 = vmatpush.msra.mxu3 %v2081_v41  ;;  %v2514_v3 = vld [vmem:[#allocation2 + $0x1ec0] sm:$0xff]  ;;  %v2440_v41 = vld [vmem:[#allocation2 + $0x1c70] sm:$0xff] }
 0x1e8   :  { %2367 = vmatpush.msra.mxu2 %v2156_v10  ;;  %2335 = vmatpush.msra.mxu0 %v2082_v46  ;;  %v1687_v55 = vpop.f32.mrf.mxu3  ;;  %v2439_v10 = vld [vmem:[#allocation2 + $0x1c68] sm:$0xff]  ;;  %v2504_v46 = vld [vmem:[#allocation2 + $0x1e70] sm:$0xff] }
 0x1e9   :  { %2348 = vmatpush.msrb.mxu1 %v2146_v8  ;;  %2316 = vmatpush.msra.mxu3 %v2072_v5  ;;  %v4716_v52 = vadd.f32 %v1687_v55, %v4671_v43  ;;  %v2521_v43 = vld [vmem:[#allocation2 + $0x1ef8] sm:$0xff]  ;;  %v2495_v5 = vld [vmem:[#allocation2 + $0x1e28] sm:$0xff]  ;;  %v2486_v55 = vld [vmem:[#allocation2 + $0x1de0] sm:$0xff] }
 0x1ea   :  { %2368 = vmatpush.msra.mxu2 %v2147_v17  ;;  %2336 = vmatpush.msra.mxu0 %v2073_v48  ;;  %v2505_v8 = vld [vmem:[#allocation2 + $0x1e78] sm:$0xff]  ;;  %v2430_v17 = vld [vmem:[#allocation2 + $0x1c20] sm:$0xff]  ;;  %v2496_v48 = vld [vmem:[#allocation2 + $0x1e30] sm:$0xff] }
 0x1eb   :  { %2349 = vmatpush.msrb.mxu1 %v2137_v56  ;;  %2317 = vmatpush.msra.mxu3 %v2063_v49  ;;  %v2421_v56 = vld [vmem:[#allocation2 + $0x1bd8] sm:$0xff]  ;;  %v2422_v49 = vld [vmem:[#allocation2 + $0x1be0] sm:$0xff] }
 0x1ec   :  { %2369 = vmatpush.msra.mxu2 %v2138_v20  ;;  %2337 = vmatpush.msra.mxu0 %v2064_v1 }
 0x1ed   :  { %2350 = vmatpush.msrb.mxu1 %v2128_v50  ;;  %2318 = vmatmul.f32.vlgmr.msra.gmra.mxu3 %v4692_v61  ;;  %v2487_v50 = vld [vmem:[#allocation2 + $0x1de8] sm:$0xff] }
 0x1ee   :  { %2338 = vmatmul.f32.vlgmr.msra.gmra.mxu0 %v4692_v61  ;;  %2370 = vmatpush.msra.mxu2 %v2129_v54  ;;  %v2412_v54 = vld [vmem:[#allocation2 + $0x1b90] sm:$0xff] }
 0x1ef   :  { %2538 = vmatpush.msrb.mxu3 %v2529_v58  ;;  %2558 = vmatpush.msrb.mxu0 %v2530_v59  ;;  %v2413_v58 = vld [vmem:[#allocation2 + $0x1b98] sm:$0xff] }
 0x1f0   :  { %2351 = vmatpush.msrb.mxu1 %v2119_v60  ;;  %2371 = vmatpush.msra.mxu2 %v2120_v63  ;;  %v2477_v59 = vld [vmem:[#allocation2 + $0x1d98] sm:$0xff]  ;;  %v2478_v60 = vld [vmem:[#allocation2 + $0x1da0] sm:$0xff]  ;;  %v2403_v63 = vld [vmem:[#allocation2 + $0x1b48] sm:$0xff] }
 0x1f1   :  { %2539 = vmatpush.msrb.mxu3 %v2520_v0  ;;  %2559 = vmatpush.msrb.mxu0 %v2521_v43  ;;  %v2404_v0 = vld [vmem:[#allocation2 + $0x1b50] sm:$0xff] }
 0x1f2   :  { %2352 = vmatpush.msrb.mxu1 %v2110_v45  ;;  %2372 = vmatpush.msra.mxu2 %v2111_v44  ;;  %v2468_v43 = vld [vmem:[#allocation2 + $0x1d50] sm:$0xff]  ;;  %v2394_v45 = vld [vmem:[#allocation2 + $0x1b00] sm:$0xff]  ;;  %v2395_v44 = vld [vmem:[#allocation2 + $0x1b08] sm:$0xff] }
 0x1f3   :  { %2540 = vmatpush.msrb.mxu3 %v2511_v22  ;;  %2560 = vmatpush.msrb.mxu0 %v2512_v57  ;;  %v2459_v22 = vld [vmem:[#allocation2 + $0x1d08] sm:$0xff]  ;;  %v4728_v57 = vld [vmem:[%s4884_s0 + $0x30] sm:$0xff] }
 0x1f4   :  { %2353 = vmatpush.msrb.mxu1 %v2101_v36  ;;  %2373 = vmatpush.msra.mxu2 %v2102_v7  ;;  %v2460_v36 = vld [vmem:[#allocation2 + $0x1d10] sm:$0xff]  ;;  %v2533_v7 = vld [vmem:[#allocation2 + $0x1f58] sm:$0xff] }
 0x1f5   :  { %2541 = vmatpush.msrb.mxu3 %v2502_v12  ;;  %2561 = vmatpush.msrb.mxu0 %v2503_v42  ;;  %v2534_v12 = vld [vmem:[#allocation2 + $0x1f60] sm:$0xff] }
 0x1f6   :  { %2354 = vmatpush.msrb.mxu1 %v2092_v11  ;;  %2374 = vmatpush.msra.mxu2 %v2093_v13  ;;  %v2450_v42 = vld [vmem:[#allocation2 + $0x1cc0] sm:$0xff]  ;;  %v2451_v11 = vld [vmem:[#allocation2 + $0x1cc8] sm:$0xff]  ;;  %v2524_v13 = vld [vmem:[#allocation2 + $0x1f10] sm:$0xff] }
 0x1f7   :  { %2542 = vmatpush.msrb.mxu3 %v2493_v14  ;;  %2562 = vmatpush.msrb.mxu0 %v2494_v15  ;;  %v2525_v14 = vld [vmem:[#allocation2 + $0x1f18] sm:$0xff] }
 0x1f8   :  { %2355 = vmatpush.msrb.mxu1 %v2083_v38  ;;  %2375 = vmatpush.msra.mxu2 %v2084_v26  ;;  %v2441_v15 = vld [vmem:[#allocation2 + $0x1c78] sm:$0xff]  ;;  %v2442_v38 = vld [vmem:[#allocation2 + $0x1c80] sm:$0xff]  ;;  %v2515_v26 = vld [vmem:[#allocation2 + $0x1ec8] sm:$0xff] }
 0x1f9   :  { %2543 = vmatpush.msrb.mxu3 %v2484_v53  ;;  %2563 = vmatpush.msrb.mxu0 %v2485_v32  ;;  %v2516_v53 = vld [vmem:[#allocation2 + $0x1ed0] sm:$0xff] }
 0x1fa   :  { %2356 = vmatpush.msrb.mxu1 %v2074_v18  ;;  %2376 = vmatpush.msra.mxu2 %v2075_v35  ;;  %v2432_v32 = vld [vmem:[#allocation2 + $0x1c30] sm:$0xff]  ;;  %v4732_v18 = vpop.f32.mrf.mxu2  ;;  %v2433_v35 = vld [vmem:[#allocation2 + $0x1c38] sm:$0xff] }
 0x1fb   :  { %2544 = vmatpush.msrb.mxu3 %v2475_v21  ;;  %2564 = vmatpush.msrb.mxu0 %v2476_v23  ;;  %v2506_v21 = vld [vmem:[#allocation2 + $0x1e80] sm:$0xff]  ;;  %v2507_v23 = vld [vmem:[#allocation2 + $0x1e88] sm:$0xff] }
 0x1fc   :  { %2357 = vmatpush.msrb.mxu1 %v2065_v25  ;;  %2377 = vmatpush.msra.mxu2 %v2066_v51  ;;  %v2423_v25 = vld [vmem:[#allocation2 + $0x1be8] sm:$0xff]  ;;  %v2424_v51 = vld [vmem:[#allocation2 + $0x1bf0] sm:$0xff] }
 0x1fd   :  { %2358 = vmatmul.f32.vlgmr.msrb.gmra.mxu1 %v4692_v61  ;;  %2545 = vmatpush.msrb.mxu3 %v2466_v31  ;;  %v2497_v31 = vld [vmem:[#allocation2 + $0x1e38] sm:$0xff] }
 0x1fe   :  { %2565 = vmatpush.msrb.mxu0 %v2467_v27  ;;  %2578 = vmatpush.msra.mxu1 %v2531_v4  ;;  %v2498_v27 = vld [vmem:[#allocation2 + $0x1e40] sm:$0xff] }
 0x1ff   :  { %2378 = vmatmul.f32.vlgmr.msra.gmra.mxu2 %v4692_v61  ;;  %2546 = vmatpush.msrb.mxu3 %v2457_v62  ;;  %v2431_v61 = vld [vmem:[#allocation2 + $0x1c28] sm:$0xff]  ;;  %v2414_v4 = vld [vmem:[#allocation2 + $0x1ba0] sm:$0xff]  ;;  %v2488_v62 = vld [vmem:[#allocation2 + $0x1df0] sm:$0xff] }
 0x200   :  { %2598 = vmatpush.msrb.mxu2 %v2532_v9  ;;  %2566 = vmatpush.msrb.mxu0 %v2458_v28  ;;  %v2415_v9 = vld [vmem:[#allocation2 + $0x1ba8] sm:$0xff]  ;;  %v2489_v28 = vld [vmem:[#allocation2 + $0x1df8] sm:$0xff] }
 0x201   :  { %2579 = vmatpush.msra.mxu1 %v2522_v2  ;;  %2547 = vmatpush.msrb.mxu3 %v2448_v19  ;;  %v2405_v2 = vld [vmem:[#allocation2 + $0x1b58] sm:$0xff]  ;;  %v2479_v19 = vld [vmem:[#allocation2 + $0x1da8] sm:$0xff] }
 0x202   :  { %2599 = vmatpush.msrb.mxu2 %v2523_v29  ;;  %2567 = vmatpush.msrb.mxu0 %v2449_v33  ;;  %v2406_v29 = vld [vmem:[#allocation2 + $0x1b60] sm:$0xff]  ;;  %v2480_v33 = vld [vmem:[#allocation2 + $0x1db0] sm:$0xff] }
 0x203   :  { %2580 = vmatpush.msra.mxu1 %v2513_v34  ;;  %2548 = vmatpush.msrb.mxu3 %v2439_v10  ;;  %v2396_v34 = vld [vmem:[#allocation2 + $0x1b10] sm:$0xff] }
 0x204   :  { %2600 = vmatpush.msrb.mxu2 %v2514_v3  ;;  %2568 = vmatpush.msrb.mxu0 %v2440_v41  ;;  %v2397_v3 = vld [vmem:[#allocation2 + $0x1b18] sm:$0xff]  ;;  %v2470_v41 = vld [vmem:[#allocation2 + $0x1d60] sm:$0xff] }
 0x205   :  { %2581 = vmatpush.msra.mxu1 %v2504_v46  ;;  %v1943_v20 = vpop.f32.mrf.mxu0  ;;  %2549 = vmatpush.msrb.mxu3 %v2430_v17  ;;  %v2471_v46 = vld [vmem:[#allocation2 + $0x1d68] sm:$0xff] }
 0x206   :  { %2601 = vmatpush.msrb.mxu2 %v2505_v8  ;;  %v4723_v1 = vadd.f32 %v1943_v20, %v4700_v37  ;;  %2569 = vmatpush.msrb.mxu0 %v2431_v61  ;;  %v2469_v37 = vld [vmem:[#allocation2 + $0x1d58] sm:$0xff]  ;;  %v2535_v17 = vld [vmem:[#allocation2 + $0x1f68] sm:$0xff]  ;;  %v2536_v61 = vld [vmem:[#allocation2 + $0x1f70] sm:$0xff] }
 0x207   :  { %2582 = vmatpush.msra.mxu1 %v2495_v5  ;;  %2550 = vmatpush.msrb.mxu3 %v2421_v56  ;;  %v2461_v5 = vld [vmem:[#allocation2 + $0x1d18] sm:$0xff]  ;;  %v2526_v56 = vld [vmem:[#allocation2 + $0x1f20] sm:$0xff]  ;;  %v2527_v20 = vld [vmem:[#allocation2 + $0x1f28] sm:$0xff] }
 0x208   :  { %2602 = vmatpush.msrb.mxu2 %v2496_v48  ;;  %2570 = vmatpush.msrb.mxu0 %v2422_v49  ;;  %v2462_v48 = vld [vmem:[#allocation2 + $0x1d20] sm:$0xff]  ;;  %v2452_v49 = vld [vmem:[#allocation2 + $0x1cd0] sm:$0xff] }
 0x209   :  { %2583 = vmatpush.msra.mxu1 %v2486_v55  ;;  %2551 = vmatpush.msrb.mxu3 %v2412_v54  ;;  %v2517_v55 = vld [vmem:[#allocation2 + $0x1ed8] sm:$0xff]  ;;  %v2443_v54 = vld [vmem:[#allocation2 + $0x1c88] sm:$0xff] }
 0x20a   :  { %2603 = vmatpush.msrb.mxu2 %v2487_v50  ;;  %2571 = vmatpush.msrb.mxu0 %v2413_v58  ;;  %v2518_v50 = vld [vmem:[#allocation2 + $0x1ee0] sm:$0xff]  ;;  %v2444_v58 = vld [vmem:[#allocation2 + $0x1c90] sm:$0xff] }
 0x20b   :  { %2584 = vmatpush.msra.mxu1 %v2477_v59  ;;  %2552 = vmatpush.msrb.mxu3 %v2403_v63  ;;  %v2508_v59 = vld [vmem:[#allocation2 + $0x1e90] sm:$0xff]  ;;  %v2509_v63 = vld [vmem:[#allocation2 + $0x1e98] sm:$0xff] }
 0x20c   :  { %2604 = vmatpush.msrb.mxu2 %v2478_v60  ;;  %2572 = vmatpush.msrb.mxu0 %v2404_v0  ;;  %v4739_v60 = vpop.f32.mrf.mxu3  ;;  %v2434_v0 = vld [vmem:[#allocation2 + $0x1c40] sm:$0xff] }
 0x20d   :  { %2585 = vmatpush.msra.mxu1 %v2468_v43  ;;  %2553 = vmatpush.msrb.mxu3 %v2394_v45  ;;  %v4741_v43 = vpop.f32.mrf.mxu1  ;;  %v2499_v45 = vld [vmem:[#allocation2 + $0x1e48] sm:$0xff] }
 0x20e   :  { %2605 = vmatpush.msrb.mxu2 %v2469_v37  ;;  %2573 = vmatpush.msrb.mxu0 %v2395_v44  ;;  %v2435_v37 = vld [vmem:[#allocation2 + $0x1c48] sm:$0xff]  ;;  %v2500_v44 = vld [vmem:[#allocation2 + $0x1e50] sm:$0xff] }
 0x20f   :  { %2586 = vmatpush.msra.mxu1 %v2459_v22  ;;  %2554 = vmatmul.f32.vlgmr.msrb.gmra.mxu3 %v4728_v57  ;;  %v2425_v22 = vld [vmem:[#allocation2 + $0x1bf8] sm:$0xff] }
 0x210   :  { %2574 = vmatmul.f32.vlgmr.msrb.gmra.mxu0 %v4728_v57  ;;  %2606 = vmatpush.msrb.mxu2 %v2460_v36 }
 0x211   :  { %2618 = vmatpush.msra.mxu3 %v2533_v7  ;;  %2638 = vmatpush.msra.mxu0 %v2534_v12  ;;  %v2426_v7 = vld [vmem:[#allocation2 + $0x1c00] sm:$0xff] }
 0x212   :  { %2587 = vmatpush.msra.mxu1 %v2450_v42  ;;  %2607 = vmatpush.msrb.mxu2 %v2451_v11  ;;  %v2490_v12 = vld [vmem:[#allocation2 + $0x1e00] sm:$0xff]  ;;  %v2491_v11 = vld [vmem:[#allocation2 + $0x1e08] sm:$0xff] }
 0x213   :  { %2619 = vmatpush.msra.mxu3 %v2524_v13  ;;  %2639 = vmatpush.msra.mxu0 %v2525_v14  ;;  %v2416_v13 = vld [vmem:[#allocation2 + $0x1bb0] sm:$0xff]  ;;  %v2417_v14 = vld [vmem:[#allocation2 + $0x1bb8] sm:$0xff] }
 0x214   :  { %2588 = vmatpush.msra.mxu1 %v2441_v15  ;;  %2608 = vmatpush.msrb.mxu2 %v2442_v38  ;;  %v2481_v15 = vld [vmem:[#allocation2 + $0x1db8] sm:$0xff]  ;;  %v2482_v38 = vld [vmem:[#allocation2 + $0x1dc0] sm:$0xff] }
 0x215   :  { %2620 = vmatpush.msra.mxu3 %v2515_v26  ;;  %2640 = vmatpush.msra.mxu0 %v2516_v53  ;;  %v2407_v26 = vld [vmem:[#allocation2 + $0x1b68] sm:$0xff]  ;;  %v2408_v53 = vld [vmem:[#allocation2 + $0x1b70] sm:$0xff] }
 0x216   :  { %2589 = vmatpush.msra.mxu1 %v2432_v32  ;;  %2609 = vmatpush.msrb.mxu2 %v2433_v35  ;;  %v2472_v32 = vld [vmem:[#allocation2 + $0x1d70] sm:$0xff]  ;;  %v2398_v35 = vld [vmem:[#allocation2 + $0x1b20] sm:$0xff] }
 0x217   :  { %2621 = vmatpush.msra.mxu3 %v2506_v21  ;;  %2641 = vmatpush.msra.mxu0 %v2507_v23  ;;  %v4746_v23 = vpop.f32.mrf.mxu1 }
 0x218   :  { %2590 = vmatpush.msra.mxu1 %v2423_v25  ;;  %2610 = vmatpush.msrb.mxu2 %v2424_v51  ;;  %v2399_v25 = vld [vmem:[#allocation2 + $0x1b28] sm:$0xff] }
 0x219   :  { %2622 = vmatpush.msra.mxu3 %v2497_v31  ;;  %2642 = vmatpush.msra.mxu0 %v2498_v27  ;;  %v2463_v51 = vld [vmem:[#allocation2 + $0x1d28] sm:$0xff]  ;;  %v2464_v27 = vld [vmem:[#allocation2 + $0x1d30] sm:$0xff] }
 0x21a   :  { %2591 = vmatpush.msra.mxu1 %v2414_v4  ;;  %2611 = vmatpush.msrb.mxu2 %v2415_v9  ;;  %v2537_v4 = vld [vmem:[#allocation2 + $0x1f78] sm:$0xff] }
 0x21b   :  { %2623 = vmatpush.msra.mxu3 %v2488_v62  ;;  %2643 = vmatpush.msra.mxu0 %v2489_v28  ;;  %v2865_v9 = vld [vmem:[#allocation2 + $0x23b8] sm:$0xff]  ;;  %v2454_v62 = vld [vmem:[#allocation2 + $0x1ce0] sm:$0xff]  ;;  %v2455_v28 = vld [vmem:[#allocation2 + $0x1ce8] sm:$0xff] }
 0x21c   :  { %2592 = vmatpush.msra.mxu1 %v2405_v2  ;;  %v1983_v10 = vpop.f32.mrf.mxu2  ;;  %2612 = vmatpush.msrb.mxu2 %v2406_v29  ;;  %v2528_v2 = vld [vmem:[#allocation2 + $0x1f30] sm:$0xff]  ;;  %v2445_v29 = vld [vmem:[#allocation2 + $0x1c98] sm:$0xff] }
 0x21d   :  { %2624 = vmatpush.msra.mxu3 %v2479_v19  ;;  %v4735_v8 = vadd.f32 %v1983_v10, %v4705_v30  ;;  %2644 = vmatpush.msra.mxu0 %v2480_v33  ;;  %v2453_v30 = vld [vmem:[#allocation2 + $0x1cd8] sm:$0xff]  ;;  %v2446_v19 = vld [vmem:[#allocation2 + $0x1ca0] sm:$0xff]  ;;  %v2519_v33 = vld [vmem:[#allocation2 + $0x1ee8] sm:$0xff] }
 0x21e   :  { %2593 = vmatpush.msra.mxu1 %v2396_v34  ;;  %2613 = vmatpush.msrb.mxu2 %v2397_v3  ;;  %v2847_v34 = vld [vmem:[#allocation2 + $0x2328] sm:$0xff]  ;;  %v2436_v3 = vld [vmem:[#allocation2 + $0x1c50] sm:$0xff]  ;;  %v2437_v10 = vld [vmem:[#allocation2 + $0x1c58] sm:$0xff] }
 0x21f   :  { %2594 = vmatmul.f32.vlgmr.msra.gmra.mxu1 %v4728_v57  ;;  %2625 = vmatpush.msra.mxu3 %v2470_v41  ;;  %v2510_v41 = vld [vmem:[#allocation2 + $0x1ea0] sm:$0xff] }
 0x220   :  { %2645 = vmatpush.msra.mxu0 %v2471_v46  ;;  %2658 = vmatpush.msrb.mxu1 %v2535_v17  ;;  %v2838_v17 = vld [vmem:[#allocation2 + $0x22e0] sm:$0xff] }
 0x221   :  { %2614 = vmatmul.f32.vlgmr.msrb.gmra.mxu2 %v4728_v57  ;;  %2626 = vmatpush.msra.mxu3 %v2461_v5 }
 0x222   :  { %2678 = vmatpush.msra.mxu2 %v2536_v61  ;;  %2646 = vmatpush.msra.mxu0 %v2462_v48  ;;  %v2427_v61 = vld [vmem:[#allocation2 + $0x1c08] sm:$0xff]  ;;  %v2428_v48 = vld [vmem:[#allocation2 + $0x1c10] sm:$0xff] }
 0x223   :  { %2659 = vmatpush.msrb.mxu1 %v2526_v56  ;;  %2627 = vmatpush.msra.mxu3 %v2452_v49  ;;  %v2501_v56 = vld [vmem:[#allocation2 + $0x1e58] sm:$0xff]  ;;  %v2418_v49 = vld [vmem:[#allocation2 + $0x1bc0] sm:$0xff] }
 0x224   :  { %2679 = vmatpush.msra.mxu2 %v2527_v20  ;;  %2647 = vmatpush.msra.mxu0 %v2453_v30  ;;  %v2829_v20 = vld [vmem:[#allocation2 + $0x2298] sm:$0xff]  ;;  %v2419_v30 = vld [vmem:[#allocation2 + $0x1bc8] sm:$0xff] }
 0x225   :  { %2660 = vmatpush.msrb.mxu1 %v2517_v55  ;;  %2628 = vmatpush.msra.mxu3 %v2443_v54  ;;  %v2492_v55 = vld [vmem:[#allocation2 + $0x1e10] sm:$0xff]  ;;  %v2409_v54 = vld [vmem:[#allocation2 + $0x1b78] sm:$0xff] }
 0x226   :  { %2680 = vmatpush.msra.mxu2 %v2518_v50  ;;  %2648 = vmatpush.msra.mxu0 %v2444_v58  ;;  %v2820_v50 = vld [vmem:[#allocation2 + $0x2250] sm:$0xff]  ;;  %v2483_v58 = vld [vmem:[#allocation2 + $0x1dc8] sm:$0xff] }
 0x227   :  { %2661 = vmatpush.msrb.mxu1 %v2508_v59  ;;  %v2023_v36 = vpop.f32.mrf.mxu0  ;;  %2629 = vmatpush.msra.mxu3 %v2434_v0  ;;  %v2811_v59 = vld [vmem:[#allocation2 + $0x2208] sm:$0xff]  ;;  %v2401_v0 = vld [vmem:[#allocation2 + $0x1b38] sm:$0xff] }
 0x228   :  { %2681 = vmatpush.msra.mxu2 %v2509_v63  ;;  %v4744_v42 = vadd.f32 %v2023_v36, %v4716_v52  ;;  %2649 = vmatpush.msra.mxu0 %v2435_v37  ;;  %v2473_v52 = vld [vmem:[#allocation2 + $0x1d78] sm:$0xff]  ;;  %v2400_v63 = vld [vmem:[#allocation2 + $0x1b30] sm:$0xff]  ;;  %v2474_v37 = vld [vmem:[#allocation2 + $0x1d80] sm:$0xff] }
 0x229   :  { %2662 = vmatpush.msrb.mxu1 %v2499_v45  ;;  %2630 = vmatpush.msra.mxu3 %v2425_v22  ;;  %v2802_v45 = vld [vmem:[#allocation2 + $0x21c0] sm:$0xff]  ;;  %v2867_v22 = vld [vmem:[#allocation2 + $0x23c8] sm:$0xff]  ;;  %v2465_v36 = vld [vmem:[#allocation2 + $0x1d38] sm:$0xff] }
 0x22a   :  { %2682 = vmatpush.msra.mxu2 %v2500_v44  ;;  %2650 = vmatpush.msra.mxu0 %v2426_v7  ;;  %v2866_v44 = vld [vmem:[#allocation2 + $0x23c0] sm:$0xff]  ;;  %v2793_v7 = vld [vmem:[#allocation2 + $0x2178] sm:$0xff] }
 0x22b   :  { %2663 = vmatpush.msrb.mxu1 %v2490_v12  ;;  %2631 = vmatpush.msra.mxu3 %v2416_v13  ;;  %v2857_v12 = vld [vmem:[#allocation2 + $0x2378] sm:$0xff]  ;;  %v2456_v13 = vld [vmem:[#allocation2 + $0x1cf0] sm:$0xff] }
 0x22c   :  { %2683 = vmatpush.msra.mxu2 %v2491_v11  ;;  %2651 = vmatpush.msra.mxu0 %v2417_v14  ;;  %v2003_v21 = vpop.f32.mrf.mxu3  ;;  %v2858_v11 = vld [vmem:[#allocation2 + $0x2380] sm:$0xff]  ;;  %v2784_v14 = vld [vmem:[#allocation2 + $0x2130] sm:$0xff] }
 0x22d   :  { %2664 = vmatpush.msrb.mxu1 %v2481_v15  ;;  %2632 = vmatpush.msra.mxu3 %v2407_v26  ;;  %v4749_v31 = vadd.f32 %v2003_v21, %v4708_v16  ;;  %v2856_v16 = vld [vmem:[#allocation2 + $0x2370] sm:$0xff]  ;;  %v2447_v26 = vld [vmem:[#allocation2 + $0x1ca8] sm:$0xff]  ;;  %v2766_v21 = vld [vmem:[#allocation2 + $0x20a0] sm:$0xff] }
 0x22e   :  { %2684 = vmatpush.msra.mxu2 %v2482_v38  ;;  %2652 = vmatpush.msra.mxu0 %v2408_v53  ;;  %v2848_v15 = vld [vmem:[#allocation2 + $0x2330] sm:$0xff]  ;;  %v2849_v38 = vld [vmem:[#allocation2 + $0x2338] sm:$0xff]  ;;  %v2775_v53 = vld [vmem:[#allocation2 + $0x20e8] sm:$0xff] }
 0x22f   :  { %2665 = vmatpush.msrb.mxu1 %v2472_v32  ;;  %2633 = vmatpush.msra.mxu3 %v2398_v35  ;;  %v2839_v32 = vld [vmem:[#allocation2 + $0x22e8] sm:$0xff]  ;;  %v2438_v35 = vld [vmem:[#allocation2 + $0x1c60] sm:$0xff] }
 0x230   :  { %2685 = vmatpush.msra.mxu2 %v2473_v52  ;;  %2653 = vmatpush.msra.mxu0 %v2399_v25  ;;  %v2840_v52 = vld [vmem:[#allocation2 + $0x22f0] sm:$0xff]  ;;  %v2830_v25 = vld [vmem:[#allocation2 + $0x22a0] sm:$0xff] }
 0x231   :  { %2666 = vmatpush.msrb.mxu1 %v2463_v51  ;;  %2634 = vmatmul.f32.vlgmr.msra.gmra.mxu3 %v4728_v57  ;;  %v2831_v51 = vld [vmem:[#allocation2 + $0x22a8] sm:$0xff] }
 0x232   :  { %2654 = vmatmul.f32.vlgmr.msra.gmra.mxu0 %v4728_v57  ;;  %2686 = vmatpush.msra.mxu2 %v2464_v27  ;;  %v2429_v27 = vld [vmem:[#allocation2 + $0x1c18] sm:$0xff] }
 0x233   :  { %2698 = vmatpush.msrb.mxu3 %v2537_v4  ;;  %2874 = vmatpush.msrb.mxu0 %v2865_v9  ;;  %v2757_v4 = vld [vmem:[#allocation2 + $0x2058] sm:$0xff] }
 0x234   :  { %2667 = vmatpush.msrb.mxu1 %v2454_v62  ;;  %2687 = vmatpush.msra.mxu2 %v2455_v28  ;;  %v2821_v9 = vld [vmem:[#allocation2 + $0x2258] sm:$0xff]  ;;  %v2822_v62 = vld [vmem:[#allocation2 + $0x2260] sm:$0xff]  ;;  %v2420_v28 = vld [vmem:[#allocation2 + $0x1bd0] sm:$0xff] }
 0x235   :  { %2699 = vmatpush.msrb.mxu3 %v2528_v2  ;;  %2875 = vmatpush.msrb.mxu0 %v2856_v16  ;;  %v2748_v2 = vld [vmem:[#allocation2 + $0x2010] sm:$0xff] }
 0x236   :  { %2668 = vmatpush.msrb.mxu1 %v2445_v29  ;;  %v2043_v46 = vpop.f32.mrf.mxu1  ;;  %2688 = vmatpush.msra.mxu2 %v2446_v19  ;;  %v2812_v16 = vld [vmem:[#allocation2 + $0x2210] sm:$0xff]  ;;  %v2813_v29 = vld [vmem:[#allocation2 + $0x2218] sm:$0xff]  ;;  %v2411_v19 = vld [vmem:[#allocation2 + $0x1b88] sm:$0xff] }
 0x237   :  { %2700 = vmatpush.msrb.mxu3 %v2519_v33  ;;  %v4754_v5 = vadd.f32 %v2043_v46, %v4713_v39  ;;  %2876 = vmatpush.msrb.mxu0 %v2847_v34  ;;  %v2410_v39 = vld [vmem:[#allocation2 + $0x1b80] sm:$0xff]  ;;  %v2739_v33 = vld [vmem:[#allocation2 + $0x1fc8] sm:$0xff] }
 0x238   :  { %2669 = vmatpush.msrb.mxu1 %v2436_v3  ;;  %2689 = vmatpush.msra.mxu2 %v2437_v10  ;;  %v2803_v34 = vld [vmem:[#allocation2 + $0x21c8] sm:$0xff]  ;;  %v2804_v3 = vld [vmem:[#allocation2 + $0x21d0] sm:$0xff]  ;;  %v2402_v10 = vld [vmem:[#allocation2 + $0x1b40] sm:$0xff] }
 0x239   :  { %2701 = vmatpush.msrb.mxu3 %v2510_v41  ;;  %2877 = vmatpush.msrb.mxu0 %v2838_v17  ;;  %v2730_v41 = vld [vmem:[#allocation2 + $0x1f80] sm:$0xff]  ;;  %v4761_v17 = vld [vmem:[%s4884_s0 + $0x38] sm:$0xff] }
 0x23a   :  { %2670 = vmatpush.msrb.mxu1 %v2427_v61  ;;  %2690 = vmatpush.msra.mxu2 %v2428_v48  ;;  %v2794_v46 = vld [vmem:[#allocation2 + $0x2180] sm:$0xff]  ;;  %v2795_v61 = vld [vmem:[#allocation2 + $0x2188] sm:$0xff]  ;;  %v2868_v48 = vld [vmem:[#allocation2 + $0x23d0] sm:$0xff] }
 0x23b   :  { %2702 = vmatpush.msrb.mxu3 %v2501_v56  ;;  %2878 = vmatpush.msrb.mxu0 %v2829_v20  ;;  %v2869_v56 = vld [vmem:[#allocation2 + $0x23d8] sm:$0xff] }
 0x23c   :  { %2671 = vmatpush.msrb.mxu1 %v2418_v49  ;;  %2691 = vmatpush.msra.mxu2 %v2419_v30  ;;  %v2785_v20 = vld [vmem:[#allocation2 + $0x2138] sm:$0xff]  ;;  %v2786_v49 = vld [vmem:[#allocation2 + $0x2140] sm:$0xff]  ;;  %v2859_v30 = vld [vmem:[#allocation2 + $0x2388] sm:$0xff] }
 0x23d   :  { %2703 = vmatpush.msrb.mxu3 %v2492_v55  ;;  %2879 = vmatpush.msrb.mxu0 %v2820_v50  ;;  %v2860_v55 = vld [vmem:[#allocation2 + $0x2390] sm:$0xff] }
 0x23e   :  { %2672 = vmatpush.msrb.mxu1 %v2409_v54  ;;  %2692 = vmatpush.msra.mxu2 %v2410_v39  ;;  %v2776_v50 = vld [vmem:[#allocation2 + $0x20f0] sm:$0xff]  ;;  %v2777_v54 = vld [vmem:[#allocation2 + $0x20f8] sm:$0xff]  ;;  %v2850_v39 = vld [vmem:[#allocation2 + $0x2340] sm:$0xff] }
 0x23f   :  { %2704 = vmatpush.msrb.mxu3 %v2483_v58  ;;  %2880 = vmatpush.msrb.mxu0 %v2811_v59  ;;  %v2851_v58 = vld [vmem:[#allocation2 + $0x2348] sm:$0xff] }
 0x240   :  { %2673 = vmatpush.msrb.mxu1 %v2400_v63  ;;  %2693 = vmatpush.msra.mxu2 %v2401_v0  ;;  %v2767_v59 = vld [vmem:[#allocation2 + $0x20a8] sm:$0xff]  ;;  %v2768_v63 = vld [vmem:[#allocation2 + $0x20b0] sm:$0xff]  ;;  %v2842_v0 = vld [vmem:[#allocation2 + $0x2300] sm:$0xff] }
 0x241   :  { %2674 = vmatmul.f32.vlgmr.msrb.gmra.mxu1 %v4728_v57  ;;  %2705 = vmatpush.msrb.mxu3 %v2474_v37  ;;  %v2758_v37 = vld [vmem:[#allocation2 + $0x2060] sm:$0xff] }
 0x242   :  { %2881 = vmatpush.msrb.mxu0 %v2802_v45  ;;  %2894 = vmatpush.msra.mxu1 %v2866_v44  ;;  %v2759_v45 = vld [vmem:[#allocation2 + $0x2068] sm:$0xff]  ;;  %v2832_v44 = vld [vmem:[#allocation2 + $0x22b0] sm:$0xff] }
 0x243   :  { %2694 = vmatmul.f32.vlgmr.msra.gmra.mxu2 %v4728_v57  ;;  %2706 = vmatpush.msrb.mxu3 %v2465_v36  ;;  %v2749_v36 = vld [vmem:[#allocation2 + $0x2018] sm:$0xff] }
 0x244   :  { %2914 = vmatpush.msrb.mxu2 %v2867_v22  ;;  %2882 = vmatpush.msrb.mxu0 %v2793_v7  ;;  %v2833_v22 = vld [vmem:[#allocation2 + $0x22b8] sm:$0xff]  ;;  %v2750_v7 = vld [vmem:[#allocation2 + $0x2020] sm:$0xff] }
 0x245   :  { %2895 = vmatpush.msra.mxu1 %v2857_v12  ;;  %2707 = vmatpush.msrb.mxu3 %v2456_v13  ;;  %v2823_v12 = vld [vmem:[#allocation2 + $0x2268] sm:$0xff]  ;;  %v2740_v13 = vld [vmem:[#allocation2 + $0x1fd0] sm:$0xff] }
 0x246   :  { %2915 = vmatpush.msrb.mxu2 %v2858_v11  ;;  %2883 = vmatpush.msrb.mxu0 %v2784_v14  ;;  %v2824_v11 = vld [vmem:[#allocation2 + $0x2270] sm:$0xff]  ;;  %v2741_v14 = vld [vmem:[#allocation2 + $0x1fd8] sm:$0xff] }
 0x247   :  { %2896 = vmatpush.msra.mxu1 %v2848_v15  ;;  %2708 = vmatpush.msrb.mxu3 %v2447_v26  ;;  %v2814_v15 = vld [vmem:[#allocation2 + $0x2220] sm:$0xff]  ;;  %v2731_v26 = vld [vmem:[#allocation2 + $0x1f88] sm:$0xff] }
 0x248   :  { %2916 = vmatpush.msrb.mxu2 %v2849_v38  ;;  %2884 = vmatpush.msrb.mxu0 %v2775_v53  ;;  %v2815_v38 = vld [vmem:[#allocation2 + $0x2228] sm:$0xff]  ;;  %v2732_v53 = vld [vmem:[#allocation2 + $0x1f90] sm:$0xff] }
 0x249   :  { %2897 = vmatpush.msra.mxu1 %v2839_v32  ;;  %2709 = vmatpush.msrb.mxu3 %v2438_v35  ;;  %v2805_v32 = vld [vmem:[#allocation2 + $0x21d8] sm:$0xff]  ;;  %v2870_v35 = vld [vmem:[#allocation2 + $0x23e0] sm:$0xff] }
 0x24a   :  { %2917 = vmatpush.msrb.mxu2 %v2840_v52  ;;  %2885 = vmatpush.msrb.mxu0 %v2766_v21  ;;  %v2806_v52 = vld [vmem:[#allocation2 + $0x21e0] sm:$0xff]  ;;  %v4765_v21 = vpop.f32.mrf.mxu0 }
 0x24b   :  { %2898 = vmatpush.msra.mxu1 %v2830_v25  ;;  %2710 = vmatpush.msrb.mxu3 %v2429_v27  ;;  %v2871_v25 = vld [vmem:[#allocation2 + $0x23e8] sm:$0xff]  ;;  %v2797_v27 = vld [vmem:[#allocation2 + $0x2198] sm:$0xff] }
 0x24c   :  { %2918 = vmatpush.msrb.mxu2 %v2831_v51  ;;  %2886 = vmatpush.msrb.mxu0 %v2757_v4  ;;  %v2796_v51 = vld [vmem:[#allocation2 + $0x2190] sm:$0xff]  ;;  %v2861_v4 = vld [vmem:[#allocation2 + $0x2398] sm:$0xff] }
 0x24d   :  { %2899 = vmatpush.msra.mxu1 %v2821_v9  ;;  %2711 = vmatpush.msrb.mxu3 %v2420_v28  ;;  %v2862_v9 = vld [vmem:[#allocation2 + $0x23a0] sm:$0xff]  ;;  %v2788_v28 = vld [vmem:[#allocation2 + $0x2150] sm:$0xff] }
 0x24e   :  { %2919 = vmatpush.msrb.mxu2 %v2822_v62  ;;  %2887 = vmatpush.msrb.mxu0 %v2748_v2  ;;  %v2787_v62 = vld [vmem:[#allocation2 + $0x2148] sm:$0xff]  ;;  %v2852_v2 = vld [vmem:[#allocation2 + $0x2350] sm:$0xff] }
 0x24f   :  { %2900 = vmatpush.msra.mxu1 %v2812_v16  ;;  %2712 = vmatpush.msrb.mxu3 %v2411_v19  ;;  %v2853_v16 = vld [vmem:[#allocation2 + $0x2358] sm:$0xff]  ;;  %v2779_v19 = vld [vmem:[#allocation2 + $0x2108] sm:$0xff] }
 0x250   :  { %2920 = vmatpush.msrb.mxu2 %v2813_v29  ;;  %2888 = vmatpush.msrb.mxu0 %v2739_v33  ;;  %v2778_v29 = vld [vmem:[#allocation2 + $0x2100] sm:$0xff]  ;;  %v2843_v33 = vld [vmem:[#allocation2 + $0x2308] sm:$0xff] }
 0x251   :  { %2901 = vmatpush.msra.mxu1 %v2803_v34  ;;  %2713 = vmatpush.msrb.mxu3 %v2402_v10  ;;  %v2844_v34 = vld [vmem:[#allocation2 + $0x2310] sm:$0xff]  ;;  %v2770_v10 = vld [vmem:[#allocation2 + $0x20c0] sm:$0xff] }
 0x252   :  { %2921 = vmatpush.msrb.mxu2 %v2804_v3  ;;  %2889 = vmatpush.msrb.mxu0 %v2730_v41  ;;  %v2769_v3 = vld [vmem:[#allocation2 + $0x20b8] sm:$0xff]  ;;  %v2834_v41 = vld [vmem:[#allocation2 + $0x22c0] sm:$0xff] }
 0x253   :  { %2902 = vmatpush.msra.mxu1 %v2794_v46  ;;  %2714 = vmatmul.f32.vlgmr.msrb.gmra.mxu3 %v4728_v57  ;;  %v2841_v57 = vld [vmem:[#allocation2 + $0x22f8] sm:$0xff]  ;;  %v2835_v46 = vld [vmem:[#allocation2 + $0x22c8] sm:$0xff] }
 0x254   :  { %2890 = vmatmul.f32.vlgmr.msrb.gmra.mxu0 %v4761_v17  ;;  %2922 = vmatpush.msrb.mxu2 %v2795_v61  ;;  %v2760_v61 = vld [vmem:[#allocation2 + $0x2070] sm:$0xff] }
 0x255   :  { %2934 = vmatpush.msra.mxu3 %v2868_v48  ;;  %2954 = vmatpush.msra.mxu0 %v2869_v56  ;;  %v2761_v56 = vld [vmem:[#allocation2 + $0x2078] sm:$0xff] }
 0x256   :  { %2903 = vmatpush.msra.mxu1 %v2785_v20  ;;  %2923 = vmatpush.msrb.mxu2 %v2786_v49  ;;  %v2825_v20 = vld [vmem:[#allocation2 + $0x2278] sm:$0xff] }
 0x257   :  { %2935 = vmatpush.msra.mxu3 %v2859_v30  ;;  %2955 = vmatpush.msra.mxu0 %v2860_v55  ;;  %v2826_v30 = vld [vmem:[#allocation2 + $0x2280] sm:$0xff]  ;;  %v2751_v55 = vld [vmem:[#allocation2 + $0x2028] sm:$0xff] }
 0x258   :  { %2904 = vmatpush.msra.mxu1 %v2776_v50  ;;  %2924 = vmatpush.msrb.mxu2 %v2777_v54  ;;  %v2752_v50 = vld [vmem:[#allocation2 + $0x2030] sm:$0xff] }
 0x259   :  { %2936 = vmatpush.msra.mxu3 %v2850_v39  ;;  %2956 = vmatpush.msra.mxu0 %v2851_v58  ;;  %v2816_v54 = vld [vmem:[#allocation2 + $0x2230] sm:$0xff]  ;;  %v2817_v39 = vld [vmem:[#allocation2 + $0x2238] sm:$0xff]  ;;  %v2742_v58 = vld [vmem:[#allocation2 + $0x1fe0] sm:$0xff] }
 0x25a   :  { %2905 = vmatpush.msra.mxu1 %v2767_v59  ;;  %2925 = vmatpush.msrb.mxu2 %v2768_v63  ;;  %v2743_v59 = vld [vmem:[#allocation2 + $0x1fe8] sm:$0xff] }
 0x25b   :  { %2937 = vmatpush.msra.mxu3 %v2841_v57  ;;  %2957 = vmatpush.msra.mxu0 %v2842_v0  ;;  %v2807_v63 = vld [vmem:[#allocation2 + $0x21e8] sm:$0xff]  ;;  %v2733_v57 = vld [vmem:[#allocation2 + $0x1f98] sm:$0xff]  ;;  %v4772_v0 = vpop.f32.mrf.mxu2 }
 0x25c   :  { %2906 = vmatpush.msra.mxu1 %v2758_v37  ;;  %2926 = vmatpush.msrb.mxu2 %v2759_v45  ;;  %v4774_v37 = vpop.f32.mrf.mxu1  ;;  %v2734_v45 = vld [vmem:[#allocation2 + $0x1fa0] sm:$0xff] }
 0x25d   :  { %2938 = vmatpush.msra.mxu3 %v2832_v44  ;;  %2958 = vmatpush.msra.mxu0 %v2833_v22  ;;  %v2798_v44 = vld [vmem:[#allocation2 + $0x21a0] sm:$0xff]  ;;  %v2799_v22 = vld [vmem:[#allocation2 + $0x21a8] sm:$0xff] }
 0x25e   :  { %2907 = vmatpush.msra.mxu1 %v2749_v36  ;;  %2927 = vmatpush.msrb.mxu2 %v2750_v7  ;;  %v2872_v36 = vld [vmem:[#allocation2 + $0x23f0] sm:$0xff]  ;;  %v2873_v7 = vld [vmem:[#allocation2 + $0x23f8] sm:$0xff] }
 0x25f   :  { %2939 = vmatpush.msra.mxu3 %v2823_v12  ;;  %2959 = vmatpush.msra.mxu0 %v2824_v11  ;;  %v2789_v12 = vld [vmem:[#allocation2 + $0x2158] sm:$0xff]  ;;  %v2790_v11 = vld [vmem:[#allocation2 + $0x2160] sm:$0xff] }
 0x260   :  { %2908 = vmatpush.msra.mxu1 %v2740_v13  ;;  %2928 = vmatpush.msrb.mxu2 %v2741_v14  ;;  %v2863_v13 = vld [vmem:[#allocation2 + $0x23a8] sm:$0xff]  ;;  %v2864_v14 = vld [vmem:[#allocation2 + $0x23b0] sm:$0xff] }
 0x261   :  { %2940 = vmatpush.msra.mxu3 %v2814_v15  ;;  %2960 = vmatpush.msra.mxu0 %v2815_v38  ;;  %v2780_v15 = vld [vmem:[#allocation2 + $0x2110] sm:$0xff]  ;;  %v2781_v38 = vld [vmem:[#allocation2 + $0x2118] sm:$0xff] }
 0x262   :  { %2909 = vmatpush.msra.mxu1 %v2731_v26  ;;  %2929 = vmatpush.msrb.mxu2 %v2732_v53  ;;  %v2854_v26 = vld [vmem:[#allocation2 + $0x2360] sm:$0xff]  ;;  %v2855_v53 = vld [vmem:[#allocation2 + $0x2368] sm:$0xff] }
 0x263   :  { %2910 = vmatmul.f32.vlgmr.msra.gmra.mxu1 %v4761_v17  ;;  %2941 = vmatpush.msra.mxu3 %v2805_v32  ;;  %v2771_v32 = vld [vmem:[#allocation2 + $0x20c8] sm:$0xff] }
 0x264   :  { %2961 = vmatpush.msra.mxu0 %v2806_v52  ;;  %2974 = vmatpush.msrb.mxu1 %v2870_v35  ;;  %v4778_v52 = vpop.f32.mrf.mxu2  ;;  %v2772_v35 = vld [vmem:[#allocation2 + $0x20d0] sm:$0xff] }
 0x265   :  { %2930 = vmatmul.f32.vlgmr.msrb.gmra.mxu2 %v4761_v17  ;;  %2942 = vmatpush.msra.mxu3 %v2796_v51 }
 0x266   :  { %2994 = vmatpush.msra.mxu2 %v2871_v25  ;;  %2962 = vmatpush.msra.mxu0 %v2797_v27  ;;  %v2845_v25 = vld [vmem:[#allocation2 + $0x2318] sm:$0xff]  ;;  %v2846_v27 = vld [vmem:[#allocation2 + $0x2320] sm:$0xff] }
 0x267   :  { %2975 = vmatpush.msrb.mxu1 %v2861_v4  ;;  %2943 = vmatpush.msra.mxu3 %v2787_v62  ;;  %v2762_v4 = vld [vmem:[#allocation2 + $0x2080] sm:$0xff]  ;;  %v2763_v62 = vld [vmem:[#allocation2 + $0x2088] sm:$0xff] }
 0x268   :  { %2995 = vmatpush.msra.mxu2 %v2862_v9  ;;  %2963 = vmatpush.msra.mxu0 %v2788_v28  ;;  %v2836_v28 = vld [vmem:[#allocation2 + $0x22d0] sm:$0xff] }
 0x269   :  { %2976 = vmatpush.msrb.mxu1 %v2852_v2  ;;  %2944 = vmatpush.msra.mxu3 %v2778_v29  ;;  %v2837_v2 = vld [vmem:[#allocation2 + $0x22d8] sm:$0xff]  ;;  %v2754_v29 = vld [vmem:[#allocation2 + $0x2040] sm:$0xff] }
 0x26a   :  { %2996 = vmatpush.msra.mxu2 %v2853_v16  ;;  %2964 = vmatpush.msra.mxu0 %v2779_v19  ;;  %v2753_v16 = vld [vmem:[#allocation2 + $0x2038] sm:$0xff]  ;;  %v2827_v19 = vld [vmem:[#allocation2 + $0x2288] sm:$0xff] }
 0x26b   :  { %2977 = vmatpush.msrb.mxu1 %v2843_v33  ;;  %v2339_v48 = vpop.f32.mrf.mxu0  ;;  %2945 = vmatpush.msra.mxu3 %v2769_v3  ;;  %v2828_v33 = vld [vmem:[#allocation2 + $0x2290] sm:$0xff]  ;;  %v2818_v3 = vld [vmem:[#allocation2 + $0x2240] sm:$0xff] }
 0x26c   :  { %2997 = vmatpush.msra.mxu2 %v2844_v34  ;;  %v4770_v49 = vadd.f32 %v2339_v48, %v4749_v31  ;;  %2965 = vmatpush.msra.mxu0 %v2770_v10  ;;  %v2808_v31 = vld [vmem:[#allocation2 + $0x21f0] sm:$0xff]  ;;  %v2819_v10 = vld [vmem:[#allocation2 + $0x2248] sm:$0xff]  ;;  %v2809_v48 = vld [vmem:[#allocation2 + $0x21f8] sm:$0xff] }
 0x26d   :  { %2978 = vmatpush.msrb.mxu1 %v2834_v41  ;;  %2946 = vmatpush.msra.mxu3 %v2760_v61  ;;  %v2744_v34 = vld [vmem:[#allocation2 + $0x1ff0] sm:$0xff]  ;;  %v2735_v41 = vld [vmem:[#allocation2 + $0x1fa8] sm:$0xff] }
 0x26e   :  { %2998 = vmatpush.msra.mxu2 %v2835_v46  ;;  %2966 = vmatpush.msra.mxu0 %v2761_v56  ;;  %v2736_v46 = vld [vmem:[#allocation2 + $0x1fb0] sm:$0xff]  ;;  %v2810_v56 = vld [vmem:[#allocation2 + $0x2200] sm:$0xff] }
 0x26f   :  { %2979 = vmatpush.msrb.mxu1 %v2825_v20  ;;  %2947 = vmatpush.msra.mxu3 %v2751_v55  ;;  %v2800_v55 = vld [vmem:[#allocation2 + $0x21b0] sm:$0xff] }
 0x270   :  { %2999 = vmatpush.msra.mxu2 %v2826_v30  ;;  %2967 = vmatpush.msra.mxu0 %v2752_v50  ;;  %v3117_v30 = vld [vmem:[#allocation7 + $0x168] sm:$0xff] }
 0x271   :  { %2980 = vmatpush.msrb.mxu1 %v2816_v54  ;;  %2948 = vmatpush.msra.mxu3 %v2742_v58  ;;  %v2801_v50 = vld [vmem:[#allocation2 + $0x21b8] sm:$0xff]  ;;  %v3114_v54 = vld [vmem:[#allocation7 + $0x150] sm:$0xff] }
 0x272   :  { %3000 = vmatpush.msra.mxu2 %v2817_v39  ;;  %2968 = vmatpush.msra.mxu0 %v2743_v59  ;;  %v3165_v39 = vld [vmem:[#allocation7 + $0x2e8] sm:$0xff]  ;;  %v2791_v58 = vld [vmem:[#allocation2 + $0x2168] sm:$0xff]  ;;  %v2792_v59 = vld [vmem:[#allocation2 + $0x2170] sm:$0xff] }
 0x273   :  { %2981 = vmatpush.msrb.mxu1 %v2807_v63  ;;  %2949 = vmatpush.msra.mxu3 %v2733_v57  ;;  %v3162_v63 = vld [vmem:[#allocation7 + $0x2d0] sm:$0xff] }
 0x274   :  { %3001 = vmatpush.msra.mxu2 %v2808_v31  ;;  %2969 = vmatpush.msra.mxu0 %v2734_v45  ;;  %v2782_v31 = vld [vmem:[#allocation2 + $0x2120] sm:$0xff]  ;;  %v2783_v57 = vld [vmem:[#allocation2 + $0x2128] sm:$0xff]  ;;  %v3108_v45 = vld [vmem:[#allocation7 + $0x120] sm:$0xff] }
 0x275   :  { %2982 = vmatpush.msrb.mxu1 %v2798_v44  ;;  %2950 = vmatmul.f32.vlgmr.msra.gmra.mxu3 %v4761_v17  ;;  %v3159_v44 = vld [vmem:[#allocation7 + $0x2b8] sm:$0xff] }
 0x276   :  { %2970 = vmatmul.f32.vlgmr.msra.gmra.mxu0 %v4761_v17  ;;  %3002 = vmatpush.msra.mxu2 %v2799_v22  ;;  %v2773_v22 = vld [vmem:[#allocation2 + $0x20d8] sm:$0xff] }
 0x277   :  { %3014 = vmatpush.msrb.mxu3 %v2872_v36  ;;  %3034 = vmatpush.msrb.mxu0 %v2873_v7  ;;  %v2774_v36 = vld [vmem:[#allocation2 + $0x20e0] sm:$0xff] }
 0x278   :  { %2983 = vmatpush.msrb.mxu1 %v2789_v12  ;;  %3003 = vmatpush.msra.mxu2 %v2790_v11  ;;  %v3105_v7 = vld [vmem:[#allocation7 + $0x108] sm:$0xff]  ;;  %v3156_v12 = vld [vmem:[#allocation7 + $0x2a0] sm:$0xff] }
 0x279   :  { %3015 = vmatpush.msrb.mxu3 %v2863_v13  ;;  %3035 = vmatpush.msrb.mxu0 %v2864_v14  ;;  %v2764_v11 = vld [vmem:[#allocation2 + $0x2090] sm:$0xff]  ;;  %v2765_v13 = vld [vmem:[#allocation2 + $0x2098] sm:$0xff]  ;;  %v3102_v14 = vld [vmem:[#allocation7 + $0xf0] sm:$0xff] }
 0x27a   :  { %2984 = vmatpush.msrb.mxu1 %v2780_v15  ;;  %v2359_v51 = vpop.f32.mrf.mxu1  ;;  %3004 = vmatpush.msra.mxu2 %v2781_v38  ;;  %v3153_v15 = vld [vmem:[#allocation7 + $0x288] sm:$0xff]  ;;  %v2755_v38 = vld [vmem:[#allocation2 + $0x2048] sm:$0xff] }
 0x27b   :  { %3016 = vmatpush.msrb.mxu3 %v2854_v26  ;;  %v4781_v9 = vadd.f32 %v2359_v51, %v4744_v42  ;;  %3036 = vmatpush.msrb.mxu0 %v2855_v53  ;;  %v2745_v42 = vld [vmem:[#allocation2 + $0x1ff8] sm:$0xff]  ;;  %v2756_v26 = vld [vmem:[#allocation2 + $0x2050] sm:$0xff] }
 0x27c   :  { %2985 = vmatpush.msrb.mxu1 %v2771_v32  ;;  %3005 = vmatpush.msra.mxu2 %v2772_v35  ;;  %v3099_v53 = vld [vmem:[#allocation7 + $0xd8] sm:$0xff]  ;;  %v3150_v32 = vld [vmem:[#allocation7 + $0x270] sm:$0xff]  ;;  %v3096_v51 = vld [vmem:[#allocation7 + $0xc0] sm:$0xff] }
 0x27d   :  { %3017 = vmatpush.msrb.mxu3 %v2845_v25  ;;  %3037 = vmatpush.msrb.mxu0 %v2846_v27  ;;  %v2746_v35 = vld [vmem:[#allocation2 + $0x2000] sm:$0xff]  ;;  %v2747_v25 = vld [vmem:[#allocation2 + $0x2008] sm:$0xff] }
 0x27e   :  { %2986 = vmatpush.msrb.mxu1 %v2762_v4  ;;  %3006 = vmatpush.msra.mxu2 %v2763_v62  ;;  %v3147_v27 = vld [vmem:[#allocation7 + $0x258] sm:$0xff]  ;;  %v2737_v4 = vld [vmem:[#allocation2 + $0x1fb8] sm:$0xff]  ;;  %v2738_v62 = vld [vmem:[#allocation2 + $0x1fc0] sm:$0xff] }
 0x27f   :  { %3018 = vmatpush.msrb.mxu3 %v2836_v28  ;;  %3038 = vmatpush.msrb.mxu0 %v2837_v2  ;;  %v3093_v28 = vld [vmem:[#allocation7 + $0xa8] sm:$0xff] }
 0x280   :  { %2987 = vmatpush.msrb.mxu1 %v2753_v16  ;;  %3007 = vmatpush.msra.mxu2 %v2754_v29  ;;  %v3213_v2 = vld [vmem:[#allocation7 + $0x468] sm:$0xff]  ;;  %v3144_v16 = vld [vmem:[#allocation7 + $0x240] sm:$0xff]  ;;  %v3090_v29 = vld [vmem:[#allocation7 + $0x90] sm:$0xff] }
 0x281   :  { %3019 = vmatpush.msrb.mxu3 %v2827_v19  ;;  %3039 = vmatpush.msrb.mxu0 %v2828_v33  ;;  %v3210_v19 = vld [vmem:[#allocation7 + $0x450] sm:$0xff]  ;;  %v3141_v33 = vld [vmem:[#allocation7 + $0x228] sm:$0xff] }
 0x282   :  { %2988 = vmatpush.msrb.mxu1 %v2744_v34  ;;  %v2379_v61 = vpop.f32.mrf.mxu2  ;;  %3008 = vmatpush.msra.mxu2 %v2745_v42  ;;  %v3261_v34 = vld [vmem:[#allocation7 + $0x5e8] sm:$0xff]  ;;  %v3087_v42 = vld [vmem:[#allocation7 + $0x78] sm:$0xff] }
 0x283   :  { %3020 = vmatpush.msrb.mxu3 %v2818_v3  ;;  %v4784_v20 = vadd.f32 %v2379_v61, %v4754_v5  ;;  %3040 = vmatpush.msrb.mxu0 %v2819_v10  ;;  %v3111_v5 = vld [vmem:[#allocation7 + $0x138] sm:$0xff]  ;;  %v3138_v10 = vld [vmem:[#allocation7 + $0x210] sm:$0xff]  ;;  %v3204_v61 = vld [vmem:[#allocation7 + $0x420] sm:$0xff] }
 0x284   :  { %2989 = vmatpush.msrb.mxu1 %v2735_v41  ;;  %3009 = vmatpush.msra.mxu2 %v2736_v46  ;;  %v3207_v3 = vld [vmem:[#allocation7 + $0x438] sm:$0xff]  ;;  %v3258_v41 = vld [vmem:[#allocation7 + $0x5d0] sm:$0xff]  ;;  %v3084_v46 = vld [vmem:[#allocation7 + $0x60] sm:$0xff] }
 0x285   :  { %2990 = vmatmul.f32.vlgmr.msrb.gmra.mxu1 %v4761_v17  ;;  %3021 = vmatpush.msrb.mxu3 %v2809_v48  ;;  %v3081_v48 = vld [vmem:[#allocation7 + $0x48] sm:$0xff] }
 0x286   :  { %3041 = vmatpush.msrb.mxu0 %v2810_v56  ;;  %3010 = vmatmul.f32.vlgmr.msra.gmra.mxu2 %v4761_v17  ;;  %v3201_v56 = vld [vmem:[#allocation7 + $0x408] sm:$0xff] }
 0x287   :  { %3512 = vmatpush.msra.mxu1 %v3117_v30  ;;  %3022 = vmatpush.msrb.mxu3 %v2800_v55  ;;  %v3132_v30 = vld [vmem:[#allocation7 + $0x1e0] sm:$0xff]  ;;  %v3078_v55 = vld [vmem:[#allocation7 + $0x30] sm:$0xff] }
 0x288   :  { %3042 = vmatpush.msrb.mxu0 %v2801_v50  ;;  %3532 = vmatpush.msrb.mxu2 %v3165_v39  ;;  %v3198_v50 = vld [vmem:[#allocation7 + $0x3f0] sm:$0xff]  ;;  %v3129_v39 = vld [vmem:[#allocation7 + $0x1c8] sm:$0xff] }
 0x289   :  { %3513 = vmatpush.msra.mxu1 %v3114_v54  ;;  %3023 = vmatpush.msrb.mxu3 %v2791_v58  ;;  %v3255_v54 = vld [vmem:[#allocation7 + $0x5b8] sm:$0xff] }
 0x28a   :  { %3043 = vmatpush.msrb.mxu0 %v2792_v59  ;;  %3533 = vmatpush.msrb.mxu2 %v3162_v63  ;;  %v3075_v58 = vld [vmem:[#allocation7 + $0x18] sm:$0xff]  ;;  %v3126_v63 = vld [vmem:[#allocation7 + $0x1b0] sm:$0xff] }
 0x28b   :  { %3514 = vmatpush.msra.mxu1 %v3111_v5  ;;  %3024 = vmatpush.msrb.mxu3 %v2782_v31  ;;  %v3195_v59 = vld [vmem:[#allocation7 + $0x3d8] sm:$0xff]  ;;  %v3252_v5 = vld [vmem:[#allocation7 + $0x5a0] sm:$0xff]  ;;  %v3249_v31 = vld [vmem:[#allocation7 + $0x588] sm:$0xff] }
 0x28c   :  { %3044 = vmatpush.msrb.mxu0 %v2783_v57  ;;  %3534 = vmatpush.msrb.mxu2 %v3159_v44  ;;  %v3072_v57 = vld [vmem:[#allocation7] sm:$0xff]  ;;  %v3309_v44 = vld [vmem:[#allocation7 + $0x768] sm:$0xff] }
 0x28d   :  { %3515 = vmatpush.msra.mxu1 %v3108_v45  ;;  %3025 = vmatpush.msrb.mxu3 %v2773_v22  ;;  %v3192_v45 = vld [vmem:[#allocation7 + $0x3c0] sm:$0xff]  ;;  %v3123_v22 = vld [vmem:[#allocation7 + $0x198] sm:$0xff] }
 0x28e   :  { %3045 = vmatpush.msrb.mxu0 %v2774_v36  ;;  %3535 = vmatpush.msrb.mxu2 %v3156_v12  ;;  %v3189_v36 = vld [vmem:[#allocation7 + $0x3a8] sm:$0xff]  ;;  %v3120_v12 = vld [vmem:[#allocation7 + $0x180] sm:$0xff] }
 0x28f   :  { %3516 = vmatpush.msra.mxu1 %v3105_v7  ;;  %3026 = vmatpush.msrb.mxu3 %v2764_v11  ;;  %v3306_v7 = vld [vmem:[#allocation7 + $0x750] sm:$0xff] }
 0x290   :  { %3046 = vmatpush.msrb.mxu0 %v2765_v13  ;;  %3536 = vmatpush.msrb.mxu2 %v3153_v15  ;;  %v3186_v11 = vld [vmem:[#allocation7 + $0x390] sm:$0xff]  ;;  %v3357_v13 = vld [vmem:[#allocation7 + $0x8e8] sm:$0xff]  ;;  %v3303_v15 = vld [vmem:[#allocation7 + $0x738] sm:$0xff] }
 0x291   :  { %3517 = vmatpush.msra.mxu1 %v3102_v14  ;;  %3027 = vmatpush.msrb.mxu3 %v2755_v38  ;;  %v3246_v14 = vld [vmem:[#allocation7 + $0x570] sm:$0xff]  ;;  %v3243_v38 = vld [vmem:[#allocation7 + $0x558] sm:$0xff] }
 0x292   :  { %3047 = vmatpush.msrb.mxu0 %v2756_v26  ;;  %3537 = vmatpush.msrb.mxu2 %v3150_v32  ;;  %v3183_v26 = vld [vmem:[#allocation7 + $0x378] sm:$0xff]  ;;  %v3300_v32 = vld [vmem:[#allocation7 + $0x720] sm:$0xff] }
 0x293   :  { %3518 = vmatpush.msra.mxu1 %v3099_v53  ;;  %3028 = vmatpush.msrb.mxu3 %v2746_v35  ;;  %v3354_v53 = vld [vmem:[#allocation7 + $0x8d0] sm:$0xff]  ;;  %v3240_v35 = vld [vmem:[#allocation7 + $0x540] sm:$0xff] }
 0x294   :  { %3048 = vmatpush.msrb.mxu0 %v2747_v25  ;;  %3538 = vmatpush.msrb.mxu2 %v3147_v27  ;;  %v3180_v25 = vld [vmem:[#allocation7 + $0x360] sm:$0xff]  ;;  %v3297_v27 = vld [vmem:[#allocation7 + $0x708] sm:$0xff] }
 0x295   :  { %3519 = vmatpush.msra.mxu1 %v3096_v51  ;;  %3029 = vmatpush.msrb.mxu3 %v2737_v4  ;;  %v3351_v51 = vld [vmem:[#allocation7 + $0x8b8] sm:$0xff]  ;;  %v3237_v4 = vld [vmem:[#allocation7 + $0x528] sm:$0xff] }
 0x296   :  { %3049 = vmatpush.msrb.mxu0 %v2738_v62  ;;  %3030 = vmatmul.f32.vlgmr.msrb.gmra.mxu3 %v4761_v17  ;;  %v3177_v62 = vld [vmem:[#allocation7 + $0x348] sm:$0xff] }
 0x297   :  { %3050 = vmatmul.f32.vlgmr.msrb.gmra.mxu0 %v4761_v17  ;;  %3520 = vmatpush.msra.mxu1 %v3093_v28  ;;  %v3135_v17 = vld [vmem:[#allocation7 + $0x1f8] sm:$0xff]  ;;  %v3348_v28 = vld [vmem:[#allocation7 + $0x8a0] sm:$0xff] }
 0x298   :  { %3552 = vmatpush.msra.mxu3 %v3213_v2  ;;  %3539 = vmatpush.msrb.mxu2 %v3144_v16  ;;  %v3294_v2 = vld [vmem:[#allocation7 + $0x6f0] sm:$0xff] }
 0x299   :  { %3572 = vmatpush.msra.mxu0 %v3261_v34  ;;  %3521 = vmatpush.msra.mxu1 %v3090_v29  ;;  %v3234_v16 = vld [vmem:[#allocation7 + $0x510] sm:$0xff]  ;;  %v3171_v34 = vld [vmem:[#allocation7 + $0x318] sm:$0xff] }
 0x29a   :  { %3553 = vmatpush.msra.mxu3 %v3210_v19  ;;  %3540 = vmatpush.msrb.mxu2 %v3141_v33  ;;  %v3174_v29 = vld [vmem:[#allocation7 + $0x330] sm:$0xff]  ;;  %v3345_v19 = vld [vmem:[#allocation7 + $0x888] sm:$0xff]  ;;  %v3291_v33 = vld [vmem:[#allocation7 + $0x6d8] sm:$0xff] }
 0x29b   :  { %3573 = vmatpush.msra.mxu0 %v3258_v41  ;;  %3522 = vmatpush.msra.mxu1 %v3087_v42  ;;  %v3342_v42 = vld [vmem:[#allocation7 + $0x870] sm:$0xff]  ;;  %v3168_v41 = vld [vmem:[#allocation7 + $0x300] sm:$0xff] }
 0x29c   :  { %3554 = vmatpush.msra.mxu3 %v3207_v3  ;;  %3541 = vmatpush.msrb.mxu2 %v3138_v10  ;;  %v3288_v3 = vld [vmem:[#allocation7 + $0x6c0] sm:$0xff]  ;;  %v3285_v10 = vld [vmem:[#allocation7 + $0x6a8] sm:$0xff] }
 0x29d   :  { %3523 = vmatpush.msra.mxu1 %v3084_v46  ;;  %3574 = vmatpush.msra.mxu0 %v3255_v54  ;;  %v3405_v46 = vld [vmem:[#allocation7 + $0xa68] sm:$0xff] }
 0x29e   :  { %3555 = vmatpush.msra.mxu3 %v3204_v61  ;;  %3542 = vmatpush.msrb.mxu2 %v3135_v17  ;;  %v3231_v61 = vld [vmem:[#allocation7 + $0x4f8] sm:$0xff]  ;;  %v3333_v54 = vld [vmem:[#allocation7 + $0x828] sm:$0xff] }
 0x29f   :  { %3524 = vmatpush.msra.mxu1 %v3081_v48  ;;  %3575 = vmatpush.msra.mxu0 %v3252_v5  ;;  %v3339_v17 = vld [vmem:[#allocation7 + $0x858] sm:$0xff]  ;;  %v3228_v48 = vld [vmem:[#allocation7 + $0x4e0] sm:$0xff]  ;;  %v3330_v5 = vld [vmem:[#allocation7 + $0x810] sm:$0xff] }
 0x2a0   :  { %3556 = vmatpush.msra.mxu3 %v3201_v56  ;;  %3543 = vmatpush.msrb.mxu2 %v3132_v30  ;;  %v3282_v56 = vld [vmem:[#allocation7 + $0x690] sm:$0xff] }
 0x2a1   :  { %3525 = vmatpush.msra.mxu1 %v3078_v55  ;;  %3576 = vmatpush.msra.mxu0 %v3249_v31  ;;  %v3402_v30 = vld [vmem:[#allocation7 + $0xa50] sm:$0xff]  ;;  %v3336_v55 = vld [vmem:[#allocation7 + $0x840] sm:$0xff] }
 0x2a2   :  { %3557 = vmatpush.msra.mxu3 %v3198_v50  ;;  %3544 = vmatpush.msrb.mxu2 %v3129_v39  ;;  %v3225_v50 = vld [vmem:[#allocation7 + $0x4c8] sm:$0xff]  ;;  %v3279_v39 = vld [vmem:[#allocation7 + $0x678] sm:$0xff]  ;;  %v3396_v31 = vld [vmem:[#allocation7 + $0xa20] sm:$0xff] }
 0x2a3   :  { %3526 = vmatpush.msra.mxu1 %v3075_v58  ;;  %3577 = vmatpush.msra.mxu0 %v3246_v14  ;;  %v3399_v58 = vld [vmem:[#allocation7 + $0xa38] sm:$0xff]  ;;  %v3453_v14 = vld [vmem:[#allocation7 + $0xbe8] sm:$0xff] }
 0x2a4   :  { %3558 = vmatpush.msra.mxu3 %v3195_v59  ;;  %3545 = vmatpush.msrb.mxu2 %v3126_v63  ;;  %v3222_v59 = vld [vmem:[#allocation7 + $0x4b0] sm:$0xff]  ;;  %v3276_v63 = vld [vmem:[#allocation7 + $0x660] sm:$0xff] }
 0x2a5   :  { %3527 = vmatpush.msra.mxu1 %v3072_v57  ;;  %3578 = vmatpush.msra.mxu0 %v3243_v38  ;;  %v3219_v57 = vld [vmem:[#allocation7 + $0x498] sm:$0xff] }
 0x2a6   :  { %3559 = vmatpush.msra.mxu3 %v3192_v45  ;;  %3546 = vmatpush.msrb.mxu2 %v3123_v22  ;;  %v3327_v45 = vld [vmem:[#allocation7 + $0x7f8] sm:$0xff]  ;;  %v3393_v22 = vld [vmem:[#allocation7 + $0xa08] sm:$0xff] }
 0x2a7   :  { %3592 = vmatpush.msrb.mxu1 %v3309_v44  ;;  %3579 = vmatpush.msra.mxu0 %v3240_v35  ;;  %v3273_v44 = vld [vmem:[#allocation7 + $0x648] sm:$0xff]  ;;  %v3267_v38 = vld [vmem:[#allocation7 + $0x618] sm:$0xff]  ;;  %v3264_v35 = vld [vmem:[#allocation7 + $0x600] sm:$0xff] }
 0x2a8   :  { %3560 = vmatpush.msra.mxu3 %v3189_v36  ;;  %3547 = vmatpush.msrb.mxu2 %v3120_v12  ;;  %v4790_v36 = vpop.f32.mrf.mxu3  ;;  %v3324_v12 = vld [vmem:[#allocation7 + $0x7e0] sm:$0xff] }
 0x2a9   :  { %3593 = vmatpush.msrb.mxu1 %v3306_v7  ;;  %3580 = vmatpush.msra.mxu0 %v3237_v4  ;;  %v3216_v7 = vld [vmem:[#allocation7 + $0x480] sm:$0xff]  ;;  %v3381_v4 = vld [vmem:[#allocation7 + $0x9a8] sm:$0xff] }
 0x2aa   :  { %3561 = vmatpush.msra.mxu3 %v3186_v11  ;;  %3612 = vmatpush.msra.mxu2 %v3357_v13  ;;  %v3270_v11 = vld [vmem:[#allocation7 + $0x630] sm:$0xff] }
 0x2ab   :  { %3594 = vmatpush.msrb.mxu1 %v3303_v15  ;;  %3581 = vmatpush.msra.mxu0 %v3234_v16  ;;  %v3390_v13 = vld [vmem:[#allocation7 + $0x9f0] sm:$0xff]  ;;  %v3321_v15 = vld [vmem:[#allocation7 + $0x7c8] sm:$0xff]  ;;  %v3312_v16 = vld [vmem:[#allocation7 + $0x780] sm:$0xff] }
 0x2ac   :  { %3562 = vmatpush.msra.mxu3 %v3183_v26  ;;  %3613 = vmatpush.msra.mxu2 %v3354_v53  ;;  %v3387_v26 = vld [vmem:[#allocation7 + $0x9d8] sm:$0xff]  ;;  %v4792_v53 = vpop.f32.mrf.mxu0 }
 0x2ad   :  { %3595 = vmatpush.msrb.mxu1 %v3300_v32  ;;  %3582 = vmatpush.msra.mxu0 %v3231_v61  ;;  %v3450_v32 = vld [vmem:[#allocation7 + $0xbd0] sm:$0xff] }
 0x2ae   :  { %3563 = vmatpush.msra.mxu3 %v3180_v25  ;;  %3614 = vmatpush.msra.mxu2 %v3351_v51  ;;  %v3384_v25 = vld [vmem:[#allocation7 + $0x9c0] sm:$0xff]  ;;  %v3318_v51 = vld [vmem:[#allocation7 + $0x7b0] sm:$0xff] }
 0x2af   :  { %3596 = vmatpush.msrb.mxu1 %v3297_v27  ;;  %3583 = vmatpush.msra.mxu0 %v3228_v48  ;;  %v3447_v27 = vld [vmem:[#allocation7 + $0xbb8] sm:$0xff] }
 0x2b0   :  { %3564 = vmatpush.msra.mxu3 %v3177_v62  ;;  %3615 = vmatpush.msra.mxu2 %v3348_v28  ;;  %v3315_v62 = vld [vmem:[#allocation7 + $0x798] sm:$0xff]  ;;  %v4794_v28 = vpop.f32.mrf.mxu3 }
 0x2b1   :  { %3597 = vmatpush.msrb.mxu1 %v3294_v2  ;;  %3584 = vmatpush.msra.mxu0 %v3225_v50  ;;  %v3444_v2 = vld [vmem:[#allocation7 + $0xba0] sm:$0xff]  ;;  %v2595_v50 = vpop.f32.mrf.mxu1 }
 0x2b2   :  { %3565 = vmatpush.msra.mxu3 %v3174_v29  ;;  %3616 = vmatpush.msra.mxu2 %v3345_v19  ;;  %v3378_v29 = vld [vmem:[#allocation7 + $0x990] sm:$0xff]  ;;  %v3441_v19 = vld [vmem:[#allocation7 + $0xb88] sm:$0xff] }
 0x2b3   :  { %3598 = vmatpush.msrb.mxu1 %v3291_v33  ;;  %3585 = vmatpush.msra.mxu0 %v3222_v59  ;;  %v3375_v33 = vld [vmem:[#allocation7 + $0x978] sm:$0xff] }
 0x2b4   :  { %3566 = vmatpush.msra.mxu3 %v3171_v34  ;;  %3617 = vmatpush.msra.mxu2 %v3342_v42  ;;  %v4796_v34 = vpop.f32.mrf.mxu0  ;;  %v3372_v42 = vld [vmem:[#allocation7 + $0x960] sm:$0xff] }
 0x2b5   :  { %3599 = vmatpush.msrb.mxu1 %v3288_v3  ;;  %3586 = vmatpush.msra.mxu0 %v3219_v57  ;;  %v3438_v3 = vld [vmem:[#allocation7 + $0xb70] sm:$0xff]  ;;  %v3417_v57 = vld [vmem:[#allocation7 + $0xac8] sm:$0xff] }
 0x2b6   :  { %3567 = vmatpush.msra.mxu3 %v3168_v41  ;;  %3618 = vmatpush.msra.mxu2 %v3339_v17  ;;  %v2046_v41 = vadd.f32 %v4741_v43, %v4676_v6  ;;  %v3432_v17 = vld [vmem:[#allocation7 + $0xb40] sm:$0xff] }
 0x2b7   :  { %3600 = vmatpush.msrb.mxu1 %v3285_v10  ;;  %3587 = vmatpush.msra.mxu0 %v3216_v7  ;;  %v3435_v10 = vld [vmem:[#allocation7 + $0xb58] sm:$0xff]  ;;  %v3360_v6 = vld [vmem:[#allocation7 + $0x900] sm:$0xff] }
 0x2b8   :  { %3632 = vmatpush.msrb.mxu3 %v3405_v46  ;;  %3619 = vmatpush.msra.mxu2 %v3336_v55  ;;  %v3369_v46 = vld [vmem:[#allocation7 + $0x948] sm:$0xff]  ;;  %v2555_v61 = vpop.f32.mrf.mxu3  ;;  %v2382_v48 = vadd.f32 %v4772_v0, %v2046_v41  ;;  %v3423_v0 = vld [vmem:[#allocation7 + $0xaf8] sm:$0xff]  ;;  %v3492_v7 = vld [vmem:[#allocation7 + $0xd20] sm:$0xff] }
 0x2b9   :  { %3601 = vmatpush.msrb.mxu1 %v3282_v56  ;;  %3652 = vmatpush.msrb.mxu0 %v3453_v14  ;;  %v3366_v56 = vld [vmem:[#allocation7 + $0x930] sm:$0xff]  ;;  %v3411_v14 = vld [vmem:[#allocation7 + $0xa98] sm:$0xff] }
 0x2ba   :  { %3633 = vmatpush.msrb.mxu3 %v3402_v30  ;;  %3620 = vmatpush.msra.mxu2 %v3333_v54  ;;  %v3429_v30 = vld [vmem:[#allocation7 + $0xb28] sm:$0xff]  ;;  %v2718_v55 = vadd.f32 %v2555_v61, %v2382_v48  ;;  %v3363_v54 = vld [vmem:[#allocation7 + $0x918] sm:$0xff] }
 0x2bb   :  { %3602 = vmatpush.msrb.mxu1 %v3279_v39  ;;  %3653 = vmatpush.msrb.mxu0 %v3450_v32  ;;  %v3465_v61 = vld [vmem:[#allocation7 + $0xc48] sm:$0xff]  ;;  %v3103_v48 = vld [vmem:[#allocation7 + $0xf8] sm:$0xff] }
 0x2bc   :  { %3634 = vmatpush.msrb.mxu3 %v3399_v58  ;;  %3621 = vmatpush.msra.mxu2 %v3330_v5  ;;  %v3426_v58 = vld [vmem:[#allocation7 + $0xb10] sm:$0xff]  ;;  %v3501_v5 = vld [vmem:[#allocation7 + $0xd68] sm:$0xff] }
 0x2bd   :  { %3603 = vmatpush.msrb.mxu1 %v3276_v63  ;;  %3654 = vmatpush.msrb.mxu0 %v3447_v27  ;;  %v3498_v63 = vld [vmem:[#allocation7 + $0xd50] sm:$0xff] }
 0x2be   :  { %3635 = vmatpush.msrb.mxu3 %v3396_v31  ;;  %3622 = vmatpush.msra.mxu2 %v3327_v45  ;;  %v3420_v31 = vld [vmem:[#allocation7 + $0xae0] sm:$0xff]  ;;  %v4804_v45 = vpop.f32.mrf.mxu2 }
 0x2bf   :  { %3604 = vmatpush.msrb.mxu1 %v3273_v44  ;;  %3655 = vmatpush.msrb.mxu0 %v3444_v2  ;;  %v4806_v44 = vpop.f32.mrf.mxu1 }
 0x2c0   :  { %3636 = vmatpush.msrb.mxu3 %v3393_v22  ;;  %3623 = vmatpush.msra.mxu2 %v3324_v12  ;;  %v3495_v22 = vld [vmem:[#allocation7 + $0xd38] sm:$0xff]  ;;  %v3414_v12 = vld [vmem:[#allocation7 + $0xab0] sm:$0xff] }
 0x2c1   :  { %3605 = vmatpush.msrb.mxu1 %v3270_v11  ;;  %3656 = vmatpush.msrb.mxu0 %v3441_v19  ;;  %v2047_v11 = vadd.f32 %v4732_v18, %v4684_v40  ;;  %v3480_v40 = vld [vmem:[#allocation7 + $0xcc0] sm:$0xff]  ;;  %v2048_v18 = vadd.f32 %v4739_v60, %v4687_v47  ;;  %v2635_v47 = vpop.f32.mrf.mxu3 }
 0x2c2   :  { %3637 = vmatpush.msrb.mxu3 %v3390_v13  ;;  %3624 = vmatpush.msra.mxu2 %v3321_v15  ;;  %v3489_v13 = vld [vmem:[#allocation7 + $0xd08] sm:$0xff]  ;;  %v3112_v19 = vld [vmem:[#allocation7 + $0x140] sm:$0xff] }
 0x2c3   :  { %3606 = vmatpush.msrb.mxu1 %v3267_v38  ;;  %3657 = vmatpush.msrb.mxu0 %v3438_v3  ;;  %v2383_v15 = vadd.f32 %v4790_v36, %v2047_v11  ;;  %v3408_v38 = vld [vmem:[#allocation7 + $0xa80] sm:$0xff]  ;;  %v3118_v36 = vld [vmem:[#allocation7 + $0x170] sm:$0xff]  ;;  %v2384_v2 = vadd.f32 %v4765_v21, %v2048_v18  ;;  %v3109_v3 = vld [vmem:[#allocation7 + $0x128] sm:$0xff] }
 0x2c4   :  { %3638 = vmatpush.msrb.mxu3 %v3387_v26  ;;  %3625 = vmatpush.msra.mxu2 %v3318_v51  ;;  %v3486_v26 = vld [vmem:[#allocation7 + $0xcf0] sm:$0xff]  ;;  %v3483_v51 = vld [vmem:[#allocation7 + $0xcd8] sm:$0xff]  ;;  %v3148_v11 = vld [vmem:[#allocation7 + $0x260] sm:$0xff] }
 0x2c5   :  { %3607 = vmatpush.msrb.mxu1 %v3264_v35  ;;  %3658 = vmatpush.msrb.mxu0 %v3435_v10  ;;  %v2719_v32 = vadd.f32 %v4792_v53, %v2383_v15  ;;  %v3115_v53 = vld [vmem:[#allocation7 + $0x158] sm:$0xff]  ;;  %v3468_v10 = vld [vmem:[#allocation7 + $0xc60] sm:$0xff]  ;;  %v3166_v21 = vld [vmem:[#allocation7 + $0x2f0] sm:$0xff] }
 0x2c6   :  { %3639 = vmatpush.msrb.mxu3 %v3384_v25  ;;  %3626 = vmatpush.msra.mxu2 %v3315_v62  ;;  %v4812_v35 = vpop.f32.mrf.mxu2  ;;  %v3477_v62 = vld [vmem:[#allocation7 + $0xca8] sm:$0xff]  ;;  %v3088_v15 = vld [vmem:[#allocation7 + $0x80] sm:$0xff]  ;;  %v3139_v18 = vld [vmem:[#allocation7 + $0x218] sm:$0xff] }
 0x2c7   :  { %3659 = vmatpush.msrb.mxu0 %v3432_v17  ;;  %v3163_v17 = vld [vmem:[#allocation7 + $0x2d8] sm:$0xff] }
 0x2c8   :  { %3640 = vmatpush.msrb.mxu3 %v3381_v4  ;;  %3627 = vmatpush.msra.mxu2 %v3312_v16  ;;  %v3474_v16 = vld [vmem:[#allocation7 + $0xc90] sm:$0xff] }
 0x2c9   :  { %3660 = vmatpush.msrb.mxu0 %v3429_v30  ;;  %v3462_v30 = vld [vmem:[#allocation7 + $0xc30] sm:$0xff] }
 0x2ca   :  { %3641 = vmatpush.msrb.mxu3 %v3378_v29  ;;  %v2720_v29 = vadd.f32 %v2595_v50, %v2384_v2  ;;  %v3100_v50 = vld [vmem:[#allocation7 + $0xe0] sm:$0xff]  ;;  %v2387_v2 = vadd.f32 %v4794_v28, %v4735_v8  ;;  %v3073_v28 = vld [vmem:[#allocation7 + $0x8] sm:$0xff] }
 0x2cb   :  { %3661 = vmatpush.msrb.mxu0 %v3426_v58 }
 0x2cc   :  { %3642 = vmatpush.msrb.mxu3 %v3375_v33 }
 0x2cd   :  { %3662 = vmatpush.msrb.mxu0 %v3423_v0  ;;  %v3154_v0 = vld [vmem:[#allocation7 + $0x290] sm:$0xff] }
 0x2ce   :  { %3643 = vmatpush.msrb.mxu3 %v3372_v42  ;;  %v3471_v42 = vld [vmem:[#allocation7 + $0xc78] sm:$0xff] }
 0x2cf   :  { %3663 = vmatpush.msrb.mxu0 %v3420_v31 }
 0x2d0   :  { %3644 = vmatpush.msrb.mxu3 %v3369_v46  ;;  %v3106_v46 = vld [vmem:[#allocation7 + $0x110] sm:$0xff] }
 0x2d1   :  { %v2891_v39 = vpop.f32.mrf.mxu0  ;;  %3664 = vmatpush.msrb.mxu0 %v3417_v57  ;;  %v2385_v57 = vadd.f32 %v4774_v37, %v4723_v1  ;;  %v3256_v1 = vld [vmem:[#allocation7 + $0x5c0] sm:$0xff]  ;;  %v3085_v37 = vld [vmem:[#allocation7 + $0x68] sm:$0xff] }
 0x2d2   :  { %3645 = vmatpush.msrb.mxu3 %v3366_v56  ;;  %v3054_v59 = vadd.f32 %v2891_v39, %v2718_v55  ;;  %v2050_v56 = vadd.f32 %v4746_v23, %v4697_v24  ;;  %v3160_v55 = vld [vmem:[#allocation7 + $0x2c0] sm:$0xff]  ;;  %v3459_v39 = vld [vmem:[#allocation7 + $0xc18] sm:$0xff] }
 0x2d3   :  { %3665 = vmatpush.msrb.mxu0 %v3414_v12  ;;  %v3456_v24 = vld [vmem:[#allocation7 + $0xc00] sm:$0xff]  ;;  %v3091_v12 = vld [vmem:[#allocation7 + $0x98] sm:$0xff] }
 0x2d4   :  { %3646 = vmatpush.msrb.mxu3 %v3363_v54  ;;  %v4801_v43 = vmax.f32 %v3054_v59, 0.0  ;;  %v2386_v54 = vadd.f32 %v4778_v52, %v2050_v56  ;;  %v3157_v59 = vld [vmem:[#allocation7 + $0x2a8] sm:$0xff]  ;;  %v3151_v52 = vld [vmem:[#allocation7 + $0x278] sm:$0xff] }
 0x2d5   :  { %3666 = vmatpush.msrb.mxu0 %v3411_v14  ;;  %v3259_v14 = vld [vmem:[#allocation7 + $0x5d8] sm:$0xff] }
 0x2d6   :  { %3647 = vmatpush.msrb.mxu3 %v3360_v6  ;;  %3528 = vmatmul.f32.vlgmr.msra.gmra.mxu1 %v4801_v43  ;;  %v4826_v58 = vpop.f32.mrf.mxu3  ;;  %v3097_v6 = vld [vmem:[#allocation7 + $0xc8] sm:$0xff]  ;;  %v3199_v56 = vld [vmem:[#allocation7 + $0x3f8] sm:$0xff] }
 0x2d7   :  { %3672 = vmatpush.msra.mxu1 %v3501_v5  ;;  %3667 = vmatpush.msrb.mxu0 %v3408_v38  ;;  %v2722_v5 = vadd.f32 %v2635_v47, %v2386_v54  ;;  %v3133_v47 = vld [vmem:[#allocation7 + $0x1e8] sm:$0xff]  ;;  %v3196_v54 = vld [vmem:[#allocation7 + $0x3e0] sm:$0xff] }
 0x2d9   :  { %3673 = vmatpush.msra.mxu1 %v3498_v63  ;;  %v3094_v63 = vld [vmem:[#allocation7 + $0xb0] sm:$0xff] }
 0x2db   :  { %3674 = vmatpush.msra.mxu1 %v3495_v22 }
 0x2dd   :  { %3675 = vmatpush.msra.mxu1 %v3492_v7  ;;  %v3262_v7 = vld [vmem:[#allocation7 + $0x5f0] sm:$0xff] }
 0x2df   :  { %3676 = vmatpush.msra.mxu1 %v3489_v13  ;;  %v2721_v13 = vadd.f32 %v4804_v45, %v2385_v57  ;;  %v3214_v45 = vld [vmem:[#allocation7 + $0x470] sm:$0xff]  ;;  %v3229_v57 = vld [vmem:[#allocation7 + $0x4e8] sm:$0xff] }
 0x2e0   :  { %v2911_v25 = vpop.f32.mrf.mxu1 }
 0x2e1   :  { %v3055_v27 = vadd.f32 %v2911_v25, %v2719_v32  ;;  %3677 = vmatpush.msra.mxu1 %v3486_v26  ;;  %v3145_v26 = vld [vmem:[#allocation7 + $0x248] sm:$0xff]  ;;  %v3142_v25 = vld [vmem:[#allocation7 + $0x230] sm:$0xff] }
 0x2e3   :  { %v4816_v4 = vmax.f32 %v3055_v27, 0.0  ;;  %3678 = vmatpush.msra.mxu1 %v3483_v51  ;;  %v3253_v27 = vld [vmem:[#allocation7 + $0x5a8] sm:$0xff] }
 0x2e5   :  { %3548 = vmatmul.f32.vlgmr.msrb.gmra.mxu2 %v4816_v4  ;;  %3679 = vmatpush.msra.mxu1 %v3480_v40  ;;  %v3082_v40 = vld [vmem:[#allocation7 + $0x50] sm:$0xff] }
 0x2e6   :  { %3692 = vmatpush.msrb.mxu2 %v3118_v36  ;;  %v3211_v36 = vld [vmem:[#allocation7 + $0x458] sm:$0xff] }
 0x2e7   :  { %3680 = vmatpush.msra.mxu1 %v3477_v62  ;;  %v3250_v62 = vld [vmem:[#allocation7 + $0x590] sm:$0xff] }
 0x2e8   :  { %v2931_v33 = vpop.f32.mrf.mxu2  ;;  %3693 = vmatpush.msrb.mxu2 %v3115_v53  ;;  %v3079_v53 = vld [vmem:[#allocation7 + $0x38] sm:$0xff] }
 0x2e9   :  { %v3056_v60 = vadd.f32 %v2931_v33, %v2720_v29  ;;  %3681 = vmatpush.msra.mxu1 %v3474_v16  ;;  %v3136_v16 = vld [vmem:[#allocation7 + $0x200] sm:$0xff]  ;;  %v2723_v33 = vadd.f32 %v4796_v34, %v2387_v2  ;;  %v3241_v34 = vld [vmem:[#allocation7 + $0x548] sm:$0xff] }
 0x2ea   :  { %3694 = vmatpush.msrb.mxu2 %v3112_v19  ;;  %v3208_v29 = vld [vmem:[#allocation7 + $0x440] sm:$0xff]  ;;  %v3247_v19 = vld [vmem:[#allocation7 + $0x578] sm:$0xff]  ;;  %v3217_v2 = vld [vmem:[#allocation7 + $0x488] sm:$0xff] }
 0x2eb   :  { %v4820_v41 = vmax.f32 %v3056_v60, 0.0  ;;  %3682 = vmatpush.msra.mxu1 %v3471_v42  ;;  %v3076_v42 = vld [vmem:[#allocation7 + $0x20] sm:$0xff] }
 0x2ec   :  { %3695 = vmatpush.msrb.mxu2 %v3109_v3  ;;  %v3205_v3 = vld [vmem:[#allocation7 + $0x428] sm:$0xff] }
 0x2ed   :  { %3568 = vmatmul.f32.vlgmr.msra.gmra.mxu3 %v4820_v41  ;;  %3683 = vmatpush.msra.mxu1 %v3468_v10  ;;  %v3244_v10 = vld [vmem:[#allocation7 + $0x560] sm:$0xff] }
 0x2ee   :  { %3712 = vmatpush.msra.mxu3 %v3166_v21  ;;  %3696 = vmatpush.msrb.mxu2 %v3106_v46  ;;  %v3130_v21 = vld [vmem:[#allocation7 + $0x1d0] sm:$0xff] }
 0x2ef   :  { %3684 = vmatpush.msra.mxu1 %v3465_v61  ;;  %v3202_v46 = vld [vmem:[#allocation7 + $0x410] sm:$0xff] }
 0x2f0   :  { %3713 = vmatpush.msra.mxu3 %v3163_v17  ;;  %3697 = vmatpush.msrb.mxu2 %v3103_v48  ;;  %v3310_v17 = vld [vmem:[#allocation7 + $0x770] sm:$0xff]  ;;  %v3127_v48 = vld [vmem:[#allocation7 + $0x1b8] sm:$0xff] }
 0x2f1   :  { %3685 = vmatpush.msra.mxu1 %v3462_v30  ;;  %v3238_v30 = vld [vmem:[#allocation7 + $0x530] sm:$0xff] }
 0x2f2   :  { %3714 = vmatpush.msra.mxu3 %v3160_v55  ;;  %3698 = vmatpush.msrb.mxu2 %v3100_v50  ;;  %v3307_v55 = vld [vmem:[#allocation7 + $0x758] sm:$0xff]  ;;  %v3124_v50 = vld [vmem:[#allocation7 + $0x1a0] sm:$0xff] }
 0x2f3   :  { %v2971_v23 = vpop.f32.mrf.mxu0  ;;  %3686 = vmatpush.msra.mxu1 %v3459_v39  ;;  %v2724_v39 = vadd.f32 %v4806_v44, %v4770_v49  ;;  %v3358_v49 = vld [vmem:[#allocation7 + $0x8f0] sm:$0xff] }
 0x2f4   :  { %v3058_v31 = vadd.f32 %v2971_v23, %v2722_v5  ;;  %3715 = vmatpush.msra.mxu3 %v3157_v59  ;;  %3699 = vmatpush.msrb.mxu2 %v3097_v6  ;;  %v3235_v59 = vld [vmem:[#allocation7 + $0x518] sm:$0xff]  ;;  %v3304_v6 = vld [vmem:[#allocation7 + $0x740] sm:$0xff]  ;;  %v3193_v23 = vld [vmem:[#allocation7 + $0x3c8] sm:$0xff] }
 0x2f5   :  { %3687 = vmatpush.msra.mxu1 %v3456_v24  ;;  %v3121_v24 = vld [vmem:[#allocation7 + $0x188] sm:$0xff]  ;;  %v3190_v44 = vld [vmem:[#allocation7 + $0x3b0] sm:$0xff] }
 0x2f6   :  { %v4830_v22 = vmax.f32 %v3058_v31, 0.0  ;;  %3716 = vmatpush.msra.mxu3 %v3154_v0  ;;  %3700 = vmatpush.msrb.mxu2 %v3094_v63  ;;  %v3232_v63 = vld [vmem:[#allocation7 + $0x500] sm:$0xff]  ;;  %v3301_v31 = vld [vmem:[#allocation7 + $0x728] sm:$0xff] }
 0x2f8   :  { %3608 = vmatmul.f32.vlgmr.msrb.gmra.mxu1 %v4830_v22  ;;  %3717 = vmatpush.msra.mxu3 %v3151_v52  ;;  %v2951_v38 = vpop.f32.mrf.mxu3 }
 0x2f9   :  { %3752 = vmatpush.msrb.mxu1 %v3262_v7  ;;  %3701 = vmatpush.msrb.mxu2 %v3091_v12  ;;  %v3057_v32 = vadd.f32 %v2951_v38, %v2721_v13  ;;  %v3298_v7 = vld [vmem:[#allocation7 + $0x710] sm:$0xff]  ;;  %v3355_v12 = vld [vmem:[#allocation7 + $0x8d8] sm:$0xff]  ;;  %v3184_v38 = vld [vmem:[#allocation7 + $0x380] sm:$0xff] }
 0x2fa   :  { %3718 = vmatpush.msra.mxu3 %v3148_v11  ;;  %v3187_v11 = vld [vmem:[#allocation7 + $0x398] sm:$0xff]  ;;  %v3226_v13 = vld [vmem:[#allocation7 + $0x4d0] sm:$0xff] }
 0x2fb   :  { %3753 = vmatpush.msrb.mxu1 %v3259_v14  ;;  %3702 = vmatpush.msrb.mxu2 %v3088_v15  ;;  %v4834_v51 = vmax.f32 %v3057_v32, 0.0  ;;  %v3295_v14 = vld [vmem:[#allocation7 + $0x6f8] sm:$0xff]  ;;  %v3352_v15 = vld [vmem:[#allocation7 + $0x8c0] sm:$0xff] }
 0x2fc   :  { %3719 = vmatpush.msra.mxu3 %v3145_v26  ;;  %v3223_v26 = vld [vmem:[#allocation7 + $0x4b8] sm:$0xff]  ;;  %v3292_v32 = vld [vmem:[#allocation7 + $0x6e0] sm:$0xff] }
 0x2fd   :  { %3754 = vmatpush.msrb.mxu1 %v3256_v1  ;;  %3703 = vmatpush.msrb.mxu2 %v3085_v37  ;;  %v2726_v1 = vadd.f32 %v4826_v58, %v4784_v20  ;;  %v3349_v37 = vld [vmem:[#allocation7 + $0x8a8] sm:$0xff]  ;;  %v3286_v20 = vld [vmem:[#allocation7 + $0x6b0] sm:$0xff]  ;;  %v3343_v58 = vld [vmem:[#allocation7 + $0x878] sm:$0xff] }
 0x2fe   :  { %3588 = vmatmul.f32.vlgmr.msra.gmra.mxu0 %v4834_v51  ;;  %3720 = vmatpush.msra.mxu3 %v3142_v25  ;;  %v3181_v25 = vld [vmem:[#allocation7 + $0x368] sm:$0xff] }
 0x2ff   :  { %3732 = vmatpush.msra.mxu0 %v3214_v45  ;;  %3755 = vmatpush.msrb.mxu1 %v3253_v27  ;;  %v3220_v27 = vld [vmem:[#allocation7 + $0x4a0] sm:$0xff] }
 0x300   :  { %3704 = vmatpush.msrb.mxu2 %v3082_v40  ;;  %3721 = vmatpush.msra.mxu3 %v3139_v18  ;;  %v3289_v40 = vld [vmem:[#allocation7 + $0x6c8] sm:$0xff] }
 0x301   :  { %3733 = vmatpush.msra.mxu0 %v3211_v36  ;;  %3756 = vmatpush.msrb.mxu1 %v3250_v62  ;;  %v3178_v36 = vld [vmem:[#allocation7 + $0x350] sm:$0xff] }
 0x302   :  { %v2991_v60 = vpop.f32.mrf.mxu1  ;;  %3705 = vmatpush.msrb.mxu2 %v3079_v53  ;;  %3722 = vmatpush.msra.mxu3 %v3136_v16  ;;  %v3346_v62 = vld [vmem:[#allocation7 + $0x890] sm:$0xff] }
 0x303   :  { %v3059_v8 = vadd.f32 %v2991_v60, %v2723_v33  ;;  %3734 = vmatpush.msra.mxu0 %v3208_v29  ;;  %3757 = vmatpush.msrb.mxu1 %v3247_v19  ;;  %v3454_v16 = vld [vmem:[#allocation7 + $0xbf0] sm:$0xff]  ;;  %v2725_v29 = vadd.f32 %v4812_v35, %v4781_v9  ;;  %v3175_v19 = vld [vmem:[#allocation7 + $0x338] sm:$0xff]  ;;  %v3169_v35 = vld [vmem:[#allocation7 + $0x308] sm:$0xff] }
 0x304   :  { %3706 = vmatpush.msrb.mxu2 %v3076_v42  ;;  %3723 = vmatpush.msra.mxu3 %v3133_v47  ;;  %v3283_v33 = vld [vmem:[#allocation7 + $0x698] sm:$0xff]  ;;  %v3340_v47 = vld [vmem:[#allocation7 + $0x860] sm:$0xff] }
 0x305   :  { %v4840_v61 = vmax.f32 %v3059_v8, 0.0  ;;  %3735 = vmatpush.msra.mxu0 %v3205_v3  ;;  %3758 = vmatpush.msrb.mxu1 %v3244_v10  ;;  %v3451_v60 = vld [vmem:[#allocation7 + $0xbd8] sm:$0xff]  ;;  %v3172_v10 = vld [vmem:[#allocation7 + $0x320] sm:$0xff] }
 0x306   :  { %3707 = vmatpush.msrb.mxu2 %v3073_v28  ;;  %3724 = vmatpush.msra.mxu3 %v3130_v21  ;;  %v3280_v8 = vld [vmem:[#allocation7 + $0x680] sm:$0xff]  ;;  %v3337_v28 = vld [vmem:[#allocation7 + $0x848] sm:$0xff] }
 0x307   :  { %3628 = vmatmul.f32.vlgmr.msra.gmra.mxu2 %v4840_v61  ;;  %3736 = vmatpush.msra.mxu0 %v3202_v46  ;;  %v3448_v21 = vld [vmem:[#allocation7 + $0xbc0] sm:$0xff]  ;;  %v3277_v46 = vld [vmem:[#allocation7 + $0x668] sm:$0xff] }
 0x308   :  { %3759 = vmatpush.msrb.mxu1 %v3241_v34  ;;  %3772 = vmatpush.msra.mxu2 %v3310_v17  ;;  %v3334_v34 = vld [vmem:[#allocation7 + $0x830] sm:$0xff] }
 0x309   :  { %3725 = vmatpush.msra.mxu3 %v3127_v48  ;;  %3737 = vmatpush.msra.mxu0 %v3199_v56  ;;  %v3011_v5 = vpop.f32.mrf.mxu2  ;;  %v3406_v17 = vld [vmem:[#allocation7 + $0xa70] sm:$0xff]  ;;  %v3445_v48 = vld [vmem:[#allocation7 + $0xba8] sm:$0xff] }
 0x30a   :  { %3760 = vmatpush.msrb.mxu1 %v3238_v30  ;;  %3773 = vmatpush.msra.mxu2 %v3307_v55  ;;  %v3060_v0 = vadd.f32 %v3011_v5, %v2724_v39  ;;  %v3274_v56 = vld [vmem:[#allocation7 + $0x650] sm:$0xff]  ;;  %v3331_v30 = vld [vmem:[#allocation7 + $0x818] sm:$0xff]  ;;  %v3328_v39 = vld [vmem:[#allocation7 + $0x800] sm:$0xff] }
 0x30b   :  { %3726 = vmatpush.msra.mxu3 %v3124_v50  ;;  %3738 = vmatpush.msra.mxu0 %v3196_v54  ;;  %v3403_v55 = vld [vmem:[#allocation7 + $0xa58] sm:$0xff]  ;;  %v3442_v50 = vld [vmem:[#allocation7 + $0xb90] sm:$0xff]  ;;  %v3268_v5 = vld [vmem:[#allocation7 + $0x620] sm:$0xff] }
 0x30c   :  { %3761 = vmatpush.msrb.mxu1 %v3235_v59  ;;  %3774 = vmatpush.msra.mxu2 %v3304_v6  ;;  %v4845_v52 = vmax.f32 %v3060_v0, 0.0  ;;  %v3271_v54 = vld [vmem:[#allocation7 + $0x638] sm:$0xff]  ;;  %v3400_v59 = vld [vmem:[#allocation7 + $0xa40] sm:$0xff] }
 0x30d   :  { %3727 = vmatpush.msra.mxu3 %v3121_v24  ;;  %3739 = vmatpush.msra.mxu0 %v3193_v23  ;;  %v3439_v6 = vld [vmem:[#allocation7 + $0xb78] sm:$0xff]  ;;  %v3325_v24 = vld [vmem:[#allocation7 + $0x7e8] sm:$0xff]  ;;  %v3436_v0 = vld [vmem:[#allocation7 + $0xb60] sm:$0xff] }
 0x30e   :  { %3762 = vmatpush.msrb.mxu1 %v3232_v63  ;;  %3775 = vmatpush.msra.mxu2 %v3301_v31  ;;  %v3397_v23 = vld [vmem:[#allocation7 + $0xa28] sm:$0xff]  ;;  %v3322_v31 = vld [vmem:[#allocation7 + $0x7d0] sm:$0xff] }
 0x30f   :  { %3648 = vmatmul.f32.vlgmr.msrb.gmra.mxu3 %v4845_v52  ;;  %3708 = vmatmul.f32.vlgmr.msrb.gmra.mxu2 %v4801_v43  ;;  %v3265_v63 = vld [vmem:[#allocation7 + $0x608] sm:$0xff] }
 0x310   :  { %3792 = vmatpush.msrb.mxu3 %v3358_v49  ;;  %3740 = vmatpush.msra.mxu0 %v3190_v44  ;;  %v3394_v49 = vld [vmem:[#allocation7 + $0xa10] sm:$0xff]  ;;  %v3433_v44 = vld [vmem:[#allocation7 + $0xb48] sm:$0xff] }
 0x311   :  { %3763 = vmatpush.msrb.mxu1 %v3229_v57  ;;  %3776 = vmatpush.msra.mxu2 %v3298_v7  ;;  %v3502_v57 = vld [vmem:[#allocation7 + $0xd70] sm:$0xff]  ;;  %v3319_v7 = vld [vmem:[#allocation7 + $0x7b8] sm:$0xff] }
 0x312   :  { %3793 = vmatpush.msrb.mxu3 %v3355_v12  ;;  %3741 = vmatpush.msra.mxu0 %v3187_v11  ;;  %v3391_v12 = vld [vmem:[#allocation7 + $0x9f8] sm:$0xff]  ;;  %v3430_v11 = vld [vmem:[#allocation7 + $0xb30] sm:$0xff] }
 0x313   :  { %3764 = vmatpush.msrb.mxu1 %v3226_v13  ;;  %3777 = vmatpush.msra.mxu2 %v3295_v14  ;;  %v3499_v13 = vld [vmem:[#allocation7 + $0xd58] sm:$0xff]  ;;  %v3316_v14 = vld [vmem:[#allocation7 + $0x7a0] sm:$0xff] }
 0x314   :  { %3794 = vmatpush.msrb.mxu3 %v3352_v15  ;;  %v3051_v45 = vpop.f32.mrf.mxu0  ;;  %3742 = vmatpush.msra.mxu0 %v3184_v38  ;;  %v3388_v15 = vld [vmem:[#allocation7 + $0x9e0] sm:$0xff]  ;;  %v3427_v38 = vld [vmem:[#allocation7 + $0xb18] sm:$0xff] }
 0x315   :  { %v3062_v18 = vadd.f32 %v3051_v45, %v2726_v1  ;;  %3765 = vmatpush.msrb.mxu1 %v3223_v26  ;;  %3778 = vmatpush.msra.mxu2 %v3292_v32  ;;  %v3496_v26 = vld [vmem:[#allocation7 + $0xd40] sm:$0xff]  ;;  %v3313_v32 = vld [vmem:[#allocation7 + $0x788] sm:$0xff]  ;;  %v3382_v45 = vld [vmem:[#allocation7 + $0x9b0] sm:$0xff] }
 0x316   :  { %3795 = vmatpush.msrb.mxu3 %v3349_v37  ;;  %3743 = vmatpush.msra.mxu0 %v3181_v25  ;;  %v3385_v1 = vld [vmem:[#allocation7 + $0x9c8] sm:$0xff]  ;;  %v3424_v37 = vld [vmem:[#allocation7 + $0xb00] sm:$0xff] }
 0x317   :  { %v4851_v53 = vmax.f32 %v3062_v18, 0.0  ;;  %3766 = vmatpush.msrb.mxu1 %v3220_v27  ;;  %3779 = vmatpush.msra.mxu2 %v3289_v40  ;;  %v3493_v25 = vld [vmem:[#allocation7 + $0xd28] sm:$0xff]  ;;  %v3119_v27 = vld [vmem:[#allocation7 + $0x178] sm:$0xff]  ;;  %v3490_v18 = vld [vmem:[#allocation7 + $0xd10] sm:$0xff] }
 0x318   :  { %3728 = vmatmul.f32.vlgmr.msra.gmra.mxu3 %v4816_v4  ;;  %3744 = vmatpush.msra.mxu0 %v3178_v36  ;;  %v3421_v40 = vld [vmem:[#allocation7 + $0xae8] sm:$0xff]  ;;  %v3379_v36 = vld [vmem:[#allocation7 + $0x998] sm:$0xff] }
 0x319   :  { %3796 = vmatpush.msrb.mxu3 %v3346_v62  ;;  %3767 = vmatpush.msrb.mxu1 %v3217_v2  ;;  %v3031_v42 = vpop.f32.mrf.mxu3  ;;  %v3116_v62 = vld [vmem:[#allocation7 + $0x160] sm:$0xff]  ;;  %v3418_v2 = vld [vmem:[#allocation7 + $0xad0] sm:$0xff] }
 0x31a   :  { %3780 = vmatpush.msra.mxu2 %v3286_v20  ;;  %3688 = vmatmul.f32.vlgmr.msra.gmra.mxu1 %v4851_v53  ;;  %v3061_v3 = vadd.f32 %v3031_v42, %v2725_v29  ;;  %v3487_v20 = vld [vmem:[#allocation7 + $0xcf8] sm:$0xff]  ;;  %v3110_v42 = vld [vmem:[#allocation7 + $0x130] sm:$0xff] }
 0x31b   :  { %3797 = vmatpush.msrb.mxu3 %v3343_v58  ;;  %3832 = vmatpush.msra.mxu1 %v3454_v16  ;;  %v3376_v58 = vld [vmem:[#allocation7 + $0x980] sm:$0xff]  ;;  %v3113_v16 = vld [vmem:[#allocation7 + $0x148] sm:$0xff]  ;;  %v3415_v29 = vld [vmem:[#allocation7 + $0xab8] sm:$0xff] }
 0x31c   :  { %3745 = vmatpush.msra.mxu0 %v3175_v19  ;;  %3781 = vmatpush.msra.mxu2 %v3283_v33  ;;  %v4857_v9 = vmax.f32 %v3061_v3, 0.0  ;;  %v3484_v19 = vld [vmem:[#allocation7 + $0xce0] sm:$0xff]  ;;  %v3373_v33 = vld [vmem:[#allocation7 + $0x968] sm:$0xff]  ;;  %v3370_v3 = vld [vmem:[#allocation7 + $0x950] sm:$0xff] }
 0x31d   :  { %3798 = vmatpush.msrb.mxu3 %v3340_v47  ;;  %3833 = vmatpush.msra.mxu1 %v3451_v60  ;;  %v3412_v47 = vld [vmem:[#allocation7 + $0xaa0] sm:$0xff]  ;;  %v3481_v60 = vld [vmem:[#allocation7 + $0xcc8] sm:$0xff] }
 0x31e   :  { %3746 = vmatpush.msra.mxu0 %v3172_v10  ;;  %3782 = vmatpush.msra.mxu2 %v3280_v8  ;;  %v3107_v10 = vld [vmem:[#allocation7 + $0x118] sm:$0xff]  ;;  %v3409_v8 = vld [vmem:[#allocation7 + $0xa88] sm:$0xff] }
 0x31f   :  { %3799 = vmatpush.msrb.mxu3 %v3337_v28  ;;  %3834 = vmatpush.msra.mxu1 %v3448_v21  ;;  %v3478_v28 = vld [vmem:[#allocation7 + $0xcb0] sm:$0xff]  ;;  %v3104_v21 = vld [vmem:[#allocation7 + $0x100] sm:$0xff] }
 0x320   :  { %3747 = vmatpush.msra.mxu0 %v3169_v35  ;;  %3783 = vmatpush.msra.mxu2 %v3277_v46  ;;  %v3215_v35 = vld [vmem:[#allocation7 + $0x478] sm:$0xff] }
 0x321   :  { %3668 = vmatmul.f32.vlgmr.msrb.gmra.mxu0 %v4857_v9  ;;  %3800 = vmatpush.msrb.mxu3 %v3334_v34  ;;  %v3367_v46 = vld [vmem:[#allocation7 + $0x938] sm:$0xff] }
 0x322   :  { %3812 = vmatpush.msrb.mxu0 %v3406_v17  ;;  %3835 = vmatpush.msra.mxu1 %v3445_v48  ;;  %v3475_v34 = vld [vmem:[#allocation7 + $0xc98] sm:$0xff]  ;;  %v3101_v17 = vld [vmem:[#allocation7 + $0xe8] sm:$0xff]  ;;  %v3212_v48 = vld [vmem:[#allocation7 + $0x460] sm:$0xff] }
 0x323   :  { %3784 = vmatpush.msra.mxu2 %v3274_v56  ;;  %3768 = vmatmul.f32.vlgmr.msrb.gmra.mxu1 %v4834_v51  ;;  %v3364_v56 = vld [vmem:[#allocation7 + $0x920] sm:$0xff] }
 0x324   :  { %3801 = vmatpush.msrb.mxu3 %v3331_v30  ;;  %3813 = vmatpush.msrb.mxu0 %v3403_v55  ;;  %v3472_v30 = vld [vmem:[#allocation7 + $0xc80] sm:$0xff]  ;;  %v3098_v55 = vld [vmem:[#allocation7 + $0xd0] sm:$0xff] }
 0x325   :  { %3836 = vmatpush.msra.mxu1 %v3442_v50  ;;  %3785 = vmatpush.msra.mxu2 %v3271_v54  ;;  %v3209_v50 = vld [vmem:[#allocation7 + $0x448] sm:$0xff] }
 0x326   :  { %3802 = vmatpush.msrb.mxu3 %v3328_v39  ;;  %3814 = vmatpush.msrb.mxu0 %v3400_v59  ;;  %v3361_v54 = vld [vmem:[#allocation7 + $0x908] sm:$0xff]  ;;  %v3095_v59 = vld [vmem:[#allocation7 + $0xb8] sm:$0xff] }
 0x327   :  { %3837 = vmatpush.msra.mxu1 %v3439_v6  ;;  %3786 = vmatpush.msra.mxu2 %v3268_v5  ;;  %v3469_v39 = vld [vmem:[#allocation7 + $0xc68] sm:$0xff]  ;;  %v3167_v6 = vld [vmem:[#allocation7 + $0x2f8] sm:$0xff]  ;;  %v3206_v5 = vld [vmem:[#allocation7 + $0x430] sm:$0xff] }
 0x328   :  { %3803 = vmatpush.msrb.mxu3 %v3325_v24  ;;  %3815 = vmatpush.msrb.mxu0 %v3397_v23  ;;  %v3466_v24 = vld [vmem:[#allocation7 + $0xc50] sm:$0xff]  ;;  %v3092_v23 = vld [vmem:[#allocation7 + $0xa0] sm:$0xff] }
 0x329   :  { %3838 = vmatpush.msra.mxu1 %v3436_v0  ;;  %3787 = vmatpush.msra.mxu2 %v3265_v63  ;;  %v3164_v0 = vld [vmem:[#allocation7 + $0x2e0] sm:$0xff]  ;;  %v3203_v63 = vld [vmem:[#allocation7 + $0x418] sm:$0xff] }
 0x32a   :  { %3748 = vmatmul.f32.vlgmr.msra.gmra.mxu0 %v4820_v41  ;;  %3788 = vmatmul.f32.vlgmr.msra.gmra.mxu2 %v4830_v22 }
 0x32b   :  { %3804 = vmatpush.msrb.mxu3 %v3322_v31  ;;  %3816 = vmatpush.msrb.mxu0 %v3394_v49  ;;  %v3463_v31 = vld [vmem:[#allocation7 + $0xc38] sm:$0xff]  ;;  %v3089_v49 = vld [vmem:[#allocation7 + $0x88] sm:$0xff] }
 0x32c   :  { %3839 = vmatpush.msra.mxu1 %v3433_v44  ;;  %3852 = vmatpush.msrb.mxu2 %v3502_v57  ;;  %v3161_v44 = vld [vmem:[#allocation7 + $0x2c8] sm:$0xff]  ;;  %v3200_v57 = vld [vmem:[#allocation7 + $0x400] sm:$0xff] }
 0x32d   :  { %3805 = vmatpush.msrb.mxu3 %v3319_v7  ;;  %3817 = vmatpush.msrb.mxu0 %v3391_v12  ;;  %v3460_v7 = vld [vmem:[#allocation7 + $0xc20] sm:$0xff]  ;;  %v3086_v12 = vld [vmem:[#allocation7 + $0x70] sm:$0xff] }
 0x32e   :  { %3840 = vmatpush.msra.mxu1 %v3430_v11  ;;  %3853 = vmatpush.msrb.mxu2 %v3499_v13  ;;  %v3158_v11 = vld [vmem:[#allocation7 + $0x2b0] sm:$0xff]  ;;  %v3197_v13 = vld [vmem:[#allocation7 + $0x3e8] sm:$0xff] }
 0x32f   :  { %3806 = vmatpush.msrb.mxu3 %v3316_v14  ;;  %3818 = vmatpush.msrb.mxu0 %v3388_v15  ;;  %v3457_v14 = vld [vmem:[#allocation7 + $0xc08] sm:$0xff]  ;;  %v3083_v15 = vld [vmem:[#allocation7 + $0x58] sm:$0xff] }
 0x330   :  { %3841 = vmatpush.msra.mxu1 %v3427_v38  ;;  %3854 = vmatpush.msrb.mxu2 %v3496_v26  ;;  %v3155_v38 = vld [vmem:[#allocation7 + $0x298] sm:$0xff]  ;;  %v3194_v26 = vld [vmem:[#allocation7 + $0x3d0] sm:$0xff] }
 0x331   :  { %3807 = vmatpush.msrb.mxu3 %v3313_v32  ;;  %3819 = vmatpush.msrb.mxu0 %v3385_v1  ;;  %v3263_v32 = vld [vmem:[#allocation7 + $0x5f8] sm:$0xff]  ;;  %v3080_v1 = vld [vmem:[#allocation7 + $0x40] sm:$0xff] }
 0x332   :  { %3842 = vmatpush.msra.mxu1 %v3424_v37  ;;  %3855 = vmatpush.msrb.mxu2 %v3493_v25  ;;  %v3152_v37 = vld [vmem:[#allocation7 + $0x280] sm:$0xff]  ;;  %v3191_v25 = vld [vmem:[#allocation7 + $0x3b8] sm:$0xff] }
 0x333   :  { %3808 = vmatmul.f32.vlgmr.msrb.gmra.mxu3 %v4840_v61  ;;  %3820 = vmatpush.msrb.mxu0 %v3382_v45  ;;  %v3260_v45 = vld [vmem:[#allocation7 + $0x5e0] sm:$0xff] }
 0x334   :  { %3872 = vmatpush.msra.mxu3 %v3119_v27  ;;  %3843 = vmatpush.msra.mxu1 %v3421_v40  ;;  %v3077_v27 = vld [vmem:[#allocation7 + $0x28] sm:$0xff] }
 0x335   :  { %3856 = vmatpush.msrb.mxu2 %v3490_v18  ;;  %3821 = vmatpush.msrb.mxu0 %v3379_v36  ;;  %v3149_v40 = vld [vmem:[#allocation7 + $0x268] sm:$0xff]  ;;  %v3188_v18 = vld [vmem:[#allocation7 + $0x3a0] sm:$0xff] }
 0x336   :  { %3873 = vmatpush.msra.mxu3 %v3116_v62  ;;  %3844 = vmatpush.msra.mxu1 %v3418_v2  ;;  %v3257_v36 = vld [vmem:[#allocation7 + $0x5c8] sm:$0xff]  ;;  %v3074_v62 = vld [vmem:[#allocation7 + $0x10] sm:$0xff] }
 0x337   :  { %3857 = vmatpush.msrb.mxu2 %v3487_v20  ;;  %3822 = vmatpush.msrb.mxu0 %v3376_v58  ;;  %v3146_v2 = vld [vmem:[#allocation7 + $0x250] sm:$0xff]  ;;  %v3185_v20 = vld [vmem:[#allocation7 + $0x388] sm:$0xff] }
 0x338   :  { %3874 = vmatpush.msra.mxu3 %v3113_v16  ;;  %3845 = vmatpush.msra.mxu1 %v3415_v29  ;;  %v3254_v58 = vld [vmem:[#allocation7 + $0x5b0] sm:$0xff]  ;;  %v3143_v16 = vld [vmem:[#allocation7 + $0x238] sm:$0xff] }
 0x339   :  { %3858 = vmatpush.msrb.mxu2 %v3484_v19  ;;  %3823 = vmatpush.msrb.mxu0 %v3373_v33  ;;  %v3311_v29 = vld [vmem:[#allocation7 + $0x778] sm:$0xff]  ;;  %v3182_v19 = vld [vmem:[#allocation7 + $0x370] sm:$0xff] }
 0x33a   :  { %3875 = vmatpush.msra.mxu3 %v3110_v42  ;;  %3846 = vmatpush.msra.mxu1 %v3412_v47  ;;  %v3251_v33 = vld [vmem:[#allocation7 + $0x598] sm:$0xff]  ;;  %v3140_v42 = vld [vmem:[#allocation7 + $0x220] sm:$0xff] }
 0x33b   :  { %3859 = vmatpush.msrb.mxu2 %v3481_v60  ;;  %3824 = vmatpush.msrb.mxu0 %v3370_v3  ;;  %v3308_v47 = vld [vmem:[#allocation7 + $0x760] sm:$0xff]  ;;  %v3179_v60 = vld [vmem:[#allocation7 + $0x358] sm:$0xff] }
 0x33c   :  { %3876 = vmatpush.msra.mxu3 %v3107_v10  ;;  %3847 = vmatpush.msra.mxu1 %v3409_v8  ;;  %v3248_v3 = vld [vmem:[#allocation7 + $0x580] sm:$0xff]  ;;  %v3137_v10 = vld [vmem:[#allocation7 + $0x208] sm:$0xff] }
 0x33d   :  { %3860 = vmatpush.msrb.mxu2 %v3478_v28  ;;  %3848 = vmatmul.f32.vlgmr.msra.gmra.mxu1 %v4857_v9  ;;  %v3305_v8 = vld [vmem:[#allocation7 + $0x748] sm:$0xff]  ;;  %v3176_v28 = vld [vmem:[#allocation7 + $0x340] sm:$0xff] }
 0x33e   :  { %3877 = vmatpush.msra.mxu3 %v3104_v21  ;;  %3912 = vmatpush.msrb.mxu1 %v3215_v35  ;;  %v3245_v21 = vld [vmem:[#allocation7 + $0x568] sm:$0xff]  ;;  %v3134_v35 = vld [vmem:[#allocation7 + $0x1f0] sm:$0xff] }
 0x33f   :  { %3825 = vmatpush.msrb.mxu0 %v3367_v46  ;;  %3861 = vmatpush.msrb.mxu2 %v3475_v34  ;;  %v3302_v46 = vld [vmem:[#allocation7 + $0x730] sm:$0xff]  ;;  %v3173_v34 = vld [vmem:[#allocation7 + $0x328] sm:$0xff] }
 0x340   :  { %3878 = vmatpush.msra.mxu3 %v3101_v17  ;;  %3913 = vmatpush.msrb.mxu1 %v3212_v48  ;;  %v3131_v17 = vld [vmem:[#allocation7 + $0x1d8] sm:$0xff] }
 0x341   :  { %3826 = vmatpush.msrb.mxu0 %v3364_v56  ;;  %3862 = vmatpush.msrb.mxu2 %v3472_v30  ;;  %v3299_v48 = vld [vmem:[#allocation7 + $0x718] sm:$0xff]  ;;  %v3170_v56 = vld [vmem:[#allocation7 + $0x310] sm:$0xff] }
 0x342   :  { %3879 = vmatpush.msra.mxu3 %v3098_v55  ;;  %3914 = vmatpush.msrb.mxu1 %v3209_v50  ;;  %v3239_v30 = vld [vmem:[#allocation7 + $0x538] sm:$0xff]  ;;  %v3296_v55 = vld [vmem:[#allocation7 + $0x700] sm:$0xff] }
 0x343   :  { %3827 = vmatpush.msrb.mxu0 %v3361_v54  ;;  %3863 = vmatpush.msrb.mxu2 %v3469_v39  ;;  %v3407_v50 = vld [vmem:[#allocation7 + $0xa78] sm:$0xff]  ;;  %v3128_v54 = vld [vmem:[#allocation7 + $0x1c0] sm:$0xff] }
 0x344   :  { %3828 = vmatmul.f32.vlgmr.msrb.gmra.mxu0 %v4845_v52  ;;  %3880 = vmatpush.msra.mxu3 %v3095_v59  ;;  %v3236_v39 = vld [vmem:[#allocation7 + $0x520] sm:$0xff]  ;;  %v3293_v59 = vld [vmem:[#allocation7 + $0x6e8] sm:$0xff] }
 0x345   :  { %3892 = vmatpush.msra.mxu0 %v3167_v6  ;;  %3915 = vmatpush.msrb.mxu1 %v3206_v5  ;;  %v3404_v6 = vld [vmem:[#allocation7 + $0xa60] sm:$0xff]  ;;  %v3125_v5 = vld [vmem:[#allocation7 + $0x1a8] sm:$0xff] }
 0x346   :  { %3864 = vmatpush.msrb.mxu2 %v3466_v24  ;;  %3881 = vmatpush.msra.mxu3 %v3092_v23  ;;  %v3233_v24 = vld [vmem:[#allocation7 + $0x508] sm:$0xff]  ;;  %v3290_v23 = vld [vmem:[#allocation7 + $0x6d0] sm:$0xff] }
 0x347   :  { %3893 = vmatpush.msra.mxu0 %v3164_v0  ;;  %3916 = vmatpush.msrb.mxu1 %v3203_v63  ;;  %v3401_v0 = vld [vmem:[#allocation7 + $0xa48] sm:$0xff]  ;;  %v3122_v63 = vld [vmem:[#allocation7 + $0x190] sm:$0xff] }
 0x348   :  { %3865 = vmatpush.msrb.mxu2 %v3463_v31  ;;  %3882 = vmatpush.msra.mxu3 %v3089_v49  ;;  %v3230_v31 = vld [vmem:[#allocation7 + $0x4f0] sm:$0xff]  ;;  %v3287_v49 = vld [vmem:[#allocation7 + $0x6b8] sm:$0xff] }
 0x349   :  { %3894 = vmatpush.msra.mxu0 %v3161_v44  ;;  %3917 = vmatpush.msrb.mxu1 %v3200_v57  ;;  %v3398_v44 = vld [vmem:[#allocation7 + $0xa30] sm:$0xff]  ;;  %v3227_v57 = vld [vmem:[#allocation7 + $0x4d8] sm:$0xff] }
 0x34a   :  { %3866 = vmatpush.msrb.mxu2 %v3460_v7  ;;  %3883 = vmatpush.msra.mxu3 %v3086_v12  ;;  %v3284_v7 = vld [vmem:[#allocation7 + $0x6a0] sm:$0xff] }
 0x34b   :  { %3895 = vmatpush.msra.mxu0 %v3158_v11  ;;  %3918 = vmatpush.msrb.mxu1 %v3197_v13  ;;  %v3356_v12 = vld [vmem:[#allocation7 + $0x8e0] sm:$0xff]  ;;  %v3395_v11 = vld [vmem:[#allocation7 + $0xa18] sm:$0xff] }
 0x34c   :  { %3867 = vmatpush.msrb.mxu2 %v3457_v14  ;;  %3884 = vmatpush.msra.mxu3 %v3083_v15  ;;  %v3224_v13 = vld [vmem:[#allocation7 + $0x4c0] sm:$0xff]  ;;  %v3281_v14 = vld [vmem:[#allocation7 + $0x688] sm:$0xff] }
 0x34d   :  { %3868 = vmatmul.f32.vlgmr.msrb.gmra.mxu2 %v4851_v53  ;;  %3896 = vmatpush.msra.mxu0 %v3155_v38  ;;  %v3353_v15 = vld [vmem:[#allocation7 + $0x8c8] sm:$0xff]  ;;  %v3392_v38 = vld [vmem:[#allocation7 + $0xa00] sm:$0xff] }
 0x34e   :  { %3919 = vmatpush.msrb.mxu1 %v3194_v26  ;;  %3932 = vmatpush.msra.mxu2 %v3263_v32  ;;  %v3221_v26 = vld [vmem:[#allocation7 + $0x4a8] sm:$0xff]  ;;  %v3278_v32 = vld [vmem:[#allocation7 + $0x670] sm:$0xff] }
 0x34f   :  { %3885 = vmatpush.msra.mxu3 %v3080_v1  ;;  %3897 = vmatpush.msra.mxu0 %v3152_v37  ;;  %v3350_v1 = vld [vmem:[#allocation7 + $0x8b0] sm:$0xff]  ;;  %v3389_v37 = vld [vmem:[#allocation7 + $0x9e8] sm:$0xff] }
 0x350   :  { %3920 = vmatpush.msrb.mxu1 %v3191_v25  ;;  %3933 = vmatpush.msra.mxu2 %v3260_v45  ;;  %v3275_v25 = vld [vmem:[#allocation7 + $0x658] sm:$0xff] }
 0x351   :  { %3886 = vmatpush.msra.mxu3 %v3077_v27  ;;  %3898 = vmatpush.msra.mxu0 %v3149_v40  ;;  %v3347_v45 = vld [vmem:[#allocation7 + $0x898] sm:$0xff]  ;;  %v3386_v27 = vld [vmem:[#allocation7 + $0x9d0] sm:$0xff] }
 0x352   :  { %3921 = vmatpush.msrb.mxu1 %v3188_v18  ;;  %3934 = vmatpush.msra.mxu2 %v3257_v36  ;;  %v3455_v40 = vld [vmem:[#allocation7 + $0xbf8] sm:$0xff]  ;;  %v3272_v18 = vld [vmem:[#allocation7 + $0x640] sm:$0xff] }
 0x353   :  { %3887 = vmatpush.msra.mxu3 %v3074_v62  ;;  %3899 = vmatpush.msra.mxu0 %v3146_v2  ;;  %v3344_v36 = vld [vmem:[#allocation7 + $0x880] sm:$0xff]  ;;  %v3383_v62 = vld [vmem:[#allocation7 + $0x9b8] sm:$0xff] }
 0x354   :  { %3922 = vmatpush.msrb.mxu1 %v3185_v20  ;;  %3935 = vmatpush.msra.mxu2 %v3254_v58  ;;  %v3452_v2 = vld [vmem:[#allocation7 + $0xbe0] sm:$0xff]  ;;  %v3269_v20 = vld [vmem:[#allocation7 + $0x628] sm:$0xff] }
 0x355   :  { %3888 = vmatmul.f32.vlgmr.msra.gmra.mxu3 %v4801_v43  ;;  %3900 = vmatpush.msra.mxu0 %v3143_v16  ;;  %v3242_v43 = vld [vmem:[#allocation7 + $0x550] sm:$0xff]  ;;  %v3341_v58 = vld [vmem:[#allocation7 + $0x868] sm:$0xff]  ;;  %v3380_v16 = vld [vmem:[#allocation7 + $0x9a0] sm:$0xff] }
 0x356   :  { %3952 = vmatpush.msrb.mxu3 %v3311_v29  ;;  %3923 = vmatpush.msrb.mxu1 %v3182_v19  ;;  %v3449_v29 = vld [vmem:[#allocation7 + $0xbc8] sm:$0xff]  ;;  %v3266_v19 = vld [vmem:[#allocation7 + $0x610] sm:$0xff] }
 0x357   :  { %3936 = vmatpush.msra.mxu2 %v3251_v33  ;;  %3901 = vmatpush.msra.mxu0 %v3140_v42  ;;  %v3338_v33 = vld [vmem:[#allocation7 + $0x850] sm:$0xff]  ;;  %v3377_v42 = vld [vmem:[#allocation7 + $0x988] sm:$0xff] }
 0x358   :  { %3953 = vmatpush.msrb.mxu3 %v3308_v47  ;;  %3924 = vmatpush.msrb.mxu1 %v3179_v60  ;;  %v3446_v47 = vld [vmem:[#allocation7 + $0xbb0] sm:$0xff]  ;;  %v3503_v60 = vld [vmem:[#allocation7 + $0xd78] sm:$0xff] }
 0x359   :  { %3937 = vmatpush.msra.mxu2 %v3248_v3  ;;  %3902 = vmatpush.msra.mxu0 %v3137_v10  ;;  %v3374_v3 = vld [vmem:[#allocation7 + $0x970] sm:$0xff]  ;;  %v3443_v10 = vld [vmem:[#allocation7 + $0xb98] sm:$0xff] }
 0x35a   :  { %3954 = vmatpush.msrb.mxu3 %v3305_v8  ;;  %3925 = vmatpush.msrb.mxu1 %v3176_v28  ;;  %v3332_v8 = vld [vmem:[#allocation7 + $0x820] sm:$0xff] }
 0x35b   :  { %3938 = vmatpush.msra.mxu2 %v3245_v21  ;;  %3903 = vmatpush.msra.mxu0 %v3134_v35  ;;  %v3500_v28 = vld [vmem:[#allocation7 + $0xd60] sm:$0xff]  ;;  %v3371_v21 = vld [vmem:[#allocation7 + $0x958] sm:$0xff] }
 0x35c   :  { %3955 = vmatpush.msrb.mxu3 %v3302_v46  ;;  %3926 = vmatpush.msrb.mxu1 %v3173_v34  ;;  %v3440_v35 = vld [vmem:[#allocation7 + $0xb80] sm:$0xff]  ;;  %v3329_v46 = vld [vmem:[#allocation7 + $0x808] sm:$0xff] }
 0x35d   :  { %3939 = vmatpush.msra.mxu2 %v3242_v43  ;;  %3904 = vmatpush.msra.mxu0 %v3131_v17  ;;  %v3497_v34 = vld [vmem:[#allocation7 + $0xd48] sm:$0xff]  ;;  %v3368_v43 = vld [vmem:[#allocation7 + $0x940] sm:$0xff] }
 0x35e   :  { %3956 = vmatpush.msrb.mxu3 %v3299_v48  ;;  %3927 = vmatpush.msrb.mxu1 %v3170_v56  ;;  %v3437_v17 = vld [vmem:[#allocation7 + $0xb68] sm:$0xff]  ;;  %v3326_v48 = vld [vmem:[#allocation7 + $0x7f0] sm:$0xff] }
 0x35f   :  { %3940 = vmatpush.msra.mxu2 %v3239_v30  ;;  %3928 = vmatmul.f32.vlgmr.msrb.gmra.mxu1 %v4820_v41  ;;  %v3359_v41 = vld [vmem:[#allocation7 + $0x8f8] sm:$0xff]  ;;  %v3494_v56 = vld [vmem:[#allocation7 + $0xd30] sm:$0xff]  ;;  %v3365_v30 = vld [vmem:[#allocation7 + $0x928] sm:$0xff] }
 0x360   :  { %3957 = vmatpush.msrb.mxu3 %v3296_v55  ;;  %3992 = vmatpush.msra.mxu1 %v3407_v50  ;;  %v3323_v55 = vld [vmem:[#allocation7 + $0x7d8] sm:$0xff] }
 0x361   :  { %3905 = vmatpush.msra.mxu0 %v3128_v54  ;;  %3941 = vmatpush.msra.mxu2 %v3236_v39  ;;  %v3491_v50 = vld [vmem:[#allocation7 + $0xd18] sm:$0xff]  ;;  %v3362_v54 = vld [vmem:[#allocation7 + $0x910] sm:$0xff] }
 0x362   :  { %3958 = vmatpush.msrb.mxu3 %v3293_v59  ;;  %3993 = vmatpush.msra.mxu1 %v3404_v6  ;;  %v3431_v39 = vld [vmem:[#allocation7 + $0xb38] sm:$0xff]  ;;  %v3488_v59 = vld [vmem:[#allocation7 + $0xd00] sm:$0xff] }
 0x363   :  { %3906 = vmatpush.msra.mxu0 %v3125_v5  ;;  %3942 = vmatpush.msra.mxu2 %v3233_v24  ;;  %v3320_v6 = vld [vmem:[#allocation7 + $0x7c0] sm:$0xff]  ;;  %v3485_v24 = vld [vmem:[#allocation7 + $0xce8] sm:$0xff] }
 0x364   :  { %3959 = vmatpush.msrb.mxu3 %v3290_v23  ;;  %3994 = vmatpush.msra.mxu1 %v3401_v0  ;;  %v3428_v5 = vld [vmem:[#allocation7 + $0xb20] sm:$0xff]  ;;  %v3317_v23 = vld [vmem:[#allocation7 + $0x7a8] sm:$0xff] }
 0x365   :  { %3907 = vmatpush.msra.mxu0 %v3122_v63  ;;  %3943 = vmatpush.msra.mxu2 %v3230_v31  ;;  %v3425_v0 = vld [vmem:[#allocation7 + $0xb08] sm:$0xff]  ;;  %v3482_v63 = vld [vmem:[#allocation7 + $0xcd0] sm:$0xff] }
 0x366   :  { %3908 = vmatmul.f32.vlgmr.msra.gmra.mxu0 %v4816_v4  ;;  %3960 = vmatpush.msrb.mxu3 %v3287_v49  ;;  %v3218_v4 = vld [vmem:[#allocation7 + $0x490] sm:$0xff] }
 0x367   :  { %3972 = vmatpush.msrb.mxu0 %v3359_v41  ;;  %3995 = vmatpush.msra.mxu1 %v3398_v44  ;;  %v3314_v31 = vld [vmem:[#allocation7 + $0x790] sm:$0xff]  ;;  %v3479_v41 = vld [vmem:[#allocation7 + $0xcb8] sm:$0xff] }
 0x368   :  { %3944 = vmatpush.msra.mxu2 %v3227_v57  ;;  %3961 = vmatpush.msrb.mxu3 %v3284_v7  ;;  %v3422_v49 = vld [vmem:[#allocation7 + $0xaf0] sm:$0xff]  ;;  %v4070_v44 = vld [vmem:[#allocation10 + $0x78] sm:$0xff] }
 0x369   :  { %3973 = vmatpush.msrb.mxu0 %v3356_v12  ;;  %3996 = vmatpush.msra.mxu1 %v3395_v11  ;;  %v3419_v57 = vld [vmem:[#allocation7 + $0xad8] sm:$0xff]  ;;  %v4874_v12 = vld [vmem:[#allocation9] sm:$0x7] }
 0x36a   :  { %3945 = vmatpush.msra.mxu2 %v3224_v13  ;;  %3962 = vmatpush.msrb.mxu3 %v3281_v14  ;;  %v4069_v7 = vld [vmem:[#allocation10 + $0x70] sm:$0xff]  ;;  %v3416_v11 = vld [vmem:[#allocation7 + $0xac0] sm:$0xff]  ;;  %v3473_v13 = vld [vmem:[#allocation7 + $0xc88] sm:$0xff] }
 0x36b   :  { %3974 = vmatpush.msrb.mxu0 %v3353_v15  ;;  %3997 = vmatpush.msra.mxu1 %v3392_v38  ;;  %v4068_v14 = vld [vmem:[#allocation10 + $0x68] sm:$0xff]  ;;  %v3506_v38 = vperm.slane %v4874_v12, 0 }
 0x36c   :  { %3946 = vmatpush.msra.mxu2 %v3221_v26  ;;  %3963 = vmatpush.msrb.mxu3 %v3278_v32  ;;  %v3413_v15 = vld [vmem:[#allocation7 + $0xaa8] sm:$0xff]  ;;  %v3470_v26 = vld [vmem:[#allocation7 + $0xc70] sm:$0xff] }
 0x36d   :  { %3975 = vmatpush.msrb.mxu0 %v3350_v1  ;;  %3998 = vmatpush.msra.mxu1 %v3389_v37  ;;  %v4067_v32 = vld [vmem:[#allocation10 + $0x60] sm:$0xff]  ;;  %v3529_v1 = vpop.f32.mrf.mxu1  ;;  %v3467_v37 = vld [vmem:[#allocation7 + $0xc58] sm:$0xff] }
 0x36e   :  { %3947 = vmatpush.msra.mxu2 %v3218_v4  ;;  %3964 = vmatpush.msrb.mxu3 %v3275_v25  ;;  %v3549_v4 = vpop.f32.mrf.mxu2  ;;  %v4066_v25 = vld [vmem:[#allocation10 + $0x58] sm:$0xff] }
 0x36f   :  { %3948 = vmatmul.f32.vlgmr.msra.gmra.mxu2 %v4834_v51  ;;  %3976 = vmatpush.msrb.mxu0 %v3347_v45  ;;  %v3335_v51 = vld [vmem:[#allocation7 + $0x838] sm:$0xff] }
 0x370   :  { %3999 = vmatpush.msra.mxu1 %v3386_v27  ;;  %4012 = vmatpush.msrb.mxu2 %v3455_v40  ;;  %v4086_v45 = vld [vmem:[#allocation10 + $0xf8] sm:$0xff]  ;;  %v3530_v27 = vadd.f32 %v3529_v1, %v3506_v38 }
 0x371   :  { %3965 = vmatpush.msrb.mxu3 %v3272_v18  ;;  %3977 = vmatpush.msrb.mxu0 %v3344_v36  ;;  %v3464_v40 = vld [vmem:[#allocation7 + $0xc40] sm:$0xff]  ;;  %v3569_v18 = vpop.f32.mrf.mxu3  ;;  %v4065_v36 = vld [vmem:[#allocation10 + $0x50] sm:$0xff] }
 0x372   :  { %4000 = vmatpush.msra.mxu1 %v3383_v62  ;;  %4013 = vmatpush.msrb.mxu2 %v3452_v2  ;;  %v3550_v62 = vadd.f32 %v3549_v4, %v3530_v27  ;;  %v3461_v2 = vld [vmem:[#allocation7 + $0xc28] sm:$0xff] }
 0x373   :  { %3966 = vmatpush.msrb.mxu3 %v3269_v20  ;;  %3978 = vmatpush.msrb.mxu0 %v3341_v58  ;;  %v4064_v58 = vld [vmem:[#allocation10 + $0x48] sm:$0xff] }
 0x374   :  { %4001 = vmatpush.msra.mxu1 %v3380_v16  ;;  %4014 = vmatpush.msrb.mxu2 %v3449_v29  ;;  %v3570_v16 = vadd.f32 %v3569_v18, %v3550_v62  ;;  %v3458_v29 = vld [vmem:[#allocation7 + $0xc10] sm:$0xff] }
 0x375   :  { %3967 = vmatpush.msrb.mxu3 %v3266_v19  ;;  %3979 = vmatpush.msrb.mxu0 %v3338_v33  ;;  %v4063_v19 = vld [vmem:[#allocation10 + $0x40] sm:$0xff]  ;;  %v4101_v62 = vld [vmem:[#allocation10 + $0x170] sm:$0xff] }
 0x376   :  { %4002 = vmatpush.msra.mxu1 %v3377_v42  ;;  %4015 = vmatpush.msrb.mxu2 %v3446_v47  ;;  %v4062_v42 = vld [vmem:[#allocation10 + $0x38] sm:$0xff]  ;;  %v4084_v47 = vld [vmem:[#allocation10 + $0xe8] sm:$0xff] }
 0x377   :  { %3968 = vmatmul.f32.vlgmr.msrb.gmra.mxu3 %v4830_v22  ;;  %3980 = vmatpush.msrb.mxu0 %v3335_v51  ;;  %v3434_v22 = vld [vmem:[#allocation7 + $0xb50] sm:$0xff]  ;;  %v3609_v51 = vpop.f32.mrf.mxu1 }
 0x378   :  { %4032 = vmatpush.msra.mxu3 %v3503_v60  ;;  %4003 = vmatpush.msra.mxu1 %v3374_v3  ;;  %v4061_v3 = vld [vmem:[#allocation10 + $0x30] sm:$0xff] }
 0x379   :  { %4016 = vmatpush.msrb.mxu2 %v3443_v10  ;;  %3981 = vmatpush.msrb.mxu0 %v3332_v8 }
 0x37a   :  { %4033 = vmatpush.msra.mxu3 %v3500_v28  ;;  %4004 = vmatpush.msra.mxu1 %v3371_v21  ;;  %v4060_v28 = vld [vmem:[#allocation10 + $0x28] sm:$0xff]  ;;  %v4083_v21 = vld [vmem:[#allocation10 + $0xe0] sm:$0xff] }
 0x37b   :  { %4017 = vmatpush.msrb.mxu2 %v3440_v35  ;;  %3982 = vmatpush.msrb.mxu0 %v3329_v46  ;;  %v3589_v20 = vpop.f32.mrf.mxu0  ;;  %v4082_v46 = vld [vmem:[#allocation10 + $0xd8] sm:$0xff] }
 0x37c   :  { %4034 = vmatpush.msra.mxu3 %v3497_v34  ;;  %4005 = vmatpush.msra.mxu1 %v3368_v43  ;;  %v3590_v33 = vadd.f32 %v3589_v20, %v3570_v16  ;;  %v4059_v34 = vld [vmem:[#allocation10 + $0x20] sm:$0xff]  ;;  %v4097_v16 = vld [vmem:[#allocation10 + $0x150] sm:$0xff] }
 0x37d   :  { %4018 = vmatpush.msrb.mxu2 %v3437_v17  ;;  %3983 = vmatpush.msrb.mxu0 %v3326_v48  ;;  %v4058_v48 = vld [vmem:[#allocation10 + $0x18] sm:$0xff]  ;;  %v4099_v20 = vld [vmem:[#allocation10 + $0x160] sm:$0xff] }
 0x37e   :  { %4035 = vmatpush.msra.mxu3 %v3494_v56  ;;  %4006 = vmatpush.msra.mxu1 %v3365_v30  ;;  %v3610_v10 = vadd.f32 %v3609_v51, %v3590_v33  ;;  %v4094_v33 = vld [vmem:[#allocation10 + $0x138] sm:$0xff] }
 0x37f   :  { %4019 = vmatpush.msrb.mxu2 %v3434_v22  ;;  %3984 = vmatpush.msrb.mxu0 %v3323_v55  ;;  %v4057_v22 = vld [vmem:[#allocation10 + $0x10] sm:$0xff]  ;;  %v4090_v51 = vld [vmem:[#allocation10 + $0x118] sm:$0xff] }
 0x380   :  { %4036 = vmatpush.msra.mxu3 %v3491_v50  ;;  %4007 = vmatpush.msra.mxu1 %v3362_v54  ;;  %v4056_v50 = vld [vmem:[#allocation10 + $0x8] sm:$0xff] }
 0x381   :  { %4020 = vmatpush.msrb.mxu2 %v3431_v39  ;;  %4008 = vmatmul.f32.vlgmr.msra.gmra.mxu1 %v4845_v52  ;;  %v3476_v52 = vld [vmem:[#allocation7 + $0xca0] sm:$0xff]  ;;  %v4080_v54 = vld [vmem:[#allocation10 + $0xc8] sm:$0xff] }
 0x382   :  { %4037 = vmatpush.msra.mxu3 %v3488_v59  ;;  %3985 = vmatpush.msrb.mxu0 %v3320_v6  ;;  %v4079_v39 = vld [vmem:[#allocation10 + $0xc0] sm:$0xff] }
 0x383   :  { %4021 = vmatpush.msrb.mxu2 %v3428_v5  ;;  %4127 = vmatpush.msrb.mxu1 %v4086_v45  ;;  %v4055_v6 = vld [vmem:[#allocation10] sm:$0xff]  ;;  %v4078_v5 = vld [vmem:[#allocation10 + $0xb8] sm:$0xff] }
 0x384   :  { %4038 = vmatpush.msra.mxu3 %v3485_v24  ;;  %3986 = vmatpush.msrb.mxu0 %v3317_v23  ;;  %v4077_v24 = vld [vmem:[#allocation10 + $0xb0] sm:$0xff]  ;;  %v4076_v23 = vld [vmem:[#allocation10 + $0xa8] sm:$0xff] }
 0x385   :  { %4022 = vmatpush.msrb.mxu2 %v3425_v0  ;;  %v4075_v0 = vld [vmem:[#allocation10 + $0xa0] sm:$0xff] }
 0x386   :  { %4039 = vmatpush.msra.mxu3 %v3482_v63  ;;  %3987 = vmatpush.msrb.mxu0 %v3314_v31  ;;  %v4074_v63 = vld [vmem:[#allocation10 + $0x98] sm:$0xff]  ;;  %v4073_v31 = vld [vmem:[#allocation10 + $0x90] sm:$0xff] }
 0x387   :  { %4023 = vmatpush.msrb.mxu2 %v3422_v49  ;;  %3988 = vmatmul.f32.vlgmr.msrb.gmra.mxu0 %v4840_v61  ;;  %v3410_v61 = vld [vmem:[#allocation7 + $0xa90] sm:$0xff] }
 0x388   :  { %4040 = vmatpush.msra.mxu3 %v3479_v41  ;;  %4107 = vmatpush.msra.mxu0 %v4070_v44  ;;  %v4072_v49 = vld [vmem:[#allocation10 + $0x88] sm:$0xff]  ;;  %v4071_v41 = vld [vmem:[#allocation10 + $0x80] sm:$0xff]  ;;  %v3507_v44 = vperm.slane %v4874_v12, 1 }
 0x389   :  { %4024 = vmatpush.msrb.mxu2 %v3419_v57 }
 0x38a   :  { %4041 = vmatpush.msra.mxu3 %v3476_v52  ;;  %4108 = vmatpush.msra.mxu0 %v4069_v7  ;;  %v3629_v60 = vpop.f32.mrf.mxu2 }
 0x38b   :  { %4025 = vmatpush.msrb.mxu2 %v3416_v11  ;;  %v3630_v35 = vadd.f32 %v3629_v60, %v3610_v10  ;;  %v4089_v60 = vld [vmem:[#allocation10 + $0x110] sm:$0xff]  ;;  %v4087_v10 = vld [vmem:[#allocation10 + $0x100] sm:$0xff] }
 0x38c   :  { %4042 = vmatpush.msra.mxu3 %v3473_v13  ;;  %4109 = vmatpush.msra.mxu0 %v4068_v14 }
 0x38d   :  { %4026 = vmatpush.msrb.mxu2 %v3413_v15 }
 0x38e   :  { %4043 = vmatpush.msra.mxu3 %v3470_v26  ;;  %4110 = vmatpush.msra.mxu0 %v4067_v32 }
 0x38f   :  { %4027 = vmatpush.msrb.mxu2 %v3410_v61 }
 0x390   :  { %4028 = vmatmul.f32.vlgmr.msrb.gmra.mxu2 %v4857_v9  ;;  %4044 = vmatpush.msra.mxu3 %v3467_v37  ;;  %v4085_v9 = vld [vmem:[#allocation10 + $0xf0] sm:$0xff] }
 0x391   :  { %4111 = vmatpush.msra.mxu0 %v4066_v25  ;;  %4128 = vmatpush.msrb.mxu1 %v4085_v9  ;;  %v4092_v9 = vld [vmem:[#allocation10 + $0x128] sm:$0xff] }
 0x392   :  { %4045 = vmatpush.msra.mxu3 %v3464_v40  ;;  %v3649_v8 = vpop.f32.mrf.mxu3  ;;  %v3709_v57 = vpop.f32.mrf.mxu2 }
 0x393   :  { %4112 = vmatpush.msra.mxu0 %v4065_v36  ;;  %4129 = vmatpush.msrb.mxu1 %v4084_v47  ;;  %v3650_v43 = vadd.f32 %v3649_v8, %v3630_v35  ;;  %v3710_v7 = vadd.f32 %v3709_v57, %v3507_v44  ;;  %v4102_v36 = vld [vmem:[#allocation10 + $0x178] sm:$0xff]  ;;  %v4091_v47 = vld [vmem:[#allocation10 + $0x120] sm:$0xff]  ;;  %v3508_v8 = vperm.slane %v4874_v12, 2 }
 0x394   :  { %4046 = vmatpush.msra.mxu3 %v3461_v2  ;;  %4147 = vmatpush.msra.mxu2 %v4102_v36  ;;  %v4100_v2 = vld [vmem:[#allocation10 + $0x168] sm:$0xff]  ;;  %v4215_v12 = vld [vmem:[#allocation12] ss:$0 sm:$0xff] }
 0x395   :  { %4113 = vmatpush.msra.mxu0 %v4064_v58  ;;  %4130 = vmatpush.msrb.mxu1 %v4083_v21  ;;  %v4098_v58 = vld [vmem:[#allocation10 + $0x158] sm:$0xff] }
 0x396   :  { %4047 = vmatpush.msra.mxu3 %v3458_v29  ;;  %4148 = vmatpush.msra.mxu2 %v4101_v62  ;;  %v4096_v29 = vld [vmem:[#allocation10 + $0x148] sm:$0xff] }
 0x397   :  { %4048 = vmatmul.f32.vlgmr.msra.gmra.mxu3 %v4851_v53  ;;  %4114 = vmatpush.msra.mxu0 %v4063_v19  ;;  %v4081_v53 = vld [vmem:[#allocation10 + $0xd0] sm:$0xff]  ;;  %v3689_v30 = vpop.f32.mrf.mxu1  ;;  %v4095_v19 = vld [vmem:[#allocation10 + $0x140] sm:$0xff] }
 0x398   :  { %4131 = vmatpush.msrb.mxu1 %v4082_v46  ;;  %4149 = vmatpush.msra.mxu2 %v4100_v2 }
 0x399   :  { %4115 = vmatpush.msra.mxu0 %v4062_v42  ;;  %v4093_v42 = vld [vmem:[#allocation10 + $0x130] sm:$0xff] }
 0x39a   :  { %4132 = vmatpush.msrb.mxu1 %v4081_v53  ;;  %4150 = vmatpush.msra.mxu2 %v4099_v20 }
 0x39b   :  { %4116 = vmatpush.msra.mxu0 %v4061_v3  ;;  %v3729_v52 = vpop.f32.mrf.mxu3  ;;  %v4088_v3 = vld [vmem:[#allocation10 + $0x108] sm:$0xff] }
 0x39c   :  { %4133 = vmatpush.msrb.mxu1 %v4080_v54  ;;  %v3730_v13 = vadd.f32 %v3729_v52, %v3710_v7  ;;  %4151 = vmatpush.msra.mxu2 %v4098_v58 }
 0x39d   :  { %4117 = vmatpush.msra.mxu0 %v4060_v28 }
 0x39e   :  { %v3669_v17 = vpop.f32.mrf.mxu0  ;;  %4134 = vmatpush.msrb.mxu1 %v4079_v39  ;;  %4152 = vmatpush.msra.mxu2 %v4097_v16 }
 0x39f   :  { %4118 = vmatpush.msra.mxu0 %v4059_v34  ;;  %v3670_v56 = vadd.f32 %v3669_v17, %v3650_v43 }
 0x3a0   :  { %4135 = vmatpush.msrb.mxu1 %v4078_v5  ;;  %v3769_v15 = vpop.f32.mrf.mxu1  ;;  %4153 = vmatpush.msra.mxu2 %v4096_v29 }
 0x3a1   :  { %v3690_v55 = vadd.f32 %v3689_v30, %v3670_v56  ;;  %4119 = vmatpush.msra.mxu0 %v4058_v48 }
 0x3a2   :  { %4136 = vmatpush.msrb.mxu1 %v4077_v24  ;;  %4154 = vmatpush.msra.mxu2 %v4095_v19 }
 0x3a3   :  { %4120 = vmatpush.msra.mxu0 %v4057_v22  ;;  %v4052_v59 = vmax.f32 %v3690_v55, 0.0 }
 0x3a4   :  { %4137 = vmatpush.msrb.mxu1 %v4076_v23  ;;  %4155 = vmatpush.msra.mxu2 %v4094_v33 }
 0x3a5   :  { %4121 = vmatpush.msra.mxu0 %v4056_v50 }
 0x3a6   :  { %4138 = vmatpush.msrb.mxu1 %v4075_v0  ;;  %4156 = vmatpush.msra.mxu2 %v4093_v42 }
 0x3a7   :  { %4122 = vmatpush.msra.mxu0 %v4055_v6  ;;  %v3749_v11 = vpop.f32.mrf.mxu0 }
 0x3a8   :  { %4123 = vmatmul.f32.vlgmr.msra.gmra.mxu0 %v4052_v59  ;;  %4139 = vmatpush.msrb.mxu1 %v4074_v63  ;;  %v3750_v14 = vadd.f32 %v3749_v11, %v3730_v13 }
 0x3a9   :  { %4157 = vmatpush.msra.mxu2 %v4092_v9 }
 0x3aa   :  { %4140 = vmatpush.msrb.mxu1 %v4073_v31  ;;  %v3770_v26 = vadd.f32 %v3769_v15, %v3750_v14 }
 0x3ab   :  { %4158 = vmatpush.msra.mxu2 %v4091_v47 }
 0x3ac   :  { %4141 = vmatpush.msrb.mxu1 %v4072_v49 }
 0x3ad   :  { %v3789_v38 = vpop.f32.mrf.mxu2  ;;  %4159 = vmatpush.msra.mxu2 %v4090_v51 }
 0x3ae   :  { %4142 = vmatpush.msrb.mxu1 %v4071_v41  ;;  %v3790_v1 = vadd.f32 %v3789_v38, %v3770_v26 }
 0x3af   :  { %4160 = vmatpush.msra.mxu2 %v4089_v60 }
 0x3b1   :  { %4161 = vmatpush.msra.mxu2 %v4088_v3 }
 0x3b3   :  { %4162 = vmatpush.msra.mxu2 %v4087_v10 }
 0x3b6   :  { %v3809_v32 = vpop.f32.mrf.mxu3 }
 0x3b7   :  { %v3810_v37 = vadd.f32 %v3809_v32, %v3790_v1 }
 0x3ba   :  { %v3849_v25 = vpop.f32.mrf.mxu1 }
 0x3c1   :  { %v3829_v61 = vpop.f32.mrf.mxu0 }
 0x3c2   :  { %v3830_v4 = vadd.f32 %v3829_v61, %v3810_v37 }
 0x3c4   :  { %v3850_v45 = vadd.f32 %v3849_v25, %v3830_v4 }
 0x3d0   :  { %v3869_v27 = vpop.f32.mrf.mxu2 }
 0x3d1   :  { %v3870_v40 = vadd.f32 %v3869_v27, %v3850_v45 }
 0x3d3   :  { %v4053_v18 = vmax.f32 %v3870_v40, 0.0 }
 0x3d5   :  { %4143 = vmatmul.f32.vlgmr.msrb.gmra.mxu1 %v4053_v18 }
 0x3d8   :  { %v3889_v28 = vpop.f32.mrf.mxu3 }
 0x3d9   :  { %v3890_v35 = vadd.f32 %v3889_v28, %v3508_v8 }
 0x3dc   :  { %v3929_v34 = vpop.f32.mrf.mxu1 }
 0x3e3   :  { %v3909_v21 = vpop.f32.mrf.mxu0 }
 0x3e4   :  { %v3910_v46 = vadd.f32 %v3909_v21, %v3890_v35 }
 0x3e6   :  { %v3930_v53 = vadd.f32 %v3929_v34, %v3910_v46 }
 0x3f2   :  { %v3949_v43 = vpop.f32.mrf.mxu2 }
 0x3f3   :  { %v3950_v48 = vadd.f32 %v3949_v43, %v3930_v53 }
 0x3fa   :  { %v3969_v17 = vpop.f32.mrf.mxu3 }
 0x3fb   :  { %v3970_v30 = vadd.f32 %v3969_v17, %v3950_v48 }
 0x3fe   :  { %v4009_v55 = vpop.f32.mrf.mxu1 }
 0x404   :  { %v3989_v56 = vpop.f32.mrf.mxu0 }
 0x405   :  { %v3990_v22 = vadd.f32 %v3989_v56, %v3970_v30 }
 0x407   :  { %v4010_v54 = vadd.f32 %v4009_v55, %v3990_v22 }
 0x413   :  { %v4029_v50 = vpop.f32.mrf.mxu2 }
 0x414   :  { %v4030_v39 = vadd.f32 %v4029_v50, %v4010_v54 }
 0x41a   :  { %v4049_v59 = vpop.f32.mrf.mxu3 }
 0x41b   :  { %v4050_v6 = vadd.f32 %v4049_v59, %v4030_v39 }
 0x41d   :  { %v4054_v5 = vmax.f32 %v4050_v6, 0.0 }
 0x41f   :  { %4163 = vmatmul.f32.vlgmr.msra.gmra.mxu2 %v4054_v5 }
 0x425   :  { %v4124_v24 = vpop.f32.mrf.mxu0 }
 0x426   :  { %v4125_v0 = vadd.f32 %v4215_v12, %v4124_v24 }
 0x452   :  { %v4144_v23 = vpop.f32.mrf.mxu1 }
 0x453   :  { %v4145_v63 = vadd.f32 %v4144_v23, %v4125_v0 }
 0x4a2   :  { %v4164_v31 = vpop.f32.mrf.mxu2 }
 0x4a3   :  { %v4165_v49 = vadd.f32 %v4164_v31, %v4145_v63 }
 0x4a5   :  { %4167 = vst [vmem:[%s4893_s9] sm:$0xff] %v4165_v49 }
 0x4a6   :  { %4172 = vsyncpa [#allocation3], 1 }
 0x4a7   :  { %4173 = vsyncpa [#allocation5], 1 }
 0x4a8   :  { %4174 = vsyncpa [#allocation8], 1 }
 0x4a9   :  { %4175 = vsyncpa [#allocation11], 1 }

</bundles_post_ra>
